<compile_context>
chip_gen: v7x
topology: tpu7x:2x2x1
jax: 0.10.0
libtpu: 0.0.40
codegen_flags: <defaults>
</compile_context>

<pallas_src>
import functools
import math

import jax
import jax.numpy as jnp
from jax.experimental import pallas as pl
from jax.experimental.pallas import tpu as pltpu

_EPS = 1e-5        # PyTorch LayerNorm default eps
_LANE = 128        # TPU lane width; channel-like dims are padded to this


def _round_up(n, m):
    return ((n + m - 1) // m) * m


# ----------------------------- in-kernel helpers -----------------------------

def _gelu(x):
    # Exact GELU 0.5*x*(1+erf(x/sqrt(2))); erf via the Abramowitz-Stegun 7.1.26
    # polynomial (|err| < 1.5e-7).  exp() lands on the EUP slot, rest is VPU.
    z = x * 0.7071067811865476
    a = jnp.abs(z)
    t = 1.0 / (1.0 + 0.3275911 * a)
    poly = t * (0.254829592 + t * (-0.284496736 + t * (1.421413741
               + t * (-1.453152027 + t * 1.061405429))))
    erf_abs = 1.0 - poly * jnp.exp(-a * a)
    erf = jnp.where(z >= 0, erf_abs, -erf_abs)
    return 0.5 * x * (1.0 + erf)


def _layernorm_padded(x, g, b, cmask, inv_c):
    # LayerNorm over the TRUE channel count only: padded lanes carry zeros, so
    # the sum-based mean is exact; they are masked out of the variance, and
    # zero-padded gamma/beta keep padded outputs at zero.
    mu = jnp.sum(x, axis=-1, keepdims=True) * inv_c
    d = (x - mu) * cmask
    var = jnp.sum(d * d, axis=-1, keepdims=True) * inv_c
    return d * jax.lax.rsqrt(var + _EPS) * g + b


def _row_softmax(s):
    # Softmax over the last (lane) dim.  EUP approximate reciprocal + one
    # Newton refinement: full f32 accuracy, no VALU divide.
    s = s - jnp.max(s, axis=-1, keepdims=True)
    e = jnp.exp(s)
    denom = jnp.sum(e, axis=-1, keepdims=True)
    r = pl.reciprocal(denom, approx=True)
    r = r * (2.0 - denom * r)
    return e * r


# --------------------------------- kernel ------------------------------------

def _transformer_kernel(C, n_heads,
                        x_ref, pe_ref, hmask_ref, cmask_ref,
                        wqkv_ref, wo_ref, g2_ref, b2_ref,
                        w1_ref, b1_ref, w2_ref, b2f_ref,
                        o_ref, x_sc):
    layer = pl.program_id(1)
    L, C_pad = x_sc.shape
    dh = C // n_heads
    scale = 1.0 / math.sqrt(dh)

    # First layer of this batch element: load activation + positional encoding
    # into the VMEM carry.
    @pl.when(layer == 0)
    def _():
        x_sc[...] = x_ref[0] + pe_ref[...]

    x = x_sc[...]                                               # (L, C_pad)

    # NOTE: torch's layer_norm_1 output is discarded by transblock.forward
    # (MHA consumes the pre-norm Q=K=V), so it is intentionally not computed.

    # Fused Q|K|V projection; splits land on 128-lane tile boundaries.
    qkv = jnp.dot(x, wqkv_ref[...], preferred_element_type=jnp.float32)
    q = qkv[:, :C_pad] * scale
    k = qkv[:, C_pad:2 * C_pad]
    v = qkv[:, 2 * C_pad:]

    # Per-head attention via channel masks (exact for contiguous head slices):
    #   (q*m_h) @ k^T == Q_h @ K_h^T ;  P_h @ (v*m_h) fills only head-h cols.
    attn = jnp.zeros((L, C_pad), jnp.float32)
    for h in range(n_heads):
        m = hmask_ref[h]                                        # (1, C_pad)
        s = jax.lax.dot_general(q * m, k, (((1,), (1,)), ((), ())),
                                preferred_element_type=jnp.float32)  # (L, L)
        attn = attn + jnp.dot(_row_softmax(s), v * m,
                              preferred_element_type=jnp.float32)

    # Output projection + residual (residual is the pre-norm input).
    x = x + jnp.dot(attn, wo_ref[...], preferred_element_type=jnp.float32)

    # LayerNorm2 + FeedForward (Linear -> GELU -> Linear) + residual.
    y = _layernorm_padded(x, g2_ref[...], b2_ref[...], cmask_ref[...], 1.0 / C)
    hid = _gelu(jnp.dot(y, w1_ref[...], preferred_element_type=jnp.float32)
                + b1_ref[...])
    x = x + (jnp.dot(hid, w2_ref[...], preferred_element_type=jnp.float32)
             + b2f_ref[...])

    x_sc[...] = x                                               # carry to l+1

    @pl.when(layer == pl.num_programs(1) - 1)
    def _():
        o_ref[0] = x.astype(o_ref.dtype)


# ----------------------------- pallas_call wrapper ----------------------------

def _pad2(w, rows, cols):
    out = jnp.zeros((rows, cols), jnp.float32)
    return out.at[:w.shape[0], :w.shape[1]].set(w.astype(jnp.float32))


def _pad_row(v, cols):
    out = jnp.zeros((1, cols), jnp.float32)
    return out.at[0, :v.shape[0]].set(v.astype(jnp.float32))


def _positional_encoding(L, C):
    pos = jnp.arange(L, dtype=jnp.float32)[:, None]
    div = jnp.exp(jnp.arange(0, C, 2, dtype=jnp.float32)
                  * (-math.log(10000.0) / C))
    pe = jnp.zeros((L, C), jnp.float32)
    pe = pe.at[:, 0::2].set(jnp.sin(pos * div))
    pe = pe.at[:, 1::2].set(jnp.cos(pos * div))
    return pe


def _head_masks(n_heads, C, C_pad):
    dh = C // n_heads
    c = jnp.arange(C_pad)
    return jnp.stack([((c >= h * dh) & (c < (h + 1) * dh))
                      .astype(jnp.float32).reshape(1, C_pad)
                      for h in range(n_heads)])                 # (nh, 1, C_pad)


def transformer_forward(x_nchw, params):
    """Forward pass of `transformer`: NCHW in, NCHW out (same shape)."""
    B, C, W, H = x_nchw.shape
    L = W * H
    layers = params['layers']
    n_layers = len(layers)
    n_heads = C // 4                                   # as in the torch module
    C_pad = _round_up(max(C, _LANE), _LANE)            # lane-dense channel dim
    Hf = 2 * C                                         # torch: int(dim * 2)
    H_pad = _round_up(max(Hf, _LANE), _LANE)

    # Layout plumbing (mirrors torch reshape/transpose): NCHW -> (B, L, C_pad).
    x_seq = jnp.transpose(x_nchw.reshape(B, C, L), (0, 2, 1)).astype(jnp.float32)
    x_seq = jnp.pad(x_seq, ((0, 0), (0, 0), (0, C_pad - C)))

    pe = jnp.pad(_positional_encoding(L, C), ((0, 0), (0, C_pad - C)))
    hmask = _head_masks(n_heads, C, C_pad)                       # (nh, 1, C_pad)
    cmask = (jnp.arange(C_pad) < C).astype(jnp.float32).reshape(1, C_pad)

    # Stack + zero-pad per-layer weights; the layer grid axis streams exactly
    # one layer's weights at a time (only that layer is resident in VMEM).
    wqkv = jnp.stack([jnp.concatenate([_pad2(p['wq'], C_pad, C_pad),
                                       _pad2(p['wk'], C_pad, C_pad),
                                       _pad2(p['wv'], C_pad, C_pad)], axis=1)
                      for p in layers])                          # (nl, C_pad, 3*C_pad)
    wo = jnp.stack([_pad2(p['wo'], C_pad, C_pad) for p in layers])
    g2 = jnp.stack([_pad_row(p['g2'], C_pad) for p in layers])
    b2 = jnp.stack([_pad_row(p['b2'], C_pad) for p in layers])
    w1 = jnp.stack([_pad2(p['w1'], C_pad, H_pad) for p in layers])
    b1 = jnp.stack([_pad_row(p['b1'], H_pad) for p in layers])
    w2 = jnp.stack([_pad2(p['w2'], H_pad, C_pad) for p in layers])
    b2f = jnp.stack([_pad_row(p['b2ff'], C_pad) for p in layers])

    per_batch = lambda b, l: (b, 0, 0)        # constant across l -> no re-DMA
    per_layer = lambda b, l: (l, 0, 0)        # streams one layer per grid step
    const2 = lambda b, l: (0, 0)
    const3 = lambda b, l: (0, 0, 0)

    out_seq = pl.pallas_call(
        functools.partial(_transformer_kernel, C, n_heads),
        out_shape=jax.ShapeDtypeStruct((B, L, C_pad), jnp.float32),
        grid_spec=pltpu.PrefetchScalarGridSpec(
            num_scalar_prefetch=0, grid=(B, n_layers),
            in_specs=[
                pl.BlockSpec((1, L, C_pad), per_batch),               # x
                pl.BlockSpec((L, C_pad), const2),                     # pe
                pl.BlockSpec((n_heads, 1, C_pad), const3),            # head masks
                pl.BlockSpec((1, C_pad), const2),                     # channel mask
                pl.BlockSpec((None, C_pad, 3 * C_pad), per_layer),    # wqkv
                pl.BlockSpec((None, C_pad, C_pad), per_layer),        # wo
                pl.BlockSpec((None, 1, C_pad), per_layer),            # ln2 gamma
                pl.BlockSpec((None, 1, C_pad), per_layer),            # ln2 beta
                pl.BlockSpec((None, C_pad, H_pad), per_layer),        # ffn w1
                pl.BlockSpec((None, 1, H_pad), per_layer),            # ffn b1
                pl.BlockSpec((None, H_pad, C_pad), per_layer),        # ffn w2
                pl.BlockSpec((None, 1, C_pad), per_layer),            # ffn b2
            ],
            out_specs=pl.BlockSpec((1, L, C_pad), per_batch),
            scratch_shapes=[pltpu.VMEM((L, C_pad), jnp.float32)]),    # activation carry
        compiler_params=pltpu.CompilerParams(
            dimension_semantics=("parallel", "arbitrary"),
            vmem_limit_bytes=32 * 1024 * 1024),
    )(x_seq, pe, hmask, cmask, wqkv, wo, g2, b2, w1, b1, w2, b2f)

    out_seq = out_seq[:, :, :C]                # drop channel padding
    return jnp.transpose(out_seq, (0, 2, 1)).reshape(B, C, W, H)


# ------------------------- deterministic parameter init -----------------------

def init_params(key, channel, n_layers=6):
    C = channel
    it = iter(jax.random.split(key, 12 * n_layers))

    def u(shape, fan_in):
        b = 1.0 / math.sqrt(fan_in)
        return jax.random.uniform(next(it), shape, jnp.float32, -b, b)

    layers = []
    for _ in range(n_layers):
        layers.append(dict(
            wq=u((C, C), C), wk=u((C, C), C), wv=u((C, C), C), wo=u((C, C), C),
            # layer_norm_1 params exist in the torch module but its output is
            # discarded by transblock.forward -> they never affect the result.
            g1=1.0 + 0.1 * u((C,), 1.0), b1_ln=0.1 * u((C,), 1.0),
            g2=1.0 + 0.1 * u((C,), 1.0), b2=0.1 * u((C,), 1.0),
            w1=u((C, 2 * C), C),      b1=u((2 * C,), C),
            w2=u((2 * C, C), 2 * C),  b2ff=u((C,), 2 * C)))
    return dict(layers=layers)


# ----------------------- pure-JAX reference for checking ----------------------

def _ref_ln(x, g, b):
    mu = jnp.mean(x, axis=-1, keepdims=True)
    var = jnp.mean((x - mu) ** 2, axis=-1, keepdims=True)
    return (x - mu) * jax.lax.rsqrt(var + _EPS) * g + b


def _ref_transformer(x_nchw, params):
    B, C, W, H = x_nchw.shape
    L = W * H
    nh = C // 4
    dh = C // nh
    x = jnp.transpose(x_nchw.reshape(B, C, L), (0, 2, 1)).astype(jnp.float32)
    x = x + _positional_encoding(L, C)[None]
    for p in params['layers']:
        q = x @ p['wq']
        k = x @ p['wk']
        v = x @ p['wv']
        split = lambda t: t.reshape(B, L, nh, dh).transpose(0, 2, 1, 3)
        qh, kh, vh = split(q), split(k), split(v)
        s = jnp.einsum('bhld,bhmd->bhlm', qh, kh) / math.sqrt(dh)
        pr = jax.nn.softmax(s, axis=-1)
        o = jnp.einsum('bhlm,bhmd->bhld', pr, vh)
        o = o.transpose(0, 2, 1, 3).reshape(B, L, C) @ p['wo']
        x = x + o
        y = _ref_ln(x, p['g2'], p['b2'])
        hid = jax.nn.gelu(y @ p['w1'] + p['b1'], approximate=False)
        x = x + (hid @ p['w2'] + p['b2ff'])
    return jnp.transpose(x, (0, 2, 1)).reshape(B, C, W, H)


# ------------------------------------ main ------------------------------------

if __name__ == "__main__":
    B, C, W, H = 2, 8, 16, 16          # head_num = C // 4 = 2, seq len = 256
    key = jax.random.PRNGKey(0)
    k_x, k_p = jax.random.split(key)
    x = jax.random.normal(k_x, (B, C, W, H), jnp.float32)
    params = init_params(k_p, C, n_layers=6)

    out = jax.jit(transformer_forward)(x, params)
    out = jax.block_until_ready(out)

    assert out.shape == (B, C, W, H), out.shape
    ref = _ref_transformer(x, params)
    max_err = float(jnp.max(jnp.abs(out - ref)))
    assert max_err < 1e-3, f"max abs err vs reference: {max_err}"
    print("KERNEL_OK")
</pallas_src>

<mosaic_0001>
module attributes {stable_mosaic.version = 11 : i64} {
  func.func @_transformer_kernel(%arg0: i32, %arg1: i32, %arg2: memref<1x256x128xf32, #tpu.memory_space<vmem>>, %arg3: memref<256x128xf32, #tpu.memory_space<vmem>>, %arg4: memref<2x1x128xf32, #tpu.memory_space<vmem>>, %arg5: memref<1x128xf32, #tpu.memory_space<vmem>>, %arg6: memref<1x128x384xf32, #tpu.memory_space<vmem>>, %arg7: memref<1x128x128xf32, #tpu.memory_space<vmem>>, %arg8: memref<1x1x128xf32, #tpu.memory_space<vmem>>, %arg9: memref<1x1x128xf32, #tpu.memory_space<vmem>>, %arg10: memref<1x128x128xf32, #tpu.memory_space<vmem>>, %arg11: memref<1x1x128xf32, #tpu.memory_space<vmem>>, %arg12: memref<1x128x128xf32, #tpu.memory_space<vmem>>, %arg13: memref<1x1x128xf32, #tpu.memory_space<vmem>>, %arg14: memref<1x256x128xf32, #tpu.memory_space<vmem>>, %arg15: memref<256x128xf32, #tpu.memory_space<vmem>>) attributes {dimension_semantics = [#tpu.dimension_semantics<parallel>, #tpu.dimension_semantics<arbitrary>], iteration_bounds = array<i64: 2, 6>, scalar_prefetch = 0 : i64, scratch_operands = 1 : i64, tpu.core_type = #tpu.core_type<tc>, window_params = [{transform_indices = @transform_0, window_bounds = array<i64: 1, 256, 128>}, {pipeline_mode = #tpu.pipeline_mode<synchronous>, transform_indices = @transform_1, window_bounds = array<i64: 256, 128>}, {pipeline_mode = #tpu.pipeline_mode<synchronous>, transform_indices = @transform_2, window_bounds = array<i64: 2, 1, 128>}, {pipeline_mode = #tpu.pipeline_mode<synchronous>, transform_indices = @transform_3, window_bounds = array<i64: 1, 128>}, {transform_indices = @transform_4, window_bounds = array<i64: 1, 128, 384>}, {transform_indices = @transform_5, window_bounds = array<i64: 1, 128, 128>}, {transform_indices = @transform_6, window_bounds = array<i64: 1, 1, 128>}, {transform_indices = @transform_7, window_bounds = array<i64: 1, 1, 128>}, {transform_indices = @transform_8, window_bounds = array<i64: 1, 128, 128>}, {transform_indices = @transform_9, window_bounds = array<i64: 1, 1, 128>}, {transform_indices = @transform_10, window_bounds = array<i64: 1, 128, 128>}, {transform_indices = @transform_11, window_bounds = array<i64: 1, 1, 128>}, {transform_indices = @transform_12, window_bounds = array<i64: 1, 256, 128>}]} {
    %c0_i32 = arith.constant 0 : i32
    %0 = arith.cmpi eq, %arg1, %c0_i32 : i32
    %1 = arith.extui %0 : i1 to i32
    %c0_i32_0 = arith.constant 0 : i32
    %2 = arith.cmpi ne, %1, %c0_i32_0 : i32
    scf.if %2 {
      %c0_71 = arith.constant 0 : index
      %c0_72 = arith.constant 0 : index
      %c0_73 = arith.constant 0 : index
      %149 = vector.load %arg2[%c0_71, %c0_72, %c0_73] : memref<1x256x128xf32, #tpu.memory_space<vmem>>, vector<1x256x128xf32>
      %150 = vector.shape_cast %149 : vector<1x256x128xf32> to vector<256x128xf32>
      %c0_74 = arith.constant 0 : index
      %c0_75 = arith.constant 0 : index
      %151 = vector.load %arg3[%c0_74, %c0_75] : memref<256x128xf32, #tpu.memory_space<vmem>>, vector<256x128xf32>
      %152 = arith.addf %150, %151 : vector<256x128xf32>
      %c0_76 = arith.constant 0 : index
      %c0_77 = arith.constant 0 : index
      %153 = vector.load %arg15[%c0_76, %c0_77] : memref<256x128xf32, #tpu.memory_space<vmem>>, vector<256x128xf32>
      tpu.vector_store %arg15[%c0_76, %c0_77], %152 {strides = array<i32>} : memref<256x128xf32, #tpu.memory_space<vmem>>, vector<256x128xf32>,
    } else {
    }
    %c0 = arith.constant 0 : index
    %c0_1 = arith.constant 0 : index
    %3 = vector.load %arg15[%c0, %c0_1] : memref<256x128xf32, #tpu.memory_space<vmem>>, vector<256x128xf32>
    %c0_2 = arith.constant 0 : index
    %c0_3 = arith.constant 0 : index
    %c0_4 = arith.constant 0 : index
    %4 = vector.load %arg6[%c0_2, %c0_3, %c0_4] : memref<1x128x384xf32, #tpu.memory_space<vmem>>, vector<1x128x384xf32>
    %5 = vector.shape_cast %4 : vector<1x128x384xf32> to vector<128x384xf32>
    %cst = arith.constant dense<0.000000e+00> : vector<256x384xf32>
    %6 = tpu.matmul %3, %5, %cst {dimension_numbers = #tpu.dot_dimension_numbers<[1], [0], [0], [1], [0, 0, 1, 1], [], []>} : vector<256x128xf32>, vector<128x384xf32>, vector<256x384xf32> -> vector<256x384xf32>
    %7 = vector.extract_strided_slice %6 {offsets = [0, 0], sizes = [256, 128], strides = [1, 1]} : vector<256x384xf32> to vector<256x128xf32>
    %cst_5 = arith.constant 5.000000e-01 : f32
    %8 = vector.broadcast %cst_5 : f32 to vector<256x128xf32>
    %9 = arith.mulf %7, %8 : vector<256x128xf32>
    %10 = vector.extract_strided_slice %6 {offsets = [0, 128], sizes = [256, 128], strides = [1, 1]} : vector<256x384xf32> to vector<256x128xf32>
    %11 = vector.extract_strided_slice %6 {offsets = [0, 256], sizes = [256, 128], strides = [1, 1]} : vector<256x384xf32> to vector<256x128xf32>
    %cst_6 = arith.constant 0.000000e+00 : f32
    %12 = vector.broadcast %cst_6 : f32 to vector<256x128xf32>
    %c0_7 = arith.constant 0 : index
    %c0_8 = arith.constant 0 : index
    %c0_9 = arith.constant 0 : index
    %13 = vector.load %arg4[%c0_7, %c0_8, %c0_9] : memref<2x1x128xf32, #tpu.memory_space<vmem>>, vector<1x1x128xf32>
    %14 = vector.shape_cast %13 : vector<1x1x128xf32> to vector<1x128xf32>
    %15 = vector.broadcast %14 : vector<1x128xf32> to vector<256x128xf32>
    %16 = arith.mulf %9, %15 : vector<256x128xf32>
    %cst_10 = arith.constant dense<0.000000e+00> : vector<256x256xf32>
    %17 = tpu.matmul %16, %10, %cst_10 {dimension_numbers = #tpu.dot_dimension_numbers<[1], [1], [0], [0], [0, 0, 1, 0], [], []>} : vector<256x128xf32>, vector<256x128xf32>, vector<256x256xf32> -> vector<256x256xf32>
    %cst_11 = arith.constant dense<0xFF800000> : vector<256xf32>
    %18 = vector.multi_reduction <maximumf>, %17, %cst_11 [1] : vector<256x256xf32> to vector<256xf32>
    %19 = vector.shape_cast %18 : vector<256xf32> to vector<256x1xf32>
    %20 = vector.broadcast %19 : vector<256x1xf32> to vector<256x256xf32>
    %21 = arith.subf %17, %20 : vector<256x256xf32>
    %22 = math.exp %21 : vector<256x256xf32>
    %cst_12 = arith.constant dense<0.000000e+00> : vector<256xf32>
    %23 = vector.multi_reduction <add>, %22, %cst_12 [1] : vector<256x256xf32> to vector<256xf32>
    %24 = vector.shape_cast %23 : vector<256xf32> to vector<256x1xf32>
    %25 = tpu.reciprocal %24 {approx = true} : vector<256x1xf32> -> vector<256x1xf32>
    %26 = arith.mulf %24, %25 : vector<256x1xf32>
    %cst_13 = arith.constant 2.000000e+00 : f32
    %27 = vector.broadcast %cst_13 : f32 to vector<256x1xf32>
    %28 = arith.subf %27, %26 : vector<256x1xf32>
    %29 = arith.mulf %25, %28 : vector<256x1xf32>
    %30 = vector.broadcast %29 : vector<256x1xf32> to vector<256x256xf32>
    %31 = arith.mulf %22, %30 : vector<256x256xf32>
    %32 = vector.broadcast %14 : vector<1x128xf32> to vector<256x128xf32>
    %33 = arith.mulf %11, %32 : vector<256x128xf32>
    %cst_14 = arith.constant dense<0.000000e+00> : vector<256x128xf32>
    %34 = tpu.matmul %31, %33, %cst_14 {dimension_numbers = #tpu.dot_dimension_numbers<[1], [0], [0], [1], [0, 0, 1, 1], [], []>} : vector<256x256xf32>, vector<256x128xf32>, vector<256x128xf32> -> vector<256x128xf32>
    %35 = arith.addf %12, %34 : vector<256x128xf32>
    %c1 = arith.constant 1 : index
    %c0_15 = arith.constant 0 : index
    %c0_16 = arith.constant 0 : index
    %36 = vector.load %arg4[%c1, %c0_15, %c0_16] : memref<2x1x128xf32, #tpu.memory_space<vmem>>, vector<1x1x128xf32>
    %37 = vector.shape_cast %36 : vector<1x1x128xf32> to vector<1x128xf32>
    %38 = vector.broadcast %37 : vector<1x128xf32> to vector<256x128xf32>
    %39 = arith.mulf %9, %38 : vector<256x128xf32>
    %cst_17 = arith.constant dense<0.000000e+00> : vector<256x256xf32>
    %40 = tpu.matmul %39, %10, %cst_17 {dimension_numbers = #tpu.dot_dimension_numbers<[1], [1], [0], [0], [0, 0, 1, 0], [], []>} : vector<256x128xf32>, vector<256x128xf32>, vector<256x256xf32> -> vector<256x256xf32>
    %cst_18 = arith.constant dense<0xFF800000> : vector<256xf32>
    %41 = vector.multi_reduction <maximumf>, %40, %cst_18 [1] : vector<256x256xf32> to vector<256xf32>
    %42 = vector.shape_cast %41 : vector<256xf32> to vector<256x1xf32>
    %43 = vector.broadcast %42 : vector<256x1xf32> to vector<256x256xf32>
    %44 = arith.subf %40, %43 : vector<256x256xf32>
    %45 = math.exp %44 : vector<256x256xf32>
    %cst_19 = arith.constant dense<0.000000e+00> : vector<256xf32>
    %46 = vector.multi_reduction <add>, %45, %cst_19 [1] : vector<256x256xf32> to vector<256xf32>
    %47 = vector.shape_cast %46 : vector<256xf32> to vector<256x1xf32>
    %48 = tpu.reciprocal %47 {approx = true} : vector<256x1xf32> -> vector<256x1xf32>
    %49 = arith.mulf %47, %48 : vector<256x1xf32>
    %cst_20 = arith.constant 2.000000e+00 : f32
    %50 = vector.broadcast %cst_20 : f32 to vector<256x1xf32>
    %51 = arith.subf %50, %49 : vector<256x1xf32>
    %52 = arith.mulf %48, %51 : vector<256x1xf32>
    %53 = vector.broadcast %52 : vector<256x1xf32> to vector<256x256xf32>
    %54 = arith.mulf %45, %53 : vector<256x256xf32>
    %55 = vector.broadcast %37 : vector<1x128xf32> to vector<256x128xf32>
    %56 = arith.mulf %11, %55 : vector<256x128xf32>
    %cst_21 = arith.constant dense<0.000000e+00> : vector<256x128xf32>
    %57 = tpu.matmul %54, %56, %cst_21 {dimension_numbers = #tpu.dot_dimension_numbers<[1], [0], [0], [1], [0, 0, 1, 1], [], []>} : vector<256x256xf32>, vector<256x128xf32>, vector<256x128xf32> -> vector<256x128xf32>
    %58 = arith.addf %35, %57 : vector<256x128xf32>
    %c0_22 = arith.constant 0 : index
    %c0_23 = arith.constant 0 : index
    %c0_24 = arith.constant 0 : index
    %59 = vector.load %arg7[%c0_22, %c0_23, %c0_24] : memref<1x128x128xf32, #tpu.memory_space<vmem>>, vector<1x128x128xf32>
    %60 = vector.shape_cast %59 : vector<1x128x128xf32> to vector<128x128xf32>
    %cst_25 = arith.constant dense<0.000000e+00> : vector<256x128xf32>
    %61 = tpu.matmul %58, %60, %cst_25 {dimension_numbers = #tpu.dot_dimension_numbers<[1], [0], [0], [1], [0, 0, 1, 1], [], []>} : vector<256x128xf32>, vector<128x128xf32>, vector<256x128xf32> -> vector<256x128xf32>
    %62 = arith.addf %3, %61 : vector<256x128xf32>
    %c0_26 = arith.constant 0 : index
    %c0_27 = arith.constant 0 : index
    %c0_28 = arith.constant 0 : index
    %63 = vector.load %arg8[%c0_26, %c0_27, %c0_28] : memref<1x1x128xf32, #tpu.memory_space<vmem>>, vector<1x1x128xf32>
    %64 = vector.shape_cast %63 : vector<1x1x128xf32> to vector<1x128xf32>
    %c0_29 = arith.constant 0 : index
    %c0_30 = arith.constant 0 : index
    %c0_31 = arith.constant 0 : index
    %65 = vector.load %arg9[%c0_29, %c0_30, %c0_31] : memref<1x1x128xf32, #tpu.memory_space<vmem>>, vector<1x1x128xf32>
    %66 = vector.shape_cast %65 : vector<1x1x128xf32> to vector<1x128xf32>
    %c0_32 = arith.constant 0 : index
    %c0_33 = arith.constant 0 : index
    %67 = vector.load %arg5[%c0_32, %c0_33] : memref<1x128xf32, #tpu.memory_space<vmem>>, vector<1x128xf32>
    %cst_34 = arith.constant dense<0.000000e+00> : vector<256xf32>
    %68 = vector.multi_reduction <add>, %62, %cst_34 [1] : vector<256x128xf32> to vector<256xf32>
    %69 = vector.shape_cast %68 : vector<256xf32> to vector<256x1xf32>
    %cst_35 = arith.constant 1.250000e-01 : f32
    %70 = vector.broadcast %cst_35 : f32 to vector<256x1xf32>
    %71 = arith.mulf %69, %70 : vector<256x1xf32>
    %72 = vector.broadcast %71 : vector<256x1xf32> to vector<256x128xf32>
    %73 = arith.subf %62, %72 : vector<256x128xf32>
    %74 = vector.broadcast %67 : vector<1x128xf32> to vector<256x128xf32>
    %75 = arith.mulf %73, %74 : vector<256x128xf32>
    %76 = arith.mulf %75, %75 : vector<256x128xf32>
    %cst_36 = arith.constant dense<0.000000e+00> : vector<256xf32>
    %77 = vector.multi_reduction <add>, %76, %cst_36 [1] : vector<256x128xf32> to vector<256xf32>
    %78 = vector.shape_cast %77 : vector<256xf32> to vector<256x1xf32>
    %cst_37 = arith.constant 1.250000e-01 : f32
    %79 = vector.broadcast %cst_37 : f32 to vector<256x1xf32>
    %80 = arith.mulf %78, %79 : vector<256x1xf32>
    %cst_38 = arith.constant 9.99999974E-6 : f32
    %81 = vector.broadcast %cst_38 : f32 to vector<256x1xf32>
    %82 = arith.addf %80, %81 : vector<256x1xf32>
    %83 = math.rsqrt %82 : vector<256x1xf32>
    %84 = vector.broadcast %83 : vector<256x1xf32> to vector<256x128xf32>
    %85 = arith.mulf %75, %84 : vector<256x128xf32>
    %86 = vector.broadcast %64 : vector<1x128xf32> to vector<256x128xf32>
    %87 = arith.mulf %85, %86 : vector<256x128xf32>
    %88 = vector.broadcast %66 : vector<1x128xf32> to vector<256x128xf32>
    %89 = arith.addf %87, %88 : vector<256x128xf32>
    %c0_39 = arith.constant 0 : index
    %c0_40 = arith.constant 0 : index
    %c0_41 = arith.constant 0 : index
    %90 = vector.load %arg10[%c0_39, %c0_40, %c0_41] : memref<1x128x128xf32, #tpu.memory_space<vmem>>, vector<1x128x128xf32>
    %91 = vector.shape_cast %90 : vector<1x128x128xf32> to vector<128x128xf32>
    %cst_42 = arith.constant dense<0.000000e+00> : vector<256x128xf32>
    %92 = tpu.matmul %89, %91, %cst_42 {dimension_numbers = #tpu.dot_dimension_numbers<[1], [0], [0], [1], [0, 0, 1, 1], [], []>} : vector<256x128xf32>, vector<128x128xf32>, vector<256x128xf32> -> vector<256x128xf32>
    %c0_43 = arith.constant 0 : index
    %c0_44 = arith.constant 0 : index
    %c0_45 = arith.constant 0 : index
    %93 = vector.load %arg11[%c0_43, %c0_44, %c0_45] : memref<1x1x128xf32, #tpu.memory_space<vmem>>, vector<1x1x128xf32>
    %94 = vector.shape_cast %93 : vector<1x1x128xf32> to vector<1x128xf32>
    %95 = vector.broadcast %94 : vector<1x128xf32> to vector<256x128xf32>
    %96 = arith.addf %92, %95 : vector<256x128xf32>
    %cst_46 = arith.constant 0.707106769 : f32
    %97 = vector.broadcast %cst_46 : f32 to vector<256x128xf32>
    %98 = arith.mulf %96, %97 : vector<256x128xf32>
    %99 = math.absf %98 : vector<256x128xf32>
    %cst_47 = arith.constant 0.327591091 : f32
    %100 = vector.broadcast %cst_47 : f32 to vector<256x128xf32>
    %101 = arith.mulf %100, %99 : vector<256x128xf32>
    %cst_48 = arith.constant 1.000000e+00 : f32
    %102 = vector.broadcast %cst_48 : f32 to vector<256x128xf32>
    %103 = arith.addf %102, %101 : vector<256x128xf32>
    %cst_49 = arith.constant 1.000000e+00 : f32
    %104 = vector.broadcast %cst_49 : f32 to vector<256x128xf32>
    %105 = arith.divf %104, %103 : vector<256x128xf32>
    %cst_50 = arith.constant 1.06140542 : f32
    %106 = vector.broadcast %cst_50 : f32 to vector<256x128xf32>
    %107 = arith.mulf %105, %106 : vector<256x128xf32>
    %cst_51 = arith.constant -1.45315206 : f32
    %108 = vector.broadcast %cst_51 : f32 to vector<256x128xf32>
    %109 = arith.addf %108, %107 : vector<256x128xf32>
    %110 = arith.mulf %105, %109 : vector<256x128xf32>
    %cst_52 = arith.constant 1.42141378 : f32
    %111 = vector.broadcast %cst_52 : f32 to vector<256x128xf32>
    %112 = arith.addf %111, %110 : vector<256x128xf32>
    %113 = arith.mulf %105, %112 : vector<256x128xf32>
    %cst_53 = arith.constant -0.284496725 : f32
    %114 = vector.broadcast %cst_53 : f32 to vector<256x128xf32>
    %115 = arith.addf %114, %113 : vector<256x128xf32>
    %116 = arith.mulf %105, %115 : vector<256x128xf32>
    %cst_54 = arith.constant 0.254829586 : f32
    %117 = vector.broadcast %cst_54 : f32 to vector<256x128xf32>
    %118 = arith.addf %117, %116 : vector<256x128xf32>
    %119 = arith.mulf %105, %118 : vector<256x128xf32>
    %cst_55 = arith.constant 0.000000e+00 : f32
    %120 = vector.broadcast %cst_55 : f32 to vector<256x128xf32>
    %121 = arith.subf %120, %99 : vector<256x128xf32>
    %122 = arith.mulf %121, %99 : vector<256x128xf32>
    %123 = math.exp %122 : vector<256x128xf32>
    %124 = arith.mulf %119, %123 : vector<256x128xf32>
    %cst_56 = arith.constant 1.000000e+00 : f32
    %125 = vector.broadcast %cst_56 : f32 to vector<256x128xf32>
    %126 = arith.subf %125, %124 : vector<256x128xf32>
    %cst_57 = arith.constant 0.000000e+00 : f32
    %127 = vector.broadcast %cst_57 : f32 to vector<256x128xf32>
    %128 = arith.cmpf oge, %98, %127 : vector<256x128xf32>
    %cst_58 = arith.constant 0.000000e+00 : f32
    %129 = vector.broadcast %cst_58 : f32 to vector<256x128xf32>
    %130 = arith.subf %129, %126 : vector<256x128xf32>
    %131 = arith.select %128, %126, %130 : vector<256x128xi1>, vector<256x128xf32>
    %cst_59 = arith.constant 5.000000e-01 : f32
    %132 = vector.broadcast %cst_59 : f32 to vector<256x128xf32>
    %133 = arith.mulf %132, %96 : vector<256x128xf32>
    %cst_60 = arith.constant 1.000000e+00 : f32
    %134 = vector.broadcast %cst_60 : f32 to vector<256x128xf32>
    %135 = arith.addf %134, %131 : vector<256x128xf32>
    %136 = arith.mulf %133, %135 : vector<256x128xf32>
    %c0_61 = arith.constant 0 : index
    %c0_62 = arith.constant 0 : index
    %c0_63 = arith.constant 0 : index
    %137 = vector.load %arg12[%c0_61, %c0_62, %c0_63] : memref<1x128x128xf32, #tpu.memory_space<vmem>>, vector<1x128x128xf32>
    %138 = vector.shape_cast %137 : vector<1x128x128xf32> to vector<128x128xf32>
    %cst_64 = arith.constant dense<0.000000e+00> : vector<256x128xf32>
    %139 = tpu.matmul %136, %138, %cst_64 {dimension_numbers = #tpu.dot_dimension_numbers<[1], [0], [0], [1], [0, 0, 1, 1], [], []>} : vector<256x128xf32>, vector<128x128xf32>, vector<256x128xf32> -> vector<256x128xf32>
    %c0_65 = arith.constant 0 : index
    %c0_66 = arith.constant 0 : index
    %c0_67 = arith.constant 0 : index
    %140 = vector.load %arg13[%c0_65, %c0_66, %c0_67] : memref<1x1x128xf32, #tpu.memory_space<vmem>>, vector<1x1x128xf32>
    %141 = vector.shape_cast %140 : vector<1x1x128xf32> to vector<1x128xf32>
    %142 = vector.broadcast %141 : vector<1x128xf32> to vector<256x128xf32>
    %143 = arith.addf %139, %142 : vector<256x128xf32>
    %144 = arith.addf %62, %143 : vector<256x128xf32>
    %c0_68 = arith.constant 0 : index
    %c0_69 = arith.constant 0 : index
    %145 = vector.load %arg15[%c0_68, %c0_69] : memref<256x128xf32, #tpu.memory_space<vmem>>, vector<256x128xf32>
    tpu.vector_store %arg15[%c0_68, %c0_69], %144 {strides = array<i32>} : memref<256x128xf32, #tpu.memory_space<vmem>>, vector<256x128xf32>,
    %c5_i32 = arith.constant 5 : i32
    %146 = arith.cmpi eq, %arg1, %c5_i32 : i32
    %147 = arith.extui %146 : i1 to i32
    %c0_i32_70 = arith.constant 0 : i32
    %148 = arith.cmpi ne, %147, %c0_i32_70 : i32
    scf.if %148 {
      %c0_71 = arith.constant 0 : index
      %c0_72 = arith.constant 0 : index
      %c0_73 = arith.constant 0 : index
      %149 = vector.load %arg14[%c0_71, %c0_72, %c0_73] : memref<1x256x128xf32, #tpu.memory_space<vmem>>, vector<1x256x128xf32>
      %150 = vector.shape_cast %149 : vector<1x256x128xf32> to vector<256x128xf32>
      %151 = vector.shape_cast %144 : vector<256x128xf32> to vector<1x256x128xf32>
      tpu.vector_store %arg14[%c0_71, %c0_72, %c0_73], %151 {strides = array<i32>} : memref<1x256x128xf32, #tpu.memory_space<vmem>>, vector<1x256x128xf32>,
    } else {
    }
    return
  }
  func.func @transform_0(%arg0: i32, %arg1: i32) -> (i32, i32, i32) {
    %c0_i32 = arith.constant 0 : i32
    %c0_i32_0 = arith.constant 0 : i32
    %c0_i32_1 = arith.constant 0 : i32
    return %arg0, %c0_i32, %c0_i32_0 : i32, i32, i32
  }
  func.func @transform_1(%arg0: i32, %arg1: i32) -> (i32, i32) {
    %c0_i32 = arith.constant 0 : i32
    %c0_i32_0 = arith.constant 0 : i32
    %c0_i32_1 = arith.constant 0 : i32
    return %c0_i32, %c0_i32_0 : i32, i32
  }
  func.func @transform_2(%arg0: i32, %arg1: i32) -> (i32, i32, i32) {
    %c0_i32 = arith.constant 0 : i32
    %c0_i32_0 = arith.constant 0 : i32
    %c0_i32_1 = arith.constant 0 : i32
    %c0_i32_2 = arith.constant 0 : i32
    return %c0_i32, %c0_i32_0, %c0_i32_1 : i32, i32, i32
  }
  func.func @transform_3(%arg0: i32, %arg1: i32) -> (i32, i32) {
    %c0_i32 = arith.constant 0 : i32
    %c0_i32_0 = arith.constant 0 : i32
    %c0_i32_1 = arith.constant 0 : i32
    return %c0_i32, %c0_i32_0 : i32, i32
  }
  func.func @transform_4(%arg0: i32, %arg1: i32) -> (i32, i32, i32) {
    %c0_i32 = arith.constant 0 : i32
    %c0_i32_0 = arith.constant 0 : i32
    %c0_i32_1 = arith.constant 0 : i32
    return %arg1, %c0_i32, %c0_i32_0 : i32, i32, i32
  }
  func.func @transform_5(%arg0: i32, %arg1: i32) -> (i32, i32, i32) {
    %c0_i32 = arith.constant 0 : i32
    %c0_i32_0 = arith.constant 0 : i32
    %c0_i32_1 = arith.constant 0 : i32
    return %arg1, %c0_i32, %c0_i32_0 : i32, i32, i32
  }
  func.func @transform_6(%arg0: i32, %arg1: i32) -> (i32, i32, i32) {
    %c0_i32 = arith.constant 0 : i32
    %c0_i32_0 = arith.constant 0 : i32
    %c0_i32_1 = arith.constant 0 : i32
    return %arg1, %c0_i32, %c0_i32_0 : i32, i32, i32
  }
  func.func @transform_7(%arg0: i32, %arg1: i32) -> (i32, i32, i32) {
    %c0_i32 = arith.constant 0 : i32
    %c0_i32_0 = arith.constant 0 : i32
    %c0_i32_1 = arith.constant 0 : i32
    return %arg1, %c0_i32, %c0_i32_0 : i32, i32, i32
  }
  func.func @transform_8(%arg0: i32, %arg1: i32) -> (i32, i32, i32) {
    %c0_i32 = arith.constant 0 : i32
    %c0_i32_0 = arith.constant 0 : i32
    %c0_i32_1 = arith.constant 0 : i32
    return %arg1, %c0_i32, %c0_i32_0 : i32, i32, i32
  }
  func.func @transform_9(%arg0: i32, %arg1: i32) -> (i32, i32, i32) {
    %c0_i32 = arith.constant 0 : i32
    %c0_i32_0 = arith.constant 0 : i32
    %c0_i32_1 = arith.constant 0 : i32
    return %arg1, %c0_i32, %c0_i32_0 : i32, i32, i32
  }
  func.func @transform_10(%arg0: i32, %arg1: i32) -> (i32, i32, i32) {
    %c0_i32 = arith.constant 0 : i32
    %c0_i32_0 = arith.constant 0 : i32
    %c0_i32_1 = arith.constant 0 : i32
    return %arg1, %c0_i32, %c0_i32_0 : i32, i32, i32
  }
  func.func @transform_11(%arg0: i32, %arg1: i32) -> (i32, i32, i32) {
    %c0_i32 = arith.constant 0 : i32
    %c0_i32_0 = arith.constant 0 : i32
    %c0_i32_1 = arith.constant 0 : i32
    return %arg1, %c0_i32, %c0_i32_0 : i32, i32, i32
  }
  func.func @transform_12(%arg0: i32, %arg1: i32) -> (i32, i32, i32) {
    %c0_i32 = arith.constant 0 : i32
    %c0_i32_0 = arith.constant 0 : i32
    %c0_i32_1 = arith.constant 0 : i32
    return %arg0, %c0_i32, %c0_i32_0 : i32, i32, i32
  }
}

</mosaic_0001>

<bundles_post_ra>
// kernel: transformer_forward.1
= control target key start
LH: loop header
LB: loop body
LE: loop exit
PB: predicated region body
PF: predicated region fallthrough
CT: control target
= control target key end

     0   :  { %s7779_s21 = smov 0   ;;  %s7781_s22 = smov 0   ;;  %s11280_s0 = inlined_call_operand.vmem [shape: f32[2,256,128], index: 0, kind: input, shape index: {}]   ;;  %s11281_s1 = inlined_call_operand.vmem [shape: f32[256,128], index: 1, kind: input, shape index: {}]   ;;  %s11282_s2 = inlined_call_operand.vmem [shape: f32[2,1,128], index: 2, kind: input, shape index: {}]   ;;  %s11283_s3 = inlined_call_operand.vmem [shape: f32[1,128], index: 3, kind: input, shape index: {}]   ;;  %s11284_s4 = inlined_call_operand.vmem [shape: f32[6,128,384], index: 4, kind: input, shape index: {}]   ;;  %s11285_s5 = inlined_call_operand.vmem [shape: f32[6,128,128], index: 5, kind: input, shape index: {}]   ;;  %s11286_s6 = inlined_call_operand.vmem [shape: f32[6,1,128], index: 6, kind: input, shape index: {}]   ;;  %s11287_s7 = inlined_call_operand.vmem [shape: f32[6,1,128], index: 7, kind: input, shape index: {}]   ;;  %s11288_s8 = inlined_call_operand.vmem [shape: f32[6,128,128], index: 8, kind: input, shape index: {}]   ;;  %s11289_s9 = inlined_call_operand.vmem [shape: f32[6,1,128], index: 9, kind: input, shape index: {}]   ;;  %s11290_s10 = inlined_call_operand.vmem [shape: f32[6,128,128], index: 10, kind: input, shape index: {}]   ;;  %s11291_s11 = inlined_call_operand.vmem [shape: f32[6,1,128], index: 11, kind: input, shape index: {}]   ;;  %s11292_s12 = inlined_call_operand.vmem [shape: f32[2,256,128], index: 12, kind: output, shape index: {}]  }
   0x1   :  { %11582 = sst [smem:[#allocation123_spill]] %s11280_s0  ;;  %s7783_s23 = smov 0  }
   0x2   :  { %11583 = sst [smem:[#allocation124_spill]] %s11282_s2  ;;  %s7785_s24 = smov 0  }
   0x3   :  { %11584 = sst [smem:[#allocation125_spill]] %s11283_s3  ;;  %s7787_s25 = smov 0  }
   0x4 LB: > { %11585 = sst [smem:[#allocation3_spill]] %s7702_s23  ;;  %s31_s26 = sadd.s32 1, %s7702_s23  ;;  %s7710_s25 = sphi %s7787_s25, %s22_s25   ;;  %s7706_s24 = sphi %s7785_s24, %s12199_s24   ;;  %s7702_s23 = sphi %s7783_s23, %s12198_s23   ;;  %s7698_s22 = sphi %s7781_s22, %s12197_s22   ;;  %s7694_s21 = sphi %s7779_s21, %s12196_s21  }
   0x5   : > { %11586 = sst [smem:[#allocation4_spill]] %s7706_s24  ;;  %s34_s27 = sadd.s32 1, %s7706_s24 }
   0x6   : > { %11587 = sst [smem:[#allocation5_spill]] %s7710_s25  ;;  %p32_p0 = scmp.ge.s32.totalorder %s31_s26, 6 }
   0x7   : > { %p5903_p1 = scmp.ge.s32.totalorder %s7710_s25, 1  ;;  %p446_p2 = scmp.lt.s32.totalorder %s7710_s25, 13 }
   0x8   : > { %s12201_s26 = smov (%p32_p0, %s31_s26), 0  ;;  %s12203_s27 = smov (!%p32_p0, %s34_s27), %s7706_s24 }
   0x9   : > { %11588 = sst [smem:[#allocation6_spill]] %s12201_s26  ;;  %p447_p3 = pnand %p5903_p1, %p446_p2 }
   0xa   : > { %p36_p4 = scmp.ge.s32.totalorder %s12203_s27, 2 }
   0xb   : > { %450 = sbr.rel (%p447_p3) target bundleno = 2510 (0x9ce), region = 68 }
   0xc   : > { %s12205_s27 = smov (%p36_p4, %s12203_s27), 0 }
   0xd   : > { %11589 = sst [smem:[#allocation7_spill]] %s12205_s27 }
  0x12   : > { %p520_p5 = scmp.lt.s32.totalorder %s7698_s22, 1  ;;  %p525_p6 = scmp.lt.s32.totalorder %s7694_s21, 5 }
  0x13   : > { %s11590_s0 = sld [smem:[#allocation123_spill]]  ;;  %p5915_p7 = scmp.ne.s32.totalorder %s7694_s21, 0 }
  0x14   : > { %s12207_s22 = smov (!%p520_p5, %s7698_s22), 1  ;;  %v598_v1 = vld [vmem:[%s11281_s1] sm:$0xff] (!%p5915_p7)  ;;  %v599_v4 = vld [vmem:[%s11281_s1 + $0x8] sm:$0xff] (!%p5915_p7)  ;;  %v600_v6 = vld [vmem:[%s11281_s1 + $0x10] sm:$0xff] (!%p5915_p7) }
  0x15   : > { %s7813_s28 = scalar_select %p525_p6, %s7694_s21, 5 }
  0x16   : > { %s5927_s29 = sshll.u32 %s12207_s22, 8  ;;  %565 = sbr.rel (%p5915_p7) target bundleno = 50 (0x32), region = 72  ;;  %v601_v10 = vld [vmem:[%s11281_s1 + $0x18] sm:$0xff] (!%p5915_p7)  ;;  %v602_v13 = vld [vmem:[%s11281_s1 + $0x20] sm:$0xff] (!%p5915_p7)  ;;  %v603_v15 = vld [vmem:[%s11281_s1 + $0x28] sm:$0xff] (!%p5915_p7) }
  0x17   : > { %s7020_s15 = smul.u32 384, %s7813_s28  ;;  %s5928_s16 = sshll.u32 %s7813_s28, 7  ;;  %v604_v19 = vld [vmem:[%s11281_s1 + $0x30] sm:$0xff] (!%p5915_p7)  ;;  %v605_v22 = vld [vmem:[%s11281_s1 + $0x38] sm:$0xff] (!%p5915_p7)  ;;  %v606_v24 = vld [vmem:[%s11281_s1 + $0x40] sm:$0xff] (!%p5915_p7) }
  0x18   : > { %s7834_s22 = scalar_lea.vmem %s11285_s5, %s5928_s16  ;;  %s7843_s2 = scalar_lea.vmem %s11288_s8, %s5928_s16  ;;  %v607_v28 = vld [vmem:[%s11281_s1 + $0x48] sm:$0xff] (!%p5915_p7)  ;;  %v608_v31 = vld [vmem:[%s11281_s1 + $0x50] sm:$0xff] (!%p5915_p7)  ;;  %v609_v33 = vld [vmem:[%s11281_s1 + $0x58] sm:$0xff] (!%p5915_p7) }
  0x19   : > { %s7818_s14 = scalar_lea.vmem %s11590_s0, %s5927_s29  ;;  %s7829_s26 = scalar_lea.vmem %s11284_s4, %s7020_s15  ;;  %v610_v37 = vld [vmem:[%s11281_s1 + $0x60] sm:$0xff] (!%p5915_p7)  ;;  %v611_v40 = vld [vmem:[%s11281_s1 + $0x68] sm:$0xff] (!%p5915_p7)  ;;  %v612_v42 = vld [vmem:[%s11281_s1 + $0x70] sm:$0xff] (!%p5915_p7) }
  0x1a   : > { %s7849_s27 = scalar_lea.vmem %s11289_s9, %s7813_s28  ;;  %s7854_s23 = scalar_lea.vmem %s11290_s10, %s5928_s16  ;;  %v566_v0 = vld [vmem:[%s7818_s14] sm:$0xff] (!%p5915_p7)  ;;  %v567_v2 = vld [vmem:[%s7818_s14 + $0x8] sm:$0xff] (!%p5915_p7)  ;;  %v568_v5 = vld [vmem:[%s7818_s14 + $0x10] sm:$0xff] (!%p5915_p7) }
  0x1b   : > { %s556_s25 = scalar_lea.vmem %s11291_s11, %s7813_s28  ;;  %s7863_s0 = scalar_lea.vmem %s11292_s12, %s5927_s29  ;;  %v630_v3 = vadd.f32 (!%p5915_p7), %v598_v1, %v566_v0  ;;  %v631_v7 = vadd.f32 (!%p5915_p7), %v599_v4, %v567_v2  ;;  %v632_v8 = vadd.f32 (!%p5915_p7), %v600_v6, %v568_v5  ;;  %v569_v9 = vld [vmem:[%s7818_s14 + $0x18] sm:$0xff] (!%p5915_p7)  ;;  %v570_v11 = vld [vmem:[%s7818_s14 + $0x20] sm:$0xff] (!%p5915_p7)  ;;  %v571_v14 = vld [vmem:[%s7818_s14 + $0x28] sm:$0xff] (!%p5915_p7) }
  0x1c   : > { %v633_v12 = vadd.f32 (!%p5915_p7), %v601_v10, %v569_v9  ;;  %v634_v16 = vadd.f32 (!%p5915_p7), %v602_v13, %v570_v11  ;;  %v635_v17 = vadd.f32 (!%p5915_p7), %v603_v15, %v571_v14  ;;  %v572_v18 = vld [vmem:[%s7818_s14 + $0x30] sm:$0xff] (!%p5915_p7)  ;;  %v573_v20 = vld [vmem:[%s7818_s14 + $0x38] sm:$0xff] (!%p5915_p7)  ;;  %v574_v23 = vld [vmem:[%s7818_s14 + $0x40] sm:$0xff] (!%p5915_p7) }
  0x1d   : > { %662 = vst [vmem:[#allocation2] sm:$0xff] %v630_v3  ;;  %663 = vst [vmem:[#allocation2 + $0x8] sm:$0xff] %v631_v7  ;;  %v636_v21 = vadd.f32 %v604_v19, %v572_v18  ;;  %v637_v25 = vadd.f32 %v605_v22, %v573_v20  ;;  %v638_v26 = vadd.f32 %v606_v24, %v574_v23  ;;  %v575_v27 = vld [vmem:[%s7818_s14 + $0x48] sm:$0xff]  ;;  %v576_v29 = vld [vmem:[%s7818_s14 + $0x50] sm:$0xff] }
  0x1e   : > { %664 = vst [vmem:[#allocation2 + $0x10] sm:$0xff] %v632_v8  ;;  %665 = vst [vmem:[#allocation2 + $0x18] sm:$0xff] %v633_v12  ;;  %v639_v30 = vadd.f32 %v607_v28, %v575_v27  ;;  %v577_v32 = vld [vmem:[%s7818_s14 + $0x58] sm:$0xff]  ;;  %v640_v34 = vadd.f32 %v608_v31, %v576_v29  ;;  %v578_v36 = vld [vmem:[%s7818_s14 + $0x60] sm:$0xff] }
  0x1f   : > { %666 = vst [vmem:[#allocation2 + $0x20] sm:$0xff] %v634_v16  ;;  %667 = vst [vmem:[#allocation2 + $0x28] sm:$0xff] %v635_v17  ;;  %v641_v35 = vadd.f32 %v609_v33, %v577_v32  ;;  %v579_v38 = vld [vmem:[%s7818_s14 + $0x68] sm:$0xff]  ;;  %v642_v39 = vadd.f32 %v610_v37, %v578_v36  ;;  %v580_v41 = vld [vmem:[%s7818_s14 + $0x70] sm:$0xff] }
  0x20   : > { %668 = vst [vmem:[#allocation2 + $0x30] sm:$0xff] %v636_v21  ;;  %669 = vst [vmem:[#allocation2 + $0x38] sm:$0xff] %v637_v25  ;;  %v643_v43 = vadd.f32 %v611_v40, %v579_v38  ;;  %v644_v44 = vadd.f32 %v612_v42, %v580_v41  ;;  %v581_v45 = vld [vmem:[%s7818_s14 + $0x78] sm:$0xff]  ;;  %v582_v47 = vld [vmem:[%s7818_s14 + $0x80] sm:$0xff] }
  0x21   : > { %670 = vst [vmem:[#allocation2 + $0x40] sm:$0xff] %v638_v26  ;;  %671 = vst [vmem:[#allocation2 + $0x48] sm:$0xff] %v639_v30  ;;  %v613_v46 = vld [vmem:[%s11281_s1 + $0x78] sm:$0xff]  ;;  %v614_v49 = vld [vmem:[%s11281_s1 + $0x80] sm:$0xff] }
  0x22   : > { %672 = vst [vmem:[#allocation2 + $0x50] sm:$0xff] %v640_v34  ;;  %673 = vst [vmem:[#allocation2 + $0x58] sm:$0xff] %v641_v35  ;;  %v645_v48 = vadd.f32 %v613_v46, %v581_v45  ;;  %v583_v50 = vld [vmem:[%s7818_s14 + $0x88] sm:$0xff]  ;;  %v646_v52 = vadd.f32 %v614_v49, %v582_v47  ;;  %v584_v54 = vld [vmem:[%s7818_s14 + $0x90] sm:$0xff] }
  0x23   : > { %674 = vst [vmem:[#allocation2 + $0x60] sm:$0xff] %v642_v39  ;;  %v615_v51 = vld [vmem:[%s11281_s1 + $0x88] sm:$0xff]  ;;  %675 = vst [vmem:[#allocation2 + $0x68] sm:$0xff] %v643_v43  ;;  %v616_v55 = vld [vmem:[%s11281_s1 + $0x90] sm:$0xff] }
  0x24   : > { %676 = vst [vmem:[#allocation2 + $0x70] sm:$0xff] %v644_v44  ;;  %v647_v53 = vadd.f32 %v615_v51, %v583_v50  ;;  %v585_v56 = vld [vmem:[%s7818_s14 + $0x98] sm:$0xff]  ;;  %677 = vst [vmem:[#allocation2 + $0x78] sm:$0xff] %v645_v48  ;;  %v648_v57 = vadd.f32 %v616_v55, %v584_v54  ;;  %v586_v59 = vld [vmem:[%s7818_s14 + $0xa0] sm:$0xff] }
  0x25   : > { %v617_v58 = vld [vmem:[%s11281_s1 + $0x98] sm:$0xff]  ;;  %v618_v60 = vld [vmem:[%s11281_s1 + $0xa0] sm:$0xff]  ;;  %678 = vst [vmem:[#allocation2 + $0x80] sm:$0xff] %v646_v52  ;;  %v587_v63 = vld [vmem:[%s7818_s14 + $0xa8] sm:$0xff] }
  0x26   : > { %679 = vst [vmem:[#allocation2 + $0x88] sm:$0xff] %v647_v53  ;;  %v649_v61 = vadd.f32 %v617_v58, %v585_v56  ;;  %v650_v62 = vadd.f32 %v618_v60, %v586_v59  ;;  %v619_v0 = vld [vmem:[%s11281_s1 + $0xa8] sm:$0xff]  ;;  %v588_v1 = vld [vmem:[%s7818_s14 + $0xb0] sm:$0xff]  ;;  %680 = vst [vmem:[#allocation2 + $0x90] sm:$0xff] %v648_v57 }
  0x27   : > { %v651_v2 = vadd.f32 %v619_v0, %v587_v63  ;;  %v620_v3 = vld [vmem:[%s11281_s1 + $0xb0] sm:$0xff]  ;;  %v589_v4 = vld [vmem:[%s7818_s14 + $0xb8] sm:$0xff]  ;;  %v590_v8 = vld [vmem:[%s7818_s14 + $0xc0] sm:$0xff] }
  0x28   : > { %v621_v5 = vld [vmem:[%s11281_s1 + $0xb8] sm:$0xff]  ;;  %681 = vst [vmem:[#allocation2 + $0x98] sm:$0xff] %v649_v61  ;;  %682 = vst [vmem:[#allocation2 + $0xa0] sm:$0xff] %v650_v62  ;;  %v652_v6 = vadd.f32 %v620_v3, %v588_v1  ;;  %v622_v9 = vld [vmem:[%s11281_s1 + $0xc0] sm:$0xff] }
  0x29   : > { %v653_v7 = vadd.f32 %v621_v5, %v589_v4  ;;  %v591_v10 = vld [vmem:[%s7818_s14 + $0xc8] sm:$0xff]  ;;  %683 = vst [vmem:[#allocation2 + $0xa8] sm:$0xff] %v651_v2  ;;  %v654_v11 = vadd.f32 %v622_v9, %v590_v8  ;;  %v592_v13 = vld [vmem:[%s7818_s14 + $0xd0] sm:$0xff]  ;;  %v593_v17 = vld [vmem:[%s7818_s14 + $0xd8] sm:$0xff] }
  0x2a   : > { %v623_v12 = vld [vmem:[%s11281_s1 + $0xc8] sm:$0xff]  ;;  %v624_v14 = vld [vmem:[%s11281_s1 + $0xd0] sm:$0xff]  ;;  %684 = vst [vmem:[#allocation2 + $0xb0] sm:$0xff] %v652_v6  ;;  %v625_v18 = vld [vmem:[%s11281_s1 + $0xd8] sm:$0xff] }
  0x2b   : > { %685 = vst [vmem:[#allocation2 + $0xb8] sm:$0xff] %v653_v7  ;;  %v655_v15 = vadd.f32 %v623_v12, %v591_v10  ;;  %v656_v16 = vadd.f32 %v624_v14, %v592_v13  ;;  %v594_v19 = vld [vmem:[%s7818_s14 + $0xe0] sm:$0xff]  ;;  %686 = vst [vmem:[#allocation2 + $0xc0] sm:$0xff] %v654_v11  ;;  %v657_v20 = vadd.f32 %v625_v18, %v593_v17  ;;  %v595_v22 = vld [vmem:[%s7818_s14 + $0xe8] sm:$0xff] }
  0x2c   : > { %v626_v21 = vld [vmem:[%s11281_s1 + $0xe0] sm:$0xff]  ;;  %v627_v23 = vld [vmem:[%s11281_s1 + $0xe8] sm:$0xff]  ;;  %v596_v26 = vld [vmem:[%s7818_s14 + $0xf0] sm:$0xff] }
  0x2d   : > { %687 = vst [vmem:[#allocation2 + $0xc8] sm:$0xff] %v655_v15  ;;  %688 = vst [vmem:[#allocation2 + $0xd0] sm:$0xff] %v656_v16  ;;  %v658_v24 = vadd.f32 %v626_v21, %v594_v19  ;;  %v659_v25 = vadd.f32 %v627_v23, %v595_v22  ;;  %v628_v27 = vld [vmem:[%s11281_s1 + $0xf0] sm:$0xff]  ;;  %v597_v28 = vld [vmem:[%s7818_s14 + $0xf8] sm:$0xff] }
  0x2e   : > { %689 = vst [vmem:[#allocation2 + $0xd8] sm:$0xff] %v657_v20  ;;  %v660_v29 = vadd.f32 %v628_v27, %v596_v26  ;;  %v629_v30 = vld [vmem:[%s11281_s1 + $0xf8] sm:$0xff] }
  0x2f   : > { %690 = vst [vmem:[#allocation2 + $0xe0] sm:$0xff] %v658_v24  ;;  %691 = vst [vmem:[#allocation2 + $0xe8] sm:$0xff] %v659_v25  ;;  %v661_v31 = vadd.f32 %v629_v30, %v597_v28 }
  0x30   : > { %692 = vst [vmem:[#allocation2 + $0xf0] sm:$0xff] %v660_v29 }
  0x31   : > { %693 = vst [vmem:[#allocation2 + $0xf8] sm:$0xff] %v661_v31 }
  0x32 PF: > { %v727_v32 = vld [vmem:[%s7829_s26 + $0x8] sm:$0xff]  ;;  %v730_v33 = vld [vmem:[%s7829_s26 + $0x20] sm:$0xff]  ;;  %v729_v36 = vld [vmem:[%s7829_s26 + $0x18] sm:$0xff]  ;;  %v7712_v39 = vmov 0.0   ;;  %s11591_s24 = sld [smem:[#allocation124_spill]]  ;;  %s12102_s13 = sld [smem:[#allocation125_spill]] }
  0x33   : > { %v726_v34 = vld [vmem:[%s7829_s26] sm:$0xff]  ;;  %v6636_v35 = vpack.c.bf16 %v730_v33, %v727_v32  ;;  %v733_v37 = vld [vmem:[%s7829_s26 + $0x38] sm:$0xff]  ;;  %v736_v38 = vld [vmem:[%s7829_s26 + $0x50] sm:$0xff]  ;;  %838 = vmatprep.mubr.f32.mxu0 %v7712_v39  ;;  %s12103_s17 = scalar_lea.vmem %s11286_s6, %s7813_s28  ;;  %s12104_s20 = scalar_lea.vmem %s11287_s7, %s7813_s28 }
  0x34   : > { %v6638_v40 = vpack.c.bf16 %v729_v36, %v726_v34  ;;  %v6640_v41 = vpack.c.bf16 %v736_v38, %v733_v37  ;;  %v732_v42 = vld [vmem:[%s7829_s26 + $0x30] sm:$0xff]  ;;  %v735_v43 = vld [vmem:[%s7829_s26 + $0x48] sm:$0xff]  ;;  %v742_v45 = vld [vmem:[%s7829_s26 + $0x80] sm:$0xff]  ;;  %p5924_p8 = scmp.ne.s32.totalorder %s7694_s21, 5 }
  0x35   : > { %v739_v44 = vld [vmem:[%s7829_s26 + $0x68] sm:$0xff]  ;;  %6637 = vmatprep.subr.bf16.mxu0 %v6636_v35  ;;  %v6642_v46 = vpack.c.bf16 %v735_v43, %v732_v42  ;;  %v738_v48 = vld [vmem:[%s7829_s26 + $0x60] sm:$0xff]  ;;  %v741_v49 = vld [vmem:[%s7829_s26 + $0x78] sm:$0xff] }
  0x36   : > { %6639 = vmatpush1.bf16.msra.mxu0 %v6638_v40  ;;  %v6644_v47 = vpack.c.bf16 %v742_v45, %v739_v44  ;;  %v745_v50 = vld [vmem:[%s7829_s26 + $0x98] sm:$0xff]  ;;  %v748_v51 = vld [vmem:[%s7829_s26 + $0xb0] sm:$0xff]  ;;  %v6646_v52 = vpack.c.bf16 %v741_v49, %v738_v48  ;;  %v747_v55 = vld [vmem:[%s7829_s26 + $0xa8] sm:$0xff] }
  0x37   : > { %6641 = vmatprep.subr.bf16.mxu0 %v6640_v41  ;;  %v6648_v53 = vpack.c.bf16 %v748_v51, %v745_v50  ;;  %v744_v54 = vld [vmem:[%s7829_s26 + $0x90] sm:$0xff]  ;;  %v751_v56 = vld [vmem:[%s7829_s26 + $0xc8] sm:$0xff]  ;;  %v754_v57 = vld [vmem:[%s7829_s26 + $0xe0] sm:$0xff] }
  0x38   : > { %v694_v58 = vld [vmem:[#allocation2] sm:$0xff]  ;;  %v6650_v59 = vpack.c.bf16 %v747_v55, %v744_v54  ;;  %v6652_v60 = vpack.c.bf16 %v754_v57, %v751_v56  ;;  %v753_v62 = vld [vmem:[%s7829_s26 + $0xd8] sm:$0xff]  ;;  %v760_v0 = vld [vmem:[%s7829_s26 + $0x110] sm:$0xff]  ;;  %s11592_s30 = smov %s11591_s24 }
  0x39   : > { %6348 = vmatprep.mubr.f32.mxu1 %v694_v58  ;;  %v750_v61 = vld [vmem:[%s7829_s26 + $0xc0] sm:$0xff]  ;;  %v757_v63 = vld [vmem:[%s7829_s26 + $0xf8] sm:$0xff]  ;;  %v756_v3 = vld [vmem:[%s7829_s26 + $0xf0] sm:$0xff] }
  0x3a   : > { %6643 = vmatpush1.bf16.msra.mxu0 %v6642_v46  ;;  %v6654_v1 = vpack.c.bf16 %v753_v62, %v750_v61  ;;  %v6656_v2 = vpack.c.bf16 %v760_v0, %v757_v63  ;;  %v759_v4 = vld [vmem:[%s7829_s26 + $0x108] sm:$0xff]  ;;  %v766_v6 = vld [vmem:[%s7829_s26 + $0x140] sm:$0xff]  ;;  %v765_v10 = vld [vmem:[%s7829_s26 + $0x138] sm:$0xff] }
  0x3b   : > { %6645 = vmatprep.subr.bf16.mxu0 %v6644_v47  ;;  %v763_v5 = vld [vmem:[%s7829_s26 + $0x128] sm:$0xff]  ;;  %v6658_v7 = vpack.c.bf16 %v759_v4, %v756_v3  ;;  %v762_v9 = vld [vmem:[%s7829_s26 + $0x120] sm:$0xff]  ;;  %v769_v11 = vld [vmem:[%s7829_s26 + $0x158] sm:$0xff] }
  0x3c   : > { %v6660_v8 = vpack.c.bf16 %v766_v6, %v763_v5  ;;  %v772_v12 = vld [vmem:[%s7829_s26 + $0x170] sm:$0xff]  ;;  %v6662_v13 = vpack.c.bf16 %v765_v10, %v762_v9  ;;  %v771_v16 = vld [vmem:[%s7829_s26 + $0x168] sm:$0xff]  ;;  %v734_v21 = vld [vmem:[%s7829_s26 + $0x40] sm:$0xff] }
  0x3d   : > { %v6664_v14 = vpack.c.bf16 %v772_v12, %v769_v11  ;;  %v768_v15 = vld [vmem:[%s7829_s26 + $0x150] sm:$0xff]  ;;  %v731_v18 = vld [vmem:[%s7829_s26 + $0x28] sm:$0xff]  ;;  %v737_v22 = vld [vmem:[%s7829_s26 + $0x58] sm:$0xff] }
  0x3e   : > { %6647 = vmatpush1.bf16.msra.mxu0 %v6646_v52  ;;  %v728_v17 = vld [vmem:[%s7829_s26 + $0x10] sm:$0xff]  ;;  %v6666_v19 = vpack.c.bf16 %v771_v16, %v768_v15  ;;  %v6672_v24 = vpack.c.bf16 %v737_v22, %v734_v21  ;;  %v743_v25 = vld [vmem:[%s7829_s26 + $0x88] sm:$0xff]  ;;  %v746_v27 = vld [vmem:[%s7829_s26 + $0xa0] sm:$0xff] }
  0x3f   : > { %6649 = vmatprep.subr.bf16.mxu0 %v6648_v53  ;;  %v6668_v20 = vpack.c.bf16 %v731_v18, %v728_v17  ;;  %v740_v23 = vld [vmem:[%s7829_s26 + $0x70] sm:$0xff]  ;;  %v749_v28 = vld [vmem:[%s7829_s26 + $0xb8] sm:$0xff]  ;;  %v695_v29 = vld [vmem:[#allocation2 + $0x8] sm:$0xff] }
  0x40   : > { %v6676_v26 = vpack.c.bf16 %v743_v25, %v740_v23  ;;  %v6680_v30 = vpack.c.bf16 %v749_v28, %v746_v27  ;;  %v752_v31 = vld [vmem:[%s7829_s26 + $0xd0] sm:$0xff]  ;;  %v755_v32 = vld [vmem:[%s7829_s26 + $0xe8] sm:$0xff]  ;;  %v758_v35 = vld [vmem:[%s7829_s26 + $0x100] sm:$0xff] }
  0x41   : > { %6669 = vmatprep.subr.bf16.mxu1 %v6668_v20  ;;  %v696_v33 = vld [vmem:[#allocation2 + $0x10] sm:$0xff]  ;;  %v6684_v34 = vpack.c.bf16 %v755_v32, %v752_v31  ;;  %v761_v36 = vld [vmem:[%s7829_s26 + $0x118] sm:$0xff]  ;;  %v767_v41 = vld [vmem:[%s7829_s26 + $0x148] sm:$0xff] }
  0x42   : > { %6651 = vmatpush1.bf16.msra.mxu0 %v6650_v59  ;;  %6671 = vmatpush3.bf16.msra.mxu1 %v6668_v20  ;;  %v697_v37 = vld [vmem:[#allocation2 + $0x18] sm:$0xff]  ;;  %v6688_v38 = vpack.c.bf16 %v761_v36, %v758_v35  ;;  %v764_v40 = vld [vmem:[%s7829_s26 + $0x130] sm:$0xff]  ;;  %v698_v42 = vld [vmem:[#allocation2 + $0x20] sm:$0xff] }
  0x43   : > { %6653 = vmatprep.subr.bf16.mxu0 %v6652_v60  ;;  %6673 = vmatprep.subr.bf16.mxu1 %v6672_v24  ;;  %v6692_v43 = vpack.c.bf16 %v767_v41, %v764_v40  ;;  %v770_v44 = vld [vmem:[%s7829_s26 + $0x160] sm:$0xff]  ;;  %v773_v45 = vld [vmem:[%s7829_s26 + $0x178] sm:$0xff]  ;;  %v699_v46 = vld [vmem:[#allocation2 + $0x28] sm:$0xff] }
  0x44   : > { %v6696_v47 = vpack.c.bf16 %v773_v45, %v770_v44  ;;  %v700_v48 = vld [vmem:[#allocation2 + $0x30] sm:$0xff]  ;;  %v701_v49 = vld [vmem:[#allocation2 + $0x38] sm:$0xff]  ;;  %v702_v50 = vld [vmem:[#allocation2 + $0x40] sm:$0xff] }
  0x45   : > { %v703_v51 = vld [vmem:[#allocation2 + $0x48] sm:$0xff]  ;;  %v704_v52 = vld [vmem:[#allocation2 + $0x50] sm:$0xff]  ;;  %v705_v53 = vld [vmem:[#allocation2 + $0x58] sm:$0xff] }
  0x46   : > { %6655 = vmatpush1.bf16.msra.mxu0 %v6654_v1  ;;  %6675 = vmatpush3.bf16.msra.mxu1 %v6672_v24  ;;  %v706_v54 = vld [vmem:[#allocation2 + $0x60] sm:$0xff]  ;;  %v707_v55 = vld [vmem:[#allocation2 + $0x68] sm:$0xff]  ;;  %v708_v56 = vld [vmem:[#allocation2 + $0x70] sm:$0xff] }
  0x47   : > { %6657 = vmatprep.subr.bf16.mxu0 %v6656_v2  ;;  %6677 = vmatprep.subr.bf16.mxu1 %v6676_v26  ;;  %v709_v57 = vld [vmem:[#allocation2 + $0x78] sm:$0xff]  ;;  %v711_v59 = vld [vmem:[#allocation2 + $0x88] sm:$0xff]  ;;  %v712_v60 = vld [vmem:[#allocation2 + $0x90] sm:$0xff] }
  0x48   : > { %v713_v61 = vld [vmem:[#allocation2 + $0x98] sm:$0xff]  ;;  %v714_v62 = vld [vmem:[#allocation2 + $0xa0] sm:$0xff]  ;;  %v715_v63 = vld [vmem:[#allocation2 + $0xa8] sm:$0xff] }
  0x49   : > { %v716_v0 = vld [vmem:[#allocation2 + $0xb0] sm:$0xff]  ;;  %v717_v1 = vld [vmem:[#allocation2 + $0xb8] sm:$0xff]  ;;  %v718_v2 = vld [vmem:[#allocation2 + $0xc0] sm:$0xff] }
  0x4a   : > { %6659 = vmatpush1.bf16.msra.mxu0 %v6658_v7  ;;  %6679 = vmatpush3.bf16.msra.mxu1 %v6676_v26  ;;  %v719_v3 = vld [vmem:[#allocation2 + $0xc8] sm:$0xff]  ;;  %v720_v4 = vld [vmem:[#allocation2 + $0xd0] sm:$0xff]  ;;  %v721_v5 = vld [vmem:[#allocation2 + $0xd8] sm:$0xff] }
  0x4b   : > { %6661 = vmatprep.subr.bf16.mxu0 %v6660_v8  ;;  %6681 = vmatprep.subr.bf16.mxu1 %v6680_v30  ;;  %v722_v6 = vld [vmem:[#allocation2 + $0xe0] sm:$0xff]  ;;  %v723_v7 = vld [vmem:[#allocation2 + $0xe8] sm:$0xff]  ;;  %v724_v8 = vld [vmem:[#allocation2 + $0xf0] sm:$0xff] }
  0x4c   : > { %v725_v9 = vld [vmem:[#allocation2 + $0xf8] sm:$0xff]  ;;  %v8077_v11 = vld [vmem:[%s11591_s24] ss:$0 sm:$0xff]  ;;  %v8082_v12 = vld [vmem:[%s11592_s30 + $0x1] ss:$0 sm:$0xff] }
  0x4e   : > { %6663 = vmatpush1.bf16.msra.mxu0 %v6662_v13  ;;  %6683 = vmatpush3.bf16.msra.mxu1 %v6680_v30 }
  0x4f   : > { %6665 = vmatprep.subr.bf16.mxu0 %v6664_v14  ;;  %6685 = vmatprep.subr.bf16.mxu1 %v6684_v34 }
  0x52   : > { %6667 = vmatpush1.bf16.msra.mxu0 %v6666_v19  ;;  %6687 = vmatpush3.bf16.msra.mxu1 %v6684_v34 }
  0x53   : > { %6689 = vmatprep.subr.bf16.mxu1 %v6688_v38 }
  0x55   : > { %839 = vmatmul.mubr.f32.vlgmr.msra.gmra.mrb[0].mxu0 %v694_v58  ;;  %v710_v58 = vld [vmem:[#allocation2 + $0x80] sm:$0xff] }
  0x56   : > { %844 = vmatprep.mubr.f32.mxu0 %v7712_v39  ;;  %6691 = vmatpush3.bf16.msra.mxu1 %v6688_v38 }
  0x57   : > { %6693 = vmatprep.subr.bf16.mxu1 %v6692_v43 }
  0x59   : > { %845 = vmatmul.mubr.f32.gmra.mrb[2].mxu0 %v695_v29 }
  0x5a   : > { %850 = vmatprep.mubr.f32.mxu0 %v7712_v39  ;;  %6695 = vmatpush3.bf16.msra.mxu1 %v6692_v43 }
  0x5b   : > { %6697 = vmatprep.subr.bf16.mxu1 %v6696_v47 }
  0x5d   : > { %851 = vmatmul.mubr.f32.gmra.mrb[4].mxu0 %v696_v33 }
  0x5e   : > { %856 = vmatprep.mubr.f32.mxu0 %v7712_v39  ;;  %6699 = vmatpush3.bf16.msra.mxu1 %v6696_v47 }
  0x61   : > { %857 = vmatmul.mubr.f32.gmra.mrb[6].mxu0 %v697_v37  ;;  %6349 = vmatmul.mubr.f32.vlgmr.msra.gmra.mrb[0].mxu1 %v695_v29 }
  0x62   : > { %862 = vmatprep.mubr.f32.mxu0 %v7712_v39  ;;  %6351 = vmatprep.mubr.f32.mxu1 %v696_v33 }
  0x65   : > { %863 = vmatmul.mubr.f32.gmra.mrb[8].mxu0 %v698_v42  ;;  %6352 = vmatmul.mubr.f32.gmra.mrb[2].mxu1 %v697_v37 }
  0x66   : > { %868 = vmatprep.mubr.f32.mxu0 %v7712_v39  ;;  %6354 = vmatprep.mubr.f32.mxu1 %v698_v42 }
  0x69   : > { %869 = vmatmul.mubr.f32.gmra.mrb[10].mxu0 %v699_v46  ;;  %6355 = vmatmul.mubr.f32.gmra.mrb[4].mxu1 %v699_v46 }
  0x6a   : > { %874 = vmatprep.mubr.f32.mxu0 %v7712_v39  ;;  %6357 = vmatprep.mubr.f32.mxu1 %v700_v48 }
  0x6d   : > { %875 = vmatmul.mubr.f32.gmra.mrb[12].mxu0 %v700_v48  ;;  %6358 = vmatmul.mubr.f32.gmra.mrb[6].mxu1 %v701_v49 }
  0x6e   : > { %880 = vmatprep.mubr.f32.mxu0 %v7712_v39  ;;  %6360 = vmatprep.mubr.f32.mxu1 %v702_v50 }
  0x71   : > { %881 = vmatmul.mubr.f32.gmra.mrb[14].mxu0 %v701_v49  ;;  %6361 = vmatmul.mubr.f32.gmra.mrb[8].mxu1 %v703_v51 }
  0x72   : > { %886 = vmatprep.mubr.f32.mxu0 %v7712_v39  ;;  %6363 = vmatprep.mubr.f32.mxu1 %v704_v52 }
  0x75   : > { %887 = vmatmul.mubr.f32.gmra.mrb[16].mxu0 %v702_v50  ;;  %6364 = vmatmul.mubr.f32.gmra.mrb[10].mxu1 %v705_v53 }
  0x76   : > { %892 = vmatprep.mubr.f32.mxu0 %v7712_v39  ;;  %6366 = vmatprep.mubr.f32.mxu1 %v706_v54 }
  0x79   : > { %893 = vmatmul.mubr.f32.gmra.mrb[18].mxu0 %v703_v51  ;;  %6367 = vmatmul.mubr.f32.gmra.mrb[12].mxu1 %v707_v55 }
  0x7a   : > { %898 = vmatprep.mubr.f32.mxu0 %v7712_v39  ;;  %6369 = vmatprep.mubr.f32.mxu1 %v708_v56 }
  0x7d   : > { %899 = vmatmul.mubr.f32.gmra.mrb[20].mxu0 %v704_v52  ;;  %6370 = vmatmul.mubr.f32.gmra.mrb[14].mxu1 %v709_v57 }
  0x7e   : > { %904 = vmatprep.mubr.f32.mxu0 %v7712_v39  ;;  %6372 = vmatprep.mubr.f32.mxu1 %v710_v58 }
  0x81   : > { %905 = vmatmul.mubr.f32.gmra.mrb[22].mxu0 %v705_v53  ;;  %6373 = vmatmul.mubr.f32.gmra.mrb[16].mxu1 %v711_v59 }
  0x82   : > { %910 = vmatprep.mubr.f32.mxu0 %v7712_v39  ;;  %6375 = vmatprep.mubr.f32.mxu1 %v712_v60 }
  0x85   : > { %911 = vmatmul.mubr.f32.gmra.mrb[24].mxu0 %v706_v54  ;;  %6376 = vmatmul.mubr.f32.gmra.mrb[18].mxu1 %v713_v61 }
  0x86   : > { %916 = vmatprep.mubr.f32.mxu0 %v7712_v39  ;;  %6378 = vmatprep.mubr.f32.mxu1 %v714_v62 }
  0x89   : > { %917 = vmatmul.mubr.f32.gmra.mrb[26].mxu0 %v707_v55  ;;  %6379 = vmatmul.mubr.f32.gmra.mrb[20].mxu1 %v715_v63 }
  0x8a   : > { %922 = vmatprep.mubr.f32.mxu0 %v7712_v39  ;;  %6381 = vmatprep.mubr.f32.mxu1 %v716_v0 }
  0x8d   : > { %923 = vmatmul.mubr.f32.gmra.mrb[28].mxu0 %v708_v56  ;;  %6382 = vmatmul.mubr.f32.gmra.mrb[22].mxu1 %v717_v1 }
  0x8e   : > { %928 = vmatprep.mubr.f32.mxu0 %v7712_v39  ;;  %6384 = vmatprep.mubr.f32.mxu1 %v718_v2 }
  0x91   : > { %929 = vmatmul.mubr.f32.gmra.mrb[30].mxu0 %v709_v57  ;;  %6385 = vmatmul.mubr.f32.gmra.mrb[24].mxu1 %v719_v3 }
  0x92   : > { %934 = vmatprep.mubr.f32.mxu0 %v7712_v39  ;;  %6387 = vmatprep.mubr.f32.mxu1 %v720_v4 }
  0x95   : > { %935 = vmatmul.mubr.f32.gmra.mrb[32].mxu0 %v710_v58  ;;  %6388 = vmatmul.mubr.f32.gmra.mrb[26].mxu1 %v721_v5 }
  0x96   : > { %940 = vmatprep.mubr.f32.mxu0 %v7712_v39  ;;  %6390 = vmatprep.mubr.f32.mxu1 %v722_v6 }
  0x99   : > { %941 = vmatmul.mubr.f32.gmra.mrb[34].mxu0 %v711_v59  ;;  %6391 = vmatmul.mubr.f32.gmra.mrb[28].mxu1 %v723_v7 }
  0x9a   : > { %946 = vmatprep.mubr.f32.mxu0 %v7712_v39  ;;  %6393 = vmatprep.mubr.f32.mxu1 %v724_v8 }
  0x9d   : > { %947 = vmatmul.mubr.f32.gmra.mrb[36].mxu0 %v712_v60  ;;  %6394 = vmatmul.mubr.f32.gmra.mrb[30].mxu1 %v725_v9 }
  0x9e   : > { %952 = vmatprep.mubr.f32.mxu0 %v7712_v39 }
  0xa1   : > { %953 = vmatmul.mubr.f32.gmra.mrb[38].mxu0 %v713_v61 }
  0xa2   : > { %958 = vmatprep.mubr.f32.mxu0 %v7712_v39 }
  0xa5   : > { %959 = vmatmul.mubr.f32.gmra.mrb[40].mxu0 %v714_v62 }
  0xa6   : > { %964 = vmatprep.mubr.f32.mxu0 %v7712_v39 }
  0xa9   : > { %965 = vmatmul.mubr.f32.gmra.mrb[42].mxu0 %v715_v63 }
  0xaa   : > { %970 = vmatprep.mubr.f32.mxu0 %v7712_v39 }
  0xad   : > { %971 = vmatmul.mubr.f32.gmra.mrb[44].mxu0 %v716_v0 }
  0xae   : > { %976 = vmatprep.mubr.f32.mxu0 %v7712_v39 }
  0xb1   : > { %977 = vmatmul.mubr.f32.gmra.mrb[46].mxu0 %v717_v1 }
  0xb2   : > { %982 = vmatprep.mubr.f32.mxu0 %v7712_v39 }
  0xb5   : > { %983 = vmatmul.mubr.f32.gmra.mrb[48].mxu0 %v718_v2 }
  0xb6   : > { %988 = vmatprep.mubr.f32.mxu0 %v7712_v39 }
  0xb9   : > { %989 = vmatmul.mubr.f32.gmra.mrb[50].mxu0 %v719_v3 }
  0xba   : > { %994 = vmatprep.mubr.f32.mxu0 %v7712_v39 }
  0xbd   : > { %995 = vmatmul.mubr.f32.gmra.mrb[52].mxu0 %v720_v4 }
  0xbe   : > { %1000 = vmatprep.mubr.f32.mxu0 %v7712_v39 }
  0xc1   : > { %1001 = vmatmul.mubr.f32.gmra.mrb[54].mxu0 %v721_v5 }
  0xc2   : > { %1006 = vmatprep.mubr.f32.mxu0 %v7712_v39 }
  0xc5   : > { %1007 = vmatmul.mubr.f32.gmra.mrb[56].mxu0 %v722_v6 }
  0xc6   : > { %1012 = vmatprep.mubr.f32.mxu0 %v7712_v39 }
  0xc9   : > { %1013 = vmatmul.mubr.f32.gmra.mrb[58].mxu0 %v723_v7 }
  0xca   : > { %1018 = vmatprep.mubr.f32.mxu0 %v7712_v39 }
  0xcd   : > { %1019 = vmatmul.mubr.f32.gmra.mrb[60].mxu0 %v724_v8 }
  0xce   : > { %1024 = vmatprep.mubr.f32.mxu0 %v7712_v39 }
  0xd1   : > { %1025 = vmatmul.mubr.f32.gmra.mrb[62].mxu0 %v725_v9 }
 0x128   : > { %v840_v10 = vpop.f32.mrb[0].mxu0 }
 0x129   : > { %v1256_v13 = vmul.f32 0.5, %v840_v10  ;;  %v842_v14 = vpop.f32.mrb[1].mxu0 }
 0x12b   : > { %v8085_v15 = vmul.f32 %v8077_v11, %v1256_v13  ;;  %v8088_v16 = vmul.f32 %v8082_v12, %v1256_v13 }
 0x12c   : > { %v8090_v39 = vpop.f32.mrb[2].mxu0 }
 0x12d   : > { %v848_v17 = vpop.f32.mrb[3].mxu0  ;;  %6012 = vmatprep.mubr.f32.mxu1 %v8085_v15  ;;  %6108 = vmatprep.mubr.f32.mxu0 %v8088_v16 }
 0x12e   : > { %v6702_v18 = vpack.c.bf16 %v848_v17, %v842_v14 }
 0x130   : > { %v8094_v19 = vpop.f32.mrb[4].mxu0 }
 0x131   : > { %v854_v20 = vpop.f32.mrb[5].mxu0 }
 0x134   : > { %v8096_v21 = vpop.f32.mrb[6].mxu0 }
 0x135   : > { %v860_v22 = vpop.f32.mrb[7].mxu0 }
 0x136   : > { %v6706_v23 = vpack.c.bf16 %v860_v22, %v854_v20 }
 0x138   : > { %v8098_v24 = vpop.f32.mrb[8].mxu0 }
 0x139   : > { %v866_v25 = vpop.f32.mrb[9].mxu0 }
 0x13c   : > { %v8100_v26 = vpop.f32.mrb[10].mxu0 }
 0x13d   : > { %v872_v27 = vpop.f32.mrb[11].mxu0 }
 0x13e   : > { %v6710_v28 = vpack.c.bf16 %v872_v27, %v866_v25 }
 0x140   : > { %v8102_v29 = vpop.f32.mrb[12].mxu0 }
 0x141   : > { %v878_v30 = vpop.f32.mrb[13].mxu0 }
 0x144   : > { %v8104_v31 = vpop.f32.mrb[14].mxu0 }
 0x145   : > { %v884_v32 = vpop.f32.mrb[15].mxu0 }
 0x146   : > { %v6714_v33 = vpack.c.bf16 %v884_v32, %v878_v30 }
 0x148   : > { %v8106_v34 = vpop.f32.mrb[16].mxu0 }
 0x149   : > { %v890_v35 = vpop.f32.mrb[17].mxu0 }
 0x14c   : > { %v8108_v36 = vpop.f32.mrb[18].mxu0 }
 0x14d   : > { %v896_v37 = vpop.f32.mrb[19].mxu0 }
 0x14e   : > { %v6718_v38 = vpack.c.bf16 %v896_v37, %v890_v35 }
 0x150   : > { %v8110_v40 = vpop.f32.mrb[20].mxu0 }
 0x151   : > { %v902_v41 = vpop.f32.mrb[21].mxu0 }
 0x154   : > { %v8112_v42 = vpop.f32.mrb[22].mxu0 }
 0x155   : > { %v908_v43 = vpop.f32.mrb[23].mxu0 }
 0x156   : > { %v8114_v44 = vpack.c.bf16 %v908_v43, %v902_v41 }
 0x158   : > { %v8116_v45 = vpop.f32.mrb[24].mxu0 }
 0x159   : > { %v914_v46 = vpop.f32.mrb[25].mxu0 }
 0x15c   : > { %v8118_v47 = vpop.f32.mrb[26].mxu0 }
 0x15d   : > { %v920_v48 = vpop.f32.mrb[27].mxu0 }
 0x15e   : > { %v8120_v49 = vpack.c.bf16 %v920_v48, %v914_v46 }
 0x160   : > { %v8122_v50 = vpop.f32.mrb[28].mxu0 }
 0x161   : > { %v926_v51 = vpop.f32.mrb[29].mxu0 }
 0x164   : > { %v8124_v52 = vpop.f32.mrb[30].mxu0 }
 0x165   : > { %v932_v53 = vpop.f32.mrb[31].mxu0 }
 0x166   : > { %v8126_v54 = vpack.c.bf16 %v932_v53, %v926_v51  ;;  %v1258_v51 = vmul.f32 0.5, %v8094_v19  ;;  %v1259_v53 = vmul.f32 0.5, %v8096_v21 }
 0x168   : > { %v8128_v55 = vpop.f32.mrb[32].mxu0  ;;  %v8181_v21 = vmul.f32 %v8077_v11, %v1259_v53 }
 0x169   : > { %v938_v56 = vpop.f32.mrb[33].mxu0 }
 0x16c   : > { %v8130_v57 = vpop.f32.mrb[34].mxu0 }
 0x16d   : > { %v944_v58 = vpop.f32.mrb[35].mxu0 }
 0x16e   : > { %v6700_v59 = vpack.c.bf16 %v944_v58, %v938_v56  ;;  %v1260_v56 = vmul.f32 0.5, %v8098_v24  ;;  %v6350_v58 = vpop.f32.mrb[0].mxu1 }
 0x16f   : > { %v8177_v19 = vmul.f32 %v6350_v58, %v8082_v12 }
 0x170   : > { %6701 = vmatprep.subr.bf16.mxu1 %v6700_v59  ;;  %6733 = vmatprep.subr.bf16.mxu0 %v6700_v59  ;;  %v8132_v60 = vpop.f32.mrb[36].mxu0 }
 0x171   : > { %6703 = vmatpush3.bf16.xpose.msra.mxu1 %v6702_v18  ;;  %6735 = vmatpush3.bf16.xpose.msra.mxu0 %v6702_v18  ;;  %v950_v61 = vpop.f32.mrb[37].mxu0 }
 0x174   : > { %v8134_v62 = vpop.f32.mrb[38].mxu0 }
 0x175   : > { %v956_v63 = vpop.f32.mrb[39].mxu0 }
 0x176   : > { %v6704_v0 = vpack.c.bf16 %v956_v63, %v950_v61  ;;  %v1297_v61 = vmul.f32 %v8077_v11, %v1258_v51  ;;  %v1097_v63 = vpop.f32.mrb[1].mxu1 }
 0x177   : > { %v8184_v24 = vmul.f32 %v8077_v11, %v1097_v63 }
 0x178   : > { %6705 = vmatprep.subr.bf16.mxu1 %v6704_v0  ;;  %6737 = vmatprep.subr.bf16.mxu0 %v6704_v0  ;;  %v8136_v1 = vpop.f32.mrb[40].mxu0  ;;  %v8187_v0 = vmul.f32 %v8082_v12, %v1097_v63 }
 0x179   : > { %6707 = vmatpush3.bf16.xpose.msra.mxu1 %v6706_v23  ;;  %6739 = vmatpush3.bf16.xpose.msra.mxu0 %v6706_v23  ;;  %v962_v2 = vpop.f32.mrb[41].mxu0  ;;  %11594 = vst [vmem:[#allocation9_spill] sm:$0xff] %v8184_v24 }
 0x17c   : > { %v8138_v3 = vpop.f32.mrb[42].mxu0 }
 0x17d   : > { %v968_v4 = vpop.f32.mrb[43].mxu0 }
 0x17e   : > { %v6708_v5 = vpack.c.bf16 %v968_v4, %v962_v2  ;;  %v6353_v2 = vpop.f32.mrb[2].mxu1  ;;  %v8190_v4 = vmul.f32 %v8082_v12, %v1259_v53 }
 0x180   : > { %6709 = vmatprep.subr.bf16.mxu1 %v6708_v5  ;;  %6741 = vmatprep.subr.bf16.mxu0 %v6708_v5  ;;  %v8140_v6 = vpop.f32.mrb[44].mxu0  ;;  %v8193_v5 = vmul.f32 %v8077_v11, %v1260_v56 }
 0x181   : > { %6711 = vmatpush3.bf16.xpose.msra.mxu1 %v6710_v28  ;;  %6743 = vmatpush3.bf16.xpose.msra.mxu0 %v6710_v28  ;;  %v974_v7 = vpop.f32.mrb[45].mxu0 }
 0x184   : > { %v8142_v8 = vpop.f32.mrb[46].mxu0 }
 0x185   : > { %v980_v9 = vpop.f32.mrb[47].mxu0 }
 0x186   : > { %v6712_v10 = vpack.c.bf16 %v980_v9, %v974_v7  ;;  %v8196_v7 = vmul.f32 %v6353_v2, %v8077_v11  ;;  %v8199_v9 = vmul.f32 %v6353_v2, %v8082_v12 }
 0x188   : > { %6713 = vmatprep.subr.bf16.mxu1 %v6712_v10  ;;  %6745 = vmatprep.subr.bf16.mxu0 %v6712_v10  ;;  %v8144_v13 = vpop.f32.mrb[48].mxu0  ;;  %11595 = vst [vmem:[#allocation10_spill] sm:$0xff] %v8196_v7  ;;  %v1107_v10 = vpop.f32.mrb[3].mxu1 }
 0x189   : > { %6715 = vmatpush3.bf16.xpose.msra.mxu1 %v6714_v33  ;;  %6747 = vmatpush3.bf16.xpose.msra.mxu0 %v6714_v33  ;;  %v986_v14 = vpop.f32.mrb[49].mxu0 }
 0x18c   : > { %v8146_v17 = vpop.f32.mrb[50].mxu0 }
 0x18d   : > { %v992_v18 = vpop.f32.mrb[51].mxu0 }
 0x18e   : > { %v6716_v20 = vpack.c.bf16 %v992_v18, %v986_v14  ;;  %v1262_v18 = vmul.f32 0.5, %v8102_v29 }
 0x190   : > { %6717 = vmatprep.subr.bf16.mxu1 %v6716_v20  ;;  %6749 = vmatprep.subr.bf16.mxu0 %v6716_v20  ;;  %v8148_v22 = vpop.f32.mrb[52].mxu0  ;;  %v8208_v20 = vmul.f32 %v8077_v11, %v1107_v10 }
 0x191   : > { %6719 = vmatpush3.bf16.xpose.msra.mxu1 %v6718_v38  ;;  %6751 = vmatpush3.bf16.xpose.msra.mxu0 %v6718_v38  ;;  %v998_v23 = vpop.f32.mrb[53].mxu0 }
 0x192   : > { %11596 = vst [vmem:[#allocation11_spill] sm:$0xff] %v8208_v20  ;;  %v2206_v20 = vmul.f32 %v8082_v12, %v1262_v18 }
 0x194   : > { %v8150_v25 = vpop.f32.mrb[54].mxu0 }
 0x195   : > { %v1004_v27 = vpop.f32.mrb[55].mxu0 }
 0x196   : > { %v6720_v28 = vpack.c.bf16 %v1004_v27, %v998_v23  ;;  %v6356_v23 = vpop.f32.mrb[4].mxu1  ;;  %v8211_v27 = vmul.f32 %v8082_v12, %v1107_v10 }
 0x198   : > { %6721 = vmatprep.subr.bf16.mxu1 %v6720_v28  ;;  %6753 = vmatprep.subr.bf16.mxu0 %v6720_v28  ;;  %v8152_v30 = vpop.f32.mrb[56].mxu0  ;;  %v8214_v28 = vmul.f32 %v6356_v23, %v8077_v11 }
 0x199   : > { %6723 = vmatpush3.bf16.xpose.msra.mxu1 %v8114_v44  ;;  %6755 = vmatpush3.bf16.xpose.msra.mxu0 %v8114_v44  ;;  %v1010_v32 = vpop.f32.mrb[57].mxu0  ;;  %v1257_v44 = vmul.f32 0.5, %v8090_v39  ;;  %v8174_v39 = vmul.f32 %v6350_v58, %v8077_v11 }
 0x19a   : > { %11597 = vst [vmem:[#allocation12_spill] sm:$0xff] %v8214_v28 }
 0x19b   : > { %v2201_v59 = vmul.f32 %v8082_v12, %v1257_v44  ;;  %11593 = vst [vmem:[#allocation8_spill] sm:$0xff] %v8174_v39 }
 0x19c   : > { %v8156_v33 = vpop.f32.mrb[58].mxu0 }
 0x19d   : > { %v1016_v35 = vpop.f32.mrb[59].mxu0 }
 0x19e   : > { %v6724_v37 = vpack.c.bf16 %v1016_v35, %v1010_v32  ;;  %v1261_v32 = vmul.f32 0.5, %v8100_v26 }
 0x1a0   : > { %6725 = vmatprep.subr.bf16.mxu1 %v6724_v37  ;;  %6757 = vmatprep.subr.bf16.mxu0 %v6724_v37  ;;  %v8158_v38 = vpop.f32.mrb[60].mxu0 }
 0x1a1   : > { %6727 = vmatpush3.bf16.xpose.msra.mxu1 %v8120_v49  ;;  %6759 = vmatpush3.bf16.xpose.msra.mxu0 %v8120_v49  ;;  %v1022_v41 = vpop.f32.mrb[61].mxu0  ;;  %v1296_v49 = vmul.f32 %v8077_v11, %v1257_v44 }
 0x1a4   : > { %v8162_v43 = vpop.f32.mrb[62].mxu0 }
 0x1a5   : > { %v1028_v46 = vpop.f32.mrb[63].mxu0 }
 0x1a6   : > { %v6728_v48 = vpack.c.bf16 %v1028_v46, %v1022_v41 }
 0x1a8   : > { %6729 = vmatprep.subr.bf16.mxu1 %v6728_v48  ;;  %6761 = vmatprep.subr.bf16.mxu0 %v6728_v48  ;;  %v8229_v48 = vmul.f32 %v8082_v12, %v1260_v56 }
 0x1a9   : > { %6731 = vmatpush3.bf16.xpose.msra.mxu1 %v8126_v54  ;;  %6763 = vmatpush3.bf16.xpose.msra.mxu0 %v8126_v54  ;;  %v2202_v54 = vmul.f32 %v8082_v12, %v1258_v51 }
 0x1b0   : > { %6013 = vmatmul.mubr.f32.vlgmr.msra.gmra.mrb[32].mxu1 %v8085_v15  ;;  %6109 = vmatmul.mubr.f32.vlgmr.msra.gmra.mrb[64].mxu0 %v8088_v16  ;;  %v8217_v15 = vmul.f32 %v6356_v23, %v8082_v12  ;;  %v1117_v16 = vpop.f32.mrb[5].mxu1 }
 0x1b1   : > { %6014 = vmatprep.mubr.f32.mxu1 %v1296_v49  ;;  %6110 = vmatprep.mubr.f32.mxu0 %v2201_v59  ;;  %v8223_v37 = vmul.f32 %v8077_v11, %v1117_v16  ;;  %v8226_v41 = vmul.f32 %v8082_v12, %v1117_v16  ;;  %v6359_v46 = vpop.f32.mrb[6].mxu1  ;;  %v8256_v16 = vmul.f32 %v8077_v11, %v1261_v32 }
 0x1b2   : > { %v8234_v51 = vmul.f32 %v6359_v46, %v8077_v11  ;;  %v8237_v26 = vmul.f32 %v6359_v46, %v8082_v12  ;;  %v1127_v53 = vpop.f32.mrb[7].mxu1 }
 0x1b3   : > { %11598 = vst [vmem:[#allocation13_spill] sm:$0xff] %v8223_v37  ;;  %v8244_v56 = vmul.f32 %v8077_v11, %v1127_v53  ;;  %v6362_v2 = vpop.f32.mrb[8].mxu1  ;;  %v8247_v10 = vmul.f32 %v8082_v12, %v1127_v53 }
 0x1b4   : > { %11599 = vst [vmem:[#allocation14_spill] sm:$0xff] %v8234_v51  ;;  %6015 = vmatmul.mubr.f32.gmra.mrb[34].mxu1 %v1296_v49  ;;  %6111 = vmatmul.mubr.f32.gmra.mrb[66].mxu0 %v2201_v59  ;;  %v8250_v23 = vmul.f32 %v6362_v2, %v8077_v11  ;;  %v8253_v49 = vmul.f32 %v6362_v2, %v8082_v12  ;;  %v1137_v59 = vpop.f32.mrb[9].mxu1 }
 0x1b5   : > { %11600 = vst [vmem:[#allocation15_spill] sm:$0xff] %v8244_v56  ;;  %6016 = vmatprep.mubr.f32.mxu1 %v1297_v61  ;;  %6112 = vmatprep.mubr.f32.mxu0 %v2202_v54  ;;  %v8261_v63 = vmul.f32 %v8077_v11, %v1137_v59  ;;  %v8264_v35 = vmul.f32 %v8082_v12, %v1137_v59  ;;  %v6365_v53 = vpop.f32.mrb[10].mxu1 }
 0x1b6   : > { %11601 = vst [vmem:[#allocation16_spill] sm:$0xff] %v8250_v23  ;;  %v8270_v58 = vmul.f32 %v6365_v53, %v8077_v11  ;;  %v8273_v44 = vmul.f32 %v6365_v53, %v8082_v12  ;;  %v1147_v14 = vpop.f32.mrb[11].mxu1  ;;  %v2205_v59 = vmul.f32 %v8082_v12, %v1261_v32  ;;  %v8303_v51 = vmul.f32 %v8077_v11, %v1262_v18 }
 0x1b7   : > { %11602 = vst [vmem:[#allocation17_spill] sm:$0xff] %v8261_v63  ;;  %v8280_v29 = vmul.f32 %v8077_v11, %v1147_v14  ;;  %v6368_v56 = vpop.f32.mrb[12].mxu1  ;;  %v8285_v53 = vmul.f32 %v8082_v12, %v1147_v14  ;;  %v1266_v18 = vmul.f32 0.5, %v8110_v40 }
 0x1b8   : > { %11603 = vst [vmem:[#allocation18_spill] sm:$0xff] %v8270_v58  ;;  %6017 = vmatmul.mubr.f32.gmra.mrb[36].mxu1 %v1297_v61  ;;  %6113 = vmatmul.mubr.f32.gmra.mrb[68].mxu0 %v2202_v54  ;;  %v8288_v61 = vmul.f32 %v6368_v56, %v8077_v11  ;;  %v8291_v54 = vmul.f32 %v6368_v56, %v8082_v12  ;;  %v1157_v46 = vpop.f32.mrb[13].mxu1 }
 0x1b9   : > { %11604 = vst [vmem:[#allocation19_spill] sm:$0xff] %v8280_v29  ;;  %6018 = vmatprep.mubr.f32.mxu1 %v8181_v21  ;;  %6114 = vmatprep.mubr.f32.mxu0 %v8190_v4  ;;  %v8297_v63 = vmul.f32 %v8077_v11, %v1157_v46  ;;  %v8300_v23 = vmul.f32 %v8082_v12, %v1157_v46  ;;  %v6371_v14 = vpop.f32.mrb[14].mxu1  ;;  %v1263_v29 = vmul.f32 0.5, %v8104_v31 }
 0x1ba   : > { %11605 = vst [vmem:[#allocation20_spill] sm:$0xff] %v8288_v61  ;;  %v8308_v37 = vmul.f32 %v6371_v14, %v8077_v11  ;;  %v8311_v32 = vmul.f32 %v6371_v14, %v8082_v12  ;;  %v1167_v2 = vpop.f32.mrb[15].mxu1 }
 0x1bb   : > { %11606 = vst [vmem:[#allocation21_spill] sm:$0xff] %v8297_v63  ;;  %v8320_v58 = vmul.f32 %v8077_v11, %v1167_v2  ;;  %v6374_v56 = vpop.f32.mrb[16].mxu1  ;;  %v8325_v14 = vmul.f32 %v8082_v12, %v1167_v2 }
 0x1bc   : > { %11607 = vst [vmem:[#allocation22_spill] sm:$0xff] %v8308_v37  ;;  %6019 = vmatmul.mubr.f32.gmra.mrb[38].mxu1 %v8181_v21  ;;  %6115 = vmatmul.mubr.f32.gmra.mrb[70].mxu0 %v8190_v4  ;;  %v8328_v21 = vmul.f32 %v6374_v56, %v8077_v11  ;;  %v8331_v4 = vmul.f32 %v6374_v56, %v8082_v12  ;;  %v1177_v46 = vpop.f32.mrb[17].mxu1  ;;  %v1264_v37 = vmul.f32 0.5, %v8106_v34 }
 0x1bd   : > { %11608 = vst [vmem:[#allocation23_spill] sm:$0xff] %v8320_v58  ;;  %6020 = vmatprep.mubr.f32.mxu1 %v8193_v5  ;;  %6116 = vmatprep.mubr.f32.mxu0 %v8229_v48  ;;  %v8337_v61 = vmul.f32 %v8077_v11, %v1177_v46  ;;  %v8340_v28 = vmul.f32 %v8082_v12, %v1177_v46  ;;  %v6377_v2 = vpop.f32.mrb[18].mxu1 }
 0x1be   : > { %11609 = vst [vmem:[#allocation24_spill] sm:$0xff] %v8328_v21  ;;  %11610 = vst [vmem:[#allocation25_spill] sm:$0xff] %v8331_v4  ;;  %v8346_v56 = vmul.f32 %v6377_v2, %v8077_v11  ;;  %v8349_v31 = vmul.f32 %v6377_v2, %v8082_v12  ;;  %v1187_v24 = vpop.f32.mrb[19].mxu1  ;;  %v1302_v58 = vmul.f32 %v8077_v11, %v1263_v29 }
 0x1bf   : > { %11611 = vst [vmem:[#allocation26_spill] sm:$0xff] %v8337_v61  ;;  %11612 = vst [vmem:[#allocation27_spill] sm:$0xff] %v8340_v28  ;;  %v8358_v63 = vmul.f32 %v8077_v11, %v1187_v24  ;;  %v6380_v7 = vpop.f32.mrb[20].mxu1  ;;  %v8362_v2 = vmul.f32 %v8082_v12, %v1187_v24 }
 0x1c0   : > { %11613 = vst [vmem:[#allocation28_spill] sm:$0xff] %v8346_v56  ;;  %6021 = vmatmul.mubr.f32.gmra.mrb[40].mxu1 %v8193_v5  ;;  %6117 = vmatmul.mubr.f32.gmra.mrb[72].mxu0 %v8229_v48  ;;  %v8365_v5 = vmul.f32 %v6380_v7, %v8077_v11  ;;  %v8368_v48 = vmul.f32 %v6380_v7, %v8082_v12  ;;  %v1197_v46 = vpop.f32.mrb[21].mxu1 }
 0x1c1   : > { %11614 = vst [vmem:[#allocation29_spill] sm:$0xff] %v8358_v63  ;;  %6022 = vmatprep.mubr.f32.mxu1 %v8256_v16  ;;  %6118 = vmatprep.mubr.f32.mxu0 %v2205_v59  ;;  %v8374_v61 = vmul.f32 %v8077_v11, %v1197_v46  ;;  %v8377_v21 = vmul.f32 %v8082_v12, %v1197_v46  ;;  %v6383_v24 = vpop.f32.mrb[22].mxu1 }
 0x1c2   : > { %11615 = vst [vmem:[#allocation30_spill] sm:$0xff] %v8365_v5  ;;  %11616 = vst [vmem:[#allocation31_spill] sm:$0xff] %v8368_v48  ;;  %v8383_v7 = vmul.f32 %v6383_v24, %v8077_v11  ;;  %v8386_v28 = vmul.f32 %v6383_v24, %v8082_v12  ;;  %v1207_v4 = vpop.f32.mrb[23].mxu1  ;;  %v2207_v46 = vmul.f32 %v8082_v12, %v1263_v29 }
 0x1c3   : > { %11617 = vst [vmem:[#allocation32_spill] sm:$0xff] %v8374_v61  ;;  %11618 = vst [vmem:[#allocation33_spill] sm:$0xff] %v8377_v21  ;;  %v8394_v34 = vmul.f32 %v8077_v11, %v1207_v4  ;;  %v6386_v39 = vpop.f32.mrb[24].mxu1  ;;  %v8398_v24 = vmul.f32 %v8082_v12, %v1207_v4  ;;  %v1303_v56 = vmul.f32 %v8077_v11, %v1264_v37 }
 0x1c4   : > { %11619 = vst [vmem:[#allocation34_spill] sm:$0xff] %v8383_v7  ;;  %6023 = vmatmul.mubr.f32.gmra.mrb[42].mxu1 %v8256_v16  ;;  %6119 = vmatmul.mubr.f32.gmra.mrb[74].mxu0 %v2205_v59  ;;  %v8401_v63 = vmul.f32 %v6386_v39, %v8077_v11  ;;  %v8404_v16 = vmul.f32 %v6386_v39, %v8082_v12  ;;  %v1217_v59 = vpop.f32.mrb[25].mxu1 }
 0x1c5   : > { %11620 = vst [vmem:[#allocation35_spill] sm:$0xff] %v8394_v34  ;;  %6024 = vmatprep.mubr.f32.mxu1 %v8303_v51  ;;  %6120 = vmatprep.mubr.f32.mxu0 %v2206_v20  ;;  %11621 = vst [vmem:[#allocation36_spill] sm:$0xff] %v8398_v24  ;;  %v8410_v61 = vmul.f32 %v8077_v11, %v1217_v59  ;;  %v8413_v5 = vmul.f32 %v8082_v12, %v1217_v59  ;;  %v6389_v4 = vpop.f32.mrb[26].mxu1 }
 0x1c6   : > { %11622 = vst [vmem:[#allocation37_spill] sm:$0xff] %v8401_v63  ;;  %11623 = vst [vmem:[#allocation38_spill] sm:$0xff] %v8404_v16  ;;  %v8419_v39 = vmul.f32 %v6389_v4, %v8077_v11  ;;  %v8422_v29 = vmul.f32 %v6389_v4, %v8082_v12  ;;  %v1227_v48 = vpop.f32.mrb[27].mxu1  ;;  %v2208_v59 = vmul.f32 %v8082_v12, %v1264_v37 }
 0x1c7   : > { %11624 = vst [vmem:[#allocation39_spill] sm:$0xff] %v8410_v61  ;;  %11625 = vst [vmem:[#allocation40_spill] sm:$0xff] %v8413_v5  ;;  %v8430_v34 = vmul.f32 %v8077_v11, %v1227_v48  ;;  %v6392_v21 = vpop.f32.mrb[28].mxu1  ;;  %v8433_v7 = vmul.f32 %v8082_v12, %v1227_v48  ;;  %v1265_v5 = vmul.f32 0.5, %v8108_v36 }
 0x1c8   : > { %11626 = vst [vmem:[#allocation41_spill] sm:$0xff] %v8419_v39  ;;  %6025 = vmatmul.mubr.f32.gmra.mrb[44].mxu1 %v8303_v51  ;;  %6121 = vmatmul.mubr.f32.gmra.mrb[76].mxu0 %v2206_v20  ;;  %v8436_v4 = vmul.f32 %v6392_v21, %v8077_v11  ;;  %v8439_v20 = vmul.f32 %v6392_v21, %v8082_v12  ;;  %v1237_v51 = vpop.f32.mrb[29].mxu1 }
 0x1c9   : > { %11627 = vst [vmem:[#allocation42_spill] sm:$0xff] %v8430_v34  ;;  %6026 = vmatprep.mubr.f32.mxu1 %v1302_v58  ;;  %6122 = vmatprep.mubr.f32.mxu0 %v2207_v46  ;;  %v8445_v61 = vmul.f32 %v8077_v11, %v1237_v51  ;;  %v8448_v63 = vmul.f32 %v8082_v12, %v1237_v51  ;;  %v6395_v48 = vpop.f32.mrb[30].mxu1 }
 0x1ca   : > { %11628 = vst [vmem:[#allocation43_spill] sm:$0xff] %v8436_v4  ;;  %v8454_v21 = vmul.f32 %v6395_v48, %v8077_v11  ;;  %v8457_v37 = vmul.f32 %v6395_v48, %v8082_v12  ;;  %v1247_v24 = vpop.f32.mrb[31].mxu1  ;;  %v1267_v4 = vmul.f32 0.5, %v8112_v42  ;;  %v1268_v48 = vmul.f32 0.5, %v8116_v45 }
 0x1cb   : > { %11629 = vst [vmem:[#allocation44_spill] sm:$0xff] %v8445_v61  ;;  %v8464_v36 = vmul.f32 %v8077_v11, %v1247_v24  ;;  %v8467_v16 = vmul.f32 %v8082_v12, %v1247_v24  ;;  %v1305_v61 = vmul.f32 %v8077_v11, %v1266_v18  ;;  %v2210_v24 = vmul.f32 %v8082_v12, %v1266_v18 }
 0x1cc   : > { %11630 = vst [vmem:[#allocation45_spill] sm:$0xff] %v8454_v21  ;;  %6027 = vmatmul.mubr.f32.gmra.mrb[46].mxu1 %v1302_v58  ;;  %6123 = vmatmul.mubr.f32.gmra.mrb[78].mxu0 %v2207_v46  ;;  %v1304_v58 = vmul.f32 %v8077_v11, %v1265_v5  ;;  %v2209_v46 = vmul.f32 %v8082_v12, %v1265_v5  ;;  %v1269_v42 = vmul.f32 0.5, %v8118_v47  ;;  %v1270_v45 = vmul.f32 0.5, %v8122_v50 }
 0x1cd   : > { %11631 = vst [vmem:[#allocation46_spill] sm:$0xff] %v8464_v36  ;;  %6028 = vmatprep.mubr.f32.mxu1 %v1303_v56  ;;  %6124 = vmatprep.mubr.f32.mxu0 %v2208_v59  ;;  %v6810_v51 = vpack.c.bf16 %v8457_v37, %v8467_v16  ;;  %v1306_v5 = vmul.f32 %v8077_v11, %v1267_v4  ;;  %v1271_v47 = vmul.f32 0.5, %v8124_v52  ;;  %v1272_v50 = vmul.f32 0.5, %v8128_v55 }
 0x1ce   : > { %v2211_v40 = vmul.f32 %v8082_v12, %v1267_v4  ;;  %v2212_v18 = vmul.f32 %v8082_v12, %v1268_v48  ;;  %v2213_v4 = vmul.f32 %v8082_v12, %v1269_v42  ;;  %v1273_v52 = vmul.f32 0.5, %v8130_v57 }
 0x1cf   : > { %v1274_v55 = vmul.f32 0.5, %v8132_v60  ;;  %v1275_v57 = vmul.f32 0.5, %v8134_v62  ;;  %v1276_v60 = vmul.f32 0.5, %v8136_v1  ;;  %v1277_v62 = vmul.f32 0.5, %v8138_v3 }
 0x1d0   : > { %6029 = vmatmul.mubr.f32.gmra.mrb[48].mxu1 %v1303_v56  ;;  %6125 = vmatmul.mubr.f32.gmra.mrb[80].mxu0 %v2208_v59  ;;  %v1307_v56 = vmul.f32 %v8077_v11, %v1268_v48  ;;  %v1308_v59 = vmul.f32 %v8077_v11, %v1269_v42  ;;  %v2214_v48 = vmul.f32 %v8082_v12, %v1270_v45  ;;  %v1278_v1 = vmul.f32 0.5, %v8140_v6 }
 0x1d1   : > { %6030 = vmatprep.mubr.f32.mxu1 %v1304_v58  ;;  %6126 = vmatprep.mubr.f32.mxu0 %v2209_v46  ;;  %v2218_v42 = vmul.f32 %v8082_v12, %v1274_v55  ;;  %v1279_v3 = vmul.f32 0.5, %v8142_v8  ;;  %v1280_v6 = vmul.f32 0.5, %v8144_v13  ;;  %v1281_v8 = vmul.f32 0.5, %v8146_v17 }
 0x1d2   : > { %v1282_v13 = vmul.f32 0.5, %v8148_v22  ;;  %v1283_v17 = vmul.f32 0.5, %v8150_v25  ;;  %v1284_v22 = vmul.f32 0.5, %v8152_v30  ;;  %v1285_v25 = vmul.f32 0.5, %v8156_v33 }
 0x1d3   : > { %v1286_v30 = vmul.f32 0.5, %v8158_v38  ;;  %v1287_v33 = vmul.f32 0.5, %v8162_v43  ;;  %v11332_v38 = vmov 0.0|0.0   ;;  %v11632_v43 = vpack.c.bf16 %v8177_v19, %v8187_v0 }
 0x1d4   : > { %6031 = vmatmul.mubr.f32.gmra.mrb[50].mxu1 %v1304_v58  ;;  %6127 = vmatmul.mubr.f32.gmra.mrb[82].mxu0 %v2209_v46  ;;  %v1310_v58 = vmul.f32 %v8077_v11, %v1271_v47  ;;  %v2215_v46 = vmul.f32 %v8082_v12, %v1271_v47  ;;  %v2221_v47 = vmul.f32 %v8082_v12, %v1277_v62 }
 0x1d5   : > { %6032 = vmatprep.mubr.f32.mxu1 %v1305_v61  ;;  %6128 = vmatprep.mubr.f32.mxu0 %v2210_v24  ;;  %v11636_v19 = vpack.c.bf16 %v8253_v49, %v8264_v35  ;;  %v11637_v0 = vpack.c.bf16 %v8273_v44, %v8285_v53  ;;  %v11641_v35 = vld [vmem:[#allocation27_spill] sm:$0xff]  ;;  %v11643_v44 = vpack.c.bf16 %v8349_v31, %v8362_v2  ;;  %v11647_v49 = vld [vmem:[#allocation36_spill] sm:$0xff] }
 0x1d6   : > { %6764 = vmatprep.subr.bf16.mxu1 %v11332_v38  ;;  %v11648_v53 = vpack.c.bf16 %v8386_v28, %v11647_v49  ;;  %v11652_v31 = vpack.c.bf16 %v8422_v29, %v8433_v7  ;;  %v11653_v2 = vpack.c.bf16 %v8439_v20, %v8448_v63 }
 0x1d7   : > { %6766 = vmatpush1.bf16.msra.mxu1 %v11632_v43 }
 0x1d8   : > { %6033 = vmatmul.mubr.f32.gmra.mrb[52].mxu1 %v1305_v61  ;;  %6129 = vmatmul.mubr.f32.gmra.mrb[84].mxu0 %v2210_v24  ;;  %v1309_v61 = vmul.f32 %v8077_v11, %v1270_v45  ;;  %v1311_v24 = vmul.f32 %v8077_v11, %v1272_v50  ;;  %v1315_v45 = vmul.f32 %v8077_v11, %v1276_v60 }
 0x1d9   : > { %6034 = vmatprep.mubr.f32.mxu1 %v1306_v5  ;;  %6130 = vmatprep.mubr.f32.mxu0 %v2211_v40 }
 0x1da   : > { %6767 = vmatprep.subr.bf16.mxu1 %v11332_v38 }
 0x1dc   : > { %6035 = vmatmul.mubr.f32.gmra.mrb[54].mxu1 %v1306_v5  ;;  %6131 = vmatmul.mubr.f32.gmra.mrb[86].mxu0 %v2211_v40  ;;  %v2216_v5 = vmul.f32 %v8082_v12, %v1272_v50  ;;  %v1312_v40 = vmul.f32 %v8077_v11, %v1273_v52  ;;  %v1318_v50 = vmul.f32 %v8077_v11, %v1279_v3 }
 0x1dd   : > { %6036 = vmatprep.mubr.f32.mxu1 %v1307_v56  ;;  %6132 = vmatprep.mubr.f32.mxu0 %v2212_v18 }
 0x1e0   : > { %6037 = vmatmul.mubr.f32.gmra.mrb[56].mxu1 %v1307_v56  ;;  %6133 = vmatmul.mubr.f32.gmra.mrb[88].mxu0 %v2212_v18  ;;  %v2217_v56 = vmul.f32 %v8082_v12, %v1273_v52  ;;  %v1313_v18 = vmul.f32 %v8077_v11, %v1274_v55  ;;  %v2224_v52 = vmul.f32 %v8082_v12, %v1280_v6 }
 0x1e1   : > { %6038 = vmatprep.mubr.f32.mxu1 %v1308_v59  ;;  %6134 = vmatprep.mubr.f32.mxu0 %v2213_v4  ;;  %v1321_v55 = vmul.f32 %v8077_v11, %v1282_v13 }
 0x1e4   : > { %6039 = vmatmul.mubr.f32.gmra.mrb[58].mxu1 %v1308_v59  ;;  %6135 = vmatmul.mubr.f32.gmra.mrb[90].mxu0 %v2213_v4  ;;  %v1314_v59 = vmul.f32 %v8077_v11, %v1275_v57  ;;  %v2219_v4 = vmul.f32 %v8082_v12, %v1275_v57  ;;  %v2227_v57 = vmul.f32 %v8082_v12, %v1283_v17 }
 0x1e5   : > { %6040 = vmatprep.mubr.f32.mxu1 %v1309_v61  ;;  %6136 = vmatprep.mubr.f32.mxu0 %v2214_v48 }
 0x1e8   : > { %6041 = vmatmul.mubr.f32.gmra.mrb[60].mxu1 %v1309_v61  ;;  %6137 = vmatmul.mubr.f32.gmra.mrb[92].mxu0 %v2214_v48  ;;  %v2220_v61 = vmul.f32 %v8082_v12, %v1276_v60  ;;  %v1316_v48 = vmul.f32 %v8077_v11, %v1277_v62  ;;  %v1324_v60 = vmul.f32 %v8077_v11, %v1285_v25 }
 0x1e9   : > { %6042 = vmatprep.mubr.f32.mxu1 %v1310_v58  ;;  %6138 = vmatprep.mubr.f32.mxu0 %v2215_v46  ;;  %v2230_v62 = vmul.f32 %v8082_v12, %v1286_v30 }
 0x1ec   : > { %6043 = vmatmul.mubr.f32.gmra.mrb[62].mxu1 %v1310_v58  ;;  %6139 = vmatmul.mubr.f32.gmra.mrb[94].mxu0 %v2215_v46  ;;  %v1317_v58 = vmul.f32 %v8077_v11, %v1278_v1  ;;  %v2222_v46 = vmul.f32 %v8082_v12, %v1278_v1  ;;  %v11635_v1 = vpack.c.bf16 %v8237_v26, %v8247_v10  ;;  %v11644_v26 = vld [vmem:[#allocation31_spill] sm:$0xff]  ;;  %v11645_v10 = vld [vmem:[#allocation33_spill] sm:$0xff] }
 0x1ed   : > { %6044 = vmatprep.mubr.f32.mxu1 %v1311_v24  ;;  %6140 = vmatprep.mubr.f32.mxu0 %v2216_v5 }
 0x1f0   : > { %6045 = vmatmul.mubr.f32.gmra.mrb[64].mxu1 %v1311_v24  ;;  %6141 = vmatmul.mubr.f32.gmra.mrb[96].mxu0 %v2216_v5  ;;  %v2223_v24 = vmul.f32 %v8082_v12, %v1279_v3  ;;  %v1319_v5 = vmul.f32 %v8077_v11, %v1280_v6 }
 0x1f1   : > { %6046 = vmatprep.mubr.f32.mxu1 %v1312_v40  ;;  %6142 = vmatprep.mubr.f32.mxu0 %v2217_v56 }
 0x1f4   : > { %6047 = vmatmul.mubr.f32.gmra.mrb[66].mxu1 %v1312_v40  ;;  %6143 = vmatmul.mubr.f32.gmra.mrb[98].mxu0 %v2217_v56  ;;  %v1320_v40 = vmul.f32 %v8077_v11, %v1281_v8  ;;  %v2225_v56 = vmul.f32 %v8082_v12, %v1281_v8 }
 0x1f5   : > { %6048 = vmatprep.mubr.f32.mxu1 %v1313_v18  ;;  %6144 = vmatprep.mubr.f32.mxu0 %v2218_v42 }
 0x1f8   : > { %6049 = vmatmul.mubr.f32.gmra.mrb[68].mxu1 %v1313_v18  ;;  %6145 = vmatmul.mubr.f32.gmra.mrb[100].mxu0 %v2218_v42  ;;  %v2226_v18 = vmul.f32 %v8082_v12, %v1282_v13  ;;  %v1322_v42 = vmul.f32 %v8077_v11, %v1283_v17 }
 0x1f9   : > { %6050 = vmatprep.mubr.f32.mxu1 %v1314_v59  ;;  %6146 = vmatprep.mubr.f32.mxu0 %v2219_v4 }
 0x1fc   : > { %6051 = vmatmul.mubr.f32.gmra.mrb[70].mxu1 %v1314_v59  ;;  %6147 = vmatmul.mubr.f32.gmra.mrb[102].mxu0 %v2219_v4  ;;  %v1323_v59 = vmul.f32 %v8077_v11, %v1284_v22  ;;  %v2228_v4 = vmul.f32 %v8082_v12, %v1284_v22 }
 0x1fd   : > { %6052 = vmatprep.mubr.f32.mxu1 %v1315_v45  ;;  %6148 = vmatprep.mubr.f32.mxu0 %v2220_v61 }
 0x200   : > { %6053 = vmatmul.mubr.f32.gmra.mrb[72].mxu1 %v1315_v45  ;;  %6149 = vmatmul.mubr.f32.gmra.mrb[104].mxu0 %v2220_v61  ;;  %v2229_v45 = vmul.f32 %v8082_v12, %v1285_v25  ;;  %v1325_v61 = vmul.f32 %v8077_v11, %v1286_v30 }
 0x201   : > { %6054 = vmatprep.mubr.f32.mxu1 %v1316_v48  ;;  %6150 = vmatprep.mubr.f32.mxu0 %v2221_v47 }
 0x204   : > { %6055 = vmatmul.mubr.f32.gmra.mrb[74].mxu1 %v1316_v48  ;;  %6151 = vmatmul.mubr.f32.gmra.mrb[106].mxu0 %v2221_v47  ;;  %v1326_v48 = vmul.f32 %v8077_v11, %v1287_v33  ;;  %v2231_v47 = vmul.f32 %v8082_v12, %v1287_v33  ;;  %v11633_v11 = vpack.c.bf16 %v8199_v9, %v8211_v27 }
 0x205   : > { %6056 = vmatprep.mubr.f32.mxu1 %v1317_v58  ;;  %6152 = vmatprep.mubr.f32.mxu0 %v2222_v46  ;;  %v11634_v12 = vpack.c.bf16 %v8217_v15, %v8226_v41  ;;  %v11638_v9 = vpack.c.bf16 %v8291_v54, %v8300_v23  ;;  %v11639_v27 = vpack.c.bf16 %v8311_v32, %v8325_v14  ;;  %v11640_v15 = vld [vmem:[#allocation25_spill] sm:$0xff]  ;;  %v11649_v54 = vld [vmem:[#allocation38_spill] sm:$0xff]  ;;  %v11650_v32 = vld [vmem:[#allocation40_spill] sm:$0xff] }
 0x206   : > { %6769 = vmatpush1.bf16.msra.mxu1 %v11633_v11  ;;  %v11642_v41 = vpack.c.bf16 %v11640_v15, %v11641_v35  ;;  %v11646_v23 = vpack.c.bf16 %v11644_v26, %v11645_v10  ;;  %v11651_v14 = vpack.c.bf16 %v11649_v54, %v11650_v32 }
 0x207   : > { %6770 = vmatprep.subr.bf16.mxu1 %v11332_v38 }
 0x208   : > { %6057 = vmatmul.mubr.f32.gmra.mrb[76].mxu1 %v1317_v58  ;;  %6153 = vmatmul.mubr.f32.gmra.mrb[108].mxu0 %v2222_v46 }
 0x209   : > { %6058 = vmatprep.mubr.f32.mxu1 %v1318_v50  ;;  %6154 = vmatprep.mubr.f32.mxu0 %v2223_v24 }
 0x20a   : > { %6772 = vmatpush1.bf16.msra.mxu1 %v11634_v12 }
 0x20b   : > { %6773 = vmatprep.subr.bf16.mxu1 %v11332_v38 }
 0x20c   : > { %6059 = vmatmul.mubr.f32.gmra.mrb[78].mxu1 %v1318_v50  ;;  %6155 = vmatmul.mubr.f32.gmra.mrb[110].mxu0 %v2223_v24 }
 0x20d   : > { %6060 = vmatprep.mubr.f32.mxu1 %v1319_v5  ;;  %6156 = vmatprep.mubr.f32.mxu0 %v2224_v52 }
 0x20e   : > { %6775 = vmatpush1.bf16.msra.mxu1 %v11635_v1 }
 0x20f   : > { %6776 = vmatprep.subr.bf16.mxu1 %v11332_v38 }
 0x210   : > { %6061 = vmatmul.mubr.f32.gmra.mrb[80].mxu1 %v1319_v5  ;;  %6157 = vmatmul.mubr.f32.gmra.mrb[112].mxu0 %v2224_v52 }
 0x211   : > { %6062 = vmatprep.mubr.f32.mxu1 %v1320_v40  ;;  %6158 = vmatprep.mubr.f32.mxu0 %v2225_v56 }
 0x212   : > { %6778 = vmatpush1.bf16.msra.mxu1 %v11636_v19 }
 0x213   : > { %6779 = vmatprep.subr.bf16.mxu1 %v11332_v38 }
 0x214   : > { %6063 = vmatmul.mubr.f32.gmra.mrb[82].mxu1 %v1320_v40  ;;  %6159 = vmatmul.mubr.f32.gmra.mrb[114].mxu0 %v2225_v56 }
 0x215   : > { %6064 = vmatprep.mubr.f32.mxu1 %v1321_v55  ;;  %6160 = vmatprep.mubr.f32.mxu0 %v2226_v18 }
 0x216   : > { %6781 = vmatpush1.bf16.msra.mxu1 %v11637_v0 }
 0x217   : > { %6782 = vmatprep.subr.bf16.mxu1 %v11332_v38 }
 0x218   : > { %6065 = vmatmul.mubr.f32.gmra.mrb[84].mxu1 %v1321_v55  ;;  %6161 = vmatmul.mubr.f32.gmra.mrb[116].mxu0 %v2226_v18 }
 0x219   : > { %6066 = vmatprep.mubr.f32.mxu1 %v1322_v42  ;;  %6162 = vmatprep.mubr.f32.mxu0 %v2227_v57 }
 0x21a   : > { %6784 = vmatpush1.bf16.msra.mxu1 %v11638_v9 }
 0x21b   : > { %6785 = vmatprep.subr.bf16.mxu1 %v11332_v38 }
 0x21c   : > { %6067 = vmatmul.mubr.f32.gmra.mrb[86].mxu1 %v1322_v42  ;;  %6163 = vmatmul.mubr.f32.gmra.mrb[118].mxu0 %v2227_v57 }
 0x21d   : > { %6068 = vmatprep.mubr.f32.mxu1 %v1323_v59  ;;  %6164 = vmatprep.mubr.f32.mxu0 %v2228_v4 }
 0x21e   : > { %6787 = vmatpush1.bf16.msra.mxu1 %v11639_v27 }
 0x21f   : > { %6788 = vmatprep.subr.bf16.mxu1 %v11332_v38 }
 0x220   : > { %6069 = vmatmul.mubr.f32.gmra.mrb[88].mxu1 %v1323_v59  ;;  %6165 = vmatmul.mubr.f32.gmra.mrb[120].mxu0 %v2228_v4 }
 0x221   : > { %6070 = vmatprep.mubr.f32.mxu1 %v1324_v60  ;;  %6166 = vmatprep.mubr.f32.mxu0 %v2229_v45 }
 0x222   : > { %6790 = vmatpush1.bf16.msra.mxu1 %v11642_v41 }
 0x223   : > { %6791 = vmatprep.subr.bf16.mxu1 %v11332_v38 }
 0x224   : > { %6071 = vmatmul.mubr.f32.gmra.mrb[90].mxu1 %v1324_v60  ;;  %6167 = vmatmul.mubr.f32.gmra.mrb[122].mxu0 %v2229_v45 }
 0x225   : > { %6072 = vmatprep.mubr.f32.mxu1 %v1325_v61  ;;  %6168 = vmatprep.mubr.f32.mxu0 %v2230_v62 }
 0x226   : > { %6793 = vmatpush1.bf16.msra.mxu1 %v11643_v44 }
 0x227   : > { %6794 = vmatprep.subr.bf16.mxu1 %v11332_v38 }
 0x228   : > { %6073 = vmatmul.mubr.f32.gmra.mrb[92].mxu1 %v1325_v61  ;;  %6169 = vmatmul.mubr.f32.gmra.mrb[124].mxu0 %v2230_v62 }
 0x229   : > { %6074 = vmatprep.mubr.f32.mxu1 %v1326_v48  ;;  %6170 = vmatprep.mubr.f32.mxu0 %v2231_v47 }
 0x22a   : > { %6796 = vmatpush1.bf16.msra.mxu1 %v11646_v23 }
 0x22b   : > { %6797 = vmatprep.subr.bf16.mxu1 %v11332_v38 }
 0x22c   : > { %6075 = vmatmul.mubr.f32.gmra.mrb[94].mxu1 %v1326_v48  ;;  %6171 = vmatmul.mubr.f32.gmra.mrb[126].mxu0 %v2231_v47 }
 0x22e   : > { %6799 = vmatpush1.bf16.msra.mxu1 %v11648_v53 }
 0x22f   : > { %6800 = vmatprep.subr.bf16.mxu1 %v11332_v38 }
 0x232   : > { %6802 = vmatpush1.bf16.msra.mxu1 %v11651_v14 }
 0x233   : > { %6803 = vmatprep.subr.bf16.mxu1 %v11332_v38 }
 0x236   : > { %6805 = vmatpush1.bf16.msra.mxu1 %v11652_v31 }
 0x237   : > { %6806 = vmatprep.subr.bf16.mxu1 %v11332_v38 }
 0x23a   : > { %6808 = vmatpush1.bf16.msra.mxu1 %v11653_v2 }
 0x23b   : > { %6809 = vmatprep.subr.bf16.mxu1 %v11332_v38 }
 0x23e   : > { %6811 = vmatpush1.bf16.msra.mxu1 %v6810_v51 }
 0x23f   : > { %6812 = vmatprep.subr.bf16.mxu1 %v11332_v38 }
 0x283   : > { %v8602_v28 = vpop.f32.mrb[32].mxu1  ;;  %v8604_v58 = vpop.f32.mrb[64].mxu0 }
 0x284   : > { %v8606_v46 = vpop.f32.mrb[33].mxu1  ;;  %v8608_v3 = vpop.f32.mrb[65].mxu0 }
 0x285   : > { %11654 = vst [vmem:[#allocation25_spill] sm:$0xff] %v8606_v46  ;;  %v2489_v7 = vmax.f32 %v8604_v58, %v8608_v3 }
 0x287   : > { %2490 = vmax.xlane.f32.xlu0 %v2489_v7  ;;  %v8618_v29 = vpop.f32.mrb[34].mxu1  ;;  %v8620_v20 = vpop.f32.mrb[66].mxu0 }
 0x288   : > { %v8622_v50 = vpop.f32.mrb[35].mxu1  ;;  %v8624_v24 = vpop.f32.mrb[67].mxu0 }
 0x289   : > { %v2492_v16 = vmax.f32 %v8620_v20, %v8624_v24 }
 0x28b   : > { %2493 = vmax.xlane.f32.xlu0 %v2492_v16  ;;  %v8630_v51 = vpop.f32.mrb[36].mxu1  ;;  %v8632_v6 = vpop.f32.mrb[68].mxu0 }
 0x28c   : > { %v8634_v5 = vpop.f32.mrb[37].mxu1  ;;  %v8636_v52 = vpop.f32.mrb[69].mxu0 }
 0x28d   : > { %11655 = vst [vmem:[#allocation27_spill] sm:$0xff] %v8634_v5  ;;  %v2495_v8 = vmax.f32 %v8632_v6, %v8636_v52 }
 0x28f   : > { %2496 = vmax.xlane.f32.xlu1 %v2495_v8  ;;  %v8642_v56 = vpop.f32.mrb[38].mxu1  ;;  %v8644_v13 = vpop.f32.mrb[70].mxu0 }
 0x290   : > { %v8646_v55 = vpop.f32.mrb[39].mxu1  ;;  %v8648_v18 = vpop.f32.mrb[71].mxu0 }
 0x291   : > { %11656 = vst [vmem:[#allocation31_spill] sm:$0xff] %v8646_v55  ;;  %v2498_v17 = vmax.f32 %v8644_v13, %v8648_v18 }
 0x293   : > { %2499 = vmax.xlane.f32.xlu1 %v2498_v17  ;;  %v8654_v57 = vpop.f32.mrb[40].mxu1  ;;  %v8656_v22 = vpop.f32.mrb[72].mxu0 }
 0x294   : > { %v8658_v59 = vpop.f32.mrb[41].mxu1  ;;  %v8660_v4 = vpop.f32.mrb[73].mxu0 }
 0x295   : > { %v2501_v25 = vmax.f32 %v8656_v22, %v8660_v4 }
 0x297   : > { %2502 = vmax.xlane.f32.xlu0 %v2501_v25  ;;  %v8666_v45 = vpop.f32.mrb[42].mxu1  ;;  %v8668_v30 = vpop.f32.mrb[74].mxu0 }
 0x298   : > { %v8670_v61 = vpop.f32.mrb[43].mxu1  ;;  %v8672_v62 = vpop.f32.mrb[75].mxu0 }
 0x299   : > { %v2504_v33 = vmax.f32 %v8668_v30, %v8672_v62 }
 0x29b   : > { %2505 = vmax.xlane.f32.xlu1 %v2504_v33  ;;  %v8678_v47 = vpop.f32.mrb[44].mxu1  ;;  %v8680_v43 = vpop.f32.mrb[76].mxu0 }
 0x29c   : > { %v8682_v11 = vpop.f32.mrb[45].mxu1  ;;  %v8684_v12 = vpop.f32.mrb[77].mxu0 }
 0x29d   : > { %v2507_v1 = vmax.f32 %v8680_v43, %v8684_v12 }
 0x29f   : > { %2508 = vmax.xlane.f32.xlu0 %v2507_v1  ;;  %v8690_v0 = vpop.f32.mrb[46].mxu1  ;;  %v8692_v9 = vpop.f32.mrb[78].mxu0 }
 0x2a0   : > { %v8694_v27 = vpop.f32.mrb[47].mxu1  ;;  %v8696_v15 = vpop.f32.mrb[79].mxu0 }
 0x2a1   : > { %v2510_v35 = vmax.f32 %v8692_v9, %v8696_v15 }
 0x2a3   : > { %2511 = vmax.xlane.f32.xlu1 %v2510_v35  ;;  %v8702_v44 = vpop.f32.mrb[48].mxu1  ;;  %v8704_v26 = vpop.f32.mrb[80].mxu0 }
 0x2a4   : > { %v8706_v10 = vpop.f32.mrb[49].mxu1  ;;  %v8708_v23 = vpop.f32.mrb[81].mxu0 }
 0x2a5   : > { %v2513_v49 = vmax.f32 %v8704_v26, %v8708_v23 }
 0x2a7   : > { %2514 = vmax.xlane.f32.xlu0 %v2513_v49  ;;  %v8714_v54 = vpop.f32.mrb[50].mxu1  ;;  %v8716_v32 = vpop.f32.mrb[82].mxu0 }
 0x2a8   : > { %v8718_v14 = vpop.f32.mrb[51].mxu1  ;;  %v8720_v31 = vpop.f32.mrb[83].mxu0 }
 0x2a9   : > { %v2516_v2 = vmax.f32 %v8716_v32, %v8720_v31 }
 0x2ab   : > { %2517 = vmax.xlane.f32.xlu1 %v2516_v2  ;;  %v8726_v16 = vpop.f32.mrb[52].mxu1  ;;  %v8728_v8 = vpop.f32.mrb[84].mxu0 }
 0x2ac   : > { %v8730_v17 = vpop.f32.mrb[53].mxu1  ;;  %v8732_v25 = vpop.f32.mrb[85].mxu0 }
 0x2ad   : > { %v2519_v33 = vmax.f32 %v8728_v8, %v8732_v25 }
 0x2af   : > { %2520 = vmax.xlane.f32.xlu0 %v2519_v33  ;;  %v8738_v35 = vpop.f32.mrb[54].mxu1  ;;  %v8740_v49 = vpop.f32.mrb[86].mxu0 }
 0x2b0   : > { %11657 = vst [vmem:[#allocation33_spill] sm:$0xff] %v8740_v49  ;;  %v8742_v2 = vpop.f32.mrb[55].mxu1  ;;  %v8744_v38 = vpop.f32.mrb[87].mxu0 }
 0x2b1   : > { %11658 = vst [vmem:[#allocation36_spill] sm:$0xff] %v8744_v38  ;;  %v2522_v7 = vmax.f32 %v8740_v49, %v8744_v38 }
 0x2b3   : > { %2523 = vmax.xlane.f32.xlu1 %v2522_v7  ;;  %v8750_v41 = vpop.f32.mrb[56].mxu1  ;;  %v8752_v19 = vpop.f32.mrb[88].mxu0 }
 0x2b4   : > { %11659 = vst [vmem:[#allocation38_spill] sm:$0xff] %v8752_v19  ;;  %v8754_v33 = vpop.f32.mrb[57].mxu1  ;;  %v8756_v1 = vpop.f32.mrb[89].mxu0 }
 0x2b5   : > { %11660 = vst [vmem:[#allocation40_spill] sm:$0xff] %v8756_v1  ;;  %v2525_v48 = vmax.f32 %v8752_v19, %v8756_v1 }
 0x2b7   : > { %2526 = vmax.xlane.f32.xlu0 %v2525_v48  ;;  %v8762_v42 = vpop.f32.mrb[58].mxu1  ;;  %v8764_v40 = vpop.f32.mrb[90].mxu0 }
 0x2b8   : > { %11661 = vst [vmem:[#allocation47_spill] sm:$0xff] %v8764_v40  ;;  %v8766_v7 = vpop.f32.mrb[59].mxu1  ;;  %v8768_v53 = vpop.f32.mrb[91].mxu0 }
 0x2b9   : > { %11662 = vst [vmem:[#allocation48_spill] sm:$0xff] %v8768_v53  ;;  %v2528_v37 = vmax.f32 %v8764_v40, %v8768_v53 }
 0x2bb   : > { %2529 = vmax.xlane.f32.xlu1 %v2528_v37  ;;  %v8774_v36 = vpop.f32.mrb[60].mxu1  ;;  %v8776_v21 = vpop.f32.mrb[92].mxu0 }
 0x2bc   : > { %11663 = vst [vmem:[#allocation49_spill] sm:$0xff] %v8776_v21  ;;  %v8778_v48 = vpop.f32.mrb[61].mxu1  ;;  %v8780_v60 = vpop.f32.mrb[93].mxu0 }
 0x2bd   : > { %11664 = vst [vmem:[#allocation50_spill] sm:$0xff] %v8780_v60  ;;  %v2531_v34 = vmax.f32 %v8776_v21, %v8780_v60 }
 0x2bf   : > { %2532 = vmax.xlane.f32.xlu0 %v2531_v34  ;;  %v8786_v53 = vpop.f32.mrb[62].mxu1  ;;  %v8788_v40 = vpop.f32.mrb[94].mxu0 }
 0x2c0   : > { %11665 = vst [vmem:[#allocation51_spill] sm:$0xff] %v8786_v53  ;;  %11666 = vst [vmem:[#allocation52_spill] sm:$0xff] %v8788_v40  ;;  %v8790_v37 = vpop.f32.mrb[63].mxu1  ;;  %v8792_v63 = vpop.f32.mrb[95].mxu0 }
 0x2c1   : > { %11667 = vst [vmem:[#allocation53_spill] sm:$0xff] %v8790_v37  ;;  %11668 = vst [vmem:[#allocation54_spill] sm:$0xff] %v8792_v63  ;;  %v2534_v1 = vmax.f32 %v8788_v40, %v8792_v63 }
 0x2c3   : > { %2535 = vmax.xlane.f32.xlu1 %v2534_v1  ;;  %v8798_v60 = vpop.f32.mrb[64].mxu1  ;;  %v8800_v21 = vpop.f32.mrb[96].mxu0 }
 0x2c4   : > { %11669 = vst [vmem:[#allocation55_spill] sm:$0xff] %v8798_v60  ;;  %11670 = vst [vmem:[#allocation56_spill] sm:$0xff] %v8800_v21  ;;  %v8802_v34 = vpop.f32.mrb[65].mxu1  ;;  %v8804_v39 = vpop.f32.mrb[97].mxu0 }
 0x2c5   : > { %11671 = vst [vmem:[#allocation57_spill] sm:$0xff] %v8802_v34  ;;  %11672 = vst [vmem:[#allocation58_spill] sm:$0xff] %v8804_v39  ;;  %v2537_v38 = vmax.f32 %v8800_v21, %v8804_v39 }
 0x2c7   : > { %2538 = vmax.xlane.f32.xlu0 %v2537_v38  ;;  %v8810_v63 = vpop.f32.mrb[66].mxu1  ;;  %v8812_v40 = vpop.f32.mrb[98].mxu0 }
 0x2c8   : > { %11673 = vst [vmem:[#allocation59_spill] sm:$0xff] %v8810_v63  ;;  %11674 = vst [vmem:[#allocation60_spill] sm:$0xff] %v8812_v40  ;;  %v8814_v1 = vpop.f32.mrb[67].mxu1  ;;  %v8816_v19 = vpop.f32.mrb[99].mxu0 }
 0x2c9   : > { %11675 = vst [vmem:[#allocation61_spill] sm:$0xff] %v8814_v1  ;;  %11676 = vst [vmem:[#allocation62_spill] sm:$0xff] %v8816_v19  ;;  %v2540_v37 = vmax.f32 %v8812_v40, %v8816_v19 }
 0x2cb   : > { %2541 = vmax.xlane.f32.xlu1 %v2540_v37  ;;  %v8822_v39 = vpop.f32.mrb[68].mxu1  ;;  %v8824_v21 = vpop.f32.mrb[100].mxu0 }
 0x2cc   : > { %11677 = vst [vmem:[#allocation63_spill] sm:$0xff] %v8822_v39  ;;  %11678 = vst [vmem:[#allocation64_spill] sm:$0xff] %v8824_v21  ;;  %v8826_v38 = vpop.f32.mrb[69].mxu1  ;;  %v8828_v49 = vpop.f32.mrb[101].mxu0 }
 0x2cd   : > { %11679 = vst [vmem:[#allocation65_spill] sm:$0xff] %v8826_v38  ;;  %11680 = vst [vmem:[#allocation66_spill] sm:$0xff] %v8828_v49  ;;  %v2543_v34 = vmax.f32 %v8824_v21, %v8828_v49 }
 0x2cf   : > { %2544 = vmax.xlane.f32.xlu0 %v2543_v34  ;;  %v8834_v19 = vpop.f32.mrb[70].mxu1  ;;  %v8836_v40 = vpop.f32.mrb[102].mxu0 }
 0x2d0   : > { %11681 = vst [vmem:[#allocation67_spill] sm:$0xff] %v8834_v19  ;;  %11682 = vst [vmem:[#allocation68_spill] sm:$0xff] %v8836_v40  ;;  %v8838_v37 = vpop.f32.mrb[71].mxu1  ;;  %v8840_v53 = vpop.f32.mrb[103].mxu0 }
 0x2d1   : > { %11683 = vst [vmem:[#allocation69_spill] sm:$0xff] %v8838_v37  ;;  %11684 = vst [vmem:[#allocation70_spill] sm:$0xff] %v8840_v53  ;;  %v2546_v1 = vmax.f32 %v8836_v40, %v8840_v53 }
 0x2d3   : > { %2547 = vmax.xlane.f32.xlu1 %v2546_v1  ;;  %v8846_v49 = vpop.f32.mrb[72].mxu1  ;;  %v8848_v21 = vpop.f32.mrb[104].mxu0 }
 0x2d4   : > { %11685 = vst [vmem:[#allocation71_spill] sm:$0xff] %v8846_v49  ;;  %11686 = vst [vmem:[#allocation72_spill] sm:$0xff] %v8848_v21  ;;  %v8850_v34 = vpop.f32.mrb[73].mxu1  ;;  %v8852_v60 = vpop.f32.mrb[105].mxu0 }
 0x2d5   : > { %11687 = vst [vmem:[#allocation73_spill] sm:$0xff] %v8850_v34  ;;  %11688 = vst [vmem:[#allocation74_spill] sm:$0xff] %v8852_v60  ;;  %v2549_v38 = vmax.f32 %v8848_v21, %v8852_v60 }
 0x2d7   : > { %2550 = vmax.xlane.f32.xlu0 %v2549_v38  ;;  %v8858_v53 = vpop.f32.mrb[74].mxu1  ;;  %v8860_v40 = vpop.f32.mrb[106].mxu0 }
 0x2d8   : > { %11689 = vst [vmem:[#allocation75_spill] sm:$0xff] %v8858_v53  ;;  %11690 = vst [vmem:[#allocation76_spill] sm:$0xff] %v8860_v40  ;;  %v8862_v1 = vpop.f32.mrb[75].mxu1  ;;  %v8864_v63 = vpop.f32.mrb[107].mxu0 }
 0x2d9   : > { %11691 = vst [vmem:[#allocation77_spill] sm:$0xff] %v8862_v1  ;;  %11692 = vst [vmem:[#allocation78_spill] sm:$0xff] %v8864_v63  ;;  %v2552_v37 = vmax.f32 %v8860_v40, %v8864_v63 }
 0x2db   : > { %2553 = vmax.xlane.f32.xlu1 %v2552_v37  ;;  %v8870_v60 = vpop.f32.mrb[76].mxu1  ;;  %v8872_v21 = vpop.f32.mrb[108].mxu0 }
 0x2dc   : > { %11693 = vst [vmem:[#allocation79_spill] sm:$0xff] %v8870_v60  ;;  %11694 = vst [vmem:[#allocation80_spill] sm:$0xff] %v8872_v21  ;;  %v8874_v38 = vpop.f32.mrb[77].mxu1  ;;  %v8876_v39 = vpop.f32.mrb[109].mxu0 }
 0x2dd   : > { %11695 = vst [vmem:[#allocation81_spill] sm:$0xff] %v8874_v38  ;;  %11696 = vst [vmem:[#allocation82_spill] sm:$0xff] %v8876_v39  ;;  %v2555_v34 = vmax.f32 %v8872_v21, %v8876_v39 }
 0x2df   : > { %2556 = vmax.xlane.f32.xlu0 %v2555_v34  ;;  %v8882_v63 = vpop.f32.mrb[78].mxu1  ;;  %v8884_v40 = vpop.f32.mrb[110].mxu0 }
 0x2e0   : > { %11697 = vst [vmem:[#allocation83_spill] sm:$0xff] %v8882_v63  ;;  %11698 = vst [vmem:[#allocation84_spill] sm:$0xff] %v8884_v40  ;;  %v8886_v37 = vpop.f32.mrb[79].mxu1  ;;  %v8888_v19 = vpop.f32.mrb[111].mxu0 }
 0x2e1   : > { %11699 = vst [vmem:[#allocation85_spill] sm:$0xff] %v8886_v37  ;;  %11700 = vst [vmem:[#allocation86_spill] sm:$0xff] %v8888_v19  ;;  %v2558_v1 = vmax.f32 %v8884_v40, %v8888_v19 }
 0x2e3   : > { %2559 = vmax.xlane.f32.xlu0 %v2558_v1  ;;  %v8894_v39 = vpop.f32.mrb[80].mxu1  ;;  %v8896_v21 = vpop.f32.mrb[112].mxu0 }
 0x2e4   : > { %11701 = vst [vmem:[#allocation87_spill] sm:$0xff] %v8894_v39  ;;  %11702 = vst [vmem:[#allocation88_spill] sm:$0xff] %v8896_v21  ;;  %v8898_v34 = vpop.f32.mrb[81].mxu1  ;;  %v8900_v49 = vpop.f32.mrb[113].mxu0 }
 0x2e5   : > { %11703 = vst [vmem:[#allocation89_spill] sm:$0xff] %v8898_v34  ;;  %11704 = vst [vmem:[#allocation90_spill] sm:$0xff] %v8900_v49  ;;  %v2561_v38 = vmax.f32 %v8896_v21, %v8900_v49 }
 0x2e7   : > { %2562 = vmax.xlane.f32.xlu0 %v2561_v38  ;;  %v8906_v19 = vpop.f32.mrb[82].mxu1  ;;  %v8908_v40 = vpop.f32.mrb[114].mxu0 }
 0x2e8   : > { %11705 = vst [vmem:[#allocation91_spill] sm:$0xff] %v8906_v19  ;;  %11706 = vst [vmem:[#allocation92_spill] sm:$0xff] %v8908_v40  ;;  %v8910_v1 = vpop.f32.mrb[83].mxu1  ;;  %v8912_v53 = vpop.f32.mrb[115].mxu0 }
 0x2e9   : > { %11707 = vst [vmem:[#allocation93_spill] sm:$0xff] %v8910_v1  ;;  %11708 = vst [vmem:[#allocation94_spill] sm:$0xff] %v8912_v53  ;;  %v2564_v37 = vmax.f32 %v8908_v40, %v8912_v53 }
 0x2eb   : > { %2565 = vmax.xlane.f32.xlu0 %v2564_v37  ;;  %v8918_v49 = vpop.f32.mrb[84].mxu1  ;;  %v8920_v21 = vpop.f32.mrb[116].mxu0 }
 0x2ec   : > { %11709 = vst [vmem:[#allocation95_spill] sm:$0xff] %v8918_v49  ;;  %11710 = vst [vmem:[#allocation96_spill] sm:$0xff] %v8920_v21  ;;  %v8922_v38 = vpop.f32.mrb[85].mxu1  ;;  %v8924_v60 = vpop.f32.mrb[117].mxu0 }
 0x2ed   : > { %11711 = vst [vmem:[#allocation97_spill] sm:$0xff] %v8922_v38  ;;  %11712 = vst [vmem:[#allocation98_spill] sm:$0xff] %v8924_v60  ;;  %v2567_v34 = vmax.f32 %v8920_v21, %v8924_v60 }
 0x2ef   : > { %2568 = vmax.xlane.f32.xlu0 %v2567_v34  ;;  %v8930_v53 = vpop.f32.mrb[86].mxu1  ;;  %v8932_v40 = vpop.f32.mrb[118].mxu0 }
 0x2f0   : > { %11713 = vst [vmem:[#allocation99_spill] sm:$0xff] %v8930_v53  ;;  %11714 = vst [vmem:[#allocation100_spill] sm:$0xff] %v8932_v40  ;;  %v8934_v37 = vpop.f32.mrb[87].mxu1  ;;  %v8936_v63 = vpop.f32.mrb[119].mxu0 }
 0x2f1   : > { %11715 = vst [vmem:[#allocation101_spill] sm:$0xff] %v8934_v37  ;;  %11716 = vst [vmem:[#allocation102_spill] sm:$0xff] %v8936_v63  ;;  %v2570_v1 = vmax.f32 %v8932_v40, %v8936_v63 }
 0x2f3   : > { %2571 = vmax.xlane.f32.xlu0 %v2570_v1  ;;  %v8942_v60 = vpop.f32.mrb[88].mxu1  ;;  %v8944_v21 = vpop.f32.mrb[120].mxu0 }
 0x2f4   : > { %11717 = vst [vmem:[#allocation103_spill] sm:$0xff] %v8942_v60  ;;  %11718 = vst [vmem:[#allocation104_spill] sm:$0xff] %v8944_v21  ;;  %v8946_v34 = vpop.f32.mrb[89].mxu1  ;;  %v8948_v39 = vpop.f32.mrb[121].mxu0 }
 0x2f5   : > { %11719 = vst [vmem:[#allocation105_spill] sm:$0xff] %v8946_v34  ;;  %11720 = vst [vmem:[#allocation106_spill] sm:$0xff] %v8948_v39  ;;  %v2573_v49 = vmax.f32 %v8944_v21, %v8948_v39  ;;  %v11731_v21 = vmax.f32 %v8602_v28, %v8606_v46 }
 0x2f7   : > { %2574 = vmax.xlane.f32.xlu0 %v2573_v49  ;;  %v8954_v63 = vpop.f32.mrb[90].mxu1  ;;  %v8956_v40 = vpop.f32.mrb[122].mxu0 }
 0x2f8   : > { %11721 = vst [vmem:[#allocation107_spill] sm:$0xff] %v8954_v63  ;;  %11722 = vst [vmem:[#allocation108_spill] sm:$0xff] %v8956_v40  ;;  %v8958_v1 = vpop.f32.mrb[91].mxu1  ;;  %v8960_v19 = vpop.f32.mrb[123].mxu0 }
 0x2f9   : > { %11723 = vst [vmem:[#allocation109_spill] sm:$0xff] %v8958_v1  ;;  %11724 = vst [vmem:[#allocation110_spill] sm:$0xff] %v8960_v19  ;;  %v2576_v53 = vmax.f32 %v8956_v40, %v8960_v19 }
 0x2fb   : > { %2577 = vmax.xlane.f32.xlu0 %v2576_v53  ;;  %v8966_v38 = vpop.f32.mrb[92].mxu1  ;;  %v8968_v34 = vpop.f32.mrb[124].mxu0 }
 0x2fc   : > { %11725 = vst [vmem:[#allocation111_spill] sm:$0xff] %v8968_v34  ;;  %v8970_v49 = vpop.f32.mrb[93].mxu1  ;;  %v8972_v39 = vpop.f32.mrb[125].mxu0 }
 0x2fd   : > { %11726 = vst [vmem:[#allocation112_spill] sm:$0xff] %v8972_v39  ;;  %v2579_v60 = vmax.f32 %v8968_v34, %v8972_v39  ;;  %v11733_v39 = vmax.f32 %v8630_v51, %v8634_v5  ;;  %v11734_v34 = vmax.f32 %v8642_v56, %v8646_v55 }
 0x2ff   : > { %2580 = vmax.xlane.f32.xlu0 %v2579_v60  ;;  %v8978_v37 = vpop.f32.mrb[94].mxu1  ;;  %v8980_v1 = vpop.f32.mrb[126].mxu0  ;;  %v11732_v60 = vmax.f32 %v8618_v29, %v8622_v50 }
 0x300   : > { %11727 = vst [vmem:[#allocation113_spill] sm:$0xff] %v8978_v37  ;;  %11728 = vst [vmem:[#allocation114_spill] sm:$0xff] %v8980_v1  ;;  %v8982_v53 = vpop.f32.mrb[95].mxu1  ;;  %v8984_v19 = vpop.f32.mrb[127].mxu0 }
 0x301   : > { %11729 = vst [vmem:[#allocation115_spill] sm:$0xff] %v8982_v53  ;;  %11730 = vst [vmem:[#allocation116_spill] sm:$0xff] %v8984_v19  ;;  %v2582_v63 = vmax.f32 %v8980_v1, %v8984_v19 }
 0x303   : > { %2583 = vmax.xlane.f32.xlu0 %v2582_v63 }
 0x307   : > { %1585 = vmax.xlane.f32.xlu0 %v11731_v21  ;;  %v11735_v21 = vmax.f32 %v8654_v57, %v8658_v59 }
 0x30b   : > { %1588 = vmax.xlane.f32.xlu0 %v11732_v60 }
 0x30f   : > { %1591 = vmax.xlane.f32.xlu0 %v11733_v39 }
 0x313   : > { %1594 = vmax.xlane.f32.xlu0 %v11734_v34 }
 0x314   : > { %v2491_v40 = vpop.xlane.xlu0 %2490 }
 0x315   : > { %v2585_v19 = vsub.f32 %v8604_v58, %v2491_v40  ;;  %v2586_v63 = vsub.f32 %v8608_v3, %v2491_v40  ;;  %v11736_v58 = vmax.f32 %v8666_v45, %v8670_v61 }
 0x317   : > { %v2649_v1 = vmul.f32 1.442695, %v2585_v19  ;;  %v2651_v46 = vmul.f32 1.442695, %v2586_v63  ;;  %1597 = vmax.xlane.f32.xlu0 %v11735_v21 }
 0x318   : > { %v2494_v60 = vpop.xlane.xlu0 %2493 }
 0x319   : > { %7063 = vpow2.f32 %v2649_v1  ;;  %v2587_v5 = vsub.f32 %v8620_v20, %v2494_v60  ;;  %v2588_v39 = vsub.f32 %v8624_v24, %v2494_v60  ;;  %v11737_v20 = vmax.f32 %v8678_v47, %v8682_v11 }
 0x31a   : > { %7065 = vpow2.f32 %v2651_v46 }
 0x31b   : > { %v2653_v55 = vmul.f32 1.442695, %v2587_v5  ;;  %v2655_v34 = vmul.f32 1.442695, %v2588_v39  ;;  %1600 = vmax.xlane.f32.xlu0 %v11736_v58 }
 0x31c   : > { %v2497_v3 = vpop.xlane.xlu1 %2496 }
 0x31d   : > { %7067 = vpow2.f32 %v2653_v55  ;;  %v2589_v40 = vsub.f32 %v8632_v6, %v2497_v3  ;;  %v2590_v19 = vsub.f32 %v8636_v52, %v2497_v3  ;;  %v11738_v52 = vmax.f32 %v8690_v0, %v8694_v27 }
 0x31e   : > { %7069 = vpow2.f32 %v2655_v34 }
 0x31f   : > { %v2657_v63 = vmul.f32 1.442695, %v2589_v40  ;;  %v2659_v1 = vmul.f32 1.442695, %v2590_v19  ;;  %1603 = vmax.xlane.f32.xlu0 %v11737_v20  ;;  %v11739_v19 = vmax.f32 %v8702_v44, %v8706_v10 }
 0x320   : > { %v2500_v46 = vpop.xlane.xlu1 %2499 }
 0x321   : > { %7071 = vpow2.f32 %v2657_v63  ;;  %v2591_v24 = vsub.f32 %v8644_v13, %v2500_v46  ;;  %v2592_v5 = vsub.f32 %v8648_v18, %v2500_v46 }
 0x322   : > { %7073 = vpow2.f32 %v2659_v1 }
 0x323   : > { %v9019_v21 = vpop.eup %7063  ;;  %v2661_v55 = vmul.f32 1.442695, %v2591_v24  ;;  %v2663_v6 = vmul.f32 1.442695, %v2592_v5  ;;  %1606 = vmax.xlane.f32.xlu0 %v11738_v52 }
 0x324   : > { %v9024_v60 = vpop.eup %7065  ;;  %v2503_v39 = vpop.xlane.xlu0 %2502 }
 0x325   : > { %7075 = vpow2.f32 %v2661_v55  ;;  %v2593_v34 = vsub.f32 %v8656_v22, %v2503_v39  ;;  %v2594_v58 = vsub.f32 %v8660_v4, %v2503_v39  ;;  %v2777_v13 = vadd.f32 %v9024_v60, %v9019_v21 }
 0x326   : > { %7077 = vpow2.f32 %v2663_v6  ;;  %v11740_v55 = vmax.f32 %v8714_v54, %v8718_v14 }
 0x327   : > { %v9030_v18 = vpop.eup %7067  ;;  %v2665_v3 = vmul.f32 1.442695, %v2593_v34  ;;  %v2667_v40 = vmul.f32 1.442695, %v2594_v58  ;;  %2778 = vadd.xlane.f32.xlu1 %v2777_v13  ;;  %1609 = vmax.xlane.f32.xlu0 %v11739_v19 }
 0x328   : > { %v9035_v63 = vpop.eup %7069  ;;  %v2506_v1 = vpop.xlane.xlu1 %2505 }
 0x329   : > { %7079 = vpow2.f32 %v2665_v3  ;;  %v2595_v22 = vsub.f32 %v8668_v30, %v2506_v1  ;;  %v2596_v4 = vsub.f32 %v8672_v62, %v2506_v1  ;;  %v2780_v20 = vadd.f32 %v9035_v63, %v9030_v18 }
 0x32a   : > { %7081 = vpow2.f32 %v2667_v40  ;;  %v11741_v3 = vmax.f32 %v8726_v16, %v8730_v17 }
 0x32b   : > { %v9041_v46 = vpop.eup %7071  ;;  %v2669_v24 = vmul.f32 1.442695, %v2595_v22  ;;  %v2671_v5 = vmul.f32 1.442695, %v2596_v4  ;;  %2781 = vadd.xlane.f32.xlu1 %v2780_v20  ;;  %1612 = vmax.xlane.f32.xlu0 %v11740_v55 }
 0x32c   : > { %v9046_v6 = vpop.eup %7073  ;;  %v2509_v52 = vpop.xlane.xlu0 %2508 }
 0x32d   : > { %7083 = vpow2.f32 %v2669_v24  ;;  %v2597_v30 = vsub.f32 %v8680_v43, %v2509_v52  ;;  %v2598_v62 = vsub.f32 %v8684_v12, %v2509_v52  ;;  %v2783_v39 = vadd.f32 %v9046_v6, %v9041_v46 }
 0x32e   : > { %7085 = vpow2.f32 %v2671_v5  ;;  %v11742_v24 = vmax.f32 %v8738_v35, %v8742_v2 }
 0x32f   : > { %v9052_v34 = vpop.eup %7075  ;;  %v2673_v58 = vmul.f32 1.442695, %v2597_v30  ;;  %v2675_v13 = vmul.f32 1.442695, %v2598_v62  ;;  %2784 = vadd.xlane.f32.xlu1 %v2783_v39  ;;  %1615 = vmax.xlane.f32.xlu0 %v11741_v3 }
 0x330   : > { %v9057_v40 = vpop.eup %7077  ;;  %v2512_v19 = vpop.xlane.xlu1 %2511 }
 0x331   : > { %7087 = vpow2.f32 %v2673_v58  ;;  %v2599_v43 = vsub.f32 %v8692_v9, %v2512_v19  ;;  %v2600_v12 = vsub.f32 %v8696_v15, %v2512_v19  ;;  %v2786_v1 = vadd.f32 %v9057_v40, %v9052_v34 }
 0x332   : > { %7089 = vpow2.f32 %v2675_v13  ;;  %v11744_v58 = vmax.f32 %v8750_v41, %v8754_v33 }
 0x333   : > { %v9063_v22 = vpop.eup %7079  ;;  %v2677_v4 = vmul.f32 1.442695, %v2599_v43  ;;  %v2679_v20 = vmul.f32 1.442695, %v2600_v12  ;;  %2787 = vadd.xlane.f32.xlu1 %v2786_v1  ;;  %1618 = vmax.xlane.f32.xlu0 %v11742_v24 }
 0x334   : > { %v9068_v5 = vpop.eup %7081  ;;  %v2515_v55 = vpop.xlane.xlu0 %2514 }
 0x335   : > { %7091 = vpow2.f32 %v2677_v4  ;;  %v2601_v9 = vsub.f32 %v8704_v26, %v2515_v55  ;;  %v2602_v15 = vsub.f32 %v8708_v23, %v2515_v55  ;;  %v2789_v52 = vadd.f32 %v9068_v5, %v9063_v22 }
 0x336   : > { %7093 = vpow2.f32 %v2679_v20  ;;  %v11747_v4 = vmax.f32 %v8762_v42, %v8766_v7 }
 0x337   : > { %v9074_v30 = vpop.eup %7083  ;;  %v2681_v62 = vmul.f32 1.442695, %v2601_v9  ;;  %v2683_v39 = vmul.f32 1.442695, %v2602_v15  ;;  %2790 = vadd.xlane.f32.xlu1 %v2789_v52  ;;  %1621 = vmax.xlane.f32.xlu0 %v11744_v58 }
 0x338   : > { %11743 = vst [vmem:[#allocation117_spill] sm:$0xff] %v9074_v30  ;;  %v9079_v13 = vpop.eup %7085  ;;  %v2518_v3 = vpop.xlane.xlu1 %2517 }
 0x339   : > { %11745 = vst [vmem:[#allocation118_spill] sm:$0xff] %v9079_v13  ;;  %7095 = vpow2.f32 %v2681_v62  ;;  %v2603_v26 = vsub.f32 %v8716_v32, %v2518_v3  ;;  %v2604_v23 = vsub.f32 %v8720_v31, %v2518_v3  ;;  %v2792_v19 = vadd.f32 %v9079_v13, %v9074_v30 }
 0x33a   : > { %7097 = vpow2.f32 %v2683_v39  ;;  %v11750_v62 = vmax.f32 %v8774_v36, %v8778_v48 }
 0x33b   : > { %v9085_v43 = vpop.eup %7087  ;;  %v2685_v12 = vmul.f32 1.442695, %v2603_v26  ;;  %v2687_v1 = vmul.f32 1.442695, %v2604_v23  ;;  %2793 = vadd.xlane.f32.xlu1 %v2792_v19  ;;  %1624 = vmax.xlane.f32.xlu0 %v11747_v4  ;;  %v11755_v4 = vld [vmem:[#allocation51_spill] sm:$0xff] }
 0x33c   : > { %11746 = vst [vmem:[#allocation119_spill] sm:$0xff] %v9085_v43  ;;  %v9090_v20 = vpop.eup %7089  ;;  %v2521_v24 = vpop.xlane.xlu0 %2520 }
 0x33d   : > { %11748 = vst [vmem:[#allocation120_spill] sm:$0xff] %v9090_v20  ;;  %7099 = vpow2.f32 %v2685_v12  ;;  %v2605_v32 = vsub.f32 %v8728_v8, %v2521_v24  ;;  %v2606_v31 = vsub.f32 %v8732_v25, %v2521_v24  ;;  %v2795_v55 = vadd.f32 %v9090_v20, %v9085_v43  ;;  %v11752_v8 = vld [vmem:[#allocation33_spill] sm:$0xff]  ;;  %v11753_v25 = vld [vmem:[#allocation36_spill] sm:$0xff] }
 0x33e   : > { %7101 = vpow2.f32 %v2687_v1  ;;  %v11756_v24 = vld [vmem:[#allocation53_spill] sm:$0xff] }
 0x33f   : > { %v9096_v9 = vpop.eup %7091  ;;  %v2689_v15 = vmul.f32 1.442695, %v2605_v32  ;;  %v2691_v52 = vmul.f32 1.442695, %v2606_v31  ;;  %2796 = vadd.xlane.f32.xlu1 %v2795_v55  ;;  %1627 = vmax.xlane.f32.xlu0 %v11750_v62  ;;  %v11757_v32 = vmax.f32 %v11755_v4, %v11756_v24 }
 0x340   : > { %11749 = vst [vmem:[#allocation121_spill] sm:$0xff] %v9096_v9  ;;  %v9101_v39 = vpop.eup %7093  ;;  %v2524_v58 = vpop.xlane.xlu1 %2523 }
 0x341   : > { %11751 = vst [vmem:[#allocation122_spill] sm:$0xff] %v9101_v39  ;;  %7103 = vpow2.f32 %v2689_v15  ;;  %v2607_v3 = vsub.f32 %v11752_v8, %v2524_v58  ;;  %v2608_v26 = vsub.f32 %v11753_v25, %v2524_v58  ;;  %v2798_v23 = vadd.f32 %v9101_v39, %v9096_v9  ;;  %v11759_v15 = vld [vmem:[#allocation38_spill] sm:$0xff]  ;;  %v11760_v58 = vld [vmem:[#allocation40_spill] sm:$0xff]  ;;  %v11763_v9 = vld [vmem:[#allocation57_spill] sm:$0xff] }
 0x342   : > { %7105 = vpow2.f32 %v2691_v52 }
 0x343   : > { %v9107_v19 = vpop.eup %7095  ;;  %v2693_v12 = vmul.f32 1.442695, %v2607_v3  ;;  %v2695_v1 = vmul.f32 1.442695, %v2608_v26  ;;  %2799 = vadd.xlane.f32.xlu1 %v2798_v23  ;;  %1630 = vmax.xlane.f32.xlu0 %v11757_v32  ;;  %v11762_v23 = vld [vmem:[#allocation55_spill] sm:$0xff] }
 0x344   : > { %11754 = vst [vmem:[#allocation33_spill] sm:$0xff] %v9107_v19  ;;  %v9112_v31 = vpop.eup %7097  ;;  %v2527_v55 = vpop.xlane.xlu0 %2526  ;;  %v11764_v32 = vmax.f32 %v11762_v23, %v11763_v9 }
 0x345   : > { %11758 = vst [vmem:[#allocation36_spill] sm:$0xff] %v9112_v31  ;;  %7107 = vpow2.f32 %v2693_v12  ;;  %v2609_v62 = vsub.f32 %v11759_v15, %v2527_v55  ;;  %v2610_v8 = vsub.f32 %v11760_v58, %v2527_v55  ;;  %v2801_v52 = vadd.f32 %v9112_v31, %v9107_v19  ;;  %v11766_v15 = vld [vmem:[#allocation47_spill] sm:$0xff]  ;;  %v11767_v55 = vld [vmem:[#allocation48_spill] sm:$0xff]  ;;  %v11770_v31 = vld [vmem:[#allocation61_spill] sm:$0xff] }
 0x346   : > { %7109 = vpow2.f32 %v2695_v1 }
 0x347   : > { %v9118_v25 = vpop.eup %7099  ;;  %v2697_v3 = vmul.f32 1.442695, %v2609_v62  ;;  %v2699_v26 = vmul.f32 1.442695, %v2610_v8  ;;  %2802 = vadd.xlane.f32.xlu1 %v2801_v52  ;;  %1633 = vmax.xlane.f32.xlu0 %v11764_v32  ;;  %v11769_v52 = vld [vmem:[#allocation59_spill] sm:$0xff] }
 0x348   : > { %11761 = vst [vmem:[#allocation51_spill] sm:$0xff] %v9118_v25  ;;  %v9123_v39 = vpop.eup %7101  ;;  %v2530_v12 = vpop.xlane.xlu1 %2529  ;;  %v11771_v32 = vmax.f32 %v11769_v52, %v11770_v31 }
 0x349   : > { %11765 = vst [vmem:[#allocation53_spill] sm:$0xff] %v9123_v39  ;;  %7111 = vpow2.f32 %v2697_v3  ;;  %v2611_v43 = vsub.f32 %v11766_v15, %v2530_v12  ;;  %v2612_v58 = vsub.f32 %v11767_v55, %v2530_v12  ;;  %v2804_v1 = vadd.f32 %v9123_v39, %v9118_v25  ;;  %v11773_v15 = vld [vmem:[#allocation49_spill] sm:$0xff]  ;;  %v11774_v12 = vld [vmem:[#allocation50_spill] sm:$0xff] }
 0x34a   : > { %7113 = vpow2.f32 %v2699_v26  ;;  %v11777_v39 = vld [vmem:[#allocation65_spill] sm:$0xff] }
 0x34b   : > { %v9129_v19 = vpop.eup %7103  ;;  %v2701_v62 = vmul.f32 1.442695, %v2611_v43  ;;  %v2703_v8 = vmul.f32 1.442695, %v2612_v58  ;;  %2805 = vadd.xlane.f32.xlu1 %v2804_v1  ;;  %1636 = vmax.xlane.f32.xlu0 %v11771_v32  ;;  %v11776_v1 = vld [vmem:[#allocation63_spill] sm:$0xff] }
 0x34c   : > { %11768 = vst [vmem:[#allocation38_spill] sm:$0xff] %v9129_v19  ;;  %v9134_v20 = vpop.eup %7105  ;;  %v2533_v3 = vpop.xlane.xlu0 %2532  ;;  %v11778_v32 = vmax.f32 %v11776_v1, %v11777_v39 }
 0x34d   : > { %11772 = vst [vmem:[#allocation40_spill] sm:$0xff] %v9134_v20  ;;  %7115 = vpow2.f32 %v2701_v62  ;;  %v2613_v30 = vsub.f32 %v11773_v15, %v2533_v3  ;;  %v2614_v55 = vsub.f32 %v11774_v12, %v2533_v3  ;;  %v2807_v26 = vadd.f32 %v9134_v20, %v9129_v19  ;;  %v11780_v15 = vld [vmem:[#allocation52_spill] sm:$0xff]  ;;  %v11781_v3 = vld [vmem:[#allocation54_spill] sm:$0xff]  ;;  %v11784_v20 = vld [vmem:[#allocation69_spill] sm:$0xff] }
 0x34e   : > { %7117 = vpow2.f32 %v2703_v8 }
 0x34f   : > { %v9140_v25 = vpop.eup %7107  ;;  %v2705_v43 = vmul.f32 1.442695, %v2613_v30  ;;  %v2707_v58 = vmul.f32 1.442695, %v2614_v55  ;;  %2808 = vadd.xlane.f32.xlu1 %v2807_v26  ;;  %1639 = vmax.xlane.f32.xlu0 %v11778_v32  ;;  %v11783_v26 = vld [vmem:[#allocation67_spill] sm:$0xff] }
 0x350   : > { %11775 = vst [vmem:[#allocation55_spill] sm:$0xff] %v9140_v25  ;;  %v9145_v13 = vpop.eup %7109  ;;  %v2536_v62 = vpop.xlane.xlu1 %2535  ;;  %v11785_v32 = vmax.f32 %v11783_v26, %v11784_v20 }
 0x351   : > { %11779 = vst [vmem:[#allocation57_spill] sm:$0xff] %v9145_v13  ;;  %7119 = vpow2.f32 %v2705_v43  ;;  %v2615_v31 = vsub.f32 %v11780_v15, %v2536_v62  ;;  %v2616_v12 = vsub.f32 %v11781_v3, %v2536_v62  ;;  %v2810_v8 = vadd.f32 %v9145_v13, %v9140_v25  ;;  %v11787_v15 = vld [vmem:[#allocation56_spill] sm:$0xff]  ;;  %v11788_v62 = vld [vmem:[#allocation58_spill] sm:$0xff]  ;;  %v11791_v13 = vld [vmem:[#allocation73_spill] sm:$0xff] }
 0x352   : > { %7121 = vpow2.f32 %v2707_v58 }
 0x353   : > { %v9151_v19 = vpop.eup %7111  ;;  %v2709_v30 = vmul.f32 1.442695, %v2615_v31  ;;  %v2711_v55 = vmul.f32 1.442695, %v2616_v12  ;;  %2811 = vadd.xlane.f32.xlu1 %v2810_v8  ;;  %1642 = vmax.xlane.f32.xlu0 %v11785_v32  ;;  %v11790_v8 = vld [vmem:[#allocation71_spill] sm:$0xff] }
 0x354   : > { %11782 = vst [vmem:[#allocation47_spill] sm:$0xff] %v9151_v19  ;;  %v9156_v39 = vpop.eup %7113  ;;  %v2539_v43 = vpop.xlane.xlu0 %2538  ;;  %v11792_v32 = vmax.f32 %v11790_v8, %v11791_v13 }
 0x355   : > { %11786 = vst [vmem:[#allocation48_spill] sm:$0xff] %v9156_v39  ;;  %7123 = vpow2.f32 %v2709_v30  ;;  %v2617_v1 = vsub.f32 %v11787_v15, %v2539_v43  ;;  %v2618_v3 = vsub.f32 %v11788_v62, %v2539_v43  ;;  %v2813_v58 = vadd.f32 %v9156_v39, %v9151_v19  ;;  %v11794_v15 = vld [vmem:[#allocation60_spill] sm:$0xff]  ;;  %v11795_v43 = vld [vmem:[#allocation62_spill] sm:$0xff]  ;;  %v11798_v39 = vld [vmem:[#allocation77_spill] sm:$0xff] }
 0x356   : > { %7125 = vpow2.f32 %v2711_v55 }
 0x357   : > { %v9162_v25 = vpop.eup %7115  ;;  %v2713_v31 = vmul.f32 1.442695, %v2617_v1  ;;  %v2715_v12 = vmul.f32 1.442695, %v2618_v3  ;;  %2814 = vadd.xlane.f32.xlu1 %v2813_v58  ;;  %1645 = vmax.xlane.f32.xlu0 %v11792_v32  ;;  %v11797_v58 = vld [vmem:[#allocation75_spill] sm:$0xff] }
 0x358   : > { %11789 = vst [vmem:[#allocation59_spill] sm:$0xff] %v9162_v25  ;;  %v9167_v20 = vpop.eup %7117  ;;  %v2542_v30 = vpop.xlane.xlu1 %2541  ;;  %v11799_v32 = vmax.f32 %v11797_v58, %v11798_v39 }
 0x359   : > { %11793 = vst [vmem:[#allocation49_spill] sm:$0xff] %v9167_v20  ;;  %7127 = vpow2.f32 %v2713_v31  ;;  %v2619_v26 = vsub.f32 %v11794_v15, %v2542_v30  ;;  %v2620_v62 = vsub.f32 %v11795_v43, %v2542_v30  ;;  %v2816_v55 = vadd.f32 %v9167_v20, %v9162_v25  ;;  %v11801_v15 = vld [vmem:[#allocation64_spill] sm:$0xff]  ;;  %v11802_v30 = vld [vmem:[#allocation66_spill] sm:$0xff]  ;;  %v11805_v20 = vld [vmem:[#allocation81_spill] sm:$0xff] }
 0x35a   : > { %7129 = vpow2.f32 %v2715_v12 }
 0x35b   : > { %v9173_v19 = vpop.eup %7119  ;;  %v2717_v1 = vmul.f32 1.442695, %v2619_v26  ;;  %v2719_v3 = vmul.f32 1.442695, %v2620_v62  ;;  %2817 = vadd.xlane.f32.xlu1 %v2816_v55  ;;  %1648 = vmax.xlane.f32.xlu0 %v11799_v32  ;;  %v11804_v55 = vld [vmem:[#allocation79_spill] sm:$0xff] }
 0x35c   : > { %11796 = vst [vmem:[#allocation50_spill] sm:$0xff] %v9173_v19  ;;  %v9178_v13 = vpop.eup %7121  ;;  %v2545_v31 = vpop.xlane.xlu0 %2544  ;;  %v11806_v32 = vmax.f32 %v11804_v55, %v11805_v20 }
 0x35d   : > { %11800 = vst [vmem:[#allocation52_spill] sm:$0xff] %v9178_v13  ;;  %7131 = vpow2.f32 %v2717_v1  ;;  %v2621_v8 = vsub.f32 %v11801_v15, %v2545_v31  ;;  %v2622_v43 = vsub.f32 %v11802_v30, %v2545_v31  ;;  %v2819_v12 = vadd.f32 %v9178_v13, %v9173_v19  ;;  %v11808_v15 = vld [vmem:[#allocation68_spill] sm:$0xff]  ;;  %v11809_v31 = vld [vmem:[#allocation70_spill] sm:$0xff]  ;;  %v11812_v13 = vld [vmem:[#allocation85_spill] sm:$0xff] }
 0x35e   : > { %7133 = vpow2.f32 %v2719_v3 }
 0x35f   : > { %v9184_v25 = vpop.eup %7123  ;;  %v2721_v26 = vmul.f32 1.442695, %v2621_v8  ;;  %v2723_v62 = vmul.f32 1.442695, %v2622_v43  ;;  %2820 = vadd.xlane.f32.xlu1 %v2819_v12  ;;  %1651 = vmax.xlane.f32.xlu0 %v11806_v32  ;;  %v11811_v12 = vld [vmem:[#allocation83_spill] sm:$0xff] }
 0x360   : > { %11803 = vst [vmem:[#allocation54_spill] sm:$0xff] %v9184_v25  ;;  %v9189_v39 = vpop.eup %7125  ;;  %v2548_v1 = vpop.xlane.xlu1 %2547  ;;  %v11813_v32 = vmax.f32 %v11811_v12, %v11812_v13 }
 0x361   : > { %11807 = vst [vmem:[#allocation56_spill] sm:$0xff] %v9189_v39  ;;  %7135 = vpow2.f32 %v2721_v26  ;;  %v2623_v58 = vsub.f32 %v11808_v15, %v2548_v1  ;;  %v2624_v30 = vsub.f32 %v11809_v31, %v2548_v1  ;;  %v2822_v3 = vadd.f32 %v9189_v39, %v9184_v25  ;;  %v11815_v15 = vld [vmem:[#allocation72_spill] sm:$0xff]  ;;  %v11816_v1 = vld [vmem:[#allocation74_spill] sm:$0xff]  ;;  %v11819_v39 = vld [vmem:[#allocation89_spill] sm:$0xff] }
 0x362   : > { %7137 = vpow2.f32 %v2723_v62 }
 0x363   : > { %v9195_v19 = vpop.eup %7127  ;;  %v2725_v8 = vmul.f32 1.442695, %v2623_v58  ;;  %v2727_v43 = vmul.f32 1.442695, %v2624_v30  ;;  %2823 = vadd.xlane.f32.xlu1 %v2822_v3  ;;  %1654 = vmax.xlane.f32.xlu0 %v11813_v32  ;;  %v11818_v3 = vld [vmem:[#allocation87_spill] sm:$0xff] }
 0x364   : > { %11810 = vst [vmem:[#allocation58_spill] sm:$0xff] %v9195_v19  ;;  %v9200_v20 = vpop.eup %7129  ;;  %v2551_v26 = vpop.xlane.xlu0 %2550  ;;  %v11820_v32 = vmax.f32 %v11818_v3, %v11819_v39 }
 0x365   : > { %11814 = vst [vmem:[#allocation60_spill] sm:$0xff] %v9200_v20  ;;  %7139 = vpow2.f32 %v2725_v8  ;;  %v2625_v55 = vsub.f32 %v11815_v15, %v2551_v26  ;;  %v2626_v31 = vsub.f32 %v11816_v1, %v2551_v26  ;;  %v2825_v62 = vadd.f32 %v9200_v20, %v9195_v19  ;;  %v11822_v15 = vld [vmem:[#allocation76_spill] sm:$0xff]  ;;  %v11823_v26 = vld [vmem:[#allocation78_spill] sm:$0xff]  ;;  %v11826_v20 = vld [vmem:[#allocation93_spill] sm:$0xff] }
 0x366   : > { %7141 = vpow2.f32 %v2727_v43 }
 0x367   : > { %v9206_v25 = vpop.eup %7131  ;;  %v2729_v58 = vmul.f32 1.442695, %v2625_v55  ;;  %v2731_v30 = vmul.f32 1.442695, %v2626_v31  ;;  %2826 = vadd.xlane.f32.xlu1 %v2825_v62  ;;  %1657 = vmax.xlane.f32.xlu0 %v11820_v32  ;;  %v11825_v62 = vld [vmem:[#allocation91_spill] sm:$0xff] }
 0x368   : > { %11817 = vst [vmem:[#allocation62_spill] sm:$0xff] %v9206_v25  ;;  %v9211_v13 = vpop.eup %7133  ;;  %v2554_v8 = vpop.xlane.xlu1 %2553  ;;  %v11827_v32 = vmax.f32 %v11825_v62, %v11826_v20 }
 0x369   : > { %11821 = vst [vmem:[#allocation64_spill] sm:$0xff] %v9211_v13  ;;  %7143 = vpow2.f32 %v2729_v58  ;;  %v2627_v12 = vsub.f32 %v11822_v15, %v2554_v8  ;;  %v2628_v1 = vsub.f32 %v11823_v26, %v2554_v8  ;;  %v2828_v43 = vadd.f32 %v9211_v13, %v9206_v25  ;;  %v11829_v15 = vld [vmem:[#allocation80_spill] sm:$0xff]  ;;  %v11830_v8 = vld [vmem:[#allocation82_spill] sm:$0xff]  ;;  %v11833_v13 = vld [vmem:[#allocation97_spill] sm:$0xff] }
 0x36a   : > { %7145 = vpow2.f32 %v2731_v30 }
 0x36b   : > { %v9217_v19 = vpop.eup %7135  ;;  %v2733_v55 = vmul.f32 1.442695, %v2627_v12  ;;  %v2735_v31 = vmul.f32 1.442695, %v2628_v1  ;;  %2829 = vadd.xlane.f32.xlu1 %v2828_v43  ;;  %1660 = vmax.xlane.f32.xlu0 %v11827_v32  ;;  %v11832_v43 = vld [vmem:[#allocation95_spill] sm:$0xff] }
 0x36c   : > { %11824 = vst [vmem:[#allocation66_spill] sm:$0xff] %v9217_v19  ;;  %v9222_v39 = vpop.eup %7137  ;;  %v2557_v58 = vpop.xlane.xlu0 %2556  ;;  %v11834_v32 = vmax.f32 %v11832_v43, %v11833_v13 }
 0x36d   : > { %11828 = vst [vmem:[#allocation68_spill] sm:$0xff] %v9222_v39  ;;  %7147 = vpow2.f32 %v2733_v55  ;;  %v2629_v3 = vsub.f32 %v11829_v15, %v2557_v58  ;;  %v2630_v26 = vsub.f32 %v11830_v8, %v2557_v58  ;;  %v2831_v30 = vadd.f32 %v9222_v39, %v9217_v19  ;;  %v11836_v15 = vld [vmem:[#allocation84_spill] sm:$0xff]  ;;  %v11837_v58 = vld [vmem:[#allocation86_spill] sm:$0xff]  ;;  %v11840_v39 = vld [vmem:[#allocation101_spill] sm:$0xff] }
 0x36e   : > { %7149 = vpow2.f32 %v2735_v31 }
 0x36f   : > { %v9228_v25 = vpop.eup %7139  ;;  %v2737_v12 = vmul.f32 1.442695, %v2629_v3  ;;  %v2739_v1 = vmul.f32 1.442695, %v2630_v26  ;;  %2832 = vadd.xlane.f32.xlu1 %v2831_v30  ;;  %1663 = vmax.xlane.f32.xlu0 %v11834_v32  ;;  %v11839_v30 = vld [vmem:[#allocation99_spill] sm:$0xff] }
 0x370   : > { %11831 = vst [vmem:[#allocation70_spill] sm:$0xff] %v9228_v25  ;;  %v9233_v20 = vpop.eup %7141  ;;  %v2560_v55 = vpop.xlane.xlu0 %2559  ;;  %v11841_v32 = vmax.f32 %v11839_v30, %v11840_v39 }
 0x371   : > { %11835 = vst [vmem:[#allocation72_spill] sm:$0xff] %v9233_v20  ;;  %7151 = vpow2.f32 %v2737_v12  ;;  %v2631_v62 = vsub.f32 %v11836_v15, %v2560_v55  ;;  %v2632_v8 = vsub.f32 %v11837_v58, %v2560_v55  ;;  %v2834_v31 = vadd.f32 %v9233_v20, %v9228_v25  ;;  %v11843_v15 = vld [vmem:[#allocation88_spill] sm:$0xff]  ;;  %v11844_v55 = vld [vmem:[#allocation90_spill] sm:$0xff]  ;;  %v11847_v20 = vld [vmem:[#allocation105_spill] sm:$0xff] }
 0x372   : > { %7153 = vpow2.f32 %v2739_v1 }
 0x373   : > { %v9239_v19 = vpop.eup %7143  ;;  %v2741_v3 = vmul.f32 1.442695, %v2631_v62  ;;  %v2743_v26 = vmul.f32 1.442695, %v2632_v8  ;;  %2835 = vadd.xlane.f32.xlu1 %v2834_v31  ;;  %1666 = vmax.xlane.f32.xlu0 %v11841_v32  ;;  %v11846_v31 = vld [vmem:[#allocation103_spill] sm:$0xff] }
 0x374   : > { %11838 = vst [vmem:[#allocation74_spill] sm:$0xff] %v9239_v19  ;;  %v9244_v13 = vpop.eup %7145  ;;  %v2563_v12 = vpop.xlane.xlu0 %2562  ;;  %v11848_v32 = vmax.f32 %v11846_v31, %v11847_v20 }
 0x375   : > { %11842 = vst [vmem:[#allocation76_spill] sm:$0xff] %v9244_v13  ;;  %7155 = vpow2.f32 %v2741_v3  ;;  %v2633_v43 = vsub.f32 %v11843_v15, %v2563_v12  ;;  %v2634_v58 = vsub.f32 %v11844_v55, %v2563_v12  ;;  %v2837_v1 = vadd.f32 %v9244_v13, %v9239_v19  ;;  %v11850_v15 = vld [vmem:[#allocation92_spill] sm:$0xff]  ;;  %v11851_v12 = vld [vmem:[#allocation94_spill] sm:$0xff]  ;;  %v11854_v13 = vld [vmem:[#allocation109_spill] sm:$0xff] }
 0x376   : > { %7157 = vpow2.f32 %v2743_v26 }
 0x377   : > { %v9250_v25 = vpop.eup %7147  ;;  %v2745_v62 = vmul.f32 1.442695, %v2633_v43  ;;  %v2747_v8 = vmul.f32 1.442695, %v2634_v58  ;;  %2838 = vadd.xlane.f32.xlu1 %v2837_v1  ;;  %1669 = vmax.xlane.f32.xlu0 %v11848_v32  ;;  %v11853_v1 = vld [vmem:[#allocation107_spill] sm:$0xff] }
 0x378   : > { %11845 = vst [vmem:[#allocation78_spill] sm:$0xff] %v9250_v25  ;;  %v9255_v39 = vpop.eup %7149  ;;  %v2566_v3 = vpop.xlane.xlu0 %2565  ;;  %v11855_v32 = vmax.f32 %v11853_v1, %v11854_v13 }
 0x379   : > { %11849 = vst [vmem:[#allocation80_spill] sm:$0xff] %v9255_v39  ;;  %7159 = vpow2.f32 %v2745_v62  ;;  %v2635_v30 = vsub.f32 %v11850_v15, %v2566_v3  ;;  %v2636_v55 = vsub.f32 %v11851_v12, %v2566_v3  ;;  %v2840_v26 = vadd.f32 %v9255_v39, %v9250_v25  ;;  %v11857_v15 = vld [vmem:[#allocation96_spill] sm:$0xff]  ;;  %v11858_v3 = vld [vmem:[#allocation98_spill] sm:$0xff] }
 0x37a   : > { %7161 = vpow2.f32 %v2747_v8 }
 0x37b   : > { %v9261_v19 = vpop.eup %7151  ;;  %v2749_v43 = vmul.f32 1.442695, %v2635_v30  ;;  %v2751_v58 = vmul.f32 1.442695, %v2636_v55  ;;  %2841 = vadd.xlane.f32.xlu1 %v2840_v26  ;;  %1672 = vmax.xlane.f32.xlu0 %v11855_v32  ;;  %v11860_v26 = vmax.f32 %v8966_v38, %v8970_v49 }
 0x37c   : > { %11852 = vst [vmem:[#allocation82_spill] sm:$0xff] %v9261_v19  ;;  %v9266_v20 = vpop.eup %7153  ;;  %v2569_v62 = vpop.xlane.xlu0 %2568 }
 0x37d   : > { %11856 = vst [vmem:[#allocation84_spill] sm:$0xff] %v9266_v20  ;;  %7163 = vpow2.f32 %v2749_v43  ;;  %v2637_v31 = vsub.f32 %v11857_v15, %v2569_v62  ;;  %v2638_v12 = vsub.f32 %v11858_v3, %v2569_v62  ;;  %v2843_v8 = vadd.f32 %v9266_v20, %v9261_v19  ;;  %v11862_v15 = vld [vmem:[#allocation100_spill] sm:$0xff]  ;;  %v11863_v62 = vld [vmem:[#allocation102_spill] sm:$0xff] }
 0x37e   : > { %7165 = vpow2.f32 %v2751_v58 }
 0x37f   : > { %v9272_v25 = vpop.eup %7155  ;;  %v2753_v30 = vmul.f32 1.442695, %v2637_v31  ;;  %v2755_v55 = vmul.f32 1.442695, %v2638_v12  ;;  %2844 = vadd.xlane.f32.xlu1 %v2843_v8  ;;  %1675 = vmax.xlane.f32.xlu0 %v11860_v26  ;;  %v11865_v8 = vmax.f32 %v8978_v37, %v8982_v53 }
 0x380   : > { %11859 = vst [vmem:[#allocation86_spill] sm:$0xff] %v9272_v25  ;;  %v9277_v32 = vpop.eup %7157  ;;  %v2572_v43 = vpop.xlane.xlu0 %2571 }
 0x381   : > { %11861 = vst [vmem:[#allocation88_spill] sm:$0xff] %v9277_v32  ;;  %7167 = vpow2.f32 %v2753_v30  ;;  %v2639_v39 = vsub.f32 %v11862_v15, %v2572_v43  ;;  %v2640_v3 = vsub.f32 %v11863_v62, %v2572_v43  ;;  %v2846_v58 = vadd.f32 %v9277_v32, %v9272_v25  ;;  %v11867_v15 = vld [vmem:[#allocation104_spill] sm:$0xff]  ;;  %v11868_v43 = vld [vmem:[#allocation106_spill] sm:$0xff] }
 0x382   : > { %7169 = vpow2.f32 %v2755_v55  ;;  %v11871_v32 = vld [vmem:[#allocation108_spill] sm:$0xff] }
 0x383   : > { %v9283_v19 = vpop.eup %7159  ;;  %v2757_v31 = vmul.f32 1.442695, %v2639_v39  ;;  %v2759_v12 = vmul.f32 1.442695, %v2640_v3  ;;  %2847 = vadd.xlane.f32.xlu1 %v2846_v58  ;;  %1678 = vmax.xlane.f32.xlu0 %v11865_v8 }
 0x384   : > { %11864 = vst [vmem:[#allocation90_spill] sm:$0xff] %v9283_v19  ;;  %v9288_v26 = vpop.eup %7161  ;;  %v2575_v30 = vpop.xlane.xlu0 %2574 }
 0x385   : > { %11866 = vst [vmem:[#allocation92_spill] sm:$0xff] %v9288_v26  ;;  %7171 = vpow2.f32 %v2757_v31  ;;  %v2641_v20 = vsub.f32 %v11867_v15, %v2575_v30  ;;  %v2642_v62 = vsub.f32 %v11868_v43, %v2575_v30  ;;  %v2849_v55 = vadd.f32 %v9288_v26, %v9283_v19  ;;  %v11872_v31 = vld [vmem:[#allocation110_spill] sm:$0xff] }
 0x386   : > { %7173 = vpow2.f32 %v2759_v12 }
 0x387   : > { %v9294_v25 = vpop.eup %7163  ;;  %v2761_v39 = vmul.f32 1.442695, %v2641_v20  ;;  %v2763_v3 = vmul.f32 1.442695, %v2642_v62  ;;  %2850 = vadd.xlane.f32.xlu1 %v2849_v55  ;;  %v11874_v55 = vld [vmem:[#allocation111_spill] sm:$0xff] }
 0x388   : > { %11869 = vst [vmem:[#allocation94_spill] sm:$0xff] %v9294_v25  ;;  %v9296_v58 = vpop.eup %7165  ;;  %v2578_v8 = vpop.xlane.xlu0 %2577 }
 0x389   : > { %11870 = vst [vmem:[#allocation107_spill] sm:$0xff] %v9296_v58  ;;  %7175 = vpow2.f32 %v2761_v39  ;;  %v2643_v53 = vsub.f32 %v11871_v32, %v2578_v8  ;;  %v2644_v37 = vsub.f32 %v11872_v31, %v2578_v8  ;;  %v2852_v30 = vadd.f32 %v9296_v58, %v9294_v25  ;;  %v11875_v39 = vld [vmem:[#allocation112_spill] sm:$0xff] }
 0x38a   : > { %7177 = vpow2.f32 %v2763_v3 }
 0x38b   : > { %v9302_v15 = vpop.eup %7167  ;;  %v2765_v12 = vmul.f32 1.442695, %v2643_v53  ;;  %v2767_v43 = vmul.f32 1.442695, %v2644_v37  ;;  %2853 = vadd.xlane.f32.xlu1 %v2852_v30  ;;  %v11876_v30 = vld [vmem:[#allocation114_spill] sm:$0xff] }
 0x38c   : > { %11873 = vst [vmem:[#allocation109_spill] sm:$0xff] %v9302_v15  ;;  %v9304_v20 = vpop.eup %7169  ;;  %v2581_v62 = vpop.xlane.xlu0 %2580 }
 0x38d   : > { %7179 = vpow2.f32 %v2765_v12  ;;  %v2645_v19 = vsub.f32 %v11874_v55, %v2581_v62  ;;  %v2646_v26 = vsub.f32 %v11875_v39, %v2581_v62  ;;  %v2855_v32 = vadd.f32 %v9304_v20, %v9302_v15  ;;  %v11877_v12 = vld [vmem:[#allocation116_spill] sm:$0xff] }
 0x38e   : > { %7181 = vpow2.f32 %v2767_v43 }
 0x38f   : > { %v9310_v8 = vpop.eup %7171  ;;  %v2769_v3 = vmul.f32 1.442695, %v2645_v19  ;;  %v2771_v31 = vmul.f32 1.442695, %v2646_v26  ;;  %2856 = vadd.xlane.f32.xlu1 %v2855_v32 }
 0x390   : > { %v9312_v53 = vpop.eup %7173  ;;  %v2584_v37 = vpop.xlane.xlu0 %2583 }
 0x391   : > { %7183 = vpow2.f32 %v2769_v3  ;;  %v2647_v25 = vsub.f32 %v11876_v30, %v2584_v37  ;;  %v2648_v58 = vsub.f32 %v11877_v12, %v2584_v37  ;;  %v2858_v62 = vadd.f32 %v9312_v53, %v9310_v8  ;;  %v11879_v3 = vld [vmem:[#allocation25_spill] sm:$0xff] }
 0x392   : > { %7185 = vpow2.f32 %v2771_v31 }
 0x393   : > { %v9318_v55 = vpop.eup %7175  ;;  %v2773_v43 = vmul.f32 1.442695, %v2647_v25  ;;  %v2775_v39 = vmul.f32 1.442695, %v2648_v58  ;;  %2859 = vadd.xlane.f32.xlu1 %v2858_v62 }
 0x394   : > { %11878 = vst [vmem:[#allocation96_spill] sm:$0xff] %v9318_v55  ;;  %v9320_v19 = vpop.eup %7177  ;;  %v1586_v26 = vpop.xlane.xlu0 %1585 }
 0x395   : > { %7187 = vpow2.f32 %v2773_v43  ;;  %v1680_v32 = vsub.f32 %v8602_v28, %v1586_v26  ;;  %v1681_v15 = vsub.f32 %v11879_v3, %v1586_v26  ;;  %v2861_v37 = vadd.f32 %v9320_v19, %v9318_v55 }
 0x396   : > { %7189 = vpow2.f32 %v2775_v39 }
 0x397   : > { %v9326_v30 = vpop.eup %7179  ;;  %v1744_v31 = vmul.f32 1.442695, %v1680_v32  ;;  %v1746_v12 = vmul.f32 1.442695, %v1681_v15  ;;  %2862 = vadd.xlane.f32.xlu1 %v2861_v37 }
 0x398   : > { %11880 = vst [vmem:[#allocation98_spill] sm:$0xff] %v9326_v30  ;;  %v9328_v25 = vpop.eup %7181  ;;  %v1589_v58 = vpop.xlane.xlu0 %1588 }
 0x399   : > { %7191 = vpow2.f32 %v1744_v31  ;;  %v1682_v62 = vsub.f32 %v8618_v29, %v1589_v58  ;;  %v1683_v43 = vsub.f32 %v8622_v50, %v1589_v58  ;;  %v2864_v28 = vadd.f32 %v9328_v25, %v9326_v30  ;;  %v11881_v31 = vld [vmem:[#allocation27_spill] sm:$0xff] }
 0x39a   : > { %7193 = vpow2.f32 %v1746_v12 }
 0x39b   : > { %v9334_v26 = vpop.eup %7183  ;;  %v1748_v39 = vmul.f32 1.442695, %v1682_v62  ;;  %v1750_v3 = vmul.f32 1.442695, %v1683_v43  ;;  %2865 = vadd.xlane.f32.xlu1 %v2864_v28 }
 0x39c   : > { %v9336_v32 = vpop.eup %7185  ;;  %v1592_v15 = vpop.xlane.xlu0 %1591 }
 0x39d   : > { %7195 = vpow2.f32 %v1748_v39  ;;  %v1684_v37 = vsub.f32 %v8630_v51, %v1592_v15  ;;  %v1685_v55 = vsub.f32 %v11881_v31, %v1592_v15  ;;  %v2867_v29 = vadd.f32 %v9336_v32, %v9334_v26  ;;  %v11882_v39 = vld [vmem:[#allocation31_spill] sm:$0xff] }
 0x39e   : > { %7197 = vpow2.f32 %v1750_v3 }
 0x39f   : > { %v9342_v50 = vpop.eup %7187  ;;  %v1752_v12 = vmul.f32 1.442695, %v1684_v37  ;;  %v1754_v58 = vmul.f32 1.442695, %v1685_v55  ;;  %2868 = vadd.xlane.f32.xlu1 %v2867_v29 }
 0x3a0   : > { %v9344_v62 = vpop.eup %7189  ;;  %v1595_v43 = vpop.xlane.xlu0 %1594 }
 0x3a1   : > { %7199 = vpow2.f32 %v1752_v12  ;;  %v1686_v28 = vsub.f32 %v8642_v56, %v1595_v43  ;;  %v1687_v30 = vsub.f32 %v11882_v39, %v1595_v43  ;;  %v2870_v51 = vadd.f32 %v9344_v62, %v9342_v50 }
 0x3a2   : > { %7201 = vpow2.f32 %v1754_v58 }
 0x3a3   : > { %v9350_v15 = vpop.eup %7191  ;;  %v1756_v3 = vmul.f32 1.442695, %v1686_v28  ;;  %v1758_v31 = vmul.f32 1.442695, %v1687_v30  ;;  %2871 = vadd.xlane.f32.xlu1 %v2870_v51 }
 0x3a4   : > { %v9352_v37 = vpop.eup %7193  ;;  %v1598_v55 = vpop.xlane.xlu0 %1597 }
 0x3a5   : > { %7203 = vpow2.f32 %v1756_v3  ;;  %v1688_v29 = vsub.f32 %v8654_v57, %v1598_v55  ;;  %v1689_v12 = vsub.f32 %v8658_v59, %v1598_v55  ;;  %v1872_v56 = vadd.f32 %v9352_v37, %v9350_v15 }
 0x3a6   : > { %7205 = vpow2.f32 %v1758_v31 }
 0x3a7   : > { %v9358_v43 = vpop.eup %7195  ;;  %v1760_v58 = vmul.f32 1.442695, %v1688_v29  ;;  %v1762_v39 = vmul.f32 1.442695, %v1689_v12  ;;  %1873 = vadd.xlane.f32.xlu1 %v1872_v56 }
 0x3a8   : > { %v9360_v28 = vpop.eup %7197  ;;  %v1601_v30 = vpop.xlane.xlu0 %1600 }
 0x3a9   : > { %7207 = vpow2.f32 %v1760_v58  ;;  %v1690_v51 = vsub.f32 %v8666_v45, %v1601_v30  ;;  %v1691_v3 = vsub.f32 %v8670_v61, %v1601_v30  ;;  %v1875_v57 = vadd.f32 %v9360_v28, %v9358_v43 }
 0x3aa   : > { %7209 = vpow2.f32 %v1762_v39 }
 0x3ab   : > { %v9366_v59 = vpop.eup %7199  ;;  %v1764_v31 = vmul.f32 1.442695, %v1690_v51  ;;  %v1766_v55 = vmul.f32 1.442695, %v1691_v3  ;;  %1876 = vadd.xlane.f32.xlu1 %v1875_v57 }
 0x3ac   : > { %v9368_v29 = vpop.eup %7201  ;;  %v1604_v12 = vpop.xlane.xlu0 %1603 }
 0x3ad   : > { %7211 = vpow2.f32 %v1764_v31  ;;  %v1692_v56 = vsub.f32 %v8678_v47, %v1604_v12  ;;  %v1693_v58 = vsub.f32 %v8682_v11, %v1604_v12  ;;  %v1878_v45 = vadd.f32 %v9368_v29, %v9366_v59 }
 0x3ae   : > { %7213 = vpow2.f32 %v1766_v55 }
 0x3af   : > { %v9374_v61 = vpop.eup %7203  ;;  %v1768_v39 = vmul.f32 1.442695, %v1692_v56  ;;  %v1770_v30 = vmul.f32 1.442695, %v1693_v58  ;;  %1879 = vadd.xlane.f32.xlu1 %v1878_v45 }
 0x3b0   : > { %11883 = vst [vmem:[#allocation100_spill] sm:$0xff] %v9374_v61  ;;  %v9376_v51 = vpop.eup %7205  ;;  %v1607_v3 = vpop.xlane.xlu0 %1606 }
 0x3b1   : > { %7215 = vpow2.f32 %v1768_v39  ;;  %v1694_v57 = vsub.f32 %v8690_v0, %v1607_v3  ;;  %v1695_v31 = vsub.f32 %v8694_v27, %v1607_v3  ;;  %v1881_v47 = vadd.f32 %v9376_v51, %v9374_v61 }
 0x3b2   : > { %7217 = vpow2.f32 %v1770_v30 }
 0x3b3   : > { %v9382_v11 = vpop.eup %7207  ;;  %v1772_v55 = vmul.f32 1.442695, %v1694_v57  ;;  %v1774_v12 = vmul.f32 1.442695, %v1695_v31  ;;  %1882 = vadd.xlane.f32.xlu1 %v1881_v47 }
 0x3b4   : > { %11884 = vst [vmem:[#allocation102_spill] sm:$0xff] %v9382_v11  ;;  %v9384_v56 = vpop.eup %7209  ;;  %v2779_v58 = vpop.xlane.xlu1 %2778 }
 0x3b5   : > { %v1610_v45 = vpop.xlane.xlu0 %1609  ;;  %7219 = vpow2.f32 %v1772_v55  ;;  %v1884_v27 = vadd.f32 %v9384_v56, %v9382_v11 }
 0x3b6   : > { %v1696_v39 = vsub.f32 %v8702_v44, %v1610_v45  ;;  %v1697_v0 = vsub.f32 %v8706_v10, %v1610_v45  ;;  %7221 = vpow2.f32 %v1774_v12 }
 0x3b7   : > { %v9390_v3 = vpop.eup %7211  ;;  %7223 = vrcp.f32 %v2779_v58  ;;  %1885 = vadd.xlane.f32.xlu1 %v1884_v27 }
 0x3b8   : > { %11885 = vst [vmem:[#allocation104_spill] sm:$0xff] %v9390_v3  ;;  %v1776_v30 = vmul.f32 1.442695, %v1696_v39  ;;  %v1778_v57 = vmul.f32 1.442695, %v1697_v0  ;;  %v9392_v31 = vpop.eup %7213  ;;  %v2782_v47 = vpop.xlane.xlu1 %2781 }
 0x3b9   : > { %11886 = vst [vmem:[#allocation106_spill] sm:$0xff] %v9392_v31  ;;  %v1613_v61 = vpop.xlane.xlu0 %1612  ;;  %v1887_v10 = vadd.f32 %v9392_v31, %v9390_v3 }
 0x3ba   : > { %7225 = vpow2.f32 %v1776_v30  ;;  %v1698_v55 = vsub.f32 %v8714_v54, %v1613_v61  ;;  %v1699_v44 = vsub.f32 %v8718_v14, %v1613_v61 }
 0x3bb   : > { %7227 = vpow2.f32 %v1778_v57  ;;  %v9398_v12 = vpop.eup %7215  ;;  %1888 = vadd.xlane.f32.xlu1 %v1887_v10 }
 0x3bc   : > { %11887 = vst [vmem:[#allocation108_spill] sm:$0xff] %v9398_v12  ;;  %7229 = vrcp.f32 %v2782_v47  ;;  %v1780_v45 = vmul.f32 1.442695, %v1698_v55  ;;  %v1782_v39 = vmul.f32 1.442695, %v1699_v44  ;;  %v9400_v0 = vpop.eup %7217  ;;  %v2785_v27 = vpop.xlane.xlu1 %2784 }
 0x3bd   : > { %11888 = vst [vmem:[#allocation110_spill] sm:$0xff] %v9400_v0  ;;  %v1616_v11 = vpop.xlane.xlu0 %1615  ;;  %v1890_v14 = vadd.f32 %v9400_v0, %v9398_v12 }
 0x3be   : > { %7231 = vpow2.f32 %v1780_v45  ;;  %v1700_v30 = vsub.f32 %v8726_v16, %v1616_v11  ;;  %v1701_v54 = vsub.f32 %v8730_v17, %v1616_v11 }
 0x3bf   : > { %7233 = vpow2.f32 %v1782_v39  ;;  %v9406_v61 = vpop.eup %7219  ;;  %1891 = vadd.xlane.f32.xlu1 %v1890_v14 }
 0x3c0   : > { %11889 = vst [vmem:[#allocation111_spill] sm:$0xff] %v9406_v61  ;;  %7235 = vrcp.f32 %v2785_v27  ;;  %v1784_v57 = vmul.f32 1.442695, %v1700_v30  ;;  %v1786_v55 = vmul.f32 1.442695, %v1701_v54  ;;  %v9408_v44 = vpop.eup %7221  ;;  %v9410_v10 = vpop.xlane.xlu1 %2787 }
 0x3c1   : > { %11890 = vst [vmem:[#allocation112_spill] sm:$0xff] %v9408_v44  ;;  %v1619_v3 = vpop.xlane.xlu0 %1618  ;;  %v7224_v45 = vpop.eup %7223  ;;  %v1893_v11 = vadd.f32 %v9408_v44, %v9406_v61 }
 0x3c2   : > { %7237 = vpow2.f32 %v1784_v57  ;;  %v1702_v16 = vsub.f32 %v8738_v35, %v1619_v3  ;;  %v1703_v17 = vsub.f32 %v8742_v2, %v1619_v3  ;;  %v2905_v39 = vmul.f32 %v7224_v45, %v2779_v58 }
 0x3c3   : > { %7239 = vpow2.f32 %v1786_v55  ;;  %1894 = vadd.xlane.f32.xlu1 %v1893_v11 }
 0x3c4   : > { %v9416_v12 = vpop.eup %7225  ;;  %7241 = vrcp.f32 %v9410_v10  ;;  %v1788_v30 = vmul.f32 1.442695, %v1702_v16  ;;  %v1790_v54 = vmul.f32 1.442695, %v1703_v17  ;;  %v2937_v0 = vsub.f32 2.0, %v2905_v39  ;;  %v9421_v57 = vpop.xlane.xlu1 %2790 }
 0x3c5   : > { %v9419_v14 = vpop.eup %7227  ;;  %v1622_v35 = vpop.xlane.xlu0 %1621 }
 0x3c6   : > { %v7230_v31 = vpop.eup %7229  ;;  %7243 = vpow2.f32 %v1788_v30  ;;  %v1704_v2 = vsub.f32 %v8750_v41, %v1622_v35  ;;  %v1705_v58 = vsub.f32 %v8754_v33, %v1622_v35  ;;  %v1896_v3 = vadd.f32 %v9419_v14, %v9416_v12 }
 0x3c7   : > { %v2906_v55 = vmul.f32 %v7230_v31, %v2782_v47  ;;  %7245 = vpow2.f32 %v1790_v54  ;;  %v2969_v16 = vmul.f32 %v7224_v45, %v2937_v0 }
 0x3c8   : > { %v9427_v17 = vpop.eup %7231  ;;  %7247 = vrcp.f32 %v9421_v57  ;;  %v1792_v11 = vmul.f32 1.442695, %v1704_v2  ;;  %v1794_v39 = vmul.f32 1.442695, %v1705_v58  ;;  %1897 = vadd.xlane.f32.xlu1 %v1896_v3  ;;  %v9432_v44 = vpop.xlane.xlu1 %2793 }
 0x3c9   : > { %v9430_v61 = vpop.eup %7233  ;;  %v2938_v30 = vsub.f32 2.0, %v2906_v55  ;;  %v3001_v41 = vmul.f32 %v9019_v21, %v2969_v16  ;;  %v3002_v33 = vmul.f32 %v9024_v60, %v2969_v16  ;;  %v1625_v35 = vpop.xlane.xlu0 %1624  ;;  %v11891_v16 = vld [vmem:[#allocation8_spill] sm:$0xff] }
 0x3ca   : > { %v7236_v47 = vpop.eup %7235  ;;  %7249 = vpow2.f32 %v1792_v11  ;;  %v1706_v0 = vsub.f32 %v8762_v42, %v1625_v35  ;;  %v1707_v45 = vsub.f32 %v8766_v7, %v1625_v35  ;;  %v1899_v54 = vadd.f32 %v9430_v61, %v9427_v17  ;;  %v11892_v7 = vld [vmem:[#allocation9_spill] sm:$0xff] }
 0x3cb   : > { %v2907_v2 = vmul.f32 %v7236_v47, %v2785_v27  ;;  %7251 = vpow2.f32 %v1794_v39  ;;  %3161 = vmatprep.mubr.f32.mxu1 %v3002_v33  ;;  %v2970_v58 = vmul.f32 %v7230_v31, %v2938_v30  ;;  %v11893_v11 = vpack.c.bf16 %v11891_v16, %v11892_v7  ;;  %v11896_v16 = vld [vmem:[#allocation11_spill] sm:$0xff] }
 0x3cc   : > { %v9440_v3 = vpop.eup %7237  ;;  %7253 = vrcp.f32 %v9432_v44  ;;  %3162 = vmatmul.mubr.f32.vlgmr.msra.gmra.mrb[96].mxu1 %v3001_v41  ;;  %v1796_v21 = vmul.f32 1.442695, %v1706_v0  ;;  %v1798_v60 = vmul.f32 1.442695, %v1707_v45  ;;  %1900 = vadd.xlane.f32.xlu1 %v1899_v54  ;;  %v9448_v35 = vpop.xlane.xlu1 %2796  ;;  %v11894_v41 = vmov 0.0|0.0  }
 0x3cd   : > { %v9443_v55 = vpop.eup %7239  ;;  %v2939_v42 = vsub.f32 2.0, %v2907_v2  ;;  %6814 = vmatpush1.bf16.msra.mxu1 %v11893_v11  ;;  %v3004_v27 = vmul.f32 %v9035_v63, %v2970_v58  ;;  %v3003_v31 = vmul.f32 %v9030_v18, %v2970_v58  ;;  %v1628_v39 = vpop.xlane.xlu0 %1627 }
 0x3ce   : > { %v7242_v30 = vpop.eup %7241  ;;  %7255 = vpow2.f32 %v1796_v21  ;;  %6815 = vmatprep.subr.bf16.mxu1 %v11894_v41  ;;  %v1708_v33 = vsub.f32 %v8774_v36, %v1628_v39  ;;  %v1709_v0 = vsub.f32 %v8778_v48, %v1628_v39  ;;  %v1902_v45 = vadd.f32 %v9443_v55, %v9440_v3  ;;  %v11895_v48 = vld [vmem:[#allocation10_spill] sm:$0xff] }
 0x3cf   : > { %v2908_v54 = vmul.f32 %v7242_v30, %v9410_v10  ;;  %7257 = vpow2.f32 %v1798_v60  ;;  %3166 = vmatprep.mubr.f32.mxu1 %v3004_v27  ;;  %v2971_v2 = vmul.f32 %v7236_v47, %v2939_v42  ;;  %v11897_v7 = vpack.c.bf16 %v11895_v48, %v11896_v16 }
 0x3d0   : > { %v9458_v63 = vpop.eup %7243  ;;  %7259 = vrcp.f32 %v9448_v35  ;;  %3167 = vmatmul.mubr.f32.gmra.mrb[98].mxu1 %v3003_v31  ;;  %v1800_v18 = vmul.f32 1.442695, %v1708_v33  ;;  %v1802_v58 = vmul.f32 1.442695, %v1709_v0  ;;  %1903 = vadd.xlane.f32.xlu0 %v1902_v45  ;;  %v9466_v11 = vpop.xlane.xlu1 %2799 }
 0x3d1   : > { %v9461_v21 = vpop.eup %7245  ;;  %v2940_v36 = vsub.f32 2.0, %v2908_v54  ;;  %6817 = vmatpush1.bf16.msra.mxu1 %v11897_v7  ;;  %v3006_v10 = vmul.f32 %v9046_v6, %v2971_v2  ;;  %v3005_v47 = vmul.f32 %v9041_v46, %v2971_v2  ;;  %v1631_v60 = vpop.xlane.xlu0 %1630  ;;  %v11899_v2 = vld [vmem:[#allocation13_spill] sm:$0xff] }
 0x3d2   : > { %v7248_v42 = vpop.eup %7247  ;;  %7261 = vpow2.f32 %v1800_v18  ;;  %6818 = vmatprep.subr.bf16.mxu1 %v11894_v41  ;;  %v1710_v27 = vsub.f32 %v11755_v4, %v1631_v60  ;;  %v1711_v31 = vsub.f32 %v11756_v24, %v1631_v60  ;;  %v1905_v39 = vadd.f32 %v9461_v21, %v9458_v63  ;;  %v11898_v24 = vld [vmem:[#allocation12_spill] sm:$0xff] }
 0x3d3   : > { %v2909_v33 = vmul.f32 %v7248_v42, %v9421_v57  ;;  %7263 = vpow2.f32 %v1802_v58  ;;  %3171 = vmatprep.mubr.f32.mxu1 %v3006_v10  ;;  %v2972_v0 = vmul.f32 %v7242_v30, %v2940_v36  ;;  %v11900_v18 = vpack.c.bf16 %v11898_v24, %v11899_v2  ;;  %v11904_v24 = vld [vmem:[#allocation61_spill] sm:$0xff] }
 0x3d4   : > { %v9476_v6 = vpop.eup %7249  ;;  %7265 = vrcp.f32 %v9466_v11  ;;  %3172 = vmatmul.mubr.f32.gmra.mrb[100].mxu1 %v3005_v47  ;;  %v1804_v46 = vmul.f32 1.442695, %v1710_v27  ;;  %v1806_v45 = vmul.f32 1.442695, %v1711_v31  ;;  %1906 = vadd.xlane.f32.xlu1 %v1905_v39  ;;  %v9484_v48 = vpop.xlane.xlu1 %2802  ;;  %v11902_v39 = vld [vmem:[#allocation15_spill] sm:$0xff] }
 0x3d5   : > { %v9479_v54 = vpop.eup %7251  ;;  %v2941_v4 = vsub.f32 2.0, %v2909_v33  ;;  %6820 = vmatpush1.bf16.msra.mxu1 %v11900_v18  ;;  %v3008_v57 = vmul.f32 %v9057_v40, %v2972_v0  ;;  %v3007_v30 = vmul.f32 %v9052_v34, %v2972_v0  ;;  %v1634_v58 = vpop.xlane.xlu0 %1633 }
 0x3d6   : > { %v7254_v36 = vpop.eup %7253  ;;  %7267 = vpow2.f32 %v1804_v46  ;;  %6821 = vmatprep.subr.bf16.mxu1 %v11894_v41  ;;  %v1712_v16 = vsub.f32 %v11762_v23, %v1634_v58  ;;  %v1713_v7 = vsub.f32 %v11763_v9, %v1634_v58  ;;  %v1908_v10 = vadd.f32 %v9479_v54, %v9476_v6  ;;  %v11901_v9 = vld [vmem:[#allocation14_spill] sm:$0xff] }
 0x3d7   : > { %v2910_v47 = vmul.f32 %v7254_v36, %v9432_v44  ;;  %7269 = vpow2.f32 %v1806_v45  ;;  %3176 = vmatprep.mubr.f32.mxu1 %v3008_v57  ;;  %v2973_v60 = vmul.f32 %v7248_v42, %v2941_v4  ;;  %v11903_v33 = vpack.c.bf16 %v11901_v9, %v11902_v39  ;;  %v11910_v39 = vld [vmem:[#allocation63_spill] sm:$0xff] }
 0x3d8   : > { %v9494_v40 = vpop.eup %7255  ;;  %7271 = vrcp.f32 %v9484_v48  ;;  %3177 = vmatmul.mubr.f32.gmra.mrb[102].mxu1 %v3007_v30  ;;  %v1808_v34 = vmul.f32 1.442695, %v1712_v16  ;;  %v1810_v27 = vmul.f32 1.442695, %v1713_v7  ;;  %1909 = vadd.xlane.f32.xlu0 %v1908_v10  ;;  %v9502_v0 = vpop.xlane.xlu1 %2805  ;;  %v11905_v7 = vld [vmem:[#allocation16_spill] sm:$0xff]  ;;  %v11906_v10 = vld [vmem:[#allocation17_spill] sm:$0xff] }
 0x3d9   : > { %v9497_v31 = vpop.eup %7257  ;;  %v2942_v23 = vsub.f32 2.0, %v2910_v47  ;;  %6823 = vmatpush1.bf16.msra.mxu1 %v11903_v33  ;;  %v3010_v44 = vmul.f32 %v9068_v5, %v2973_v60  ;;  %v3009_v42 = vmul.f32 %v9063_v22, %v2973_v60  ;;  %v1637_v46 = vpop.xlane.xlu0 %1636  ;;  %v11907_v47 = vpack.c.bf16 %v11905_v7, %v11906_v10  ;;  %v11912_v7 = vld [vmem:[#allocation18_spill] sm:$0xff]  ;;  %v11913_v10 = vld [vmem:[#allocation19_spill] sm:$0xff] }
 0x3da   : > { %v7260_v45 = vpop.eup %7259  ;;  %7273 = vpow2.f32 %v1808_v34  ;;  %6824 = vmatprep.subr.bf16.mxu1 %v11894_v41  ;;  %v1714_v4 = vsub.f32 %v11769_v52, %v1637_v46  ;;  %v1715_v2 = vsub.f32 %v11904_v24, %v1637_v46  ;;  %v1911_v18 = vadd.f32 %v9497_v31, %v9494_v40 }
 0x3db   : > { %v2911_v57 = vmul.f32 %v7260_v45, %v9448_v35  ;;  %7275 = vpow2.f32 %v1810_v27  ;;  %3181 = vmatprep.mubr.f32.mxu1 %v3010_v44  ;;  %v2974_v30 = vmul.f32 %v7254_v36, %v2942_v23  ;;  %v11908_v35 = vld [vmem:[#allocation118_spill] sm:$0xff]  ;;  %v11909_v36 = vld [vmem:[#allocation117_spill] sm:$0xff] }
 0x3dc   : > { %v9512_v5 = vpop.eup %7261  ;;  %7277 = vrcp.f32 %v9502_v0  ;;  %3182 = vmatmul.mubr.f32.gmra.mrb[104].mxu1 %v3009_v42  ;;  %v1812_v22 = vmul.f32 1.442695, %v1714_v4  ;;  %v1814_v58 = vmul.f32 1.442695, %v1715_v2  ;;  %1912 = vadd.xlane.f32.xlu1 %v1911_v18  ;;  %v9520_v60 = vpop.xlane.xlu1 %2808  ;;  %v11911_v44 = vld [vmem:[#allocation65_spill] sm:$0xff] }
 0x3dd   : > { %v9515_v16 = vpop.eup %7263  ;;  %v2943_v52 = vsub.f32 2.0, %v2911_v57  ;;  %6826 = vmatpush1.bf16.msra.mxu1 %v11907_v47  ;;  %v3012_v34 = vmul.f32 %v11908_v35, %v2974_v30  ;;  %v3011_v27 = vmul.f32 %v11909_v36, %v2974_v30  ;;  %v1640_v23 = vpop.xlane.xlu0 %1639  ;;  %v11914_v47 = vpack.c.bf16 %v11912_v7, %v11913_v10 }
 0x3de   : > { %v7266_v9 = vpop.eup %7265  ;;  %7279 = vpow2.f32 %v1812_v22  ;;  %6827 = vmatprep.subr.bf16.mxu1 %v11894_v41  ;;  %v1716_v33 = vsub.f32 %v11910_v39, %v1640_v23  ;;  %v1717_v42 = vsub.f32 %v11911_v44, %v1640_v23  ;;  %v1914_v46 = vadd.f32 %v9515_v16, %v9512_v5  ;;  %v11918_v39 = vld [vmem:[#allocation69_spill] sm:$0xff] }
 0x3df   : > { %v2912_v4 = vmul.f32 %v7266_v9, %v9466_v11  ;;  %7281 = vpow2.f32 %v1814_v58  ;;  %3186 = vmatprep.mubr.f32.mxu1 %v3012_v34  ;;  %v2975_v24 = vmul.f32 %v7260_v45, %v2943_v52  ;;  %v11915_v11 = vld [vmem:[#allocation120_spill] sm:$0xff]  ;;  %v11916_v45 = vld [vmem:[#allocation119_spill] sm:$0xff] }
 0x3e0   : > { %v9530_v2 = vpop.eup %7267  ;;  %7283 = vrcp.f32 %v9520_v60  ;;  %3187 = vmatmul.mubr.f32.gmra.mrb[106].mxu1 %v3011_v27  ;;  %v1816_v18 = vmul.f32 1.442695, %v1716_v33  ;;  %v1818_v57 = vmul.f32 1.442695, %v1717_v42  ;;  %1915 = vadd.xlane.f32.xlu0 %v1914_v46  ;;  %v9538_v35 = vpop.xlane.xlu1 %2811  ;;  %v11917_v27 = vld [vmem:[#allocation67_spill] sm:$0xff] }
 0x3e1   : > { %v9533_v30 = vpop.eup %7269  ;;  %v2944_v22 = vsub.f32 2.0, %v2912_v4  ;;  %6829 = vmatpush1.bf16.msra.mxu1 %v11914_v47  ;;  %v3014_v58 = vmul.f32 %v11915_v11, %v2975_v24  ;;  %v3013_v52 = vmul.f32 %v11916_v45, %v2975_v24  ;;  %v1643_v34 = vpop.xlane.xlu0 %1642  ;;  %v11920_v47 = vld [vmem:[#allocation20_spill] sm:$0xff]  ;;  %v11921_v11 = vld [vmem:[#allocation21_spill] sm:$0xff] }
 0x3e2   : > { %v7272_v36 = vpop.eup %7271  ;;  %7285 = vpow2.f32 %v1816_v18  ;;  %6830 = vmatprep.subr.bf16.mxu1 %v11894_v41  ;;  %v1718_v23 = vsub.f32 %v11917_v27, %v1643_v34  ;;  %v1719_v33 = vsub.f32 %v11918_v39, %v1643_v34  ;;  %v1917_v44 = vadd.f32 %v9533_v30, %v9530_v2  ;;  %v11926_v39 = vld [vmem:[#allocation73_spill] sm:$0xff] }
 0x3e3   : > { %v2913_v42 = vmul.f32 %v7272_v36, %v9484_v48  ;;  %7287 = vpow2.f32 %v1818_v57  ;;  %3191 = vmatprep.mubr.f32.mxu1 %v3014_v58  ;;  %v2976_v46 = vmul.f32 %v7266_v9, %v2944_v22  ;;  %v11922_v45 = vpack.c.bf16 %v11920_v47, %v11921_v11  ;;  %v11923_v48 = vld [vmem:[#allocation122_spill] sm:$0xff]  ;;  %v11924_v9 = vld [vmem:[#allocation121_spill] sm:$0xff] }
 0x3e4   : > { %v9548_v4 = vpop.eup %7273  ;;  %7289 = vrcp.f32 %v9538_v35  ;;  %3192 = vmatmul.mubr.f32.gmra.mrb[108].mxu1 %v3013_v52  ;;  %v1820_v24 = vmul.f32 1.442695, %v1718_v23  ;;  %v1822_v18 = vmul.f32 1.442695, %v1719_v33  ;;  %1918 = vadd.xlane.f32.xlu1 %v1917_v44  ;;  %v9556_v34 = vpop.xlane.xlu1 %2814  ;;  %v11925_v52 = vld [vmem:[#allocation71_spill] sm:$0xff] }
 0x3e5   : > { %11919 = vst [vmem:[#allocation114_spill] sm:$0xff] %v9548_v4  ;;  %v9551_v7 = vpop.eup %7275  ;;  %v2945_v10 = vsub.f32 2.0, %v2913_v42  ;;  %6832 = vmatpush1.bf16.msra.mxu1 %v11922_v45  ;;  %v3016_v57 = vmul.f32 %v11923_v48, %v2976_v46  ;;  %v3015_v22 = vmul.f32 %v11924_v9, %v2976_v46  ;;  %v1646_v58 = vpop.xlane.xlu0 %1645  ;;  %v11929_v9 = vld [vmem:[#allocation22_spill] sm:$0xff] }
 0x3e6   : > { %v7278_v27 = vpop.eup %7277  ;;  %7291 = vpow2.f32 %v1820_v24  ;;  %6833 = vmatprep.subr.bf16.mxu1 %v11894_v41  ;;  %v1720_v23 = vsub.f32 %v11925_v52, %v1646_v58  ;;  %v1721_v33 = vsub.f32 %v11926_v39, %v1646_v58  ;;  %v1920_v44 = vadd.f32 %v9551_v7, %v9548_v4  ;;  %v11930_v58 = vld [vmem:[#allocation23_spill] sm:$0xff] }
 0x3e7   : > { %v2914_v42 = vmul.f32 %v7278_v27, %v9502_v0  ;;  %7293 = vpow2.f32 %v1822_v18  ;;  %3196 = vmatprep.mubr.f32.mxu1 %v3016_v57  ;;  %v2977_v47 = vmul.f32 %v7272_v36, %v2945_v10  ;;  %v11931_v52 = vpack.c.bf16 %v11929_v9, %v11930_v58  ;;  %v11932_v0 = vld [vmem:[#allocation36_spill] sm:$0xff]  ;;  %v11933_v36 = vld [vmem:[#allocation33_spill] sm:$0xff] }
 0x3e8   : > { %v9566_v11 = vpop.eup %7279  ;;  %7295 = vrcp.f32 %v9556_v34  ;;  %3197 = vmatmul.mubr.f32.gmra.mrb[110].mxu1 %v3015_v22  ;;  %v1824_v46 = vmul.f32 1.442695, %v1720_v23  ;;  %v1826_v24 = vmul.f32 1.442695, %v1721_v33  ;;  %1921 = vadd.xlane.f32.xlu0 %v1920_v44  ;;  %v9574_v39 = vpop.xlane.xlu1 %2817  ;;  %v11934_v22 = vld [vmem:[#allocation75_spill] sm:$0xff]  ;;  %v11935_v33 = vld [vmem:[#allocation77_spill] sm:$0xff] }
 0x3e9   : > { %11927 = vst [vmem:[#allocation116_spill] sm:$0xff] %v9566_v11  ;;  %v9569_v45 = vpop.eup %7281  ;;  %v2946_v48 = vsub.f32 2.0, %v2914_v42  ;;  %6835 = vmatpush1.bf16.msra.mxu1 %v11931_v52  ;;  %v3018_v18 = vmul.f32 %v11932_v0, %v2977_v47  ;;  %v3017_v10 = vmul.f32 %v11933_v36, %v2977_v47  ;;  %v1649_v57 = vpop.xlane.xlu0 %1648 }
 0x3ea   : > { %11928 = vst [vmem:[#allocation25_spill] sm:$0xff] %v9569_v45  ;;  %v7284_v4 = vpop.eup %7283  ;;  %7297 = vpow2.f32 %v1824_v46  ;;  %6836 = vmatprep.subr.bf16.mxu1 %v11894_v41  ;;  %v1722_v23 = vsub.f32 %v11934_v22, %v1649_v57  ;;  %v1723_v44 = vsub.f32 %v11935_v33, %v1649_v57  ;;  %v1923_v42 = vadd.f32 %v9569_v45, %v9566_v11  ;;  %v11938_v57 = vld [vmem:[#allocation24_spill] sm:$0xff]  ;;  %v11939_v22 = vld [vmem:[#allocation26_spill] sm:$0xff] }
 0x3eb   : > { %v2915_v9 = vmul.f32 %v7284_v4, %v9520_v60  ;;  %7299 = vpow2.f32 %v1826_v24  ;;  %3201 = vmatprep.mubr.f32.mxu1 %v3018_v18  ;;  %v2978_v58 = vmul.f32 %v7278_v27, %v2946_v48  ;;  %v11940_v33 = vpack.c.bf16 %v11938_v57, %v11939_v22  ;;  %v11941_v60 = vld [vmem:[#allocation53_spill] sm:$0xff]  ;;  %v11942_v27 = vld [vmem:[#allocation51_spill] sm:$0xff] }
 0x3ec   : > { %v9584_v52 = vpop.eup %7285  ;;  %7301 = vrcp.f32 %v9574_v39  ;;  %3202 = vmatmul.mubr.f32.gmra.mrb[112].mxu1 %v3017_v10  ;;  %v1828_v47 = vmul.f32 1.442695, %v1722_v23  ;;  %v1830_v46 = vmul.f32 1.442695, %v1723_v44  ;;  %1924 = vadd.xlane.f32.xlu1 %v1923_v42  ;;  %v9592_v11 = vpop.xlane.xlu1 %2820  ;;  %v11943_v10 = vld [vmem:[#allocation79_spill] sm:$0xff]  ;;  %v11944_v44 = vld [vmem:[#allocation81_spill] sm:$0xff] }
 0x3ed   : > { %11936 = vst [vmem:[#allocation27_spill] sm:$0xff] %v9584_v52  ;;  %v9587_v0 = vpop.eup %7287  ;;  %v2947_v36 = vsub.f32 2.0, %v2915_v9  ;;  %6838 = vmatpush1.bf16.msra.mxu1 %v11940_v33  ;;  %v3020_v24 = vmul.f32 %v11941_v60, %v2978_v58  ;;  %v3019_v48 = vmul.f32 %v11942_v27, %v2978_v58  ;;  %v1652_v18 = vpop.xlane.xlu0 %1651 }
 0x3ee   : > { %11937 = vst [vmem:[#allocation31_spill] sm:$0xff] %v9587_v0  ;;  %v7290_v45 = vpop.eup %7289  ;;  %7303 = vpow2.f32 %v1828_v47  ;;  %6839 = vmatprep.subr.bf16.mxu1 %v11894_v41  ;;  %v1724_v23 = vsub.f32 %v11943_v10, %v1652_v18  ;;  %v1725_v42 = vsub.f32 %v11944_v44, %v1652_v18  ;;  %v1926_v9 = vadd.f32 %v9587_v0, %v9584_v52  ;;  %v11947_v18 = vld [vmem:[#allocation28_spill] sm:$0xff]  ;;  %v11948_v10 = vld [vmem:[#allocation29_spill] sm:$0xff] }
 0x3ef   : > { %v2916_v57 = vmul.f32 %v7290_v45, %v9538_v35  ;;  %7305 = vpow2.f32 %v1830_v46  ;;  %3206 = vmatprep.mubr.f32.mxu1 %v3020_v24  ;;  %v2979_v22 = vmul.f32 %v7284_v4, %v2947_v36  ;;  %v11949_v44 = vpack.c.bf16 %v11947_v18, %v11948_v10  ;;  %v11950_v35 = vld [vmem:[#allocation40_spill] sm:$0xff]  ;;  %v11951_v4 = vld [vmem:[#allocation38_spill] sm:$0xff] }
 0x3f0   : > { %v9602_v33 = vpop.eup %7291  ;;  %7307 = vrcp.f32 %v9592_v11  ;;  %3207 = vmatmul.mubr.f32.gmra.mrb[114].mxu1 %v3019_v48  ;;  %v1832_v58 = vmul.f32 1.442695, %v1724_v23  ;;  %v1834_v47 = vmul.f32 1.442695, %v1725_v42  ;;  %1927 = vadd.xlane.f32.xlu0 %v1926_v9  ;;  %v9610_v52 = vpop.xlane.xlu1 %2823  ;;  %v11952_v48 = vld [vmem:[#allocation83_spill] sm:$0xff]  ;;  %v11953_v42 = vld [vmem:[#allocation85_spill] sm:$0xff] }
 0x3f1   : > { %11945 = vst [vmem:[#allocation8_spill] sm:$0xff] %v9602_v33  ;;  %v9605_v60 = vpop.eup %7293  ;;  %v2948_v27 = vsub.f32 2.0, %v2916_v57  ;;  %6841 = vmatpush1.bf16.msra.mxu1 %v11949_v44  ;;  %v3022_v46 = vmul.f32 %v11950_v35, %v2979_v22  ;;  %v3021_v36 = vmul.f32 %v11951_v4, %v2979_v22  ;;  %v1655_v24 = vpop.xlane.xlu0 %1654 }
 0x3f2   : > { %11946 = vst [vmem:[#allocation9_spill] sm:$0xff] %v9605_v60  ;;  %v7296_v0 = vpop.eup %7295  ;;  %7309 = vpow2.f32 %v1832_v58  ;;  %6842 = vmatprep.subr.bf16.mxu1 %v11894_v41  ;;  %v1726_v23 = vsub.f32 %v11952_v48, %v1655_v24  ;;  %v1727_v9 = vsub.f32 %v11953_v42, %v1655_v24  ;;  %v1929_v57 = vadd.f32 %v9605_v60, %v9602_v33  ;;  %v11956_v24 = vld [vmem:[#allocation30_spill] sm:$0xff]  ;;  %v11957_v48 = vld [vmem:[#allocation32_spill] sm:$0xff] }
 0x3f3   : > { %v2917_v18 = vmul.f32 %v7296_v0, %v9556_v34  ;;  %7311 = vpow2.f32 %v1834_v47  ;;  %3211 = vmatprep.mubr.f32.mxu1 %v3022_v46  ;;  %v2980_v10 = vmul.f32 %v7290_v45, %v2948_v27  ;;  %v11958_v42 = vpack.c.bf16 %v11956_v24, %v11957_v48  ;;  %v11959_v34 = vld [vmem:[#allocation57_spill] sm:$0xff]  ;;  %v11960_v45 = vld [vmem:[#allocation55_spill] sm:$0xff] }
 0x3f4   : > { %v9620_v44 = vpop.eup %7297  ;;  %7313 = vrcp.f32 %v9610_v52  ;;  %3212 = vmatmul.mubr.f32.gmra.mrb[116].mxu1 %v3021_v36  ;;  %v1836_v22 = vmul.f32 1.442695, %v1726_v23  ;;  %v1838_v58 = vmul.f32 1.442695, %v1727_v9  ;;  %1930 = vadd.xlane.f32.xlu1 %v1929_v57  ;;  %v9628_v33 = vpop.xlane.xlu1 %2826  ;;  %v11961_v36 = vld [vmem:[#allocation87_spill] sm:$0xff]  ;;  %v11962_v9 = vld [vmem:[#allocation89_spill] sm:$0xff] }
 0x3f5   : > { %11954 = vst [vmem:[#allocation10_spill] sm:$0xff] %v9620_v44  ;;  %v9623_v35 = vpop.eup %7299  ;;  %v2949_v4 = vsub.f32 2.0, %v2917_v18  ;;  %6844 = vmatpush1.bf16.msra.mxu1 %v11958_v42  ;;  %v3024_v47 = vmul.f32 %v11959_v34, %v2980_v10  ;;  %v3023_v27 = vmul.f32 %v11960_v45, %v2980_v10  ;;  %v1658_v46 = vpop.xlane.xlu0 %1657 }
 0x3f6   : > { %11955 = vst [vmem:[#allocation11_spill] sm:$0xff] %v9623_v35  ;;  %v7302_v60 = vpop.eup %7301  ;;  %7315 = vpow2.f32 %v1836_v22  ;;  %6845 = vmatprep.subr.bf16.mxu1 %v11894_v41  ;;  %v1728_v23 = vsub.f32 %v11961_v36, %v1658_v46  ;;  %v1729_v57 = vsub.f32 %v11962_v9, %v1658_v46  ;;  %v1932_v18 = vadd.f32 %v9623_v35, %v9620_v44  ;;  %v11965_v46 = vld [vmem:[#allocation34_spill] sm:$0xff]  ;;  %v11966_v36 = vld [vmem:[#allocation35_spill] sm:$0xff] }
 0x3f7   : > { %v2918_v24 = vmul.f32 %v7302_v60, %v9574_v39  ;;  %7317 = vpow2.f32 %v1838_v58  ;;  %3216 = vmatprep.mubr.f32.mxu1 %v3024_v47  ;;  %v2981_v48 = vmul.f32 %v7296_v0, %v2949_v4  ;;  %v11967_v9 = vpack.c.bf16 %v11965_v46, %v11966_v36  ;;  %v11968_v39 = vld [vmem:[#allocation48_spill] sm:$0xff]  ;;  %v11969_v0 = vld [vmem:[#allocation47_spill] sm:$0xff] }
 0x3f8   : > { %v9638_v42 = vpop.eup %7303  ;;  %7319 = vrcp.f32 %v9628_v33  ;;  %3217 = vmatmul.mubr.f32.gmra.mrb[118].mxu1 %v3023_v27  ;;  %v1840_v10 = vmul.f32 1.442695, %v1728_v23  ;;  %v1842_v22 = vmul.f32 1.442695, %v1729_v57  ;;  %1933 = vadd.xlane.f32.xlu0 %v1932_v18  ;;  %v9646_v44 = vpop.xlane.xlu1 %2829  ;;  %v11970_v27 = vld [vmem:[#allocation91_spill] sm:$0xff]  ;;  %v11971_v57 = vld [vmem:[#allocation93_spill] sm:$0xff] }
 0x3f9   : > { %11963 = vst [vmem:[#allocation12_spill] sm:$0xff] %v9638_v42  ;;  %v9641_v34 = vpop.eup %7305  ;;  %v2950_v45 = vsub.f32 2.0, %v2918_v24  ;;  %6847 = vmatpush1.bf16.msra.mxu1 %v11967_v9  ;;  %v3026_v58 = vmul.f32 %v11968_v39, %v2981_v48  ;;  %v3025_v4 = vmul.f32 %v11969_v0, %v2981_v48  ;;  %v1661_v47 = vpop.xlane.xlu0 %1660 }
 0x3fa   : > { %11964 = vst [vmem:[#allocation13_spill] sm:$0xff] %v9641_v34  ;;  %v7308_v35 = vpop.eup %7307  ;;  %7321 = vpow2.f32 %v1840_v10  ;;  %6848 = vmatprep.subr.bf16.mxu1 %v11894_v41  ;;  %v1730_v23 = vsub.f32 %v11970_v27, %v1661_v47  ;;  %v1731_v18 = vsub.f32 %v11971_v57, %v1661_v47  ;;  %v1935_v24 = vadd.f32 %v9641_v34, %v9638_v42  ;;  %v11974_v47 = vld [vmem:[#allocation37_spill] sm:$0xff]  ;;  %v11975_v27 = vld [vmem:[#allocation39_spill] sm:$0xff] }
 0x3fb   : > { %v2919_v46 = vmul.f32 %v7308_v35, %v9592_v11  ;;  %7323 = vpow2.f32 %v1842_v22  ;;  %3221 = vmatprep.mubr.f32.mxu1 %v3026_v58  ;;  %v2982_v36 = vmul.f32 %v7302_v60, %v2950_v45  ;;  %v11976_v57 = vpack.c.bf16 %v11974_v47, %v11975_v27  ;;  %v11977_v11 = vld [vmem:[#allocation49_spill] sm:$0xff]  ;;  %v11978_v60 = vld [vmem:[#allocation59_spill] sm:$0xff] }
 0x3fc   : > { %v9656_v9 = vpop.eup %7309  ;;  %7325 = vrcp.f32 %v9646_v44  ;;  %3222 = vmatmul.mubr.f32.gmra.mrb[120].mxu1 %v3025_v4  ;;  %v1844_v48 = vmul.f32 1.442695, %v1730_v23  ;;  %v1846_v10 = vmul.f32 1.442695, %v1731_v18  ;;  %1936 = vadd.xlane.f32.xlu1 %v1935_v24  ;;  %v9664_v42 = vpop.xlane.xlu1 %2832  ;;  %v11979_v4 = vld [vmem:[#allocation95_spill] sm:$0xff]  ;;  %v11980_v18 = vld [vmem:[#allocation97_spill] sm:$0xff] }
 0x3fd   : > { %11972 = vst [vmem:[#allocation14_spill] sm:$0xff] %v9656_v9  ;;  %v9659_v39 = vpop.eup %7311  ;;  %v2951_v0 = vsub.f32 2.0, %v2919_v46  ;;  %6850 = vmatpush1.bf16.msra.mxu1 %v11976_v57  ;;  %v3028_v22 = vmul.f32 %v11977_v11, %v2982_v36  ;;  %v3027_v45 = vmul.f32 %v11978_v60, %v2982_v36  ;;  %v1664_v58 = vpop.xlane.xlu0 %1663 }
 0x3fe   : > { %11973 = vst [vmem:[#allocation15_spill] sm:$0xff] %v9659_v39  ;;  %v7314_v34 = vpop.eup %7313  ;;  %7327 = vpow2.f32 %v1844_v48  ;;  %6851 = vmatprep.subr.bf16.mxu1 %v11894_v41  ;;  %v1732_v23 = vsub.f32 %v11979_v4, %v1664_v58  ;;  %v1733_v24 = vsub.f32 %v11980_v18, %v1664_v58  ;;  %v1938_v46 = vadd.f32 %v9659_v39, %v9656_v9  ;;  %v11983_v58 = vld [vmem:[#allocation41_spill] sm:$0xff]  ;;  %v11984_v4 = vld [vmem:[#allocation42_spill] sm:$0xff] }
 0x3ff   : > { %v2920_v47 = vmul.f32 %v7314_v34, %v9610_v52  ;;  %7329 = vpow2.f32 %v1846_v10  ;;  %3226 = vmatprep.mubr.f32.mxu1 %v3028_v22  ;;  %v2983_v27 = vmul.f32 %v7308_v35, %v2951_v0  ;;  %v11985_v18 = vpack.c.bf16 %v11983_v58, %v11984_v4  ;;  %v11986_v52 = vld [vmem:[#allocation52_spill] sm:$0xff]  ;;  %v11987_v35 = vld [vmem:[#allocation50_spill] sm:$0xff] }
 0x400   : > { %v9674_v57 = vpop.eup %7315  ;;  %7331 = vrcp.f32 %v9664_v42  ;;  %3227 = vmatmul.mubr.f32.gmra.mrb[122].mxu1 %v3027_v45  ;;  %v1848_v36 = vmul.f32 1.442695, %v1732_v23  ;;  %v1850_v48 = vmul.f32 1.442695, %v1733_v24  ;;  %1939 = vadd.xlane.f32.xlu0 %v1938_v46  ;;  %v9682_v9 = vpop.xlane.xlu1 %2835  ;;  %v11988_v45 = vld [vmem:[#allocation99_spill] sm:$0xff]  ;;  %v11989_v24 = vld [vmem:[#allocation101_spill] sm:$0xff] }
 0x401   : > { %11981 = vst [vmem:[#allocation61_spill] sm:$0xff] %v9674_v57  ;;  %v9677_v11 = vpop.eup %7317  ;;  %v2952_v60 = vsub.f32 2.0, %v2920_v47  ;;  %6853 = vmatpush1.bf16.msra.mxu1 %v11985_v18  ;;  %v3030_v10 = vmul.f32 %v11986_v52, %v2983_v27  ;;  %v3029_v0 = vmul.f32 %v11987_v35, %v2983_v27  ;;  %v1667_v22 = vpop.xlane.xlu0 %1666 }
 0x402   : > { %11982 = vst [vmem:[#allocation16_spill] sm:$0xff] %v9677_v11  ;;  %v7320_v39 = vpop.eup %7319  ;;  %7333 = vpow2.f32 %v1848_v36  ;;  %6854 = vmatprep.subr.bf16.mxu1 %v11894_v41  ;;  %v1734_v23 = vsub.f32 %v11988_v45, %v1667_v22  ;;  %v1735_v46 = vsub.f32 %v11989_v24, %v1667_v22  ;;  %v1941_v47 = vadd.f32 %v9677_v11, %v9674_v57  ;;  %v11991_v22 = vld [vmem:[#allocation43_spill] sm:$0xff]  ;;  %v11992_v45 = vld [vmem:[#allocation44_spill] sm:$0xff] }
 0x403   : > { %v2921_v58 = vmul.f32 %v7320_v39, %v9628_v33  ;;  %7335 = vpow2.f32 %v1850_v48  ;;  %3231 = vmatprep.mubr.f32.mxu1 %v3030_v10  ;;  %v2984_v4 = vmul.f32 %v7314_v34, %v2952_v60  ;;  %v11993_v24 = vpack.c.bf16 %v11991_v22, %v11992_v45  ;;  %v11994_v33 = vld [vmem:[#allocation56_spill] sm:$0xff]  ;;  %v11995_v34 = vld [vmem:[#allocation54_spill] sm:$0xff] }
 0x404   : > { %v9692_v18 = vpop.eup %7321  ;;  %7337 = vrcp.f32 %v9682_v9  ;;  %3232 = vmatmul.mubr.f32.gmra.mrb[124].mxu1 %v3029_v0  ;;  %v1852_v27 = vmul.f32 1.442695, %v1734_v23  ;;  %v1854_v36 = vmul.f32 1.442695, %v1735_v46  ;;  %1942 = vadd.xlane.f32.xlu1 %v1941_v47  ;;  %v9700_v57 = vpop.xlane.xlu1 %2838  ;;  %v11996_v0 = vld [vmem:[#allocation103_spill] sm:$0xff]  ;;  %v11997_v46 = vld [vmem:[#allocation105_spill] sm:$0xff] }
 0x405   : > { %11990 = vst [vmem:[#allocation17_spill] sm:$0xff] %v9692_v18  ;;  %v9695_v52 = vpop.eup %7323  ;;  %v2953_v35 = vsub.f32 2.0, %v2921_v58  ;;  %6856 = vmatpush1.bf16.msra.mxu1 %v11993_v24  ;;  %v3032_v48 = vmul.f32 %v11994_v33, %v2984_v4  ;;  %v3031_v60 = vmul.f32 %v11995_v34, %v2984_v4  ;;  %v1670_v10 = vpop.xlane.xlu0 %1669  ;;  %v11998_v34 = vld [vmem:[#allocation45_spill] sm:$0xff] }
 0x406   : > { %v7326_v11 = vpop.eup %7325  ;;  %7339 = vpow2.f32 %v1852_v27  ;;  %6857 = vmatprep.subr.bf16.mxu1 %v11894_v41  ;;  %v1736_v23 = vsub.f32 %v11996_v0, %v1670_v10  ;;  %v1737_v47 = vsub.f32 %v11997_v46, %v1670_v10  ;;  %v1944_v58 = vadd.f32 %v9695_v52, %v9692_v18  ;;  %v11999_v10 = vld [vmem:[#allocation46_spill] sm:$0xff] }
 0x407   : > { %v2922_v22 = vmul.f32 %v7326_v11, %v9646_v44  ;;  %7341 = vpow2.f32 %v1854_v36  ;;  %3236 = vmatprep.mubr.f32.mxu1 %v3032_v48  ;;  %v2985_v45 = vmul.f32 %v7320_v39, %v2953_v35  ;;  %v12000_v0 = vpack.c.bf16 %v11998_v34, %v11999_v10  ;;  %v12001_v44 = vld [vmem:[#allocation60_spill] sm:$0xff]  ;;  %v12002_v39 = vld [vmem:[#allocation58_spill] sm:$0xff] }
 0x408   : > { %v9710_v24 = vpop.eup %7327  ;;  %7343 = vrcp.f32 %v9700_v57  ;;  %3237 = vmatmul.mubr.f32.gmra.mrb[126].mxu1 %v3031_v60  ;;  %v1856_v4 = vmul.f32 1.442695, %v1736_v23  ;;  %v1858_v27 = vmul.f32 1.442695, %v1737_v47  ;;  %1945 = vadd.xlane.f32.xlu0 %v1944_v58  ;;  %v9718_v46 = vpop.xlane.xlu1 %2841 }
 0x409   : > { %v9713_v41 = vpop.eup %7329  ;;  %v2954_v33 = vsub.f32 2.0, %v2922_v22  ;;  %6859 = vmatpush1.bf16.msra.mxu1 %v12000_v0  ;;  %v3034_v36 = vmul.f32 %v12001_v44, %v2985_v45  ;;  %v3033_v35 = vmul.f32 %v12002_v39, %v2985_v45  ;;  %v1673_v48 = vpop.xlane.xlu0 %1672  ;;  %v12004_v0 = vld [vmem:[#allocation64_spill] sm:$0xff]  ;;  %v12005_v39 = vld [vmem:[#allocation62_spill] sm:$0xff] }
 0x40a   : > { %v7332_v18 = vpop.eup %7331  ;;  %7345 = vpow2.f32 %v1856_v4  ;;  %v1738_v60 = vsub.f32 %v11853_v1, %v1673_v48  ;;  %v1739_v23 = vsub.f32 %v11854_v13, %v1673_v48  ;;  %v1947_v47 = vadd.f32 %v9713_v41, %v9710_v24 }
 0x40b   : > { %v2923_v58 = vmul.f32 %v7332_v18, %v9664_v42  ;;  %7347 = vpow2.f32 %v1858_v27  ;;  %3241 = vmatprep.mubr.f32.mxu1 %v3034_v36  ;;  %v2986_v22 = vmul.f32 %v7326_v11, %v2954_v33 }
 0x40c   : > { %v9727_v34 = vpop.eup %7333  ;;  %7349 = vrcp.f32 %v9718_v46  ;;  %3242 = vmatmul.mubr.f32.gmra.mrb[128].mxu1 %v3033_v35  ;;  %v1860_v45 = vmul.f32 1.442695, %v1738_v60  ;;  %v1862_v10 = vmul.f32 1.442695, %v1739_v23  ;;  %1948 = vadd.xlane.f32.xlu1 %v1947_v47  ;;  %v9732_v13 = vpop.xlane.xlu1 %2844 }
 0x40d   : > { %12003 = vst [vmem:[#allocation118_spill] sm:$0xff] %v9727_v34  ;;  %v9730_v4 = vpop.eup %7335  ;;  %v2955_v1 = vsub.f32 2.0, %v2923_v58  ;;  %v3036_v44 = vmul.f32 %v12004_v0, %v2986_v22  ;;  %v3035_v42 = vmul.f32 %v12005_v39, %v2986_v22  ;;  %v1676_v27 = vpop.xlane.xlu0 %1675  ;;  %v12009_v39 = vld [vmem:[#allocation66_spill] sm:$0xff] }
 0x40e   : > { %v7338_v36 = vpop.eup %7337  ;;  %7351 = vpow2.f32 %v1860_v45  ;;  %v1740_v11 = vsub.f32 %v8966_v38, %v1676_v27  ;;  %v1741_v33 = vsub.f32 %v8970_v49, %v1676_v27  ;;  %v1950_v35 = vadd.f32 %v9730_v4, %v9727_v34  ;;  %v12008_v45 = vld [vmem:[#allocation68_spill] sm:$0xff] }
 0x40f   : > { %v2924_v48 = vmul.f32 %v7338_v36, %v9682_v9  ;;  %7353 = vpow2.f32 %v1862_v10  ;;  %3246 = vmatprep.mubr.f32.mxu1 %v3036_v44  ;;  %v2987_v60 = vmul.f32 %v7332_v18, %v2955_v1  ;;  %v12010_v18 = vld [vmem:[#allocation113_spill] sm:$0xff]  ;;  %v12011_v44 = vld [vmem:[#allocation115_spill] sm:$0xff] }
 0x410   : > { %v9741_v23 = vpop.eup %7339  ;;  %7355 = vrcp.f32 %v9732_v13  ;;  %3247 = vmatmul.mubr.f32.gmra.mrb[130].mxu1 %v3035_v42  ;;  %v1864_v47 = vmul.f32 1.442695, %v1740_v11  ;;  %v1866_v58 = vmul.f32 1.442695, %v1741_v33  ;;  %1951 = vadd.xlane.f32.xlu0 %v1950_v35  ;;  %v2848_v49 = vpop.xlane.xlu1 %2847 }
 0x411   : > { %12006 = vst [vmem:[#allocation117_spill] sm:$0xff] %v9741_v23  ;;  %v9744_v22 = vpop.eup %7341  ;;  %v2956_v38 = vsub.f32 2.0, %v2924_v48  ;;  %v3038_v0 = vmul.f32 %v12008_v45, %v2987_v60  ;;  %v3037_v27 = vmul.f32 %v12009_v39, %v2987_v60  ;;  %v1679_v9 = vpop.xlane.xlu0 %1678 }
 0x412   : > { %12007 = vst [vmem:[#allocation63_spill] sm:$0xff] %v9744_v22  ;;  %v7344_v10 = vpop.eup %7343  ;;  %7357 = vpow2.f32 %v1864_v47  ;;  %v1742_v1 = vsub.f32 %v12010_v18, %v1679_v9  ;;  %v1743_v34 = vsub.f32 %v12011_v44, %v1679_v9  ;;  %v1953_v42 = vadd.f32 %v9744_v22, %v9741_v23  ;;  %v12013_v9 = vld [vmem:[#allocation72_spill] sm:$0xff]  ;;  %v12014_v44 = vld [vmem:[#allocation70_spill] sm:$0xff] }
 0x413   : > { %v2925_v11 = vmul.f32 %v7344_v10, %v9700_v57  ;;  %7359 = vpow2.f32 %v1866_v58  ;;  %3251 = vmatprep.mubr.f32.mxu1 %v3038_v0  ;;  %v2988_v33 = vmul.f32 %v7338_v36, %v2956_v38 }
 0x414   : > { %v9753_v35 = vpop.eup %7345  ;;  %7361 = vrcp.f32 %v2848_v49  ;;  %3252 = vmatmul.mubr.f32.gmra.mrb[132].mxu1 %v3037_v27  ;;  %v1868_v48 = vmul.f32 1.442695, %v1742_v1  ;;  %v1870_v60 = vmul.f32 1.442695, %v1743_v34  ;;  %1954 = vadd.xlane.f32.xlu1 %v1953_v42  ;;  %v2851_v39 = vpop.xlane.xlu1 %2850  ;;  %v12017_v1 = vld [vmem:[#allocation76_spill] sm:$0xff] }
 0x415   : > { %12012 = vst [vmem:[#allocation65_spill] sm:$0xff] %v9753_v35  ;;  %v9755_v47 = vpop.eup %7347  ;;  %v2957_v45 = vsub.f32 2.0, %v2925_v11  ;;  %v3040_v18 = vmul.f32 %v12013_v9, %v2988_v33  ;;  %v3039_v23 = vmul.f32 %v12014_v44, %v2988_v33  ;;  %v12018_v11 = vld [vmem:[#allocation74_spill] sm:$0xff]  ;;  %v12021_v44 = vld [vmem:[#allocation80_spill] sm:$0xff] }
 0x416   : > { %v7350_v22 = vpop.eup %7349  ;;  %7363 = vpow2.f32 %v1868_v48  ;;  %v1956_v57 = vadd.f32 %v9755_v47, %v9753_v35 }
 0x417   : > { %v2926_v36 = vmul.f32 %v7350_v22, %v9718_v46  ;;  %7365 = vpow2.f32 %v1870_v60  ;;  %3256 = vmatprep.mubr.f32.mxu1 %v3040_v18  ;;  %v2989_v58 = vmul.f32 %v7344_v10, %v2957_v45 }
 0x418   : > { %v9762_v34 = vpop.eup %7351  ;;  %7367 = vrcp.f32 %v2851_v39  ;;  %3257 = vmatmul.mubr.f32.gmra.mrb[134].mxu1 %v3039_v23  ;;  %1957 = vadd.xlane.f32.xlu0 %v1956_v57  ;;  %v2854_v27 = vpop.xlane.xlu1 %2853 }
 0x419   : > { %12015 = vst [vmem:[#allocation18_spill] sm:$0xff] %v9762_v34  ;;  %v9764_v38 = vpop.eup %7353  ;;  %v2958_v0 = vsub.f32 2.0, %v2926_v36  ;;  %v3042_v42 = vmul.f32 %v12017_v1, %v2989_v58  ;;  %v3041_v33 = vmul.f32 %v12018_v11, %v2989_v58  ;;  %7369 = vrcp.f32 %v2854_v27  ;;  %v12022_v36 = vld [vmem:[#allocation78_spill] sm:$0xff] }
 0x41a   : > { %12016 = vst [vmem:[#allocation19_spill] sm:$0xff] %v9764_v38  ;;  %v7356_v48 = vpop.eup %7355  ;;  %v1959_v46 = vadd.f32 %v9764_v38, %v9762_v34  ;;  %v12026_v34 = vld [vmem:[#allocation82_spill] sm:$0xff] }
 0x41b   : > { %v2927_v10 = vmul.f32 %v7356_v48, %v9732_v13  ;;  %3261 = vmatprep.mubr.f32.mxu1 %v3042_v42  ;;  %v2990_v60 = vmul.f32 %v7350_v22, %v2958_v0  ;;  %v12028_v38 = vld [vmem:[#allocation86_spill] sm:$0xff] }
 0x41c   : > { %v9771_v45 = vpop.eup %7357  ;;  %3262 = vmatmul.mubr.f32.gmra.mrb[136].mxu1 %v3041_v33  ;;  %1960 = vadd.xlane.f32.xlu1 %v1959_v46  ;;  %v2857_v18 = vpop.xlane.xlu1 %2856 }
 0x41d   : > { %12019 = vst [vmem:[#allocation120_spill] sm:$0xff] %v9771_v45  ;;  %v9773_v23 = vpop.eup %7359  ;;  %v2959_v9 = vsub.f32 2.0, %v2927_v10  ;;  %v3044_v57 = vmul.f32 %v12021_v44, %v2990_v60  ;;  %v3043_v58 = vmul.f32 %v12022_v36, %v2990_v60  ;;  %7371 = vrcp.f32 %v2857_v18  ;;  %v12025_v10 = vld [vmem:[#allocation84_spill] sm:$0xff] }
 0x41e   : > { %12020 = vst [vmem:[#allocation119_spill] sm:$0xff] %v9773_v23  ;;  %v7362_v1 = vpop.eup %7361  ;;  %v1962_v11 = vadd.f32 %v9773_v23, %v9771_v45 }
 0x41f   : > { %v2928_v13 = vmul.f32 %v7362_v1, %v2848_v49  ;;  %3266 = vmatprep.mubr.f32.mxu1 %v3044_v57  ;;  %v2991_v22 = vmul.f32 %v7356_v48, %v2959_v9 }
 0x420   : > { %v9779_v0 = vpop.eup %7363  ;;  %3267 = vmatmul.mubr.f32.gmra.mrb[138].mxu1 %v3043_v58  ;;  %1963 = vadd.xlane.f32.xlu0 %v1962_v11  ;;  %v2860_v46 = vpop.xlane.xlu1 %2859 }
 0x421   : > { %12023 = vst [vmem:[#allocation67_spill] sm:$0xff] %v9779_v0  ;;  %v9781_v42 = vpop.eup %7365  ;;  %v2960_v33 = vsub.f32 2.0, %v2928_v13  ;;  %v3046_v44 = vmul.f32 %v12025_v10, %v2991_v22  ;;  %v3045_v60 = vmul.f32 %v12026_v34, %v2991_v22  ;;  %7373 = vrcp.f32 %v2860_v46  ;;  %v12027_v13 = vld [vmem:[#allocation88_spill] sm:$0xff] }
 0x422   : > { %12024 = vst [vmem:[#allocation69_spill] sm:$0xff] %v9781_v42  ;;  %v7368_v36 = vpop.eup %7367  ;;  %v1965_v45 = vadd.f32 %v9781_v42, %v9779_v0 }
 0x423   : > { %v2929_v49 = vmul.f32 %v7368_v36, %v2851_v39  ;;  %3271 = vmatprep.mubr.f32.mxu1 %v3046_v44  ;;  %v2992_v48 = vmul.f32 %v7362_v1, %v2960_v33  ;;  %v7370_v9 = vpop.eup %7369  ;;  %v12029_v44 = vld [vmem:[#allocation92_spill] sm:$0xff]  ;;  %v12030_v33 = vld [vmem:[#allocation90_spill] sm:$0xff] }
 0x424   : > { %3272 = vmatmul.mubr.f32.gmra.mrb[140].mxu1 %v3045_v60  ;;  %1966 = vadd.xlane.f32.xlu1 %v1965_v45  ;;  %v2930_v58 = vmul.f32 %v7370_v9, %v2854_v27  ;;  %v2863_v11 = vpop.xlane.xlu1 %2862 }
 0x425   : > { %v2961_v57 = vsub.f32 2.0, %v2929_v49  ;;  %v3048_v23 = vmul.f32 %v12027_v13, %v2992_v48  ;;  %v3047_v10 = vmul.f32 %v12028_v38, %v2992_v48  ;;  %7375 = vrcp.f32 %v2863_v11  ;;  %v12031_v49 = vld [vmem:[#allocation107_spill] sm:$0xff]  ;;  %v12032_v38 = vld [vmem:[#allocation94_spill] sm:$0xff] }
 0x426   : > { %v2962_v34 = vsub.f32 2.0, %v2930_v58 }
 0x427   : > { %3276 = vmatprep.mubr.f32.mxu1 %v3048_v23  ;;  %v2993_v22 = vmul.f32 %v7368_v36, %v2961_v57  ;;  %v7372_v35 = vpop.eup %7371 }
 0x428   : > { %3277 = vmatmul.mubr.f32.gmra.mrb[142].mxu1 %v3047_v10  ;;  %v2931_v0 = vmul.f32 %v7372_v35, %v2857_v18  ;;  %v2866_v39 = vpop.xlane.xlu1 %2865  ;;  %v2994_v45 = vmul.f32 %v7370_v9, %v2962_v34  ;;  %v12033_v9 = vld [vmem:[#allocation109_spill] sm:$0xff] }
 0x429   : > { %v3050_v1 = vmul.f32 %v12029_v44, %v2993_v22  ;;  %v3049_v60 = vmul.f32 %v12030_v33, %v2993_v22  ;;  %7377 = vrcp.f32 %v2866_v39 }
 0x42a   : > { %v2963_v27 = vsub.f32 2.0, %v2931_v0  ;;  %v3052_v13 = vmul.f32 %v12031_v49, %v2994_v45  ;;  %v3051_v48 = vmul.f32 %v12032_v38, %v2994_v45 }
 0x42b   : > { %3281 = vmatprep.mubr.f32.mxu1 %v3050_v1  ;;  %v7374_v42 = vpop.eup %7373 }
 0x42c   : > { %3282 = vmatmul.mubr.f32.gmra.mrb[144].mxu1 %v3049_v60  ;;  %v2932_v23 = vmul.f32 %v7374_v42, %v2860_v46  ;;  %v2869_v36 = vpop.xlane.xlu1 %2868  ;;  %v2995_v57 = vmul.f32 %v7372_v35, %v2963_v27 }
 0x42d   : > { %3286 = vmatprep.mubr.f32.mxu1 %v3052_v13  ;;  %7379 = vrcp.f32 %v2869_v36  ;;  %v12034_v13 = vld [vmem:[#allocation96_spill] sm:$0xff] }
 0x42e   : > { %v2964_v18 = vsub.f32 2.0, %v2932_v23  ;;  %v3054_v58 = vmul.f32 %v9304_v20, %v2995_v57  ;;  %v3053_v34 = vmul.f32 %v12033_v9, %v2995_v57  ;;  %v12035_v57 = vld [vmem:[#allocation98_spill] sm:$0xff] }
 0x42f   : > { %v7376_v10 = vpop.eup %7375 }
 0x430   : > { %3287 = vmatmul.mubr.f32.gmra.mrb[146].mxu1 %v3051_v48  ;;  %v2933_v0 = vmul.f32 %v7376_v10, %v2863_v11  ;;  %v2872_v22 = vpop.xlane.xlu1 %2871  ;;  %v2996_v44 = vmul.f32 %v7374_v42, %v2964_v18 }
 0x431   : > { %3291 = vmatprep.mubr.f32.mxu1 %v3054_v58  ;;  %7381 = vrcp.f32 %v2872_v22 }
 0x432   : > { %v2965_v1 = vsub.f32 2.0, %v2933_v0  ;;  %v3056_v33 = vmul.f32 %v9312_v53, %v2996_v44  ;;  %v3055_v35 = vmul.f32 %v9310_v8, %v2996_v44 }
 0x433   : > { %v7378_v46 = vpop.eup %7377 }
 0x434   : > { %3292 = vmatmul.mubr.f32.gmra.mrb[148].mxu1 %v3053_v34  ;;  %v2934_v60 = vmul.f32 %v7378_v46, %v2866_v39  ;;  %v1874_v45 = vpop.xlane.xlu1 %1873  ;;  %v2997_v20 = vmul.f32 %v7376_v10, %v2965_v1 }
 0x435   : > { %3296 = vmatprep.mubr.f32.mxu1 %v3056_v33  ;;  %7383 = vrcp.f32 %v1874_v45 }
 0x436   : > { %v2966_v27 = vsub.f32 2.0, %v2934_v60  ;;  %v3058_v49 = vmul.f32 %v9320_v19, %v2997_v20  ;;  %v3057_v42 = vmul.f32 %v12034_v13, %v2997_v20  ;;  %v3549_v13 = vld [vmem:[%s7834_s22 + $0x10] sm:$0xff] }
 0x437   : > { %v7380_v11 = vpop.eup %7379 }
 0x438   : > { %3297 = vmatmul.mubr.f32.gmra.mrb[150].mxu1 %v3055_v35  ;;  %v2935_v38 = vmul.f32 %v7380_v11, %v2869_v36  ;;  %v1877_v48 = vpop.xlane.xlu1 %1876  ;;  %v2998_v53 = vmul.f32 %v7378_v46, %v2966_v27 }
 0x439   : > { %3301 = vmatprep.mubr.f32.mxu1 %v3058_v49  ;;  %7385 = vrcp.f32 %v1877_v48  ;;  %v3547_v49 = vld [vmem:[%s7834_s22] sm:$0xff] }
 0x43a   : > { %v2967_v23 = vsub.f32 2.0, %v2935_v38  ;;  %v3060_v8 = vmul.f32 %v9328_v25, %v2998_v53  ;;  %v3059_v18 = vmul.f32 %v12035_v57, %v2998_v53  ;;  %v3550_v53 = vld [vmem:[%s7834_s22 + $0x18] sm:$0xff] }
 0x43b   : > { %v7382_v39 = vpop.eup %7381 }
 0x43c   : > { %3302 = vmatmul.mubr.f32.gmra.mrb[152].mxu1 %v3057_v42  ;;  %v2936_v58 = vmul.f32 %v7382_v39, %v2872_v22  ;;  %v1880_v10 = vpop.xlane.xlu1 %1879  ;;  %v2999_v19 = vmul.f32 %v7380_v11, %v2967_v23  ;;  %v3548_v11 = vld [vmem:[%s7834_s22 + $0x8] sm:$0xff]  ;;  %v6864_v23 = vpack.c.bf16 %v3550_v53, %v3549_v13 }
 0x43d   : > { %3306 = vmatprep.mubr.f32.mxu1 %v3060_v8  ;;  %7387 = vrcp.f32 %v1880_v10  ;;  %v3551_v8 = vld [vmem:[%s7834_s22 + $0x20] sm:$0xff] }
 0x43e   : > { %v2968_v9 = vsub.f32 2.0, %v2936_v58  ;;  %v3062_v34 = vmul.f32 %v9336_v32, %v2999_v19  ;;  %v3061_v0 = vmul.f32 %v9334_v26, %v2999_v19 }
 0x43f   : > { %v7384_v36 = vpop.eup %7383 }
 0x440   : > { %3307 = vmatmul.mubr.f32.gmra.mrb[154].mxu1 %v3059_v18  ;;  %v2000_v44 = vmul.f32 %v7384_v36, %v1874_v45  ;;  %v1883_v1 = vpop.xlane.xlu1 %1882  ;;  %v3000_v25 = vmul.f32 %v7382_v39, %v2968_v9  ;;  %v3552_v39 = vld [vmem:[%s7834_s22 + $0x28] sm:$0xff] }
 0x441   : > { %3311 = vmatprep.mubr.f32.mxu1 %v3062_v34  ;;  %7389 = vrcp.f32 %v1883_v1  ;;  %v6868_v9 = vpack.c.bf16 %v3552_v39, %v3551_v8  ;;  %v3553_v34 = vld [vmem:[%s7834_s22 + $0x30] sm:$0xff]  ;;  %v3559_v39 = vld [vmem:[%s7834_s22 + $0x60] sm:$0xff] }
 0x442   : > { %v2032_v33 = vsub.f32 2.0, %v2000_v44  ;;  %v3064_v22 = vmul.f32 %v9344_v62, %v3000_v25  ;;  %v3063_v35 = vmul.f32 %v9342_v50, %v3000_v25 }
 0x443   : > { %v7386_v46 = vpop.eup %7385 }
 0x444   : > { %3312 = vmatmul.mubr.f32.gmra.mrb[156].mxu1 %v3061_v0  ;;  %v2001_v32 = vmul.f32 %v7386_v46, %v1877_v48  ;;  %v1886_v60 = vpop.xlane.xlu1 %1885  ;;  %v2064_v26 = vmul.f32 %v7384_v36, %v2032_v33  ;;  %v6860_v48 = vpack.c.bf16 %v3548_v11, %v3547_v49  ;;  %v3554_v36 = vld [vmem:[%s7834_s22 + $0x38] sm:$0xff]  ;;  %v3557_v49 = vld [vmem:[%s7834_s22 + $0x50] sm:$0xff] }
 0x445   : > { %3316 = vmatprep.mubr.f32.mxu1 %v3064_v22  ;;  %7391 = vrcp.f32 %v1886_v60  ;;  %v6872_v22 = vpack.c.bf16 %v3554_v36, %v3553_v34  ;;  %v3558_v11 = vld [vmem:[%s7834_s22 + $0x58] sm:$0xff] }
 0x446   : > { %v2033_v45 = vsub.f32 2.0, %v2001_v32  ;;  %v2097_v20 = vmul.f32 %v9352_v37, %v2064_v26  ;;  %v2096_v62 = vmul.f32 %v9350_v15, %v2064_v26  ;;  %6861 = vmatprep.subr.bf16.mxu0 %v6860_v48  ;;  %v6880_v8 = vpack.c.bf16 %v3558_v11, %v3557_v49 }
 0x447   : > { %v7388_v27 = vpop.eup %7387  ;;  %6863 = vmatpush3.bf16.msra.mxu0 %v6860_v48 }
 0x448   : > { %3317 = vmatmul.mubr.f32.gmra.mrb[158].mxu1 %v3063_v35  ;;  %v2002_v42 = vmul.f32 %v7388_v27, %v1880_v10  ;;  %v1889_v50 = vpop.xlane.xlu1 %1888  ;;  %v2065_v38 = vmul.f32 %v7386_v46, %v2033_v45  ;;  %6865 = vmatprep.subr.bf16.mxu0 %v6864_v23  ;;  %v3555_v46 = vld [vmem:[%s7834_s22 + $0x40] sm:$0xff]  ;;  %v3556_v35 = vld [vmem:[%s7834_s22 + $0x48] sm:$0xff] }
 0x449   : > { %3386 = vmatprep.mubr.f32.mxu1 %v2097_v20  ;;  %7393 = vrcp.f32 %v1889_v50  ;;  %v12036_v45 = vld [vmem:[#allocation100_spill] sm:$0xff] }
 0x44a   : > { %v2034_v37 = vsub.f32 2.0, %v2002_v42  ;;  %v2099_v57 = vmul.f32 %v9360_v28, %v2065_v38  ;;  %v2098_v18 = vmul.f32 %v9358_v43, %v2065_v38  ;;  %v12037_v38 = vld [vmem:[#allocation102_spill] sm:$0xff] }
 0x44b   : > { %v7390_v15 = vpop.eup %7389  ;;  %6867 = vmatpush3.bf16.msra.mxu0 %v6864_v23 }
 0x44c   : > { %3387 = vmatmul.mubr.f32.vlgmr.msra.gmra.mrb[96].mxu1 %v2096_v62  ;;  %v2003_v58 = vmul.f32 %v7390_v15, %v1883_v1  ;;  %v1892_v10 = vpop.xlane.xlu1 %1891  ;;  %v2066_v19 = vmul.f32 %v7388_v27, %v2034_v37  ;;  %6869 = vmatprep.subr.bf16.mxu0 %v6868_v9  ;;  %v6876_v62 = vpack.c.bf16 %v3556_v35, %v3555_v46  ;;  %v3560_v37 = vld [vmem:[%s7834_s22 + $0x68] sm:$0xff] }
 0x44d   : > { %3391 = vmatprep.mubr.f32.mxu1 %v2099_v57  ;;  %7395 = vrcp.f32 %v1892_v10 }
 0x44e   : > { %v2035_v0 = vsub.f32 2.0, %v2003_v58  ;;  %v2101_v28 = vmul.f32 %v9368_v29, %v2066_v19  ;;  %v2100_v25 = vmul.f32 %v9366_v59, %v2066_v19 }
 0x44f   : > { %v7392_v44 = vpop.eup %7391  ;;  %6871 = vmatpush3.bf16.msra.mxu0 %v6868_v9 }
 0x450   : > { %3392 = vmatmul.mubr.f32.gmra.mrb[98].mxu1 %v2098_v18  ;;  %v2004_v43 = vmul.f32 %v7392_v44, %v1886_v60  ;;  %v1895_v1 = vpop.xlane.xlu1 %1894  ;;  %v2067_v33 = vmul.f32 %v7390_v15, %v2035_v0  ;;  %6873 = vmatprep.subr.bf16.mxu0 %v6872_v22  ;;  %v12038_v15 = vld [vmem:[#allocation106_spill] sm:$0xff] }
 0x451   : > { %3396 = vmatprep.mubr.f32.mxu1 %v2101_v28  ;;  %7397 = vrcp.f32 %v1895_v1  ;;  %v12040_v28 = vld [vmem:[#allocation110_spill] sm:$0xff] }
 0x452   : > { %v2036_v32 = vsub.f32 2.0, %v2004_v43  ;;  %v2103_v26 = vmul.f32 %v9376_v51, %v2067_v33  ;;  %v2102_v20 = vmul.f32 %v12036_v45, %v2067_v33  ;;  %v12041_v43 = vld [vmem:[#allocation108_spill] sm:$0xff]  ;;  %v12043_v45 = vld [vmem:[#allocation111_spill] sm:$0xff] }
 0x453   : > { %v7394_v29 = vpop.eup %7393  ;;  %6875 = vmatpush3.bf16.msra.mxu0 %v6872_v22 }
 0x454   : > { %3397 = vmatmul.mubr.f32.gmra.mrb[100].mxu1 %v2100_v25  ;;  %v2068_v59 = vmul.f32 %v7392_v44, %v2036_v32  ;;  %v2005_v60 = vmul.f32 %v7394_v29, %v1889_v50  ;;  %6877 = vmatprep.subr.bf16.mxu0 %v6876_v62  ;;  %v12042_v32 = vld [vmem:[#allocation112_spill] sm:$0xff] }
 0x455   : > { %3401 = vmatprep.mubr.f32.mxu1 %v2103_v26  ;;  %v1898_v27 = vpop.xlane.xlu1 %1897 }
 0x456   : > { %7399 = vrcp.f32 %v1898_v27  ;;  %v2037_v13 = vsub.f32 2.0, %v2005_v60  ;;  %v2105_v42 = vmul.f32 %v9384_v56, %v2068_v59  ;;  %v2104_v48 = vmul.f32 %v12037_v38, %v2068_v59  ;;  %v12039_v56 = vld [vmem:[#allocation104_spill] sm:$0xff] }
 0x457   : > { %v7396_v51 = vpop.eup %7395  ;;  %6879 = vmatpush3.bf16.msra.mxu0 %v6876_v62 }
 0x458   : > { %3402 = vmatmul.mubr.f32.gmra.mrb[102].mxu1 %v2102_v20  ;;  %v2069_v53 = vmul.f32 %v7394_v29, %v2037_v13  ;;  %v2006_v23 = vmul.f32 %v7396_v51, %v1892_v10  ;;  %6881 = vmatprep.subr.bf16.mxu0 %v6880_v8  ;;  %v6884_v10 = vpack.c.bf16 %v3560_v37, %v3559_v39 }
 0x459   : > { %3406 = vmatprep.mubr.f32.mxu1 %v2105_v42  ;;  %v1901_v50 = vpop.xlane.xlu1 %1900 }
 0x45a   : > { %7401 = vrcp.f32 %v1901_v50  ;;  %v2038_v57 = vsub.f32 2.0, %v2006_v23  ;;  %v2107_v18 = vmul.f32 %v12038_v15, %v2069_v53  ;;  %v2106_v19 = vmul.f32 %v12039_v56, %v2069_v53 }
 0x45b   : > { %v7398_v58 = vpop.eup %7397  ;;  %6883 = vmatpush3.bf16.msra.mxu0 %v6880_v8 }
 0x45c   : > { %3407 = vmatmul.mubr.f32.gmra.mrb[104].mxu1 %v2104_v48  ;;  %v2070_v9 = vmul.f32 %v7396_v51, %v2038_v57  ;;  %v2007_v34 = vmul.f32 %v7398_v58, %v1895_v1  ;;  %6885 = vmatprep.subr.bf16.mxu0 %v6884_v10 }
 0x45d   : > { %3411 = vmatprep.mubr.f32.mxu1 %v2107_v18  ;;  %v1904_v36 = vpop.xlane.xlu0 %1903 }
 0x45e   : > { %7403 = vrcp.f32 %v1904_v36  ;;  %v2039_v0 = vsub.f32 2.0, %v2007_v34  ;;  %v2109_v44 = vmul.f32 %v12040_v28, %v2070_v9  ;;  %v2108_v33 = vmul.f32 %v12041_v43, %v2070_v9 }
 0x45f   : > { %6887 = vmatpush3.bf16.msra.mxu0 %v6884_v10 }
 0x460   : > { %v7400_v25 = vpop.eup %7399  ;;  %3412 = vmatmul.mubr.f32.gmra.mrb[106].mxu1 %v2106_v19  ;;  %v2071_v22 = vmul.f32 %v7398_v58, %v2039_v0 }
 0x461   : > { %v2008_v46 = vmul.f32 %v7400_v25, %v1898_v27  ;;  %3416 = vmatprep.mubr.f32.mxu1 %v2109_v44  ;;  %v1907_v35 = vpop.xlane.xlu1 %1906 }
 0x462   : > { %7405 = vrcp.f32 %v1907_v35  ;;  %v2111_v26 = vmul.f32 %v12042_v32, %v2071_v22  ;;  %v2110_v20 = vmul.f32 %v12043_v45, %v2071_v22 }
 0x463   : > { %v2040_v1 = vsub.f32 2.0, %v2008_v46 }
 0x464   : > { %v7402_v29 = vpop.eup %7401  ;;  %3417 = vmatmul.mubr.f32.gmra.mrb[108].mxu1 %v2108_v33 }
 0x465   : > { %v2072_v59 = vmul.f32 %v7400_v25, %v2040_v1  ;;  %v2009_v60 = vmul.f32 %v7402_v29, %v1901_v50  ;;  %3421 = vmatprep.mubr.f32.mxu1 %v2111_v26  ;;  %v1910_v62 = vpop.xlane.xlu0 %1909 }
 0x466   : > { %7407 = vrcp.f32 %v1910_v62 }
 0x467   : > { %v2041_v49 = vsub.f32 2.0, %v2009_v60  ;;  %v2113_v27 = vmul.f32 %v9419_v14, %v2072_v59  ;;  %v2112_v13 = vmul.f32 %v9416_v12, %v2072_v59 }
 0x468   : > { %v7404_v11 = vpop.eup %7403  ;;  %3422 = vmatmul.mubr.f32.gmra.mrb[110].mxu1 %v2110_v20 }
 0x469   : > { %v2073_v42 = vmul.f32 %v7402_v29, %v2041_v49  ;;  %v2010_v51 = vmul.f32 %v7404_v11, %v1904_v36  ;;  %3426 = vmatprep.mubr.f32.mxu1 %v2113_v27  ;;  %v1913_v38 = vpop.xlane.xlu1 %1912 }
 0x46a   : > { %7409 = vrcp.f32 %v1913_v38 }
 0x46b   : > { %v2042_v48 = vsub.f32 2.0, %v2010_v51  ;;  %v2115_v53 = vmul.f32 %v9430_v61, %v2073_v42  ;;  %v2114_v50 = vmul.f32 %v9427_v17, %v2073_v42 }
 0x46c   : > { %v7406_v23 = vpop.eup %7405  ;;  %3427 = vmatmul.mubr.f32.gmra.mrb[112].mxu1 %v2112_v13  ;;  %v12044_v13 = vld [vmem:[#allocation114_spill] sm:$0xff] }
 0x46d   : > { %v2074_v8 = vmul.f32 %v7404_v11, %v2042_v48  ;;  %v2011_v39 = vmul.f32 %v7406_v23, %v1907_v35  ;;  %3431 = vmatprep.mubr.f32.mxu1 %v2115_v53  ;;  %v1916_v14 = vpop.xlane.xlu0 %1915  ;;  %v12045_v53 = vld [vmem:[#allocation25_spill] sm:$0xff] }
 0x46e   : > { %7411 = vrcp.f32 %v1916_v14 }
 0x46f   : > { %v2043_v37 = vsub.f32 2.0, %v2011_v39  ;;  %v2117_v12 = vmul.f32 %v9443_v55, %v2074_v8  ;;  %v2116_v15 = vmul.f32 %v9440_v3, %v2074_v8 }
 0x470   : > { %v7408_v57 = vpop.eup %7407  ;;  %3432 = vmatmul.mubr.f32.gmra.mrb[114].mxu1 %v2114_v50  ;;  %v12046_v50 = vld [vmem:[#allocation116_spill] sm:$0xff] }
 0x471   : > { %v2075_v18 = vmul.f32 %v7406_v23, %v2043_v37  ;;  %v2012_v58 = vmul.f32 %v7408_v57, %v1910_v62  ;;  %v1919_v56 = vpop.xlane.xlu1 %1918  ;;  %3436 = vmatprep.mubr.f32.mxu1 %v2117_v12  ;;  %v12047_v12 = vld [vmem:[#allocation31_spill] sm:$0xff] }
 0x472   : > { %7413 = vrcp.f32 %v1919_v56 }
 0x473   : > { %v2044_v61 = vsub.f32 2.0, %v2012_v58  ;;  %v2119_v17 = vmul.f32 %v9461_v21, %v2075_v18  ;;  %v2118_v9 = vmul.f32 %v9458_v63, %v2075_v18  ;;  %v12048_v18 = vld [vmem:[#allocation27_spill] sm:$0xff] }
 0x474   : > { %v7410_v19 = vpop.eup %7409  ;;  %3437 = vmatmul.mubr.f32.gmra.mrb[116].mxu1 %v2116_v15 }
 0x475   : > { %v2076_v34 = vmul.f32 %v7408_v57, %v2044_v61  ;;  %v2013_v36 = vmul.f32 %v7410_v19, %v1913_v38  ;;  %3441 = vmatprep.mubr.f32.mxu1 %v2119_v17  ;;  %v1922_v55 = vpop.xlane.xlu0 %1921 }
 0x476   : > { %7415 = vrcp.f32 %v1922_v55 }
 0x477   : > { %v2045_v10 = vsub.f32 2.0, %v2013_v36  ;;  %v2121_v3 = vmul.f32 %v9479_v54, %v2076_v34  ;;  %v2120_v28 = vmul.f32 %v9476_v6, %v2076_v34 }
 0x478   : > { %v7412_v0 = vpop.eup %7411  ;;  %3442 = vmatmul.mubr.f32.gmra.mrb[118].mxu1 %v2118_v9  ;;  %v12049_v9 = vld [vmem:[#allocation9_spill] sm:$0xff] }
 0x479   : > { %v2077_v44 = vmul.f32 %v7410_v19, %v2045_v10  ;;  %v2014_v25 = vmul.f32 %v7412_v0, %v1916_v14  ;;  %v1925_v43 = vpop.xlane.xlu1 %1924  ;;  %3446 = vmatprep.mubr.f32.mxu1 %v2121_v3 }
 0x47a   : > { %7417 = vrcp.f32 %v1925_v43 }
 0x47b   : > { %v2046_v21 = vsub.f32 2.0, %v2014_v25  ;;  %v2123_v63 = vmul.f32 %v9497_v31, %v2077_v44  ;;  %v2122_v22 = vmul.f32 %v9494_v40, %v2077_v44  ;;  %v12051_v25 = vld [vmem:[#allocation11_spill] sm:$0xff] }
 0x47c   : > { %v7414_v33 = vpop.eup %7413  ;;  %3447 = vmatmul.mubr.f32.gmra.mrb[120].mxu1 %v2120_v28 }
 0x47d   : > { %v2078_v46 = vmul.f32 %v7412_v0, %v2046_v21  ;;  %v2015_v35 = vmul.f32 %v7414_v33, %v1919_v56  ;;  %3451 = vmatprep.mubr.f32.mxu1 %v2123_v63  ;;  %v1928_v54 = vpop.xlane.xlu0 %1927  ;;  %v12052_v63 = vld [vmem:[#allocation10_spill] sm:$0xff] }
 0x47e   : > { %7419 = vrcp.f32 %v1928_v54 }
 0x47f   : > { %v2047_v1 = vsub.f32 2.0, %v2015_v35  ;;  %v2125_v6 = vmul.f32 %v9515_v16, %v2078_v46  ;;  %v2124_v26 = vmul.f32 %v9512_v5, %v2078_v46 }
 0x480   : > { %v7416_v32 = vpop.eup %7415  ;;  %3452 = vmatmul.mubr.f32.gmra.mrb[122].mxu1 %v2122_v22 }
 0x481   : > { %v2079_v29 = vmul.f32 %v7414_v33, %v2047_v1  ;;  %v2016_v45 = vmul.f32 %v7416_v32, %v1922_v55  ;;  %v1931_v20 = vpop.xlane.xlu1 %1930  ;;  %3456 = vmatprep.mubr.f32.mxu1 %v2125_v6  ;;  %v12050_v55 = vld [vmem:[#allocation8_spill] sm:$0xff]  ;;  %v12053_v1 = vld [vmem:[#allocation13_spill] sm:$0xff] }
 0x482   : > { %7421 = vrcp.f32 %v1931_v20 }
 0x483   : > { %v2048_v31 = vsub.f32 2.0, %v2016_v45  ;;  %v2127_v40 = vmul.f32 %v9533_v30, %v2079_v29  ;;  %v2126_v60 = vmul.f32 %v9530_v2, %v2079_v29 }
 0x484   : > { %v7418_v59 = vpop.eup %7417  ;;  %3457 = vmatmul.mubr.f32.gmra.mrb[124].mxu1 %v2124_v26  ;;  %v12054_v26 = vld [vmem:[#allocation12_spill] sm:$0xff] }
 0x485   : > { %v2080_v62 = vmul.f32 %v7416_v32, %v2048_v31  ;;  %v2017_v49 = vmul.f32 %v7418_v59, %v1925_v43  ;;  %3461 = vmatprep.mubr.f32.mxu1 %v2127_v40  ;;  %v1934_v16 = vpop.xlane.xlu0 %1933  ;;  %v3561_v40 = vld [vmem:[%s7834_s22 + $0x70] sm:$0xff] }
 0x486   : > { %7423 = vrcp.f32 %v1934_v16 }
 0x487   : > { %v2049_v27 = vsub.f32 2.0, %v2017_v49  ;;  %v2129_v5 = vmul.f32 %v9551_v7, %v2080_v62  ;;  %v2128_v42 = vmul.f32 %v12044_v13, %v2080_v62  ;;  %v12055_v62 = vld [vmem:[#allocation15_spill] sm:$0xff] }
 0x488   : > { %v7420_v11 = vpop.eup %7419  ;;  %3462 = vmatmul.mubr.f32.gmra.mrb[126].mxu1 %v2126_v60 }
 0x489   : > { %v2081_v51 = vmul.f32 %v7418_v59, %v2049_v27  ;;  %v2018_v38 = vmul.f32 %v7420_v11, %v1928_v54  ;;  %v1937_v48 = vpop.xlane.xlu1 %1936  ;;  %3466 = vmatprep.mubr.f32.mxu1 %v2129_v5  ;;  %v3562_v59 = vld [vmem:[%s7834_s22 + $0x78] sm:$0xff]  ;;  %v12056_v5 = vld [vmem:[#allocation14_spill] sm:$0xff] }
 0x48a   : > { %7425 = vrcp.f32 %v1937_v48 }
 0x48b   : > { %v2050_v30 = vsub.f32 2.0, %v2018_v38  ;;  %v2131_v2 = vmul.f32 %v12045_v53, %v2081_v51  ;;  %v2130_v8 = vmul.f32 %v12046_v50, %v2081_v51 }
 0x48c   : > { %v7422_v23 = vpop.eup %7421  ;;  %3467 = vmatmul.mubr.f32.gmra.mrb[128].mxu1 %v2128_v42 }
 0x48d   : > { %v2082_v39 = vmul.f32 %v7420_v11, %v2050_v30  ;;  %v2019_v14 = vmul.f32 %v7422_v23, %v1931_v20  ;;  %3471 = vmatprep.mubr.f32.mxu1 %v2131_v2  ;;  %v1940_v7 = vpop.xlane.xlu0 %1939  ;;  %v12058_v2 = vld [vmem:[#allocation61_spill] sm:$0xff] }
 0x48e   : > { %7427 = vrcp.f32 %v1940_v7 }
 0x48f   : > { %v2051_v37 = vsub.f32 2.0, %v2019_v14  ;;  %v2133_v57 = vmul.f32 %v12047_v12, %v2082_v39  ;;  %v2132_v58 = vmul.f32 %v12048_v18, %v2082_v39  ;;  %v12059_v12 = vld [vmem:[#allocation17_spill] sm:$0xff] }
 0x490   : > { %v7424_v15 = vpop.eup %7423  ;;  %3472 = vmatmul.mubr.f32.gmra.mrb[130].mxu1 %v2130_v8 }
 0x491   : > { %v2083_v56 = vmul.f32 %v7422_v23, %v2051_v37  ;;  %v2020_v61 = vmul.f32 %v7424_v15, %v1934_v16  ;;  %v1943_v17 = vpop.xlane.xlu1 %1942  ;;  %3476 = vmatprep.mubr.f32.mxu1 %v2133_v57  ;;  %v6888_v16 = vpack.c.bf16 %v3562_v59, %v3561_v40  ;;  %v12065_v40 = vld [vmem:[#allocation18_spill] sm:$0xff] }
 0x492   : > { %7429 = vrcp.f32 %v1943_v17 }
 0x493   : > { %v2052_v19 = vsub.f32 2.0, %v2020_v61  ;;  %v2135_v34 = vmul.f32 %v12049_v9, %v2083_v56  ;;  %v2134_v10 = vmul.f32 %v12050_v55, %v2083_v56  ;;  %6889 = vmatprep.subr.bf16.mxu0 %v6888_v16 }
 0x494   : > { %v7426_v36 = vpop.eup %7425  ;;  %3477 = vmatmul.mubr.f32.gmra.mrb[132].mxu1 %v2132_v58  ;;  %6891 = vmatpush3.bf16.msra.mxu0 %v6888_v16  ;;  %v12066_v16 = vld [vmem:[#allocation119_spill] sm:$0xff] }
 0x495   : > { %v2084_v3 = vmul.f32 %v7424_v15, %v2052_v19  ;;  %v2021_v0 = vmul.f32 %v7426_v36, %v1937_v48  ;;  %3481 = vmatprep.mubr.f32.mxu1 %v2135_v34  ;;  %v1946_v28 = vpop.xlane.xlu0 %1945  ;;  %v12057_v48 = vld [vmem:[#allocation16_spill] sm:$0xff] }
 0x496   : > { %7431 = vrcp.f32 %v1946_v28 }
 0x497   : > { %v2053_v44 = vsub.f32 2.0, %v2021_v0  ;;  %v2137_v43 = vmul.f32 %v12051_v25, %v2084_v3  ;;  %v2136_v33 = vmul.f32 %v12052_v63, %v2084_v3  ;;  %v12060_v3 = vld [vmem:[#allocation118_spill] sm:$0xff]  ;;  %v12062_v63 = vld [vmem:[#allocation117_spill] sm:$0xff] }
 0x498   : > { %v7428_v21 = vpop.eup %7427  ;;  %3482 = vmatmul.mubr.f32.gmra.mrb[134].mxu1 %v2134_v10 }
 0x499   : > { %v2085_v22 = vmul.f32 %v7426_v36, %v2053_v44  ;;  %v2022_v46 = vmul.f32 %v7428_v21, %v1940_v7  ;;  %v1949_v35 = vpop.xlane.xlu1 %1948  ;;  %3486 = vmatprep.mubr.f32.mxu1 %v2137_v43  ;;  %v12061_v43 = vld [vmem:[#allocation63_spill] sm:$0xff] }
 0x49a   : > { %7433 = vrcp.f32 %v1949_v35 }
 0x49b   : > { %v2054_v54 = vsub.f32 2.0, %v2022_v46  ;;  %v2139_v6 = vmul.f32 %v12053_v1, %v2085_v22  ;;  %v2138_v29 = vmul.f32 %v12054_v26, %v2085_v22  ;;  %v12063_v1 = vld [vmem:[#allocation65_spill] sm:$0xff] }
 0x49c   : > { %v7430_v32 = vpop.eup %7429  ;;  %3487 = vmatmul.mubr.f32.gmra.mrb[136].mxu1 %v2136_v33 }
 0x49d   : > { %v2086_v45 = vmul.f32 %v7428_v21, %v2054_v54  ;;  %v2023_v20 = vmul.f32 %v7430_v32, %v1943_v17  ;;  %3491 = vmatprep.mubr.f32.mxu1 %v2139_v6  ;;  %v1952_v31 = vpop.xlane.xlu0 %1951 }
 0x49e   : > { %7435 = vrcp.f32 %v1952_v31 }
 0x49f   : > { %v2055_v60 = vsub.f32 2.0, %v2023_v20  ;;  %v2141_v49 = vmul.f32 %v12055_v62, %v2086_v45  ;;  %v2140_v11 = vmul.f32 %v12056_v5, %v2086_v45  ;;  %v12064_v45 = vld [vmem:[#allocation19_spill] sm:$0xff] }
 0x4a0   : > { %v7432_v27 = vpop.eup %7431  ;;  %3492 = vmatmul.mubr.f32.gmra.mrb[138].mxu1 %v2138_v29 }
 0x4a1   : > { %v2087_v13 = vmul.f32 %v7430_v32, %v2055_v60  ;;  %v2024_v42 = vmul.f32 %v7432_v27, %v1946_v28  ;;  %v1955_v51 = vpop.xlane.xlu1 %1954  ;;  %3496 = vmatprep.mubr.f32.mxu1 %v2141_v49 }
 0x4a2   : > { %7437 = vrcp.f32 %v1955_v51 }
 0x4a3   : > { %v2056_v38 = vsub.f32 2.0, %v2024_v42  ;;  %v2143_v30 = vmul.f32 %v12057_v48, %v2087_v13  ;;  %v2142_v23 = vmul.f32 %v12058_v2, %v2087_v13  ;;  %v12068_v13 = vld [vmem:[#allocation69_spill] sm:$0xff] }
 0x4a4   : > { %v7434_v53 = vpop.eup %7433  ;;  %3497 = vmatmul.mubr.f32.gmra.mrb[140].mxu1 %v2140_v11 }
 0x4a5   : > { %v2088_v50 = vmul.f32 %v7432_v27, %v2056_v38  ;;  %v2025_v8 = vmul.f32 %v7434_v53, %v1949_v35  ;;  %3501 = vmatprep.mubr.f32.mxu1 %v2143_v30  ;;  %v1958_v39 = vpop.xlane.xlu0 %1957  ;;  %v12067_v27 = vld [vmem:[#allocation120_spill] sm:$0xff] }
 0x4a6   : > { %7439 = vrcp.f32 %v1958_v39 }
 0x4a7   : > { %v2057_v14 = vsub.f32 2.0, %v2025_v8  ;;  %v2145_v7 = vmul.f32 %v9695_v52, %v2088_v50  ;;  %v2144_v57 = vmul.f32 %v12059_v12, %v2088_v50 }
 0x4a8   : > { %v7436_v37 = vpop.eup %7435  ;;  %3502 = vmatmul.mubr.f32.gmra.mrb[142].mxu1 %v2142_v23 }
 0x4a9   : > { %v2089_v15 = vmul.f32 %v7434_v53, %v2057_v14  ;;  %v2026_v18 = vmul.f32 %v7436_v37, %v1952_v31  ;;  %v1961_v58 = vpop.xlane.xlu1 %1960  ;;  %3506 = vmatprep.mubr.f32.mxu1 %v2145_v7 }
 0x4aa   : > { %7441 = vrcp.f32 %v1961_v58 }
 0x4ab   : > { %v2058_v56 = vsub.f32 2.0, %v2026_v18  ;;  %v2147_v61 = vmul.f32 %v9713_v41, %v2089_v15  ;;  %v2146_v19 = vmul.f32 %v9710_v24, %v2089_v15 }
 0x4ac   : > { %v7438_v17 = vpop.eup %7437  ;;  %3507 = vmatmul.mubr.f32.gmra.mrb[144].mxu1 %v2144_v57 }
 0x4ad   : > { %v2090_v9 = vmul.f32 %v7436_v37, %v2058_v56  ;;  %v2027_v34 = vmul.f32 %v7438_v17, %v1955_v51  ;;  %3511 = vmatprep.mubr.f32.mxu1 %v2147_v61  ;;  %v1964_v52 = vpop.xlane.xlu0 %1963  ;;  %v12069_v51 = vld [vmem:[#allocation67_spill] sm:$0xff] }
 0x4ae   : > { %7443 = vrcp.f32 %v1964_v52 }
 0x4af   : > { %v2059_v36 = vsub.f32 2.0, %v2027_v34  ;;  %v2149_v55 = vmul.f32 %v9730_v4, %v2090_v9  ;;  %v2148_v0 = vmul.f32 %v12060_v3, %v2090_v9 }
 0x4b0   : > { %v7440_v10 = vpop.eup %7439  ;;  %3512 = vmatmul.mubr.f32.gmra.mrb[146].mxu1 %v2146_v19 }
 0x4b1   : > { %v2091_v28 = vmul.f32 %v7438_v17, %v2059_v36  ;;  %v2028_v44 = vmul.f32 %v7440_v10, %v1958_v39  ;;  %v1967_v25 = vpop.xlane.xlu1 %1966  ;;  %3516 = vmatprep.mubr.f32.mxu1 %v2149_v55 }
 0x4b2   : > { %7445 = vrcp.f32 %v1967_v25 }
 0x4b3   : > { %v2060_v41 = vsub.f32 2.0, %v2028_v44  ;;  %v2151_v24 = vmul.f32 %v12061_v43, %v2091_v28  ;;  %v2150_v33 = vmul.f32 %v12062_v63, %v2091_v28 }
 0x4b4   : > { %v7442_v21 = vpop.eup %7441  ;;  %3517 = vmatmul.mubr.f32.gmra.mrb[148].mxu1 %v2148_v0 }
 0x4b5   : > { %v2092_v22 = vmul.f32 %v7440_v10, %v2060_v41  ;;  %v2029_v46 = vmul.f32 %v7442_v21, %v1961_v58  ;;  %3521 = vmatprep.mubr.f32.mxu1 %v2151_v24 }
 0x4b7   : > { %v2061_v4 = vsub.f32 2.0, %v2029_v46  ;;  %v2153_v35 = vmul.f32 %v9755_v47, %v2092_v22  ;;  %v2152_v6 = vmul.f32 %v12063_v1, %v2092_v22 }
 0x4b8   : > { %v7444_v54 = vpop.eup %7443  ;;  %3522 = vmatmul.mubr.f32.gmra.mrb[150].mxu1 %v2150_v33 }
 0x4b9   : > { %v2093_v32 = vmul.f32 %v7442_v21, %v2061_v4  ;;  %v2030_v26 = vmul.f32 %v7444_v54, %v1964_v52  ;;  %3526 = vmatprep.mubr.f32.mxu1 %v2153_v35 }
 0x4bb   : > { %v2062_v29 = vsub.f32 2.0, %v2030_v26  ;;  %v2155_v20 = vmul.f32 %v12064_v45, %v2093_v32  ;;  %v2154_v59 = vmul.f32 %v12065_v40, %v2093_v32 }
 0x4bc   : > { %v7446_v31 = vpop.eup %7445  ;;  %3527 = vmatmul.mubr.f32.gmra.mrb[152].mxu1 %v2152_v6 }
 0x4bd   : > { %v2094_v60 = vmul.f32 %v7444_v54, %v2062_v29  ;;  %v2031_v62 = vmul.f32 %v7446_v31, %v1967_v25  ;;  %3531 = vmatprep.mubr.f32.mxu1 %v2155_v20 }
 0x4bf   : > { %v2063_v49 = vsub.f32 2.0, %v2031_v62  ;;  %v2157_v47 = vmul.f32 %v12066_v16, %v2094_v60  ;;  %v2156_v5 = vmul.f32 %v12067_v27, %v2094_v60 }
 0x4c0   : > { %3532 = vmatmul.mubr.f32.gmra.mrb[154].mxu1 %v2154_v59 }
 0x4c1   : > { %v2095_v11 = vmul.f32 %v7446_v31, %v2063_v49  ;;  %3536 = vmatprep.mubr.f32.mxu1 %v2157_v47 }
 0x4c3   : > { %v2159_v42 = vmul.f32 %v12068_v13, %v2095_v11  ;;  %v2158_v38 = vmul.f32 %v12069_v51, %v2095_v11 }
 0x4c4   : > { %3537 = vmatmul.mubr.f32.gmra.mrb[156].mxu1 %v2156_v5 }
 0x4c5   : > { %3541 = vmatprep.mubr.f32.mxu1 %v2159_v42 }
 0x4c8   : > { %3542 = vmatmul.mubr.f32.gmra.mrb[158].mxu1 %v2158_v38 }
 0x51f   : > { %v3388_v48 = vpop.f32.mrb[96].mxu1 }
 0x520   : > { %v3390_v30 = vpop.f32.mrb[97].mxu1  ;;  %6428 = vmatprep.mubr.f32.mxu0 %v3388_v48 }
 0x521   : > { %v7639_v30 = vld [vmem:[#allocation2 + $0x8] sm:$0xff] }
 0x523   : > { %v3393_v53 = vpop.f32.mrb[98].mxu1 }
 0x524   : > { %v3395_v2 = vpop.f32.mrb[99].mxu1  ;;  %6429 = vmatmul.mubr.f32.vlgmr.msra.gmra.mrb[128].mxu0 %v3393_v53 }
 0x527   : > { %v3398_v23 = vpop.f32.mrb[100].mxu1 }
 0x528   : > { %v3400_v50 = vpop.f32.mrb[101].mxu1  ;;  %6431 = vmatprep.mubr.f32.mxu0 %v3398_v23  ;;  %v7640_v23 = vld [vmem:[#allocation2] sm:$0xff] }
 0x52b   : > { %v3403_v8 = vpop.f32.mrb[102].mxu1 }
 0x52c   : > { %v3405_v39 = vpop.f32.mrb[103].mxu1  ;;  %6432 = vmatmul.mubr.f32.gmra.mrb[130].mxu0 %v3403_v8 }
 0x52d   : > { %v7641_v39 = vld [vmem:[#allocation2 + $0x18] sm:$0xff] }
 0x52f   : > { %v3408_v14 = vpop.f32.mrb[104].mxu1 }
 0x530   : > { %v3410_v7 = vpop.f32.mrb[105].mxu1  ;;  %6434 = vmatprep.mubr.f32.mxu0 %v3408_v14 }
 0x533   : > { %v3413_v37 = vpop.f32.mrb[106].mxu1 }
 0x534   : > { %v3415_v12 = vpop.f32.mrb[107].mxu1  ;;  %6435 = vmatmul.mubr.f32.gmra.mrb[132].mxu0 %v3413_v37  ;;  %v7642_v37 = vld [vmem:[#allocation2 + $0x10] sm:$0xff] }
 0x537   : > { %v3418_v57 = vpop.f32.mrb[108].mxu1 }
 0x538   : > { %v3420_v15 = vpop.f32.mrb[109].mxu1  ;;  %6437 = vmatprep.mubr.f32.mxu0 %v3418_v57 }
 0x539   : > { %v7643_v15 = vld [vmem:[#allocation2 + $0x28] sm:$0xff] }
 0x53b   : > { %v3423_v18 = vpop.f32.mrb[110].mxu1 }
 0x53c   : > { %v3425_v58 = vpop.f32.mrb[111].mxu1  ;;  %6438 = vmatmul.mubr.f32.gmra.mrb[134].mxu0 %v3423_v18 }
 0x53f   : > { %v3428_v56 = vpop.f32.mrb[112].mxu1 }
 0x540   : > { %v3430_v61 = vpop.f32.mrb[113].mxu1  ;;  %6440 = vmatprep.mubr.f32.mxu0 %v3428_v56  ;;  %v7644_v56 = vld [vmem:[#allocation2 + $0x20] sm:$0xff] }
 0x543   : > { %v3433_v17 = vpop.f32.mrb[114].mxu1 }
 0x544   : > { %v3435_v19 = vpop.f32.mrb[115].mxu1  ;;  %6441 = vmatmul.mubr.f32.gmra.mrb[136].mxu0 %v3433_v17 }
 0x545   : > { %v7645_v19 = vld [vmem:[#allocation2 + $0x38] sm:$0xff] }
 0x547   : > { %v3438_v9 = vpop.f32.mrb[116].mxu1 }
 0x548   : > { %v3440_v34 = vpop.f32.mrb[117].mxu1  ;;  %6443 = vmatprep.mubr.f32.mxu0 %v3438_v9 }
 0x54b   : > { %v3443_v52 = vpop.f32.mrb[118].mxu1 }
 0x54c   : > { %v3445_v36 = vpop.f32.mrb[119].mxu1  ;;  %6444 = vmatmul.mubr.f32.gmra.mrb[138].mxu0 %v3443_v52  ;;  %v7646_v52 = vld [vmem:[#allocation2 + $0x30] sm:$0xff] }
 0x54f   : > { %v3448_v55 = vpop.f32.mrb[120].mxu1 }
 0x550   : > { %v3450_v10 = vpop.f32.mrb[121].mxu1  ;;  %6446 = vmatprep.mubr.f32.mxu0 %v3448_v55 }
 0x551   : > { %v7647_v10 = vld [vmem:[#allocation2 + $0x48] sm:$0xff] }
 0x553   : > { %v3453_v3 = vpop.f32.mrb[122].mxu1 }
 0x554   : > { %v3455_v0 = vpop.f32.mrb[123].mxu1  ;;  %6447 = vmatmul.mubr.f32.gmra.mrb[140].mxu0 %v3453_v3 }
 0x557   : > { %v3458_v28 = vpop.f32.mrb[124].mxu1 }
 0x558   : > { %v3460_v44 = vpop.f32.mrb[125].mxu1  ;;  %6449 = vmatprep.mubr.f32.mxu0 %v3458_v28  ;;  %v7648_v28 = vld [vmem:[#allocation2 + $0x40] sm:$0xff] }
 0x55b   : > { %v3463_v25 = vpop.f32.mrb[126].mxu1 }
 0x55c   : > { %v3465_v41 = vpop.f32.mrb[127].mxu1  ;;  %6450 = vmatmul.mubr.f32.gmra.mrb[142].mxu0 %v3463_v25 }
 0x55d   : > { %v7649_v41 = vld [vmem:[#allocation2 + $0x58] sm:$0xff] }
 0x55f   : > { %v3468_v43 = vpop.f32.mrb[128].mxu1 }
 0x560   : > { %v3470_v24 = vpop.f32.mrb[129].mxu1  ;;  %6452 = vmatprep.mubr.f32.mxu0 %v3468_v43 }
 0x563   : > { %v3473_v21 = vpop.f32.mrb[130].mxu1 }
 0x564   : > { %v3475_v63 = vpop.f32.mrb[131].mxu1  ;;  %6453 = vmatmul.mubr.f32.gmra.mrb[144].mxu0 %v3473_v21  ;;  %v7650_v21 = vld [vmem:[#allocation2 + $0x50] sm:$0xff] }
 0x567   : > { %v3478_v33 = vpop.f32.mrb[132].mxu1 }
 0x568   : > { %v3480_v22 = vpop.f32.mrb[133].mxu1  ;;  %6455 = vmatprep.mubr.f32.mxu0 %v3478_v33 }
 0x569   : > { %v7651_v22 = vld [vmem:[#allocation2 + $0x68] sm:$0xff] }
 0x56b   : > { %v3483_v46 = vpop.f32.mrb[134].mxu1 }
 0x56c   : > { %v3485_v4 = vpop.f32.mrb[135].mxu1  ;;  %6456 = vmatmul.mubr.f32.gmra.mrb[146].mxu0 %v3483_v46 }
 0x56f   : > { %v3488_v35 = vpop.f32.mrb[136].mxu1 }
 0x570   : > { %v3490_v54 = vpop.f32.mrb[137].mxu1  ;;  %6458 = vmatprep.mubr.f32.mxu0 %v3488_v35  ;;  %v7652_v35 = vld [vmem:[#allocation2 + $0x60] sm:$0xff] }
 0x573   : > { %v3493_v1 = vpop.f32.mrb[138].mxu1 }
 0x574   : > { %v3495_v6 = vpop.f32.mrb[139].mxu1  ;;  %6459 = vmatmul.mubr.f32.gmra.mrb[148].mxu0 %v3493_v1 }
 0x575   : > { %v7653_v6 = vld [vmem:[#allocation2 + $0x78] sm:$0xff] }
 0x577   : > { %v3498_v32 = vpop.f32.mrb[140].mxu1 }
 0x578   : > { %v3500_v26 = vpop.f32.mrb[141].mxu1  ;;  %6461 = vmatprep.mubr.f32.mxu0 %v3498_v32 }
 0x57b   : > { %v3503_v29 = vpop.f32.mrb[142].mxu1 }
 0x57c   : > { %v3505_v45 = vpop.f32.mrb[143].mxu1  ;;  %6462 = vmatmul.mubr.f32.gmra.mrb[150].mxu0 %v3503_v29  ;;  %v7654_v29 = vld [vmem:[#allocation2 + $0x70] sm:$0xff] }
 0x57f   : > { %v3508_v20 = vpop.f32.mrb[144].mxu1 }
 0x580   : > { %v3510_v31 = vpop.f32.mrb[145].mxu1  ;;  %6464 = vmatprep.mubr.f32.mxu0 %v3508_v20 }
 0x581   : > { %v7655_v31 = vld [vmem:[#allocation2 + $0x88] sm:$0xff] }
 0x583   : > { %v3513_v40 = vpop.f32.mrb[146].mxu1 }
 0x584   : > { %v3515_v59 = vpop.f32.mrb[147].mxu1  ;;  %6465 = vmatmul.mubr.f32.gmra.mrb[152].mxu0 %v3513_v40 }
 0x587   : > { %v3518_v60 = vpop.f32.mrb[148].mxu1 }
 0x588   : > { %v3520_v62 = vpop.f32.mrb[149].mxu1  ;;  %6467 = vmatprep.mubr.f32.mxu0 %v3518_v60  ;;  %v7656_v60 = vld [vmem:[#allocation2 + $0x80] sm:$0xff] }
 0x58b   : > { %v3523_v49 = vpop.f32.mrb[150].mxu1 }
 0x58c   : > { %v3525_v16 = vpop.f32.mrb[151].mxu1  ;;  %6468 = vmatmul.mubr.f32.gmra.mrb[154].mxu0 %v3523_v49 }
 0x58d   : > { %v7657_v16 = vld [vmem:[#allocation2 + $0x98] sm:$0xff] }
 0x58f   : > { %v3528_v47 = vpop.f32.mrb[152].mxu1 }
 0x590   : > { %v3530_v27 = vpop.f32.mrb[153].mxu1  ;;  %6470 = vmatprep.mubr.f32.mxu0 %v3528_v47 }
 0x593   : > { %v3533_v5 = vpop.f32.mrb[154].mxu1 }
 0x594   : > { %v3535_v11 = vpop.f32.mrb[155].mxu1  ;;  %6471 = vmatmul.mubr.f32.gmra.mrb[156].mxu0 %v3533_v5  ;;  %v7658_v5 = vld [vmem:[#allocation2 + $0x90] sm:$0xff] }
 0x597   : > { %v3538_v13 = vpop.f32.mrb[156].mxu1 }
 0x598   : > { %v3540_v42 = vpop.f32.mrb[157].mxu1  ;;  %6473 = vmatprep.mubr.f32.mxu0 %v3538_v13 }
 0x599   : > { %v7659_v42 = vld [vmem:[#allocation2 + $0xa8] sm:$0xff] }
 0x59b   : > { %v3543_v51 = vpop.f32.mrb[158].mxu1 }
 0x59c   : > { %v3545_v38 = vpop.f32.mrb[159].mxu1  ;;  %6474 = vmatmul.mubr.f32.gmra.mrb[158].mxu0 %v3543_v51 }
 0x5f7   : > { %v6430_v48 = vpop.f32.mrb[128].mxu0 }
 0x5f8   : > { %v9885_v53 = vadd.f32 %v7639_v30, %v6430_v48  ;;  %v3629_v2 = vpop.f32.mrb[129].mxu0  ;;  %v7660_v48 = vld [vmem:[#allocation2 + $0xa0] sm:$0xff] }
 0x5f9   : > { %v9887_v50 = vadd.f32 %v7640_v23, %v3629_v2  ;;  %v7661_v23 = vld [vmem:[#allocation2 + $0xb8] sm:$0xff] }
 0x5fa   : > { %12070 = vst [vmem:[#allocation20_spill] sm:$0xff] %v9885_v53  ;;  %3825 = vadd.xlane.f32.xlu1 %v9885_v53 }
 0x5fb   : > { %12071 = vst [vmem:[#allocation21_spill] sm:$0xff] %v9887_v50  ;;  %3823 = vadd.xlane.f32.xlu0 %v9887_v50 }
 0x5ff   : > { %v6433_v8 = vpop.f32.mrb[130].mxu0 }
 0x600   : > { %v9891_v14 = vadd.f32 %v7641_v39, %v6433_v8  ;;  %v3639_v7 = vpop.f32.mrb[131].mxu0 }
 0x601   : > { %v9893_v12 = vadd.f32 %v7642_v37, %v3639_v7  ;;  %v7662_v7 = vld [vmem:[#allocation2 + $0xb0] sm:$0xff] }
 0x602   : > { %12072 = vst [vmem:[#allocation122_spill] sm:$0xff] %v9891_v14  ;;  %3829 = vadd.xlane.f32.xlu1 %v9891_v14 }
 0x603   : > { %12073 = vst [vmem:[#allocation121_spill] sm:$0xff] %v9893_v12  ;;  %3827 = vadd.xlane.f32.xlu0 %v9893_v12 }
 0x607   : > { %v6436_v57 = vpop.f32.mrb[132].mxu0 }
 0x608   : > { %v9897_v18 = vadd.f32 %v7643_v15, %v6436_v57  ;;  %v3649_v58 = vpop.f32.mrb[133].mxu0  ;;  %v7663_v15 = vld [vmem:[#allocation2 + $0xc8] sm:$0xff] }
 0x609   : > { %v9899_v61 = vadd.f32 %v7644_v56, %v3649_v58 }
 0x60a   : > { %12074 = vst [vmem:[#allocation71_spill] sm:$0xff] %v9897_v18  ;;  %3833 = vadd.xlane.f32.xlu1 %v9897_v18 }
 0x60b   : > { %12075 = vst [vmem:[#allocation73_spill] sm:$0xff] %v9899_v61  ;;  %3831 = vadd.xlane.f32.xlu0 %v9899_v61 }
 0x60f   : > { %v6439_v17 = vpop.f32.mrb[134].mxu0 }
 0x610   : > { %v9903_v9 = vadd.f32 %v7645_v19, %v6439_v17  ;;  %v3659_v34 = vpop.f32.mrb[135].mxu0  ;;  %v7664_v17 = vld [vmem:[#allocation2 + $0xc0] sm:$0xff] }
 0x611   : > { %v9905_v36 = vadd.f32 %v7646_v52, %v3659_v34  ;;  %v7665_v52 = vld [vmem:[#allocation2 + $0xd8] sm:$0xff] }
 0x612   : > { %12076 = vst [vmem:[#allocation22_spill] sm:$0xff] %v9903_v9  ;;  %3837 = vadd.xlane.f32.xlu1 %v9903_v9 }
 0x613   : > { %12077 = vst [vmem:[#allocation23_spill] sm:$0xff] %v9905_v36  ;;  %3835 = vadd.xlane.f32.xlu0 %v9905_v36 }
 0x617   : > { %v6442_v55 = vpop.f32.mrb[136].mxu0 }
 0x618   : > { %v9909_v3 = vadd.f32 %v7647_v10, %v6442_v55  ;;  %v3669_v0 = vpop.f32.mrb[137].mxu0 }
 0x619   : > { %v9911_v44 = vadd.f32 %v7648_v28, %v3669_v0  ;;  %v7666_v0 = vld [vmem:[#allocation2 + $0xd0] sm:$0xff] }
 0x61a   : > { %12078 = vst [vmem:[#allocation36_spill] sm:$0xff] %v9909_v3  ;;  %3841 = vadd.xlane.f32.xlu1 %v9909_v3 }
 0x61b   : > { %12079 = vst [vmem:[#allocation33_spill] sm:$0xff] %v9911_v44  ;;  %3839 = vadd.xlane.f32.xlu0 %v9911_v44 }
 0x61f   : > { %v6445_v25 = vpop.f32.mrb[138].mxu0 }
 0x620   : > { %v9915_v43 = vadd.f32 %v7649_v41, %v6445_v25  ;;  %v3679_v24 = vpop.f32.mrb[139].mxu0  ;;  %v7667_v41 = vld [vmem:[#allocation2 + $0xe8] sm:$0xff] }
 0x621   : > { %v9917_v63 = vadd.f32 %v7650_v21, %v3679_v24 }
 0x622   : > { %12080 = vst [vmem:[#allocation75_spill] sm:$0xff] %v9915_v43  ;;  %3845 = vadd.xlane.f32.xlu1 %v9915_v43 }
 0x623   : > { %12081 = vst [vmem:[#allocation77_spill] sm:$0xff] %v9917_v63  ;;  %3843 = vadd.xlane.f32.xlu0 %v9917_v63 }
 0x627   : > { %v6448_v33 = vpop.f32.mrb[140].mxu0 }
 0x628   : > { %v9921_v46 = vadd.f32 %v7651_v22, %v6448_v33  ;;  %v3689_v4 = vpop.f32.mrb[141].mxu0  ;;  %v7668_v33 = vld [vmem:[#allocation2 + $0xe0] sm:$0xff] }
 0x629   : > { %v9923_v54 = vadd.f32 %v7652_v35, %v3689_v4  ;;  %v7669_v35 = vld [vmem:[#allocation2 + $0xf8] sm:$0xff] }
 0x62a   : > { %12082 = vst [vmem:[#allocation24_spill] sm:$0xff] %v9921_v46  ;;  %3849 = vadd.xlane.f32.xlu1 %v9921_v46 }
 0x62b   : > { %12083 = vst [vmem:[#allocation26_spill] sm:$0xff] %v9923_v54  ;;  %3847 = vadd.xlane.f32.xlu0 %v9923_v54 }
 0x62f   : > { %v6451_v1 = vpop.f32.mrb[142].mxu0 }
 0x630   : > { %v9927_v32 = vadd.f32 %v7653_v6, %v6451_v1  ;;  %v3699_v26 = vpop.f32.mrb[143].mxu0 }
 0x631   : > { %v9929_v45 = vadd.f32 %v7654_v29, %v3699_v26  ;;  %v7670_v26 = vld [vmem:[#allocation2 + $0xf0] sm:$0xff] }
 0x632   : > { %12084 = vst [vmem:[#allocation53_spill] sm:$0xff] %v9927_v32  ;;  %3853 = vadd.xlane.f32.xlu1 %v9927_v32 }
 0x633   : > { %12085 = vst [vmem:[#allocation51_spill] sm:$0xff] %v9929_v45  ;;  %3851 = vadd.xlane.f32.xlu0 %v9929_v45 }
 0x637   : > { %v6454_v20 = vpop.f32.mrb[144].mxu0 }
 0x638   : > { %v9933_v40 = vadd.f32 %v7655_v31, %v6454_v20  ;;  %v3709_v59 = vpop.f32.mrb[145].mxu0  ;;  %v9984_v31 = vld [vmem:[%s12102_s13] ss:$0 sm:$0xff] }
 0x639   : > { %v9935_v62 = vadd.f32 %v7656_v60, %v3709_v59 }
 0x63a   : > { %12086 = vst [vmem:[#allocation79_spill] sm:$0xff] %v9933_v40  ;;  %3857 = vadd.xlane.f32.xlu1 %v9933_v40 }
 0x63b   : > { %12087 = vst [vmem:[#allocation81_spill] sm:$0xff] %v9935_v62  ;;  %3855 = vadd.xlane.f32.xlu0 %v9935_v62 }
 0x63f   : > { %v6457_v49 = vpop.f32.mrb[146].mxu0 }
 0x640   : > { %v9939_v47 = vadd.f32 %v7657_v16, %v6457_v49  ;;  %v3719_v27 = vpop.f32.mrb[147].mxu0  ;;  %v4289_v16 = vld [vmem:[%s7843_s2] sm:$0xff] }
 0x641   : > { %v9941_v11 = vadd.f32 %v7658_v5, %v3719_v27  ;;  %v4290_v27 = vld [vmem:[%s7843_s2 + $0x8] sm:$0xff]  ;;  %v4291_v5 = vld [vmem:[%s7843_s2 + $0x10] sm:$0xff] }
 0x642   : > { %12088 = vst [vmem:[#allocation28_spill] sm:$0xff] %v9939_v47  ;;  %3861 = vadd.xlane.f32.xlu1 %v9939_v47 }
 0x643   : > { %12089 = vst [vmem:[#allocation29_spill] sm:$0xff] %v9941_v11  ;;  %3859 = vadd.xlane.f32.xlu0 %v9941_v11 }
 0x647   : > { %v6460_v13 = vpop.f32.mrb[148].mxu0 }
 0x648   : > { %v9945_v51 = vadd.f32 %v7659_v42, %v6460_v13  ;;  %v3729_v38 = vpop.f32.mrb[149].mxu0  ;;  %v6892_v42 = vpack.c.bf16 %v4290_v27, %v4289_v16 }
 0x649   : > { %v9947_v30 = vadd.f32 %v7660_v48, %v3729_v38  ;;  %v4292_v38 = vld [vmem:[%s7843_s2 + $0x18] sm:$0xff] }
 0x64a   : > { %12090 = vst [vmem:[#allocation40_spill] sm:$0xff] %v9945_v51  ;;  %3865 = vadd.xlane.f32.xlu1 %v9945_v51  ;;  %6893 = vmatprep.subr.bf16.mxu0 %v6892_v42 }
 0x64b   : > { %12091 = vst [vmem:[#allocation38_spill] sm:$0xff] %v9947_v30  ;;  %3863 = vadd.xlane.f32.xlu0 %v9947_v30  ;;  %6895 = vmatpush3.bf16.msra.mxu0 %v6892_v42 }
 0x64f   : > { %v6463_v2 = vpop.f32.mrb[150].mxu0 }
 0x650   : > { %v9951_v8 = vadd.f32 %v7661_v23, %v6463_v2  ;;  %v3739_v39 = vpop.f32.mrb[151].mxu0  ;;  %v6896_v2 = vpack.c.bf16 %v4292_v38, %v4291_v5  ;;  %v4293_v23 = vld [vmem:[%s7843_s2 + $0x20] sm:$0xff]  ;;  %v4295_v38 = vld [vmem:[%s7843_s2 + $0x30] sm:$0xff] }
 0x651   : > { %v9953_v37 = vadd.f32 %v7662_v7, %v3739_v39  ;;  %v4294_v39 = vld [vmem:[%s7843_s2 + $0x28] sm:$0xff] }
 0x652   : > { %12092 = vst [vmem:[#allocation83_spill] sm:$0xff] %v9951_v8  ;;  %3869 = vadd.xlane.f32.xlu1 %v9951_v8  ;;  %6897 = vmatprep.subr.bf16.mxu0 %v6896_v2 }
 0x653   : > { %12093 = vst [vmem:[#allocation85_spill] sm:$0xff] %v9953_v37  ;;  %3867 = vadd.xlane.f32.xlu0 %v9953_v37  ;;  %6899 = vmatpush3.bf16.msra.mxu0 %v6896_v2 }
 0x657   : > { %v6466_v57 = vpop.f32.mrb[152].mxu0 }
 0x658   : > { %v9957_v58 = vadd.f32 %v7663_v15, %v6466_v57  ;;  %v3749_v56 = vpop.f32.mrb[153].mxu0 }
 0x659   : > { %v9959_v19 = vadd.f32 %v7664_v17, %v3749_v56  ;;  %v6900_v56 = vpack.c.bf16 %v4294_v39, %v4293_v23 }
 0x65a   : > { %12094 = vst [vmem:[#allocation30_spill] sm:$0xff] %v9957_v58  ;;  %3873 = vadd.xlane.f32.xlu1 %v9957_v58 }
 0x65b   : > { %12095 = vst [vmem:[#allocation32_spill] sm:$0xff] %v9959_v19  ;;  %3871 = vadd.xlane.f32.xlu0 %v9959_v19  ;;  %6901 = vmatprep.subr.bf16.mxu0 %v6900_v56 }
 0x65c   : > { %6903 = vmatpush3.bf16.msra.mxu0 %v6900_v56 }
 0x65f   : > { %v6469_v34 = vpop.f32.mrb[154].mxu0 }
 0x660   : > { %v9963_v55 = vadd.f32 %v7665_v52, %v6469_v34  ;;  %v3759_v10 = vpop.f32.mrb[155].mxu0 }
 0x661   : > { %v9965_v28 = vadd.f32 %v7666_v0, %v3759_v10 }
 0x662   : > { %12096 = vst [vmem:[#allocation57_spill] sm:$0xff] %v9963_v55  ;;  %3877 = vadd.xlane.f32.xlu1 %v9963_v55 }
 0x663   : > { %12097 = vst [vmem:[#allocation55_spill] sm:$0xff] %v9965_v28  ;;  %3875 = vadd.xlane.f32.xlu0 %v9965_v28 }
 0x667   : > { %v6472_v25 = vpop.f32.mrb[156].mxu0 }
 0x668   : > { %v9969_v24 = vadd.f32 %v7667_v41, %v6472_v25  ;;  %v3769_v21 = vpop.f32.mrb[157].mxu0 }
 0x669   : > { %v9971_v22 = vadd.f32 %v7668_v33, %v3769_v21 }
 0x66a   : > { %12098 = vst [vmem:[#allocation87_spill] sm:$0xff] %v9969_v24  ;;  %3881 = vadd.xlane.f32.xlu1 %v9969_v24 }
 0x66b   : > { %12099 = vst [vmem:[#allocation89_spill] sm:$0xff] %v9971_v22  ;;  %3879 = vadd.xlane.f32.xlu0 %v9971_v22 }
 0x66f   : > { %v6475_v4 = vpop.f32.mrb[158].mxu0 }
 0x670   : > { %v9975_v1 = vadd.f32 %v7669_v35, %v6475_v4  ;;  %v3779_v6 = vpop.f32.mrb[159].mxu0 }
 0x671   : > { %v9977_v29 = vadd.f32 %v7670_v26, %v3779_v6 }
 0x672   : > { %12100 = vst [vmem:[#allocation34_spill] sm:$0xff] %v9975_v1  ;;  %3885 = vadd.xlane.f32.xlu1 %v9975_v1 }
 0x673   : > { %12101 = vst [vmem:[#allocation35_spill] sm:$0xff] %v9977_v29  ;;  %3883 = vadd.xlane.f32.xlu0 %v9977_v29 }
 0x687   : > { %v3826_v20 = vpop.xlane.xlu1 %3825 }
 0x688   : > { %v3888_v59 = vmul.f32 0.125, %v3826_v20  ;;  %v3824_v60 = vpop.xlane.xlu0 %3823 }
 0x689   : > { %v3887_v49 = vmul.f32 0.125, %v3824_v60 }
 0x68a   : > { %v3920_v13 = vsub.f32 %v9885_v53, %v3888_v59 }
 0x68b   : > { %v3919_v48 = vsub.f32 %v9887_v50, %v3887_v49 }
 0x68c   : > { %v9995_v7 = vmul.f32 %v9984_v31, %v3920_v13 }
 0x68d   : > { %v9998_v57 = vmul.f32 %v9984_v31, %v3919_v48  ;;  %v4296_v48 = vld [vmem:[%s7843_s2 + $0x38] sm:$0xff] }
 0x68e   : > { %v3990_v15 = vmul.f32 %v9995_v7, %v9995_v7  ;;  %v6904_v39 = vpack.c.bf16 %v4296_v48, %v4295_v38  ;;  %v4302_v38 = vld [vmem:[%s7843_s2 + $0x68] sm:$0xff] }
 0x68f   : > { %v3830_v17 = vpop.xlane.xlu1 %3829  ;;  %v3989_v34 = vmul.f32 %v9998_v57, %v9998_v57 }
 0x690   : > { %v3890_v52 = vmul.f32 0.125, %v3830_v17  ;;  %4023 = vadd.xlane.f32.xlu1 %v3990_v15  ;;  %v3828_v10 = vpop.xlane.xlu0 %3827  ;;  %6905 = vmatprep.subr.bf16.mxu0 %v6904_v39 }
 0x691   : > { %v3889_v0 = vmul.f32 0.125, %v3828_v10  ;;  %4021 = vadd.xlane.f32.xlu0 %v3989_v34  ;;  %6907 = vmatpush3.bf16.msra.mxu0 %v6904_v39  ;;  %v4297_v34 = vld [vmem:[%s7843_s2 + $0x40] sm:$0xff] }
 0x692   : > { %v3922_v25 = vsub.f32 %v9891_v14, %v3890_v52  ;;  %v4298_v52 = vld [vmem:[%s7843_s2 + $0x48] sm:$0xff] }
 0x693   : > { %v3921_v41 = vsub.f32 %v9893_v12, %v3889_v0  ;;  %v6908_v0 = vpack.c.bf16 %v4298_v52, %v4297_v34  ;;  %v4304_v34 = vld [vmem:[%s7843_s2 + $0x78] sm:$0xff] }
 0x694   : > { %v10007_v21 = vmul.f32 %v9984_v31, %v3922_v25 }
 0x695   : > { %v10010_v33 = vmul.f32 %v9984_v31, %v3921_v41  ;;  %6909 = vmatprep.subr.bf16.mxu0 %v6908_v0 }
 0x696   : > { %v3992_v4 = vmul.f32 %v10007_v21, %v10007_v21  ;;  %6911 = vmatpush3.bf16.msra.mxu0 %v6908_v0 }
 0x697   : > { %v3834_v35 = vpop.xlane.xlu1 %3833  ;;  %v3991_v6 = vmul.f32 %v10010_v33, %v10010_v33 }
 0x698   : > { %v3892_v26 = vmul.f32 0.125, %v3834_v35  ;;  %4027 = vadd.xlane.f32.xlu1 %v3992_v4  ;;  %v3832_v20 = vpop.xlane.xlu0 %3831 }
 0x699   : > { %v3891_v59 = vmul.f32 0.125, %v3832_v20  ;;  %4025 = vadd.xlane.f32.xlu0 %v3991_v6  ;;  %v4299_v6 = vld [vmem:[%s7843_s2 + $0x50] sm:$0xff] }
 0x69a   : > { %v3924_v60 = vsub.f32 %v9897_v18, %v3892_v26  ;;  %v4300_v26 = vld [vmem:[%s7843_s2 + $0x58] sm:$0xff] }
 0x69b   : > { %v3923_v49 = vsub.f32 %v9899_v61, %v3891_v59 }
 0x69c   : > { %v10019_v16 = vmul.f32 %v9984_v31, %v3924_v60  ;;  %v6912_v60 = vpack.c.bf16 %v4300_v26, %v4299_v6 }
 0x69d   : > { %v10022_v27 = vmul.f32 %v9984_v31, %v3923_v49 }
 0x69e   : > { %v3994_v5 = vmul.f32 %v10019_v16, %v10019_v16  ;;  %6913 = vmatprep.subr.bf16.mxu0 %v6912_v60 }
 0x69f   : > { %v3838_v13 = vpop.xlane.xlu1 %3837  ;;  %v3993_v42 = vmul.f32 %v10022_v27, %v10022_v27  ;;  %6915 = vmatpush3.bf16.msra.mxu0 %v6912_v60 }
 0x6a0   : > { %v3894_v2 = vmul.f32 0.125, %v3838_v13  ;;  %4031 = vadd.xlane.f32.xlu1 %v3994_v5  ;;  %v3836_v23 = vpop.xlane.xlu0 %3835 }
 0x6a1   : > { %v3893_v15 = vmul.f32 0.125, %v3836_v23  ;;  %4029 = vadd.xlane.f32.xlu0 %v3993_v42  ;;  %v4301_v42 = vld [vmem:[%s7843_s2 + $0x60] sm:$0xff] }
 0x6a2   : > { %v3926_v56 = vsub.f32 %v9903_v9, %v3894_v2  ;;  %v6916_v2 = vpack.c.bf16 %v4302_v38, %v4301_v42 }
 0x6a3   : > { %v3925_v17 = vsub.f32 %v9905_v36, %v3893_v15 }
 0x6a4   : > { %v10035_v10 = vmul.f32 %v9984_v31, %v3926_v56  ;;  %6917 = vmatprep.subr.bf16.mxu0 %v6916_v2 }
 0x6a5   : > { %v10038_v25 = vmul.f32 %v9984_v31, %v3925_v17  ;;  %6919 = vmatpush3.bf16.msra.mxu0 %v6916_v2  ;;  %v4303_v17 = vld [vmem:[%s7843_s2 + $0x70] sm:$0xff] }
 0x6a6   : > { %v3996_v41 = vmul.f32 %v10035_v10, %v10035_v10 }
 0x6a7   : > { %v3842_v4 = vpop.xlane.xlu1 %3841  ;;  %v3995_v35 = vmul.f32 %v10038_v25, %v10038_v25 }
 0x6a8   : > { %v3896_v20 = vmul.f32 0.125, %v3842_v4  ;;  %4035 = vadd.xlane.f32.xlu1 %v3996_v41  ;;  %v3840_v59 = vpop.xlane.xlu0 %3839  ;;  %v6920_v41 = vpack.c.bf16 %v4304_v34, %v4303_v17 }
 0x6a9   : > { %v3895_v49 = vmul.f32 0.125, %v3840_v59  ;;  %4033 = vadd.xlane.f32.xlu0 %v3995_v35 }
 0x6aa   : > { %v3928_v5 = vsub.f32 %v9909_v3, %v3896_v20  ;;  %6921 = vmatprep.subr.bf16.mxu0 %v6920_v41 }
 0x6ab   : > { %v3927_v13 = vsub.f32 %v9911_v44, %v3895_v49  ;;  %6923 = vmatpush3.bf16.msra.mxu0 %v6920_v41 }
 0x6ac   : > { %v10051_v48 = vmul.f32 %v9984_v31, %v3928_v5 }
 0x6ad   : > { %v10054_v23 = vmul.f32 %v9984_v31, %v3927_v13 }
 0x6ae   : > { %v3998_v39 = vmul.f32 %v10051_v48, %v10051_v48 }
 0x6af   : > { %v3846_v15 = vpop.xlane.xlu1 %3845  ;;  %v3997_v56 = vmul.f32 %v10054_v23, %v10054_v23 }
 0x6b0   : > { %v3898_v52 = vmul.f32 0.125, %v3846_v15  ;;  %4039 = vadd.xlane.f32.xlu1 %v3998_v39  ;;  %v3844_v0 = vpop.xlane.xlu0 %3843 }
 0x6b1   : > { %v3897_v4 = vmul.f32 0.125, %v3844_v0  ;;  %4037 = vadd.xlane.f32.xlu0 %v3997_v56 }
 0x6b2   : > { %v3930_v35 = vsub.f32 %v9915_v43, %v3898_v52 }
 0x6b3   : > { %v3929_v6 = vsub.f32 %v9917_v63, %v3897_v4 }
 0x6b4   : > { %v10065_v26 = vmul.f32 %v9984_v31, %v3930_v35 }
 0x6b5   : > { %v10068_v20 = vmul.f32 %v9984_v31, %v3929_v6 }
 0x6b6   : > { %v4000_v59 = vmul.f32 %v10065_v26, %v10065_v26 }
 0x6b7   : > { %v3850_v60 = vpop.xlane.xlu1 %3849  ;;  %v3999_v49 = vmul.f32 %v10068_v20, %v10068_v20 }
 0x6b8   : > { %v3900_v5 = vmul.f32 0.125, %v3850_v60  ;;  %4043 = vadd.xlane.f32.xlu1 %v4000_v59  ;;  %v3848_v13 = vpop.xlane.xlu0 %3847 }
 0x6b9   : > { %v3899_v42 = vmul.f32 0.125, %v3848_v13  ;;  %4041 = vadd.xlane.f32.xlu0 %v3999_v49 }
 0x6ba   : > { %v3932_v38 = vsub.f32 %v9921_v46, %v3900_v5 }
 0x6bb   : > { %v3931_v2 = vsub.f32 %v9923_v54, %v3899_v42 }
 0x6bc   : > { %v10077_v39 = vmul.f32 %v9984_v31, %v3932_v38 }
 0x6bd   : > { %v10080_v15 = vmul.f32 %v9984_v31, %v3931_v2 }
 0x6be   : > { %v4002_v56 = vmul.f32 %v10077_v39, %v10077_v39 }
 0x6bf   : > { %v3854_v17 = vpop.xlane.xlu1 %3853  ;;  %v4001_v34 = vmul.f32 %v10080_v15, %v10080_v15 }
 0x6c0   : > { %v3902_v52 = vmul.f32 0.125, %v3854_v17  ;;  %4047 = vadd.xlane.f32.xlu1 %v4002_v56  ;;  %v3852_v0 = vpop.xlane.xlu0 %3851 }
 0x6c1   : > { %v3901_v41 = vmul.f32 0.125, %v3852_v0  ;;  %4045 = vadd.xlane.f32.xlu0 %v4001_v34 }
 0x6c2   : > { %v3934_v4 = vsub.f32 %v9927_v32, %v3902_v52 }
 0x6c3   : > { %v3933_v35 = vsub.f32 %v9929_v45, %v3901_v41 }
 0x6c4   : > { %v10089_v6 = vmul.f32 %v9984_v31, %v3934_v4 }
 0x6c5   : > { %v10092_v59 = vmul.f32 %v9984_v31, %v3933_v35 }
 0x6c6   : > { %v4004_v60 = vmul.f32 %v10089_v6, %v10089_v6 }
 0x6c7   : > { %v3858_v49 = vpop.xlane.xlu1 %3857  ;;  %v4003_v5 = vmul.f32 %v10092_v59, %v10092_v59 }
 0x6c8   : > { %v3904_v13 = vmul.f32 0.125, %v3858_v49  ;;  %4051 = vadd.xlane.f32.xlu1 %v4004_v60  ;;  %v3856_v42 = vpop.xlane.xlu0 %3855 }
 0x6c9   : > { %v3903_v38 = vmul.f32 0.125, %v3856_v42  ;;  %4049 = vadd.xlane.f32.xlu0 %v4003_v5 }
 0x6ca   : > { %v3936_v2 = vsub.f32 %v9933_v40, %v3904_v13 }
 0x6cb   : > { %v3935_v56 = vsub.f32 %v9935_v62, %v3903_v38 }
 0x6cc   : > { %v10101_v17 = vmul.f32 %v9984_v31, %v3936_v2 }
 0x6cd   : > { %v10104_v34 = vmul.f32 %v9984_v31, %v3935_v56 }
 0x6ce   : > { %v4006_v52 = vmul.f32 %v10101_v17, %v10101_v17 }
 0x6cf   : > { %v3862_v0 = vpop.xlane.xlu1 %3861  ;;  %v4005_v41 = vmul.f32 %v10104_v34, %v10104_v34 }
 0x6d0   : > { %v3906_v4 = vmul.f32 0.125, %v3862_v0  ;;  %4055 = vadd.xlane.f32.xlu1 %v4006_v52  ;;  %v3860_v35 = vpop.xlane.xlu0 %3859 }
 0x6d1   : > { %v3905_v60 = vmul.f32 0.125, %v3860_v35  ;;  %4053 = vadd.xlane.f32.xlu0 %v4005_v41 }
 0x6d2   : > { %v3938_v49 = vsub.f32 %v9939_v47, %v3906_v4 }
 0x6d3   : > { %v3937_v5 = vsub.f32 %v9941_v11, %v3905_v60 }
 0x6d4   : > { %v10113_v13 = vmul.f32 %v9984_v31, %v3938_v49 }
 0x6d5   : > { %v10116_v42 = vmul.f32 %v9984_v31, %v3937_v5 }
 0x6d6   : > { %v4008_v38 = vmul.f32 %v10113_v13, %v10113_v13 }
 0x6d7   : > { %v3866_v2 = vpop.xlane.xlu1 %3865  ;;  %v4007_v56 = vmul.f32 %v10116_v42, %v10116_v42 }
 0x6d8   : > { %v3908_v52 = vmul.f32 0.125, %v3866_v2  ;;  %4059 = vadd.xlane.f32.xlu1 %v4008_v38  ;;  %v3864_v0 = vpop.xlane.xlu0 %3863 }
 0x6d9   : > { %v3907_v41 = vmul.f32 0.125, %v3864_v0  ;;  %4057 = vadd.xlane.f32.xlu0 %v4007_v56 }
 0x6da   : > { %v3940_v4 = vsub.f32 %v9945_v51, %v3908_v52 }
 0x6db   : > { %v3939_v35 = vsub.f32 %v9947_v30, %v3907_v41 }
 0x6dc   : > { %v10125_v60 = vmul.f32 %v9984_v31, %v3940_v4 }
 0x6dd   : > { %v10128_v49 = vmul.f32 %v9984_v31, %v3939_v35 }
 0x6de   : > { %v4010_v5 = vmul.f32 %v10125_v60, %v10125_v60 }
 0x6df   : > { %v3870_v11 = vpop.xlane.xlu1 %3869  ;;  %v4009_v38 = vmul.f32 %v10128_v49, %v10128_v49 }
 0x6e0   : > { %v3910_v2 = vmul.f32 0.125, %v3870_v11  ;;  %4063 = vadd.xlane.f32.xlu1 %v4010_v5  ;;  %v3868_v56 = vpop.xlane.xlu0 %3867 }
 0x6e1   : > { %v3909_v0 = vmul.f32 0.125, %v3868_v56  ;;  %4061 = vadd.xlane.f32.xlu0 %v4009_v38 }
 0x6e2   : > { %v3942_v52 = vsub.f32 %v9951_v8, %v3910_v2 }
 0x6e3   : > { %v3941_v41 = vsub.f32 %v9953_v37, %v3909_v0 }
 0x6e4   : > { %v10137_v4 = vmul.f32 %v9984_v31, %v3942_v52 }
 0x6e5   : > { %v10140_v35 = vmul.f32 %v9984_v31, %v3941_v41 }
 0x6e6   : > { %v4012_v30 = vmul.f32 %v10137_v4, %v10137_v4 }
 0x6e7   : > { %v3874_v51 = vpop.xlane.xlu1 %3873  ;;  %v4011_v11 = vmul.f32 %v10140_v35, %v10140_v35 }
 0x6e8   : > { %v3912_v5 = vmul.f32 0.125, %v3874_v51  ;;  %4067 = vadd.xlane.f32.xlu1 %v4012_v30  ;;  %v3872_v38 = vpop.xlane.xlu0 %3871 }
 0x6e9   : > { %v3911_v56 = vmul.f32 0.125, %v3872_v38  ;;  %4065 = vadd.xlane.f32.xlu0 %v4011_v11 }
 0x6ea   : > { %v3944_v2 = vsub.f32 %v9957_v58, %v3912_v5 }
 0x6eb   : > { %v3943_v0 = vsub.f32 %v9959_v19, %v3911_v56 }
 0x6ec   : > { %v10149_v52 = vmul.f32 %v9984_v31, %v3944_v2 }
 0x6ed   : > { %v10152_v41 = vmul.f32 %v9984_v31, %v3943_v0 }
 0x6ee   : > { %v4014_v37 = vmul.f32 %v10149_v52, %v10149_v52 }
 0x6ef   : > { %v3878_v8 = vpop.xlane.xlu1 %3877  ;;  %v4013_v51 = vmul.f32 %v10152_v41, %v10152_v41 }
 0x6f0   : > { %v3914_v30 = vmul.f32 0.125, %v3878_v8  ;;  %4071 = vadd.xlane.f32.xlu1 %v4014_v37  ;;  %v3876_v11 = vpop.xlane.xlu0 %3875 }
 0x6f1   : > { %v3913_v38 = vmul.f32 0.125, %v3876_v11  ;;  %4069 = vadd.xlane.f32.xlu0 %v4013_v51 }
 0x6f2   : > { %v3946_v5 = vsub.f32 %v9963_v55, %v3914_v30 }
 0x6f3   : > { %v3945_v56 = vsub.f32 %v9965_v28, %v3913_v38 }
 0x6f4   : > { %v10161_v2 = vmul.f32 %v9984_v31, %v3946_v5 }
 0x6f5   : > { %v10164_v0 = vmul.f32 %v9984_v31, %v3945_v56 }
 0x6f6   : > { %v4016_v19 = vmul.f32 %v10161_v2, %v10161_v2 }
 0x6f7   : > { %v3882_v58 = vpop.xlane.xlu1 %3881  ;;  %v4015_v8 = vmul.f32 %v10164_v0, %v10164_v0 }
 0x6f8   : > { %v3916_v37 = vmul.f32 0.125, %v3882_v58  ;;  %4075 = vadd.xlane.f32.xlu1 %v4016_v19  ;;  %v3880_v51 = vpop.xlane.xlu0 %3879 }
 0x6f9   : > { %v3915_v11 = vmul.f32 0.125, %v3880_v51  ;;  %4073 = vadd.xlane.f32.xlu0 %v4015_v8 }
 0x6fa   : > { %v3948_v30 = vsub.f32 %v9969_v24, %v3916_v37 }
 0x6fb   : > { %v3947_v38 = vsub.f32 %v9971_v22, %v3915_v11 }
 0x6fc   : > { %v10173_v5 = vmul.f32 %v9984_v31, %v3948_v30 }
 0x6fd   : > { %v10176_v56 = vmul.f32 %v9984_v31, %v3947_v38 }
 0x6fe   : > { %v4018_v28 = vmul.f32 %v10173_v5, %v10173_v5 }
 0x6ff   : > { %v3886_v55 = vpop.xlane.xlu1 %3885  ;;  %v4017_v58 = vmul.f32 %v10176_v56, %v10176_v56 }
 0x700   : > { %v3918_v19 = vmul.f32 0.125, %v3886_v55  ;;  %4079 = vadd.xlane.f32.xlu1 %v4018_v28  ;;  %v3884_v8 = vpop.xlane.xlu0 %3883 }
 0x701   : > { %v3917_v51 = vmul.f32 0.125, %v3884_v8  ;;  %4077 = vadd.xlane.f32.xlu0 %v4017_v58 }
 0x702   : > { %v3950_v37 = vsub.f32 %v9975_v1, %v3918_v19 }
 0x703   : > { %v3949_v11 = vsub.f32 %v9977_v29, %v3917_v51 }
 0x704   : > { %v10185_v30 = vmul.f32 %v9984_v31, %v3950_v37 }
 0x705   : > { %v10188_v38 = vmul.f32 %v9984_v31, %v3949_v11 }
 0x706   : > { %v4020_v22 = vmul.f32 %v10185_v30, %v10185_v30 }
 0x707   : > { %v4019_v55 = vmul.f32 %v10188_v38, %v10188_v38 }
 0x708   : > { %4083 = vadd.xlane.f32.xlu1 %v4020_v22 }
 0x709   : > { %4081 = vadd.xlane.f32.xlu0 %v4019_v55  ;;  %v10199_v55 = vld [vmem:[%s12103_s17] ss:$0 sm:$0xff] }
 0x71d   : > { %v4024_v28 = vpop.xlane.xlu1 %4023 }
 0x71e   : > { %v4086_v58 = vmul.f32 0.125, %v4024_v28  ;;  %v4022_v19 = vpop.xlane.xlu0 %4021 }
 0x71f   : > { %v4085_v8 = vmul.f32 0.125, %v4022_v19 }
 0x720   : > { %v4118_v51 = vadd.f32 1e-05, %v4086_v58 }
 0x721   : > { %v4117_v29 = vadd.f32 1e-05, %v4085_v8 }
 0x722   : > { %7447 = vrsqrt.f32 %v4118_v51 }
 0x723   : > { %7449 = vrsqrt.f32 %v4117_v29 }
 0x725   : > { %v4028_v37 = vpop.xlane.xlu1 %4027 }
 0x726   : > { %v4088_v31 = vmul.f32 0.125, %v4028_v37  ;;  %v4026_v11 = vpop.xlane.xlu0 %4025 }
 0x727   : > { %v4087_v1 = vmul.f32 0.125, %v4026_v11 }
 0x728   : > { %v4120_v24 = vadd.f32 1e-05, %v4088_v31 }
 0x729   : > { %v4119_v47 = vadd.f32 1e-05, %v4087_v1 }
 0x72a   : > { %7451 = vrsqrt.f32 %v4120_v24 }
 0x72b   : > { %7453 = vrsqrt.f32 %v4119_v47  ;;  %v10208_v47 = vld [vmem:[%s12104_s20] ss:$0 sm:$0xff] }
 0x72c   : > { %v7448_v22 = vpop.eup %7447 }
 0x72d   : > { %v7450_v28 = vpop.eup %7449  ;;  %v4182_v58 = vmul.f32 %v7448_v22, %v9995_v7  ;;  %v4032_v29 = vpop.xlane.xlu1 %4031 }
 0x72e   : > { %v4090_v19 = vmul.f32 0.125, %v4032_v29  ;;  %v4030_v8 = vpop.xlane.xlu0 %4029  ;;  %v4181_v51 = vmul.f32 %v7450_v28, %v9998_v57 }
 0x72f   : > { %v4089_v37 = vmul.f32 0.125, %v4030_v8  ;;  %v4220_v24 = vmul.f32 %v10199_v55, %v4182_v58 }
 0x730   : > { %v4122_v1 = vadd.f32 1e-05, %v4090_v19  ;;  %v4219_v31 = vmul.f32 %v10199_v55, %v4181_v51 }
 0x731   : > { %v4121_v11 = vadd.f32 1e-05, %v4089_v37  ;;  %v4258_v22 = vadd.f32 %v10208_v47, %v4220_v24 }
 0x732   : > { %7455 = vrsqrt.f32 %v4122_v1  ;;  %v4257_v7 = vadd.f32 %v10208_v47, %v4219_v31 }
 0x733   : > { %7457 = vrsqrt.f32 %v4121_v11 }
 0x734   : > { %v7452_v57 = vpop.eup %7451  ;;  %6508 = vmatprep.mubr.f32.mxu0 %v4257_v7 }
 0x735   : > { %v7454_v28 = vpop.eup %7453  ;;  %v4036_v29 = vpop.xlane.xlu1 %4035  ;;  %6509 = vmatmul.mubr.f32.vlgmr.msra.gmra.mrb[160].mxu0 %v4258_v22  ;;  %v4184_v8 = vmul.f32 %v7452_v57, %v10007_v21 }
 0x736   : > { %v4092_v62 = vmul.f32 0.125, %v4036_v29  ;;  %v4034_v40 = vpop.xlane.xlu0 %4033  ;;  %v4183_v58 = vmul.f32 %v7454_v28, %v10010_v33 }
 0x737   : > { %v4091_v19 = vmul.f32 0.125, %v4034_v40  ;;  %v4222_v51 = vmul.f32 %v10199_v55, %v4184_v8 }
 0x738   : > { %v4124_v37 = vadd.f32 1e-05, %v4092_v62  ;;  %v4221_v1 = vmul.f32 %v10199_v55, %v4183_v58 }
 0x739   : > { %v4123_v31 = vadd.f32 1e-05, %v4091_v19  ;;  %v4260_v11 = vadd.f32 %v10208_v47, %v4222_v51 }
 0x73a   : > { %7459 = vrsqrt.f32 %v4124_v37  ;;  %v4259_v24 = vadd.f32 %v10208_v47, %v4221_v1 }
 0x73b   : > { %7461 = vrsqrt.f32 %v4123_v31 }
 0x73c   : > { %v7456_v7 = vpop.eup %7455  ;;  %6511 = vmatprep.mubr.f32.mxu0 %v4259_v24 }
 0x73d   : > { %v7458_v21 = vpop.eup %7457  ;;  %v4040_v22 = vpop.xlane.xlu1 %4039  ;;  %6512 = vmatmul.mubr.f32.gmra.mrb[162].mxu0 %v4260_v11  ;;  %v4186_v33 = vmul.f32 %v7456_v7, %v10019_v16 }
 0x73e   : > { %v4094_v40 = vmul.f32 0.125, %v4040_v22  ;;  %v4038_v57 = vpop.xlane.xlu0 %4037  ;;  %v4185_v62 = vmul.f32 %v7458_v21, %v10022_v27 }
 0x73f   : > { %v4093_v28 = vmul.f32 0.125, %v4038_v57  ;;  %v4224_v29 = vmul.f32 %v10199_v55, %v4186_v33 }
 0x740   : > { %v4126_v8 = vadd.f32 1e-05, %v4094_v40  ;;  %v4223_v58 = vmul.f32 %v10199_v55, %v4185_v62 }
 0x741   : > { %v4125_v19 = vadd.f32 1e-05, %v4093_v28  ;;  %v4262_v37 = vadd.f32 %v10208_v47, %v4224_v29 }
 0x742   : > { %7463 = vrsqrt.f32 %v4126_v8  ;;  %v4261_v51 = vadd.f32 %v10208_v47, %v4223_v58 }
 0x743   : > { %7465 = vrsqrt.f32 %v4125_v19 }
 0x744   : > { %v7460_v1 = vpop.eup %7459  ;;  %6514 = vmatprep.mubr.f32.mxu0 %v4261_v51 }
 0x745   : > { %v7462_v16 = vpop.eup %7461  ;;  %v4044_v31 = vpop.xlane.xlu1 %4043  ;;  %6515 = vmatmul.mubr.f32.gmra.mrb[164].mxu0 %v4262_v37  ;;  %v4188_v27 = vmul.f32 %v7460_v1, %v10035_v10 }
 0x746   : > { %v4096_v24 = vmul.f32 0.125, %v4044_v31  ;;  %v4042_v11 = vpop.xlane.xlu0 %4041  ;;  %v4187_v7 = vmul.f32 %v7462_v16, %v10038_v25 }
 0x747   : > { %v4095_v21 = vmul.f32 0.125, %v4042_v11  ;;  %v4226_v22 = vmul.f32 %v10199_v55, %v4188_v27 }
 0x748   : > { %v4128_v33 = vadd.f32 1e-05, %v4096_v24  ;;  %v4225_v40 = vmul.f32 %v10199_v55, %v4187_v7 }
 0x749   : > { %v4127_v57 = vadd.f32 1e-05, %v4095_v21  ;;  %v4264_v28 = vadd.f32 %v10208_v47, %v4226_v22 }
 0x74a   : > { %7467 = vrsqrt.f32 %v4128_v33  ;;  %v4263_v62 = vadd.f32 %v10208_v47, %v4225_v40 }
 0x74b   : > { %7469 = vrsqrt.f32 %v4127_v57 }
 0x74c   : > { %v7464_v29 = vpop.eup %7463  ;;  %6517 = vmatprep.mubr.f32.mxu0 %v4263_v62 }
 0x74d   : > { %v7466_v10 = vpop.eup %7465  ;;  %v4048_v8 = vpop.xlane.xlu1 %4047  ;;  %6518 = vmatmul.mubr.f32.gmra.mrb[166].mxu0 %v4264_v28  ;;  %v4190_v25 = vmul.f32 %v7464_v29, %v10051_v48 }
 0x74e   : > { %v4098_v58 = vmul.f32 0.125, %v4048_v8  ;;  %v4046_v19 = vpop.xlane.xlu0 %4045  ;;  %v4189_v51 = vmul.f32 %v7466_v10, %v10054_v23 }
 0x74f   : > { %v4097_v37 = vmul.f32 0.125, %v4046_v19  ;;  %v4228_v1 = vmul.f32 %v10199_v55, %v4190_v25 }
 0x750   : > { %v4130_v16 = vadd.f32 1e-05, %v4098_v58  ;;  %v4227_v31 = vmul.f32 %v10199_v55, %v4189_v51 }
 0x751   : > { %v4129_v27 = vadd.f32 1e-05, %v4097_v37  ;;  %v4266_v11 = vadd.f32 %v10208_v47, %v4228_v1 }
 0x752   : > { %7471 = vrsqrt.f32 %v4130_v16  ;;  %v4265_v24 = vadd.f32 %v10208_v47, %v4227_v31 }
 0x753   : > { %7473 = vrsqrt.f32 %v4129_v27 }
 0x754   : > { %v7468_v7 = vpop.eup %7467  ;;  %6520 = vmatprep.mubr.f32.mxu0 %v4265_v24 }
 0x755   : > { %v7470_v48 = vpop.eup %7469  ;;  %v4052_v21 = vpop.xlane.xlu1 %4051  ;;  %6521 = vmatmul.mubr.f32.gmra.mrb[168].mxu0 %v4266_v11  ;;  %v4192_v23 = vmul.f32 %v7468_v7, %v10065_v26 }
 0x756   : > { %v4100_v22 = vmul.f32 0.125, %v4052_v21  ;;  %v4050_v33 = vpop.xlane.xlu0 %4049  ;;  %v4191_v40 = vmul.f32 %v7470_v48, %v10068_v20 }
 0x757   : > { %v4099_v57 = vmul.f32 0.125, %v4050_v33  ;;  %v4230_v62 = vmul.f32 %v10199_v55, %v4192_v23 }
 0x758   : > { %v4132_v28 = vadd.f32 1e-05, %v4100_v22  ;;  %v4229_v29 = vmul.f32 %v10199_v55, %v4191_v40 }
 0x759   : > { %v4131_v10 = vadd.f32 1e-05, %v4099_v57  ;;  %v4268_v25 = vadd.f32 %v10208_v47, %v4230_v62 }
 0x75a   : > { %7475 = vrsqrt.f32 %v4132_v28  ;;  %v4267_v8 = vadd.f32 %v10208_v47, %v4229_v29 }
 0x75b   : > { %7477 = vrsqrt.f32 %v4131_v10 }
 0x75c   : > { %v7472_v58 = vpop.eup %7471  ;;  %6523 = vmatprep.mubr.f32.mxu0 %v4267_v8 }
 0x75d   : > { %v7474_v26 = vpop.eup %7473  ;;  %v4056_v19 = vpop.xlane.xlu1 %4055  ;;  %6524 = vmatmul.mubr.f32.gmra.mrb[170].mxu0 %v4268_v25  ;;  %v4194_v20 = vmul.f32 %v7472_v58, %v10077_v39 }
 0x75e   : > { %v4102_v51 = vmul.f32 0.125, %v4056_v19  ;;  %v4054_v37 = vpop.xlane.xlu0 %4053  ;;  %v4193_v1 = vmul.f32 %v7474_v26, %v10080_v15 }
 0x75f   : > { %v4101_v16 = vmul.f32 0.125, %v4054_v37  ;;  %v4232_v31 = vmul.f32 %v10199_v55, %v4194_v20 }
 0x760   : > { %v4134_v27 = vadd.f32 1e-05, %v4102_v51  ;;  %v4231_v24 = vmul.f32 %v10199_v55, %v4193_v1 }
 0x761   : > { %v4133_v11 = vadd.f32 1e-05, %v4101_v16  ;;  %v4270_v48 = vadd.f32 %v10208_v47, %v4232_v31 }
 0x762   : > { %7479 = vrsqrt.f32 %v4134_v27  ;;  %v4269_v7 = vadd.f32 %v10208_v47, %v4231_v24 }
 0x763   : > { %7481 = vrsqrt.f32 %v4133_v11 }
 0x764   : > { %v7476_v21 = vpop.eup %7475  ;;  %6526 = vmatprep.mubr.f32.mxu0 %v4269_v7 }
 0x765   : > { %v7478_v39 = vpop.eup %7477  ;;  %v4060_v23 = vpop.xlane.xlu1 %4059  ;;  %6527 = vmatmul.mubr.f32.gmra.mrb[172].mxu0 %v4270_v48  ;;  %v4196_v15 = vmul.f32 %v7476_v21, %v10089_v6 }
 0x766   : > { %v4104_v22 = vmul.f32 0.125, %v4060_v23  ;;  %v4058_v33 = vpop.xlane.xlu0 %4057  ;;  %v4195_v40 = vmul.f32 %v7478_v39, %v10092_v59 }
 0x767   : > { %v4103_v57 = vmul.f32 0.125, %v4058_v33  ;;  %v4234_v62 = vmul.f32 %v10199_v55, %v4196_v15 }
 0x768   : > { %v4136_v28 = vadd.f32 1e-05, %v4104_v22  ;;  %v4233_v29 = vmul.f32 %v10199_v55, %v4195_v40 }
 0x769   : > { %v4135_v10 = vadd.f32 1e-05, %v4103_v57  ;;  %v4272_v25 = vadd.f32 %v10208_v47, %v4234_v62 }
 0x76a   : > { %7483 = vrsqrt.f32 %v4136_v28  ;;  %v4271_v8 = vadd.f32 %v10208_v47, %v4233_v29 }
 0x76b   : > { %7485 = vrsqrt.f32 %v4135_v10 }
 0x76c   : > { %v7480_v58 = vpop.eup %7479  ;;  %6529 = vmatprep.mubr.f32.mxu0 %v4271_v8 }
 0x76d   : > { %v7482_v6 = vpop.eup %7481  ;;  %v4064_v26 = vpop.xlane.xlu1 %4063  ;;  %6530 = vmatmul.mubr.f32.gmra.mrb[174].mxu0 %v4272_v25  ;;  %v4198_v59 = vmul.f32 %v7480_v58, %v10101_v17 }
 0x76e   : > { %v4106_v19 = vmul.f32 0.125, %v4064_v26  ;;  %v4062_v20 = vpop.xlane.xlu0 %4061  ;;  %v4197_v51 = vmul.f32 %v7482_v6, %v10104_v34 }
 0x76f   : > { %v4105_v37 = vmul.f32 0.125, %v4062_v20  ;;  %v4236_v1 = vmul.f32 %v10199_v55, %v4198_v59 }
 0x770   : > { %v4138_v16 = vadd.f32 1e-05, %v4106_v19  ;;  %v4235_v31 = vmul.f32 %v10199_v55, %v4197_v51 }
 0x771   : > { %v4137_v27 = vadd.f32 1e-05, %v4105_v37  ;;  %v4274_v11 = vadd.f32 %v10208_v47, %v4236_v1 }
 0x772   : > { %7487 = vrsqrt.f32 %v4138_v16  ;;  %v4273_v24 = vadd.f32 %v10208_v47, %v4235_v31 }
 0x773   : > { %7489 = vrsqrt.f32 %v4137_v27 }
 0x774   : > { %v7484_v7 = vpop.eup %7483  ;;  %6532 = vmatprep.mubr.f32.mxu0 %v4273_v24 }
 0x775   : > { %v7486_v17 = vpop.eup %7485  ;;  %v4068_v48 = vpop.xlane.xlu1 %4067  ;;  %6533 = vmatmul.mubr.f32.gmra.mrb[176].mxu0 %v4274_v11  ;;  %v4200_v34 = vmul.f32 %v7484_v7, %v10113_v13 }
 0x776   : > { %v4108_v21 = vmul.f32 0.125, %v4068_v48  ;;  %v4066_v39 = vpop.xlane.xlu0 %4065  ;;  %v4199_v23 = vmul.f32 %v7486_v17, %v10116_v42 }
 0x777   : > { %v4107_v15 = vmul.f32 0.125, %v4066_v39  ;;  %v4238_v22 = vmul.f32 %v10199_v55, %v4200_v34 }
 0x778   : > { %v4140_v33 = vadd.f32 1e-05, %v4108_v21  ;;  %v4237_v40 = vmul.f32 %v10199_v55, %v4199_v23 }
 0x779   : > { %v4139_v57 = vadd.f32 1e-05, %v4107_v15  ;;  %v4276_v28 = vadd.f32 %v10208_v47, %v4238_v22 }
 0x77a   : > { %7491 = vrsqrt.f32 %v4140_v33  ;;  %v4275_v62 = vadd.f32 %v10208_v47, %v4237_v40 }
 0x77b   : > { %7493 = vrsqrt.f32 %v4139_v57 }
 0x77c   : > { %v7488_v29 = vpop.eup %7487  ;;  %6535 = vmatprep.mubr.f32.mxu0 %v4275_v62 }
 0x77d   : > { %v7490_v13 = vpop.eup %7489  ;;  %v4072_v10 = vpop.xlane.xlu1 %4071  ;;  %6536 = vmatmul.mubr.f32.gmra.mrb[178].mxu0 %v4276_v28  ;;  %v4202_v42 = vmul.f32 %v7488_v29, %v10125_v60 }
 0x77e   : > { %v4110_v8 = vmul.f32 0.125, %v4072_v10  ;;  %v4070_v25 = vpop.xlane.xlu0 %4069  ;;  %v4201_v58 = vmul.f32 %v7490_v13, %v10128_v49 }
 0x77f   : > { %v4109_v6 = vmul.f32 0.125, %v4070_v25  ;;  %v4240_v26 = vmul.f32 %v10199_v55, %v4202_v42 }
 0x780   : > { %v4142_v59 = vadd.f32 1e-05, %v4110_v8  ;;  %v4239_v19 = vmul.f32 %v10199_v55, %v4201_v58 }
 0x781   : > { %v4141_v20 = vadd.f32 1e-05, %v4109_v6  ;;  %v4278_v37 = vadd.f32 %v10208_v47, %v4240_v26 }
 0x782   : > { %7495 = vrsqrt.f32 %v4142_v59  ;;  %v4277_v51 = vadd.f32 %v10208_v47, %v4239_v19 }
 0x783   : > { %7497 = vrsqrt.f32 %v4141_v20 }
 0x784   : > { %v7492_v1 = vpop.eup %7491  ;;  %6538 = vmatprep.mubr.f32.mxu0 %v4277_v51 }
 0x785   : > { %v7494_v60 = vpop.eup %7493  ;;  %v4076_v16 = vpop.xlane.xlu1 %4075  ;;  %6539 = vmatmul.mubr.f32.gmra.mrb[180].mxu0 %v4278_v37  ;;  %v4204_v49 = vmul.f32 %v7492_v1, %v10137_v4 }
 0x786   : > { %v4112_v31 = vmul.f32 0.125, %v4076_v16  ;;  %v4074_v27 = vpop.xlane.xlu0 %4073  ;;  %v4203_v24 = vmul.f32 %v7494_v60, %v10140_v35  ;;  %v5402_v16 = vld [vmem:[%s7854_s23 + $0x8] sm:$0xff] }
 0x787   : > { %v4111_v11 = vmul.f32 0.125, %v4074_v27  ;;  %v4242_v7 = vmul.f32 %v10199_v55, %v4204_v49 }
 0x788   : > { %v4144_v17 = vadd.f32 1e-05, %v4112_v31  ;;  %v4241_v48 = vmul.f32 %v10199_v55, %v4203_v24 }
 0x789   : > { %v4143_v34 = vadd.f32 1e-05, %v4111_v11  ;;  %v4280_v39 = vadd.f32 %v10208_v47, %v4242_v7  ;;  %v5403_v7 = vld [vmem:[%s7854_s23 + $0x10] sm:$0xff] }
 0x78a   : > { %7499 = vrsqrt.f32 %v4144_v17  ;;  %v4279_v21 = vadd.f32 %v10208_v47, %v4241_v48  ;;  %v5404_v17 = vld [vmem:[%s7854_s23 + $0x18] sm:$0xff] }
 0x78b   : > { %7501 = vrsqrt.f32 %v4143_v34  ;;  %v6928_v34 = vpack.c.bf16 %v5404_v17, %v5403_v7 }
 0x78c   : > { %v7496_v23 = vpop.eup %7495  ;;  %6541 = vmatprep.mubr.f32.mxu0 %v4279_v21 }
 0x78d   : > { %v7498_v4 = vpop.eup %7497  ;;  %v4080_v15 = vpop.xlane.xlu1 %4079  ;;  %6542 = vmatmul.mubr.f32.gmra.mrb[182].mxu0 %v4280_v39  ;;  %v4206_v35 = vmul.f32 %v7496_v23, %v10149_v52  ;;  %v5406_v23 = vld [vmem:[%s7854_s23 + $0x28] sm:$0xff] }
 0x78e   : > { %v4114_v22 = vmul.f32 0.125, %v4080_v15  ;;  %v4078_v33 = vpop.xlane.xlu0 %4077  ;;  %v4205_v40 = vmul.f32 %v7498_v4, %v10152_v41 }
 0x78f   : > { %v4113_v57 = vmul.f32 0.125, %v4078_v33  ;;  %v4244_v62 = vmul.f32 %v10199_v55, %v4206_v35 }
 0x790   : > { %v4146_v28 = vadd.f32 1e-05, %v4114_v22  ;;  %v4243_v29 = vmul.f32 %v10199_v55, %v4205_v40  ;;  %v5407_v40 = vld [vmem:[%s7854_s23 + $0x30] sm:$0xff] }
 0x791   : > { %v4145_v13 = vadd.f32 1e-05, %v4113_v57  ;;  %v4282_v42 = vadd.f32 %v10208_v47, %v4244_v62  ;;  %v5408_v57 = vld [vmem:[%s7854_s23 + $0x38] sm:$0xff] }
 0x792   : > { %7503 = vrsqrt.f32 %v4146_v28  ;;  %v4281_v10 = vadd.f32 %v10208_v47, %v4243_v29  ;;  %v6936_v28 = vpack.c.bf16 %v5408_v57, %v5407_v40 }
 0x793   : > { %7505 = vrsqrt.f32 %v4145_v13  ;;  %v5410_v13 = vld [vmem:[%s7854_s23 + $0x48] sm:$0xff] }
 0x794   : > { %v7500_v8 = vpop.eup %7499  ;;  %6544 = vmatprep.mubr.f32.mxu0 %v4281_v10 }
 0x795   : > { %v7502_v52 = vpop.eup %7501  ;;  %v4084_v25 = vpop.xlane.xlu1 %4083  ;;  %6545 = vmatmul.mubr.f32.gmra.mrb[184].mxu0 %v4282_v42  ;;  %v4208_v41 = vmul.f32 %v7500_v8, %v10161_v2  ;;  %v5401_v2 = vld [vmem:[%s7854_s23] sm:$0xff]  ;;  %v5412_v42 = vld [vmem:[%s7854_s23 + $0x58] sm:$0xff] }
 0x796   : > { %v4116_v58 = vmul.f32 0.125, %v4084_v25  ;;  %v4082_v6 = vpop.xlane.xlu0 %4081  ;;  %v4207_v26 = vmul.f32 %v7502_v52, %v10164_v0  ;;  %v6924_v0 = vpack.c.bf16 %v5402_v16, %v5401_v2  ;;  %v5413_v52 = vld [vmem:[%s7854_s23 + $0x60] sm:$0xff]  ;;  %v5414_v25 = vld [vmem:[%s7854_s23 + $0x68] sm:$0xff] }
 0x797   : > { %v4115_v59 = vmul.f32 0.125, %v4082_v6  ;;  %v4246_v19 = vmul.f32 %v10199_v55, %v4208_v41  ;;  %v6948_v41 = vpack.c.bf16 %v5414_v25, %v5413_v52 }
 0x798   : > { %v4148_v20 = vadd.f32 1e-05, %v4116_v58  ;;  %v4245_v51 = vmul.f32 %v10199_v55, %v4207_v26  ;;  %6925 = vmatprep.subr.bf16.mxu0 %v6924_v0  ;;  %v5416_v58 = vld [vmem:[%s7854_s23 + $0x78] sm:$0xff]  ;;  %v10321_v26 = vld [vmem:[%s7849_s27] ss:$0 sm:$0xff] }
 0x799   : > { %v4147_v37 = vadd.f32 1e-05, %v4115_v59  ;;  %v4284_v60 = vadd.f32 %v10208_v47, %v4246_v19  ;;  %6927 = vmatpush3.bf16.msra.mxu0 %v6924_v0 }
 0x79a   : > { %7507 = vrsqrt.f32 %v4148_v20  ;;  %v4283_v1 = vadd.f32 %v10208_v47, %v4245_v51  ;;  %6929 = vmatprep.subr.bf16.mxu0 %v6928_v34 }
 0x79b   : > { %7509 = vrsqrt.f32 %v4147_v37 }
 0x79c   : > { %v7504_v49 = vpop.eup %7503  ;;  %6547 = vmatprep.mubr.f32.mxu0 %v4283_v1 }
 0x79d   : > { %v7506_v31 = vpop.eup %7505  ;;  %6548 = vmatmul.mubr.f32.gmra.mrb[186].mxu0 %v4284_v60  ;;  %v4210_v27 = vmul.f32 %v7504_v49, %v10173_v5  ;;  %v5405_v5 = vld [vmem:[%s7854_s23 + $0x20] sm:$0xff] }
 0x79e   : > { %v4209_v24 = vmul.f32 %v7506_v31, %v10176_v56  ;;  %6931 = vmatpush3.bf16.msra.mxu0 %v6928_v34  ;;  %v6932_v4 = vpack.c.bf16 %v5406_v23, %v5405_v5 }
 0x79f   : > { %v4248_v11 = vmul.f32 %v10199_v55, %v4210_v27 }
 0x7a0   : > { %v4247_v48 = vmul.f32 %v10199_v55, %v4209_v24  ;;  %6933 = vmatprep.subr.bf16.mxu0 %v6932_v4 }
 0x7a1   : > { %v4286_v39 = vadd.f32 %v10208_v47, %v4248_v11 }
 0x7a2   : > { %v4285_v21 = vadd.f32 %v10208_v47, %v4247_v48  ;;  %6935 = vmatpush3.bf16.msra.mxu0 %v6932_v4 }
 0x7a3   : > { %6937 = vmatprep.subr.bf16.mxu0 %v6936_v28 }
 0x7a4   : > { %v7508_v56 = vpop.eup %7507  ;;  %6550 = vmatprep.mubr.f32.mxu0 %v4285_v21 }
 0x7a5   : > { %v7510_v15 = vpop.eup %7509  ;;  %6551 = vmatmul.mubr.f32.gmra.mrb[188].mxu0 %v4286_v39  ;;  %v4212_v35 = vmul.f32 %v7508_v56, %v10185_v30 }
 0x7a6   : > { %v4211_v22 = vmul.f32 %v7510_v15, %v10188_v38  ;;  %6939 = vmatpush3.bf16.msra.mxu0 %v6936_v28  ;;  %v5409_v38 = vld [vmem:[%s7854_s23 + $0x40] sm:$0xff] }
 0x7a7   : > { %v4250_v33 = vmul.f32 %v10199_v55, %v4212_v35  ;;  %v6940_v10 = vpack.c.bf16 %v5410_v13, %v5409_v38 }
 0x7a8   : > { %v4249_v62 = vmul.f32 %v10199_v55, %v4211_v22  ;;  %v5411_v55 = vld [vmem:[%s7854_s23 + $0x50] sm:$0xff] }
 0x7a9   : > { %v4288_v30 = vadd.f32 %v10208_v47, %v4250_v33  ;;  %6941 = vmatprep.subr.bf16.mxu0 %v6940_v10  ;;  %v6944_v8 = vpack.c.bf16 %v5412_v42, %v5411_v55 }
 0x7aa   : > { %v4287_v29 = vadd.f32 %v10208_v47, %v4249_v62  ;;  %6943 = vmatpush3.bf16.msra.mxu0 %v6940_v10  ;;  %v5415_v47 = vld [vmem:[%s7854_s23 + $0x70] sm:$0xff] }
 0x7ab   : > { %6945 = vmatprep.subr.bf16.mxu0 %v6944_v8  ;;  %v6952_v6 = vpack.c.bf16 %v5416_v58, %v5415_v47 }
 0x7ac   : > { %6553 = vmatprep.mubr.f32.mxu0 %v4287_v29 }
 0x7ad   : > { %6554 = vmatmul.mubr.f32.gmra.mrb[190].mxu0 %v4288_v30 }
 0x7ae   : > { %6947 = vmatpush3.bf16.msra.mxu0 %v6944_v8 }
 0x7af   : > { %6949 = vmatprep.subr.bf16.mxu0 %v6948_v41 }
 0x7b2   : > { %6951 = vmatpush3.bf16.msra.mxu0 %v6948_v41 }
 0x7b3   : > { %6953 = vmatprep.subr.bf16.mxu0 %v6952_v6 }
 0x7b6   : > { %6955 = vmatpush3.bf16.msra.mxu0 %v6952_v6 }
 0x808   : > { %v6510_v59 = vpop.f32.mrb[160].mxu0 }
 0x809   : > { %v4384_v19 = vadd.f32 %v6510_v59, %v10321_v26  ;;  %v4378_v20 = vpop.f32.mrb[161].mxu0 }
 0x80a   : > { %v4379_v51 = vadd.f32 %v10321_v26, %v4378_v20 }
 0x80b   : > { %v10325_v37 = vmul.f32 0.70710677, %v4384_v19 }
 0x80c   : > { %v10327_v1 = vmul.f32 0.70710677, %v4379_v51 }
 0x80d   : > { %v4570_v60 = vand.u32 2147483647, %v10325_v37  ;;  %vm5210_vm0 = vcmp.ge.f32.partialorder %v10325_v37, 0.0 }
 0x80e   : > { %v4569_v2 = vand.u32 2147483647, %v10327_v1  ;;  %vm5209_vm1 = vcmp.ge.f32.partialorder %v10327_v1, 0.0 }
 0x80f   : > { %v4602_v16 = vmul.f32 0.3275911, %v4570_v60  ;;  %v5018_v23 = vsub.f32 0.0, %v4570_v60 }
 0x810   : > { %v4601_v49 = vmul.f32 0.3275911, %v4569_v2  ;;  %v6513_v0 = vpop.f32.mrb[162].mxu0  ;;  %v5017_v62 = vsub.f32 0.0, %v4569_v2 }
 0x811   : > { %v4634_v31 = vadd.f32 1.0, %v4602_v16  ;;  %v4388_v27 = vpop.f32.mrb[163].mxu0  ;;  %v4394_v17 = vadd.f32 %v6513_v0, %v10321_v26  ;;  %v5050_v29 = vmul.f32 %v5018_v23, %v4570_v60 }
 0x812   : > { %v4633_v24 = vadd.f32 1.0, %v4601_v49  ;;  %v10332_v11 = vadd.f32 %v10321_v26, %v4388_v27  ;;  %v5049_v41 = vmul.f32 %v5017_v62, %v4569_v2  ;;  %v10366_v49 = vmul.f32 0.5, %v4384_v19 }
 0x813   : > { %7511 = vrcp.f32 %v4634_v31  ;;  %v10339_v39 = vmul.f32 0.70710677, %v4394_v17  ;;  %v5083_v58 = vmul.f32 1.442695, %v5050_v29 }
 0x814   : > { %7513 = vrcp.f32 %v4633_v24  ;;  %v10335_v7 = vmul.f32 0.70710677, %v10332_v11  ;;  %v10370_v24 = vmul.f32 0.5, %v4379_v51  ;;  %v5081_v23 = vmul.f32 1.442695, %v5049_v41 }
 0x815   : > { %v4572_v22 = vand.u32 2147483647, %v10339_v39  ;;  %v10388_v41 = vmul.f32 0.5, %v10332_v11  ;;  %vm5212_vm3 = vcmp.ge.f32.partialorder %v10339_v39, 0.0 }
 0x816   : > { %v4571_v34 = vand.u32 2147483647, %v10335_v7  ;;  %vm5211_vm2 = vcmp.ge.f32.partialorder %v10335_v7, 0.0 }
 0x817   : > { %v5020_v55 = vsub.f32 0.0, %v4572_v22  ;;  %v4604_v60 = vmul.f32 0.3275911, %v4572_v22 }
 0x818   : > { %v6516_v48 = vpop.f32.mrb[164].mxu0  ;;  %v4603_v56 = vmul.f32 0.3275911, %v4571_v34  ;;  %v5019_v42 = vsub.f32 0.0, %v4571_v34 }
 0x819   : > { %v4398_v21 = vpop.f32.mrb[165].mxu0  ;;  %v4404_v4 = vadd.f32 %v6516_v48, %v10321_v26  ;;  %v5052_v16 = vmul.f32 %v5020_v55, %v4572_v22  ;;  %v4636_v22 = vadd.f32 1.0, %v4604_v60 }
 0x81a   : > { %v10349_v33 = vadd.f32 %v10321_v26, %v4398_v21  ;;  %v4635_v30 = vadd.f32 1.0, %v4603_v56  ;;  %v5051_v0 = vmul.f32 %v5019_v42, %v4571_v34 }
 0x81b   : > { %v10352_v38 = vmul.f32 0.70710677, %v4404_v4 }
 0x81c   : > { %v10356_v8 = vmul.f32 0.70710677, %v10349_v33  ;;  %7515 = vrcp.f32 %v4635_v30  ;;  %v5085_v62 = vmul.f32 1.442695, %v5051_v0  ;;  %v10383_v30 = vmul.f32 0.5, %v4394_v17 }
 0x81d   : > { %v10341_v5 = vpop.eup %7511  ;;  %v4574_v6 = vand.u32 2147483647, %v10352_v38  ;;  %7517 = vpow2.f32 %v5083_v58  ;;  %vm5214_vm5 = vcmp.ge.f32.partialorder %v10352_v38, 0.0 }
 0x81e   : > { %v10344_v15 = vpop.eup %7513  ;;  %v4730_v35 = vmul.f32 1.0614054, %v10341_v5  ;;  %v4573_v31 = vand.u32 2147483647, %v10356_v8  ;;  %7519 = vpow2.f32 %v5081_v23  ;;  %vm5213_vm4 = vcmp.ge.f32.partialorder %v10356_v8, 0.0 }
 0x81f   : > { %v4729_v40 = vmul.f32 1.0614054, %v10344_v15  ;;  %v5022_v56 = vsub.f32 0.0, %v4574_v6  ;;  %7521 = vrcp.f32 %v4636_v22 }
 0x820   : > { %v4762_v57 = vadd.f32 -1.4531521, %v4730_v35  ;;  %v6519_v28 = vpop.f32.mrb[166].mxu0 }
 0x821   : > { %v4408_v13 = vpop.f32.mrb[167].mxu0  ;;  %v4761_v52 = vadd.f32 -1.4531521, %v4729_v40  ;;  %v10359_v47 = vadd.f32 %v6519_v28, %v10321_v26  ;;  %v5087_v40 = vmul.f32 1.442695, %v5052_v16 }
 0x822   : > { %v4794_v10 = vmul.f32 %v10341_v5, %v4762_v57  ;;  %v10363_v59 = vadd.f32 %v10321_v26, %v4408_v13  ;;  %v4606_v57 = vmul.f32 0.3275911, %v4574_v6  ;;  %v4605_v13 = vmul.f32 0.3275911, %v4573_v31 }
 0x823   : > { %v4793_v2 = vmul.f32 %v10344_v15, %v4761_v52  ;;  %v10373_v48 = vmul.f32 0.70710677, %v10359_v47  ;;  %v5054_v52 = vmul.f32 %v5022_v56, %v4574_v6  ;;  %7523 = vpow2.f32 %v5087_v40 }
 0x824   : > { %v4826_v25 = vadd.f32 1.4214138, %v4794_v10  ;;  %v10376_v35 = vmul.f32 0.70710677, %v10363_v59  ;;  %v5021_v10 = vsub.f32 0.0, %v4573_v31  ;;  %v4638_v58 = vadd.f32 1.0, %v4606_v57 }
 0x825   : > { %v4825_v29 = vadd.f32 1.4214138, %v4793_v2  ;;  %v4576_v55 = vand.u32 2147483647, %v10373_v48  ;;  %7525 = vpow2.f32 %v5085_v62  ;;  %v4637_v6 = vadd.f32 1.0, %v4605_v13 }
 0x826   : > { %v4858_v20 = vmul.f32 %v10341_v5, %v4826_v25  ;;  %v4575_v25 = vand.u32 2147483647, %v10376_v35  ;;  %v10392_v60 = vpop.eup %7515  ;;  %v5053_v2 = vmul.f32 %v5021_v10, %v4573_v31  ;;  %v5091_v23 = vmul.f32 1.442695, %v5054_v52 }
 0x827   : > { %v4857_v0 = vmul.f32 %v10344_v15, %v4825_v29  ;;  %7527 = vrcp.f32 %v4638_v58  ;;  %v4731_v40 = vmul.f32 1.0614054, %v10392_v60  ;;  %v7518_v57 = vpop.eup %7517  ;;  %v10416_v32 = vmul.f32 0.5, %v10363_v59 }
 0x828   : > { %v4890_v27 = vadd.f32 -0.28449672, %v4858_v20  ;;  %v6522_v21 = vpop.f32.mrb[168].mxu0  ;;  %v10390_v20 = vmul.f32 0.5, %v4404_v4  ;;  %v4608_v4 = vmul.f32 0.3275911, %v4576_v55  ;;  %7529 = vrcp.f32 %v4637_v6 }
 0x829   : > { %v4418_v19 = vpop.f32.mrb[169].mxu0  ;;  %v4424_v51 = vadd.f32 %v6522_v21, %v10321_v26  ;;  %v5023_v56 = vsub.f32 0.0, %v4575_v25  ;;  %v4607_v22 = vmul.f32 0.3275911, %v4575_v25  ;;  %v5089_v13 = vmul.f32 1.442695, %v5053_v2 }
 0x82a   : > { %v4922_v34 = vmul.f32 %v10341_v5, %v4890_v27  ;;  %v10381_v28 = vadd.f32 %v10321_v26, %v4418_v19  ;;  %v5024_v27 = vsub.f32 0.0, %v4576_v55  ;;  %7531 = vpow2.f32 %v5091_v23 }
 0x82b   : > { %v10394_v17 = vmul.f32 0.70710677, %v4424_v51  ;;  %v4640_v52 = vadd.f32 1.0, %v4608_v4  ;;  %v5055_v58 = vmul.f32 %v5023_v56, %v4575_v25  ;;  %v4639_v45 = vadd.f32 1.0, %v4607_v22 }
 0x82c   : > { %v4954_v42 = vadd.f32 0.2548296, %v4922_v34  ;;  %v10397_v16 = vmul.f32 0.70710677, %v10381_v28  ;;  %v10402_v34 = vmul.f32 0.5, %v10349_v33  ;;  %v5056_v10 = vmul.f32 %v5024_v27, %v4576_v55 }
 0x82d   : > { %v4578_v62 = vand.u32 2147483647, %v10394_v17  ;;  %7533 = vpow2.f32 %v5089_v13  ;;  %v10427_v23 = vmul.f32 0.5, %v4424_v51  ;;  %vm5215_vm6 = vcmp.ge.f32.partialorder %v10376_v35, 0.0 }
 0x82e   : > { %v4986_v11 = vmul.f32 %v10341_v5, %v4954_v42  ;;  %v4577_v31 = vand.u32 2147483647, %v10397_v16  ;;  %v4889_v5 = vadd.f32 -0.28449672, %v4857_v0  ;;  %v10411_v42 = vmul.f32 0.5, %v10359_v47  ;;  %v7520_v0 = vpop.eup %7519 }
 0x82f   : > { %v5026_v6 = vsub.f32 0.0, %v4578_v62  ;;  %v10425_v27 = vpop.eup %7521  ;;  %v5095_v25 = vmul.f32 1.442695, %v5056_v10  ;;  %7535 = vrcp.f32 %v4640_v52  ;;  %vm5216_vm7 = vcmp.ge.f32.partialorder %v10373_v48, 0.0 }
 0x830   : > { %v6525_v21 = vpop.f32.mrb[170].mxu0  ;;  %v10413_v33 = vmul.f32 %v7518_v57, %v4986_v11  ;;  %v5025_v2 = vsub.f32 0.0, %v4577_v31  ;;  %v4921_v47 = vmul.f32 %v10344_v15, %v4889_v5  ;;  %v4610_v11 = vmul.f32 0.3275911, %v4578_v62  ;;  %v10429_v4 = vpop.eup %7523 }
 0x831   : > { %v4428_v19 = vpop.f32.mrb[171].mxu0  ;;  %v10408_v29 = vadd.f32 %v6525_v21, %v10321_v26  ;;  %v4763_v21 = vadd.f32 -1.4531521, %v4731_v40  ;;  %v4609_v22 = vmul.f32 0.3275911, %v4577_v31  ;;  %v10433_v57 = vpop.eup %7525  ;;  %7537 = vrcp.f32 %v4639_v45 }
 0x832   : > { %v10419_v54 = vadd.f32 %v10321_v26, %v4428_v19  ;;  %v5178_v56 = vsub.f32 1.0, %v10413_v33  ;;  %v5093_v19 = vmul.f32 1.442695, %v5055_v58  ;;  %v4953_v51 = vadd.f32 0.2548296, %v4921_v47  ;;  %v10443_v52 = vpop.eup %7527 }
 0x833   : > { %v10422_v55 = vmul.f32 0.70710677, %v10408_v29  ;;  %v4795_v10 = vmul.f32 %v10392_v60, %v4763_v21  ;;  %v5058_v46 = vmul.f32 %v5026_v6, %v4578_v62  ;;  %v5057_v33 = vmul.f32 %v5025_v2, %v4577_v31  ;;  %v10454_v62 = vpop.eup %7529 }
 0x834   : > { %v10436_v5 = vmul.f32 0.70710677, %v10419_v54  ;;  %7539 = vpow2.f32 %v5095_v25  ;;  %v4642_v58 = vadd.f32 1.0, %v4610_v11  ;;  %v5242_v44 = vsub.f32 0.0, %v5178_v56  ;;  %v10460_v25 = vpop.eup %7531 }
 0x835   : > { %v4580_v63 = vand.u32 2147483647, %v10422_v55  ;;  %v4641_v47 = vadd.f32 1.0, %v4609_v22  ;;  %v10451_v21 = vmul.f32 0.5, %v10381_v28  ;;  %v4985_v45 = vmul.f32 %v10344_v15, %v4953_v51 }
 0x836   : > { %7541 = vpow2.f32 %v5093_v19  ;;  %v4579_v31 = vand.u32 2147483647, %v10436_v5  ;;  %v4827_v2 = vadd.f32 1.4214138, %v4795_v10  ;;  %v5099_v11 = vmul.f32 1.442695, %v5058_v46 }
 0x837   : > { %v5028_v3 = vsub.f32 0.0, %v4580_v63  ;;  %v5145_v22 = vmul.f32 %v7520_v0, %v4985_v45  ;;  %7543 = vrcp.f32 %v4642_v58  ;;  %v4612_v36 = vmul.f32 0.3275911, %v4580_v63  ;;  %v10469_v18 = vpop.eup %7533 }
 0x838   : > { %v6528_v59 = vpop.f32.mrb[172].mxu0  ;;  %v4859_v51 = vmul.f32 %v10392_v60, %v4827_v2  ;;  %7545 = vrcp.f32 %v4641_v47  ;;  %v10467_v9 = vmul.f32 0.5, %v10408_v29  ;;  %v5274_v46 = vsel %vm5210_vm0, %v5178_v56, %v5242_v44 }
 0x839   : > { %v4438_v40 = vpop.f32.mrb[173].mxu0  ;;  %v10439_v13 = vadd.f32 %v6528_v59, %v10321_v26  ;;  %v4732_v59 = vmul.f32 1.0614054, %v10425_v27  ;;  %v5177_v10 = vsub.f32 1.0, %v5145_v22  ;;  %v4611_v0 = vmul.f32 0.3275911, %v4579_v31  ;;  %v10474_v45 = vpop.eup %7535 }
 0x83a   : > { %v10447_v43 = vadd.f32 %v10321_v26, %v4438_v40  ;;  %v5097_v40 = vmul.f32 1.442695, %v5057_v33  ;;  %12107 = vst [vmem:[#allocation91_spill] sm:$0xff] %v10467_v9  ;;  %v5027_v33 = vsub.f32 0.0, %v4579_v31  ;;  %7547 = vpow2.f32 %v5099_v11 }
 0x83b   : > { %v10458_v6 = vmul.f32 0.70710677, %v10439_v13  ;;  %v4764_v19 = vadd.f32 -1.4531521, %v4732_v59  ;;  %v5060_v59 = vmul.f32 %v5028_v3, %v4580_v63  ;;  %v5241_v47 = vsub.f32 0.0, %v5177_v10  ;;  %v10481_v37 = vpop.eup %7537 }
 0x83c   : > { %v10463_v28 = vmul.f32 0.70710677, %v10447_v43  ;;  %v4891_v2 = vadd.f32 -0.28449672, %v4859_v51  ;;  %7549 = vpow2.f32 %v5097_v40  ;;  %v10477_v29 = vmul.f32 0.5, %v10419_v54 }
 0x83d   : > { %12105 = vst [vmem:[#allocation48_spill] sm:$0xff] %v10458_v6  ;;  %v4582_v58 = vand.u32 2147483647, %v10458_v6  ;;  %v4796_v12 = vmul.f32 %v10425_v27, %v4764_v19  ;;  %v5338_v44 = vadd.f32 1.0, %v5274_v46  ;;  %v4644_v56 = vadd.f32 1.0, %v4612_v36 }
 0x83e   : > { %12106 = vst [vmem:[#allocation47_spill] sm:$0xff] %v10463_v28  ;;  %v4581_v22 = vand.u32 2147483647, %v10463_v28  ;;  %v5273_v14 = vsel %vm5209_vm1, %v5177_v10, %v5241_v47  ;;  %v10486_v3 = vpop.eup %7539  ;;  %v4643_v63 = vadd.f32 1.0, %v4611_v0  ;;  %v5059_v40 = vmul.f32 %v5027_v33, %v4579_v31 }
 0x83f   : > { %v5030_v51 = vsub.f32 0.0, %v4582_v58  ;;  %v5337_v54 = vadd.f32 1.0, %v5273_v14  ;;  %v5103_v50 = vmul.f32 1.442695, %v5060_v59  ;;  %v4614_v53 = vmul.f32 0.3275911, %v4582_v58 }
 0x840   : > { %v6531_v15 = vpop.f32.mrb[174].mxu0  ;;  %v4923_v19 = vmul.f32 %v10392_v60, %v4891_v2  ;;  %v10492_v46 = vpop.eup %7541  ;;  %v4613_v36 = vmul.f32 0.3275911, %v4581_v22  ;;  %v5029_v1 = vsub.f32 0.0, %v4581_v22  ;;  %v5370_v0 = vmul.f32 %v5338_v44, %v10366_v49 }
 0x841   : > { %v4448_v61 = vpop.f32.mrb[175].mxu0  ;;  %v4454_v11 = vadd.f32 %v6531_v15, %v10321_v26  ;;  %v5369_v10 = vmul.f32 %v5337_v54, %v10370_v24  ;;  %v4828_v15 = vadd.f32 1.4214138, %v4796_v12  ;;  %7551 = vrcp.f32 %v4644_v56  ;;  %v10498_v59 = vpop.eup %7543 }
 0x842   : > { %v10489_v6 = vadd.f32 %v10321_v26, %v4448_v61  ;;  %v4955_v14 = vadd.f32 0.2548296, %v4923_v19  ;;  %v5101_v61 = vmul.f32 1.442695, %v5059_v40  ;;  %v5062_v2 = vmul.f32 %v5030_v51, %v4582_v58  ;;  %v10505_v24 = vpop.eup %7545 }
 0x843   : > { %v10496_v31 = vmul.f32 0.70710677, %v4454_v11  ;;  %v10502_v9 = vmul.f32 0.5, %v10439_v13  ;;  %6588 = vmatprep.mubr.f32.mxu0 %v5369_v10  ;;  %v4860_v12 = vmul.f32 %v10425_v27, %v4828_v15  ;;  %v4646_v49 = vadd.f32 1.0, %v4614_v53 }
 0x844   : > { %6589 = vmatmul.mubr.f32.vlgmr.msra.gmra.mrb[192].mxu0 %v5370_v0  ;;  %v10508_v44 = vmul.f32 0.70710677, %v10489_v6  ;;  %v4987_v56 = vmul.f32 %v10392_v60, %v4955_v14  ;;  %v4733_v54 = vmul.f32 1.0614054, %v10454_v62  ;;  %7553 = vrcp.f32 %v4643_v63  ;;  %v10512_v13 = vpop.eup %7547 }
 0x845   : > { %12108 = vst [vmem:[#allocation93_spill] sm:$0xff] %v10496_v31  ;;  %12109 = vst [vmem:[#allocation37_spill] sm:$0xff] %v10502_v9  ;;  %v4645_v40 = vadd.f32 1.0, %v4613_v36  ;;  %v5061_v58 = vmul.f32 %v5029_v1, %v4581_v22  ;;  %v4892_v51 = vadd.f32 -0.28449672, %v4860_v12  ;;  %7555 = vpow2.f32 %v5103_v50 }
 0x846   : > { %12110 = vst [vmem:[#allocation39_spill] sm:$0xff] %v10508_v44  ;;  %v10515_v19 = vmul.f32 0.5, %v10447_v43  ;;  %v4584_v53 = vand.u32 2147483647, %v10496_v31  ;;  %v5147_v10 = vmul.f32 %v10433_v57, %v4987_v56  ;;  %v10519_v15 = vpop.eup %7549  ;;  %7557 = vpow2.f32 %v5101_v61 }
 0x847   : > { %v5107_v60 = vmul.f32 1.442695, %v5062_v2  ;;  %v4924_v0 = vmul.f32 %v10425_v27, %v4892_v51  ;;  %7559 = vrcp.f32 %v4646_v49  ;;  %v4583_v22 = vand.u32 2147483647, %v10508_v44 }
 0x848   : > { %v6534_v47 = vpop.f32.mrb[176].mxu0  ;;  %12111 = vst [vmem:[#allocation49_spill] sm:$0xff] %v10515_v19  ;;  %v5179_v50 = vsub.f32 1.0, %v5147_v10  ;;  %v4765_v36 = vadd.f32 -1.4531521, %v4733_v54  ;;  %7561 = vrcp.f32 %v4645_v40  ;;  %v10526_v1 = vmul.f32 0.5, %v4454_v11 }
 0x849   : > { %v4458_v33 = vpop.f32.mrb[177].mxu0  ;;  %v10523_v63 = vadd.f32 %v6534_v47, %v10321_v26  ;;  %v5105_v43 = vmul.f32 1.442695, %v5061_v58  ;;  %v4956_v14 = vadd.f32 0.2548296, %v4924_v0  ;;  %v5032_v2 = vsub.f32 0.0, %v4584_v53 }
 0x84a   : > { %12112 = vst [vmem:[#allocation59_spill] sm:$0xff] %v10526_v1  ;;  %v4616_v61 = vmul.f32 0.3275911, %v4584_v53  ;;  %v5243_v12 = vsub.f32 0.0, %v5179_v50  ;;  %v4797_v56 = vmul.f32 %v10454_v62, %v4765_v36  ;;  %v10535_v54 = vadd.f32 %v10321_v26, %v4458_v33 }
 0x84b   : > { %v4988_v49 = vmul.f32 %v10425_v27, %v4956_v14  ;;  %v10532_v51 = vmul.f32 0.70710677, %v10523_v63  ;;  %v4734_v11 = vmul.f32 1.0614054, %v10443_v52  ;;  %v10538_v40 = vpop.eup %7551  ;;  %7563 = vpow2.f32 %v5107_v60 }
 0x84c   : > { %v4615_v58 = vmul.f32 0.3275911, %v4583_v22  ;;  %v5275_v10 = vsel %vm5211_vm2, %v5179_v50, %v5243_v12  ;;  %v4829_v0 = vadd.f32 1.4214138, %v4797_v56  ;;  %7565 = vpow2.f32 %v5105_v43 }
 0x84d   : > { %12113 = vst [vmem:[#allocation95_spill] sm:$0xff] %v10532_v51  ;;  %v5031_v36 = vsub.f32 0.0, %v4583_v22  ;;  %v5339_v1 = vadd.f32 1.0, %v5275_v10  ;;  %v5148_v27 = vmul.f32 %v10429_v4, %v4988_v49  ;;  %v4648_v14 = vadd.f32 1.0, %v4616_v61 }
 0x84e   : > { %v5064_v31 = vmul.f32 %v5032_v2, %v4584_v53  ;;  %v4861_v33 = vmul.f32 %v10454_v62, %v4829_v0  ;;  %v4766_v9 = vadd.f32 -1.4531521, %v4734_v11  ;;  %v10544_v19 = vpop.eup %7553  ;;  %v4586_v28 = vand.u32 2147483647, %v10532_v51 }
 0x84f   : > { %v5371_v44 = vmul.f32 %v5339_v1, %v10388_v41  ;;  %v5180_v60 = vsub.f32 1.0, %v5148_v27  ;;  %v10549_v7 = vmul.f32 0.70710677, %v10535_v54  ;;  %v10551_v50 = vpop.eup %7555  ;;  %v4647_v43 = vadd.f32 1.0, %v4615_v58 }
 0x850   : > { %v6537_v57 = vpop.f32.mrb[178].mxu0  ;;  %v10554_v4 = vmul.f32 0.5, %v10489_v6  ;;  %v4893_v53 = vadd.f32 -0.28449672, %v4861_v33  ;;  %v4798_v61 = vmul.f32 %v10443_v52, %v4766_v9  ;;  %v10557_v2 = vpop.eup %7557  ;;  %v5063_v12 = vmul.f32 %v5031_v36, %v4583_v22 }
 0x851   : > { %v4468_v47 = vpop.f32.mrb[179].mxu0  ;;  %12114 = vst [vmem:[#allocation97_spill] sm:$0xff] %v10549_v7  ;;  %6591 = vmatprep.mubr.f32.mxu0 %v5371_v44  ;;  %v5244_v41 = vsub.f32 0.0, %v5180_v60  ;;  %v10560_v1 = vadd.f32 %v6537_v57, %v10321_v26  ;;  %v4735_v56 = vmul.f32 1.0614054, %v10481_v37  ;;  %v10565_v11 = vpop.eup %7559  ;;  %7567 = vrcp.f32 %v4648_v14 }
 0x852   : > { %12115 = vst [vmem:[#allocation41_spill] sm:$0xff] %v10554_v4  ;;  %v5111_v6 = vmul.f32 1.442695, %v5064_v31  ;;  %v4925_v58 = vmul.f32 %v10454_v62, %v4893_v53  ;;  %v4830_v10 = vadd.f32 1.4214138, %v4798_v61  ;;  %v10570_v0 = vpop.eup %7561  ;;  %v5034_v22 = vsub.f32 0.0, %v4586_v28 }
 0x853   : > { %v5276_v44 = vsel %vm5212_vm3, %v5180_v60, %v5244_v41  ;;  %v4585_v57 = vand.u32 2147483647, %v10549_v7  ;;  %v4767_v36 = vadd.f32 -1.4531521, %v4735_v56  ;;  %7569 = vrcp.f32 %v4647_v43 }
 0x854   : > { %v5340_v27 = vadd.f32 1.0, %v5276_v44  ;;  %v4957_v33 = vadd.f32 0.2548296, %v4925_v58  ;;  %v4862_v14 = vmul.f32 %v10443_v52, %v4830_v10  ;;  %v4618_v31 = vmul.f32 0.3275911, %v4586_v28 }
 0x855   : > { %v10578_v53 = vmul.f32 0.70710677, %v10560_v1  ;;  %v10581_v61 = vadd.f32 %v10321_v26, %v4468_v47  ;;  %v4799_v39 = vmul.f32 %v10481_v37, %v4767_v36  ;;  %v10584_v60 = vpop.eup %7563  ;;  %v5109_v41 = vmul.f32 1.442695, %v5063_v12 }
 0x856   : > { %12117 = vst [vmem:[#allocation52_spill] sm:$0xff] %v10584_v60  ;;  %v5372_v43 = vmul.f32 %v5340_v27, %v10383_v30  ;;  %v4989_v56 = vmul.f32 %v10454_v62, %v4957_v33  ;;  %v4894_v58 = vadd.f32 -0.28449672, %v4862_v14  ;;  %v10588_v10 = vpop.eup %7565  ;;  %v5066_v44 = vmul.f32 %v5034_v22, %v4586_v28 }
 0x857   : > { %12116 = vst [vmem:[#allocation42_spill] sm:$0xff] %v10578_v53  ;;  %v10591_v51 = vmul.f32 0.5, %v10523_v63  ;;  %v5033_v7 = vsub.f32 0.0, %v4585_v57  ;;  %v4831_v4 = vadd.f32 1.4214138, %v4799_v39  ;;  %v4650_v30 = vadd.f32 1.0, %v4618_v31 }
 0x858   : > { %v10563_v49 = vpop.f32.mrb[180].mxu0  ;;  %6592 = vmatmul.mubr.f32.gmra.mrb[194].mxu0 %v5372_v43  ;;  %v4617_v47 = vmul.f32 0.3275911, %v4585_v57  ;;  %v5149_v36 = vmul.f32 %v10469_v18, %v4989_v56  ;;  %v4926_v60 = vmul.f32 %v10443_v52, %v4894_v58  ;;  %v4736_v12 = vmul.f32 1.0614054, %v10474_v45 }
 0x859   : > { %v10568_v9 = vpop.f32.mrb[181].mxu0  ;;  %12118 = vst [vmem:[#allocation50_spill] sm:$0xff] %v10591_v51  ;;  %v4588_v62 = vand.u32 2147483647, %v10578_v53  ;;  %v10598_v27 = vmul.f32 0.70710677, %v10581_v61  ;;  %v4863_v28 = vmul.f32 %v10481_v37, %v4831_v4  ;;  %7571 = vpow2.f32 %v5111_v6 }
 0x85a   : > { %v5181_v22 = vsub.f32 1.0, %v5149_v36  ;;  %v4958_v33 = vadd.f32 0.2548296, %v4926_v60  ;;  %v4768_v14 = vadd.f32 -1.4531521, %v4736_v12  ;;  %7573 = vpow2.f32 %v5109_v41 }
 0x85b   : > { %v5065_v18 = vmul.f32 %v5033_v7, %v4585_v57  ;;  %v10607_v31 = vmul.f32 0.5, %v10535_v54  ;;  %v4895_v43 = vadd.f32 -0.28449672, %v4863_v28  ;;  %v10609_v56 = vpop.eup %7567  ;;  %v5115_v58 = vmul.f32 1.442695, %v5066_v44 }
 0x85c   : > { %v5245_v4 = vsub.f32 0.0, %v5181_v22  ;;  %v4990_v53 = vmul.f32 %v10443_v52, %v4958_v33  ;;  %v4800_v6 = vmul.f32 %v10474_v45, %v4768_v14  ;;  %7575 = vrcp.f32 %v4650_v30 }
 0x85d   : > { %v4649_v60 = vadd.f32 1.0, %v4617_v47  ;;  %v5036_v36 = vsub.f32 0.0, %v4588_v62  ;;  %v4927_v12 = vmul.f32 %v10481_v37, %v4895_v43  ;;  %v10614_v51 = vpop.eup %7569  ;;  %v4587_v57 = vand.u32 2147483647, %v10598_v27 }
 0x85e   : > { %v5277_v54 = vsel %vm5213_vm4, %v5181_v22, %v5245_v4  ;;  %v5150_v7 = vmul.f32 %v10460_v25, %v4990_v53  ;;  %v4832_v41 = vadd.f32 1.4214138, %v4800_v6  ;;  %v5113_v44 = vmul.f32 1.442695, %v5065_v18 }
 0x85f   : > { %v5341_v28 = vadd.f32 1.0, %v5277_v54  ;;  %v4959_v52 = vadd.f32 0.2548296, %v4927_v12  ;;  %v10622_v30 = vadd.f32 %v10563_v49, %v10321_v26  ;;  %7577 = vpow2.f32 %v5115_v58 }
 0x860   : > { %v10601_v63 = vpop.f32.mrb[182].mxu0  ;;  %v5182_v47 = vsub.f32 1.0, %v5150_v7  ;;  %v4620_v33 = vmul.f32 0.3275911, %v4588_v62  ;;  %v4864_v8 = vmul.f32 %v10474_v45, %v4832_v41  ;;  %v5068_v25 = vmul.f32 %v5036_v36, %v4588_v62 }
 0x861   : > { %v10603_v39 = vpop.f32.mrb[183].mxu0  ;;  %v5373_v22 = vmul.f32 %v5341_v28, %v10402_v34  ;;  %v4991_v53 = vmul.f32 %v10481_v37, %v4959_v52  ;;  %v10630_v14 = vadd.f32 %v10321_v26, %v10568_v9  ;;  %7579 = vrcp.f32 %v4649_v60 }
 0x862   : > { %v5246_v49 = vsub.f32 0.0, %v5182_v47  ;;  %v5035_v43 = vsub.f32 0.0, %v4587_v57  ;;  %v4896_v4 = vadd.f32 -0.28449672, %v4864_v8  ;;  %7581 = vpow2.f32 %v5113_v44 }
 0x863   : > { %6594 = vmatprep.mubr.f32.mxu0 %v5373_v22  ;;  %v10635_v58 = vmul.f32 0.5, %v10560_v1  ;;  %v5151_v34 = vmul.f32 %v10492_v46, %v4991_v53  ;;  %v10639_v62 = vmul.f32 0.70710677, %v10622_v30  ;;  %v10643_v9 = vpop.eup %7571  ;;  %v4652_v60 = vadd.f32 1.0, %v4620_v33 }
 0x864   : > { %v5278_v6 = vsel %vm5214_vm5, %v5182_v47, %v5246_v49  ;;  %v4619_v36 = vmul.f32 0.3275911, %v4587_v57  ;;  %v4928_v12 = vmul.f32 %v10474_v45, %v4896_v4  ;;  %v10648_v54 = vpop.eup %7573  ;;  %v5119_v7 = vmul.f32 1.442695, %v5068_v25 }
 0x865   : > { %12119 = vst [vmem:[#allocation99_spill] sm:$0xff] %v10635_v58  ;;  %v5342_v1 = vadd.f32 1.0, %v5278_v6  ;;  %v5183_v41 = vsub.f32 1.0, %v5151_v34  ;;  %v10651_v46 = vmul.f32 0.70710677, %v10630_v14  ;;  %v5067_v44 = vmul.f32 %v5035_v43, %v4587_v57 }
 0x866   : > { %v10654_v28 = vmul.f32 0.5, %v10581_v61  ;;  %v4960_v52 = vadd.f32 0.2548296, %v4928_v12  ;;  %v4737_v38 = vmul.f32 1.0614054, %v10505_v24  ;;  %v10657_v47 = vpop.eup %7575  ;;  %7583 = vrcp.f32 %v4652_v60 }
 0x867   : > { %v5374_v33 = vmul.f32 %v5342_v1, %v10390_v20  ;;  %v5247_v8 = vsub.f32 0.0, %v5183_v41  ;;  %v4590_v22 = vand.u32 2147483647, %v10639_v62  ;;  %v4738_v25 = vmul.f32 1.0614054, %v10498_v59 }
 0x868   : > { %v10632_v18 = vpop.f32.mrb[184].mxu0  ;;  %12120 = vst [vmem:[#allocation101_spill] sm:$0xff] %v10654_v28  ;;  %v4651_v53 = vadd.f32 1.0, %v4619_v36  ;;  %v4992_v57 = vmul.f32 %v10474_v45, %v4960_v52  ;;  %v4769_v61 = vadd.f32 -1.4531521, %v4737_v38  ;;  %7585 = vpow2.f32 %v5119_v7 }
 0x869   : > { %v10641_v37 = vpop.f32.mrb[185].mxu0  ;;  %6595 = vmatmul.mubr.f32.gmra.mrb[196].mxu0 %v5374_v33  ;;  %v5279_v49 = vsel %vm5215_vm6, %v5183_v41, %v5247_v8  ;;  %v4589_v43 = vand.u32 2147483647, %v10651_v46  ;;  %v4770_v4 = vadd.f32 -1.4531521, %v4738_v25  ;;  %v10669_v20 = vpop.eup %7577  ;;  %v5038_v1 = vsub.f32 0.0, %v4590_v22 }
 0x86a   : > { %v5117_v6 = vmul.f32 1.442695, %v5067_v44  ;;  %v5343_v12 = vadd.f32 1.0, %v5279_v49  ;;  %v5152_v60 = vmul.f32 %v10486_v3, %v4992_v57  ;;  %v4801_v36 = vmul.f32 %v10505_v24, %v4769_v61 }
 0x86b   : > { %v4802_v7 = vmul.f32 %v10498_v59, %v4770_v4  ;;  %v10678_v35 = vadd.f32 %v10601_v63, %v10321_v26  ;;  %v4739_v41 = vmul.f32 1.0614054, %v10544_v19  ;;  %v10681_v52 = vpop.eup %7579  ;;  %v4622_v33 = vmul.f32 0.3275911, %v4590_v22 }
 0x86c   : > { %v5375_v44 = vmul.f32 %v5343_v12, %v10416_v32  ;;  %v5184_v38 = vsub.f32 1.0, %v5152_v60  ;;  %v4833_v3 = vadd.f32 1.4214138, %v4801_v36  ;;  %v10684_v8 = vpop.eup %7581  ;;  %7587 = vrcp.f32 %v4651_v53 }
 0x86d   : > { %v5037_v25 = vsub.f32 0.0, %v4589_v43  ;;  %v4834_v57 = vadd.f32 1.4214138, %v4802_v7  ;;  %v10688_v61 = vadd.f32 %v10321_v26, %v10603_v39  ;;  %7589 = vpow2.f32 %v5117_v6 }
 0x86e   : > { %6597 = vmatprep.mubr.f32.mxu0 %v5375_v44  ;;  %v5248_v63 = vsub.f32 0.0, %v5184_v38  ;;  %v4621_v49 = vmul.f32 0.3275911, %v4589_v43  ;;  %v4865_v4 = vmul.f32 %v10505_v24, %v4833_v3  ;;  %v5070_v58 = vmul.f32 %v5038_v1, %v4590_v22 }
 0x86f   : > { %v4866_v32 = vmul.f32 %v10498_v59, %v4834_v57  ;;  %v10693_v12 = vmul.f32 0.70710677, %v10678_v35  ;;  %v4771_v60 = vadd.f32 -1.4531521, %v4739_v41  ;;  %v4654_v36 = vadd.f32 1.0, %v4622_v33 }
 0x870   : > { %v10667_v34 = vpop.f32.mrb[186].mxu0  ;;  %v5280_v53 = vsel %vm5216_vm7, %v5184_v38, %v5248_v63  ;;  %v10698_v39 = vmul.f32 0.5, %v10622_v30  ;;  %v4897_v6 = vadd.f32 -0.28449672, %v4865_v4  ;;  %v5069_v44 = vmul.f32 %v5037_v25, %v4589_v43  ;;  %v10705_v1 = vpop.eup %7583 }
 0x871   : > { %v10673_v45 = vpop.f32.mrb[187].mxu0  ;;  %12121 = vst [vmem:[#allocation43_spill] sm:$0xff] %v10693_v12  ;;  %v5344_v7 = vadd.f32 1.0, %v5280_v53  ;;  %v4898_v28 = vadd.f32 -0.28449672, %v4866_v32  ;;  %v4653_v57 = vadd.f32 1.0, %v4621_v49  ;;  %v4803_v30 = vmul.f32 %v10544_v19, %v4771_v60 }
 0x872   : > { %12122 = vst [vmem:[#allocation44_spill] sm:$0xff] %v10698_v39  ;;  %v10701_v3 = vmul.f32 0.70710677, %v10688_v61  ;;  %v10708_v41 = vmul.f32 0.5, %v10630_v14  ;;  %v4929_v48 = vmul.f32 %v10505_v24, %v4897_v6  ;;  %v10714_v33 = vpop.eup %7585  ;;  %v5123_v25 = vmul.f32 1.442695, %v5070_v58 }
 0x873   : > { %12125 = vst [vmem:[#allocation103_spill] sm:$0xff] %v10714_v33  ;;  %v5376_v43 = vmul.f32 %v5344_v7, %v10411_v42  ;;  %v4930_v63 = vmul.f32 %v10498_v59, %v4898_v28  ;;  %v4592_v4 = vand.u32 2147483647, %v10693_v12  ;;  %7591 = vrcp.f32 %v4654_v36 }
 0x874   : > { %12123 = vst [vmem:[#allocation56_spill] sm:$0xff] %v10701_v3  ;;  %12124 = vst [vmem:[#allocation54_spill] sm:$0xff] %v10708_v41  ;;  %v4961_v49 = vadd.f32 0.2548296, %v4929_v48  ;;  %v4835_v32 = vadd.f32 1.4214138, %v4803_v30  ;;  %v10724_v42 = vadd.f32 %v10632_v18, %v10321_v26  ;;  %7593 = vrcp.f32 %v4653_v57 }
 0x875   : > { %v4740_v14 = vmul.f32 1.0614054, %v10538_v40  ;;  %vm5217_vm8 = vcmp.ge.f32.partialorder %v10397_v16, 0.0  ;;  %6598 = vmatmul.mubr.f32.gmra.mrb[198].mxu0 %v5376_v43  ;;  %v5121_v60 = vmul.f32 1.442695, %v5069_v44  ;;  %vm5218_vm9 = vcmp.ge.f32.partialorder %v10394_v17, 0.0 }
 0x876   : > { %v4962_v53 = vadd.f32 0.2548296, %v4930_v63  ;;  %v4591_v6 = vand.u32 2147483647, %v10701_v3  ;;  %v4993_v58 = vmul.f32 %v10505_v24, %v4961_v49  ;;  %v4867_v28 = vmul.f32 %v10544_v19, %v4835_v32  ;;  %v10729_v7 = vpop.eup %7587 }
 0x877   : > { %v4772_v36 = vadd.f32 -1.4531521, %v4740_v14  ;;  %7595 = vpow2.f32 %v5123_v25  ;;  %v4624_v48 = vmul.f32 0.3275911, %v4592_v4  ;;  %v5040_v30 = vsub.f32 0.0, %v4592_v4  ;;  %v10732_v43 = vpop.eup %7589 }
 0x878   : > { %v10703_v22 = vpop.f32.mrb[188].mxu0  ;;  %v4994_v44 = vmul.f32 %v10498_v59, %v4962_v53  ;;  %v5153_v18 = vmul.f32 %v10519_v15, %v4993_v58  ;;  %v4899_v63 = vadd.f32 -0.28449672, %v4867_v28  ;;  %v10738_v24 = vadd.f32 %v10321_v26, %v10641_v37 }
 0x879   : > { %v10712_v38 = vpop.f32.mrb[189].mxu0  ;;  %v4804_v39 = vmul.f32 %v10538_v40, %v4772_v36  ;;  %7597 = vpow2.f32 %v5121_v60  ;;  %v4623_v49 = vmul.f32 0.3275911, %v4591_v6  ;;  %v10742_v25 = vmul.f32 0.70710677, %v10724_v42 }
 0x87a   : > { %v5154_v57 = vmul.f32 %v10512_v13, %v4994_v44  ;;  %v5185_v32 = vsub.f32 1.0, %v5153_v18  ;;  %v5039_v14 = vsub.f32 0.0, %v4591_v6  ;;  %v4931_v15 = vmul.f32 %v10544_v19, %v4899_v63 }
 0x87b   : > { %12126 = vst [vmem:[#allocation105_spill] sm:$0xff] %v10742_v25  ;;  %v4836_v53 = vadd.f32 1.4214138, %v4804_v39  ;;  %v4656_v36 = vadd.f32 1.0, %v4624_v48  ;;  %v5072_v26 = vmul.f32 %v5040_v30, %v4592_v4  ;;  %v10750_v37 = vmul.f32 0.5, %v10678_v35 }
 0x87c   : > { %v5186_v28 = vsub.f32 1.0, %v5154_v57  ;;  %v5249_v13 = vsub.f32 0.0, %v5185_v32  ;;  %v4963_v60 = vadd.f32 0.2548296, %v4931_v15  ;;  %v10754_v41 = vmul.f32 0.70710677, %v10738_v24 }
 0x87d   : > { %12127 = vst [vmem:[#allocation45_spill] sm:$0xff] %v10750_v37  ;;  %v4868_v44 = vmul.f32 %v10538_v40, %v4836_v53  ;;  %vm5219_vm10 = vcmp.ge.f32.partialorder %v10436_v5, 0.0  ;;  %v4655_v63 = vadd.f32 1.0, %v4623_v49  ;;  %v4594_v39 = vand.u32 2147483647, %v10742_v25  ;;  %v10759_v48 = vpop.eup %7591 }
 0x87e   : > { %v5250_v18 = vsub.f32 0.0, %v5186_v28  ;;  %v4741_v57 = vmul.f32 1.0614054, %v10570_v0  ;;  %v5281_v35 = vsel %vm5217_vm8, %v5185_v32, %v5249_v13  ;;  %v5071_v4 = vmul.f32 %v5039_v14, %v4591_v6  ;;  %v10766_v49 = vpop.eup %7593 }
 0x87f   : > { %v4995_v30 = vmul.f32 %v10544_v19, %v4963_v60  ;;  %v4900_v15 = vadd.f32 -0.28449672, %v4868_v44  ;;  %v5345_v53 = vadd.f32 1.0, %v5281_v35  ;;  %7599 = vrcp.f32 %v4656_v36  ;;  %v10781_v60 = vld [vmem:[%s7849_s27] ss:$0 sm:$0xff] }
 0x880   : > { %v10744_v59 = vpop.f32.mrb[190].mxu0  ;;  %v5282_v37 = vsel %vm5218_vm9, %v5186_v28, %v5250_v18  ;;  %v5127_v12 = vmul.f32 1.442695, %v5072_v26  ;;  %v4593_v16 = vand.u32 2147483647, %v10754_v41  ;;  %v5042_v14 = vsub.f32 0.0, %v4594_v39 }
 0x881   : > { %v10747_v58 = vpop.f32.mrb[191].mxu0  ;;  %v5346_v25 = vadd.f32 1.0, %v5282_v37  ;;  %v5155_v3 = vmul.f32 %v10557_v2, %v4995_v30  ;;  %v4932_v33 = vmul.f32 %v10538_v40, %v4900_v15  ;;  %v10771_v6 = vpop.eup %7595  ;;  %v5377_v19 = vmul.f32 %v5345_v53, %v10451_v21 }
 0x882   : > { %v4626_v32 = vmul.f32 0.3275911, %v4594_v39  ;;  %v4773_v17 = vadd.f32 -1.4531521, %v4741_v57  ;;  %v4742_v37 = vmul.f32 1.0614054, %v10565_v11  ;;  %7601 = vrcp.f32 %v4655_v63 }
 0x883   : > { %v5378_v28 = vmul.f32 %v5346_v25, %v10427_v23  ;;  %v5187_v36 = vsub.f32 1.0, %v5155_v3  ;;  %v4964_v26 = vadd.f32 0.2548296, %v4932_v33  ;;  %v10776_v13 = vpop.eup %7597  ;;  %vm5220_vm11 = vcmp.ge.f32.partialorder %v10422_v55, 0.0  ;;  %6600 = vmatprep.mubr.f32.mxu0 %v5377_v19 }
 0x884   : > { %v4805_v2 = vmul.f32 %v10570_v0, %v4773_v17  ;;  %v10785_v21 = vadd.f32 %v10781_v60, %v10667_v34  ;;  %v10789_v23 = vadd.f32 %v10781_v60, %v10673_v45  ;;  %v4625_v25 = vmul.f32 0.3275911, %v4593_v16 }
 0x885   : > { %6601 = vmatmul.mubr.f32.gmra.mrb[200].mxu0 %v5378_v28  ;;  %v5251_v3 = vsub.f32 0.0, %v5187_v36  ;;  %v4996_v33 = vmul.f32 %v10538_v40, %v4964_v26  ;;  %v4774_v44 = vadd.f32 -1.4531521, %v4742_v37  ;;  %v5125_v18 = vmul.f32 1.442695, %v5071_v4 }
 0x886   : > { %v4658_v63 = vadd.f32 1.0, %v4626_v32  ;;  %v5074_v57 = vmul.f32 %v5042_v14, %v4594_v39  ;;  %v4837_v35 = vadd.f32 1.4214138, %v4805_v2  ;;  %v10797_v45 = vmul.f32 0.70710677, %v10785_v21 }
 0x887   : > { %v5283_v30 = vsel %vm5219_vm10, %v5187_v36, %v5251_v3  ;;  %v5156_v34 = vmul.f32 %v10551_v50, %v4996_v33  ;;  %v4806_v15 = vmul.f32 %v10565_v11, %v4774_v44  ;;  %v10801_v40 = vmul.f32 0.70710677, %v10789_v23 }
 0x888   : > { %v5347_v53 = vadd.f32 1.0, %v5283_v30  ;;  %v4869_v19 = vmul.f32 %v10570_v0, %v4837_v35  ;;  %v4743_v4 = vmul.f32 1.0614054, %v10614_v51  ;;  %v4657_v32 = vadd.f32 1.0, %v4625_v25 }
 0x889   : > { %v5188_v39 = vsub.f32 1.0, %v5156_v34  ;;  %v5041_v14 = vsub.f32 0.0, %v4593_v16  ;;  %v4838_v5 = vadd.f32 1.4214138, %v4806_v15  ;;  %v10804_v17 = vpop.eup %7599  ;;  %7603 = vpow2.f32 %v5127_v12 }
 0x88a   : > { %v5379_v50 = vmul.f32 %v5347_v53, %v10477_v29  ;;  %v5131_v28 = vmul.f32 1.442695, %v5074_v57  ;;  %v4901_v36 = vadd.f32 -0.28449672, %v4869_v19  ;;  %7605 = vpow2.f32 %v5125_v18  ;;  %v12129_v19 = vld [vmem:[#allocation91_spill] sm:$0xff] }
 0x88b   : > { %v5252_v26 = vsub.f32 0.0, %v5188_v39  ;;  %v4870_v37 = vmul.f32 %v10565_v11, %v4838_v5  ;;  %v4596_v2 = vand.u32 2147483647, %v10797_v45  ;;  %7607 = vrcp.f32 %v4658_v63  ;;  %v12128_v63 = vld [vmem:[#allocation47_spill] sm:$0xff] }
 0x88c   : > { %6603 = vmatprep.mubr.f32.mxu0 %v5379_v50  ;;  %v4933_v3 = vmul.f32 %v10570_v0, %v4901_v36  ;;  %v4595_v33 = vand.u32 2147483647, %v10801_v40  ;;  %v4775_v25 = vadd.f32 -1.4531521, %v4743_v4  ;;  %7609 = vrcp.f32 %v4657_v32  ;;  %v10813_v57 = vpop.eup %7601 }
 0x88d   : > { %v5284_v12 = vsel %vm5220_vm11, %v5188_v39, %v5252_v26  ;;  %v5073_v29 = vmul.f32 %v5041_v14, %v4593_v16  ;;  %v4902_v44 = vadd.f32 -0.28449672, %v4870_v37  ;;  %v10816_v18 = vmul.f32 0.5, %v10688_v61 }
 0x88e   : > { %v5348_v35 = vadd.f32 1.0, %v5284_v12  ;;  %7611 = vpow2.f32 %v5131_v28  ;;  %v4965_v30 = vadd.f32 0.2548296, %v4933_v3  ;;  %vm5221_vm12 = vcmp.ge.f32.partialorder %v12128_v63, 0.0  ;;  %v12131_v28 = vld [vmem:[#allocation48_spill] sm:$0xff] }
 0x88f   : > { %v4934_v34 = vmul.f32 %v10565_v11, %v4902_v44  ;;  %v4628_v15 = vmul.f32 0.3275911, %v4596_v2  ;;  %v5044_v53 = vsub.f32 0.0, %v4596_v2  ;;  %v4807_v55 = vmul.f32 %v10614_v51, %v4775_v25 }
 0x890   : > { %v5380_v4 = vmul.f32 %v5348_v35, %v12129_v19  ;;  %v4997_v16 = vmul.f32 %v10570_v0, %v4965_v30  ;;  %v5043_v39 = vsub.f32 0.0, %v4595_v33  ;;  %v4744_v32 = vmul.f32 1.0614054, %v10609_v56 }
 0x891   : > { %v5129_v61 = vmul.f32 1.442695, %v5073_v29  ;;  %v4966_v14 = vadd.f32 0.2548296, %v4934_v34  ;;  %v4839_v5 = vadd.f32 1.4214138, %v4807_v55  ;;  %v10826_v50 = vadd.f32 %v10781_v60, %v10703_v22 }
 0x892   : > { %vm5222_vm13 = vcmp.ge.f32.partialorder %v12131_v28, 0.0  ;;  %6604 = vmatmul.mubr.f32.gmra.mrb[202].mxu0 %v5380_v4  ;;  %v5157_v36 = vmul.f32 %v10588_v10, %v4997_v16  ;;  %v4627_v26 = vmul.f32 0.3275911, %v4595_v33  ;;  %v4776_v37 = vadd.f32 -1.4531521, %v4744_v32 }
 0x893   : > { %12130 = vst [vmem:[#allocation46_spill] sm:$0xff] %v10826_v50  ;;  %v10832_v0 = vadd.f32 %v10781_v60, %v10712_v38  ;;  %v4998_v3 = vmul.f32 %v10565_v11, %v4966_v14  ;;  %v4660_v25 = vadd.f32 1.0, %v4628_v15  ;;  %v5076_v12 = vmul.f32 %v5044_v53, %v4596_v2  ;;  %v10836_v44 = vpop.eup %7603  ;;  %v12133_v11 = vld [vmem:[#allocation52_spill] sm:$0xff] }
 0x894   : > { %v4871_v29 = vmul.f32 %v10614_v51, %v4839_v5  ;;  %v5189_v22 = vsub.f32 1.0, %v5157_v36  ;;  %v5075_v35 = vmul.f32 %v5043_v39, %v4595_v33  ;;  %v4808_v30 = vmul.f32 %v10609_v56, %v4776_v37  ;;  %v10842_v34 = vpop.eup %7605 }
 0x895   : > { %12132 = vst [vmem:[#allocation60_spill] sm:$0xff] %v10832_v0  ;;  %v10840_v10 = vmul.f32 0.70710677, %v10826_v50  ;;  %v10845_v38 = vmul.f32 0.5, %v10724_v42  ;;  %7613 = vpow2.f32 %v5129_v61  ;;  %v5158_v15 = vmul.f32 %v12133_v11, %v4998_v3  ;;  %v10848_v53 = vpop.eup %7607  ;;  %v12134_v11 = vld [vmem:[#allocation39_spill] sm:$0xff]  ;;  %v12136_v50 = vld [vmem:[#allocation37_spill] sm:$0xff] }
 0x896   : > { %v4903_v2 = vadd.f32 -0.28449672, %v4871_v29  ;;  %v5253_v55 = vsub.f32 0.0, %v5189_v22  ;;  %v4659_v19 = vadd.f32 1.0, %v4627_v26  ;;  %v4840_v4 = vadd.f32 1.4214138, %v4808_v30  ;;  %v10853_v16 = vpop.eup %7609 }
 0x897   : > { %v10851_v33 = vmul.f32 0.70710677, %v10832_v0  ;;  %v5190_v39 = vsub.f32 1.0, %v5158_v15  ;;  %7615 = vrcp.f32 %v4660_v25  ;;  %v5135_v32 = vmul.f32 1.442695, %v5076_v12 }
 0x898   : > { %v4935_v42 = vmul.f32 %v10614_v51, %v4903_v2  ;;  %v10856_v14 = vpop.eup %7611  ;;  %v5285_v61 = vsel %vm5221_vm12, %v5189_v22, %v5253_v55  ;;  %v5133_v5 = vmul.f32 1.442695, %v5075_v35  ;;  %v4872_v36 = vmul.f32 %v10609_v56, %v4840_v4  ;;  %v12135_v22 = vld [vmem:[#allocation49_spill] sm:$0xff] }
 0x899   : > { %v4598_v26 = vand.u32 2147483647, %v10840_v10  ;;  %v5349_v37 = vadd.f32 1.0, %v5285_v61  ;;  %v5254_v3 = vsub.f32 0.0, %v5190_v39  ;;  %v4745_v30 = vmul.f32 1.0614054, %v10681_v52 }
 0x89a   : > { %v4967_v29 = vadd.f32 0.2548296, %v4935_v42  ;;  %vm5223_vm14 = vcmp.ge.f32.partialorder %v12134_v11, 0.0  ;;  %v10865_v25 = vmul.f32 0.5, %v10738_v24  ;;  %7617 = vrcp.f32 %v4659_v19 }
 0x89b   : > { %v4904_v12 = vadd.f32 -0.28449672, %v4872_v36  ;;  %v4597_v63 = vand.u32 2147483647, %v10851_v33  ;;  %v5381_v35 = vmul.f32 %v5349_v37, %v12135_v22  ;;  %v5286_v15 = vsel %vm5222_vm13, %v5190_v39, %v5254_v3 }
 0x89c   : > { %7619 = vpow2.f32 %v5135_v32  ;;  %v4999_v2 = vmul.f32 %v10614_v51, %v4967_v29  ;;  %v5350_v55 = vadd.f32 1.0, %v5286_v15  ;;  %v4630_v42 = vmul.f32 0.3275911, %v4598_v26  ;;  %v12138_v32 = vld [vmem:[#allocation93_spill] sm:$0xff] }
 0x89d   : > { %7621 = vpow2.f32 %v5133_v5  ;;  %v4936_v4 = vmul.f32 %v10609_v56, %v4904_v12  ;;  %6606 = vmatprep.mubr.f32.mxu0 %v5381_v35  ;;  %v5046_v19 = vsub.f32 0.0, %v4598_v26  ;;  %v4777_v61 = vadd.f32 -1.4531521, %v4745_v30 }
 0x89e   : > { %v5159_v24 = vmul.f32 %v10648_v54, %v4999_v2  ;;  %v4746_v36 = vmul.f32 1.0614054, %v10657_v47  ;;  %v5382_v37 = vmul.f32 %v5350_v55, %v12136_v50  ;;  %v4629_v28 = vmul.f32 0.3275911, %v4597_v63 }
 0x89f   : > { %v4968_v22 = vadd.f32 0.2548296, %v4936_v4  ;;  %v10878_v39 = vadd.f32 %v10781_v60, %v10744_v59  ;;  %v10880_v51 = vpop.eup %7613  ;;  %vm5224_vm15 = vcmp.ge.f32.partialorder %v12138_v32, 0.0  ;;  %v5045_v3 = vsub.f32 0.0, %v4597_v63 }
 0x8a0   : > { %v5191_v5 = vsub.f32 1.0, %v5159_v24  ;;  %v4809_v54 = vmul.f32 %v10681_v52, %v4777_v61  ;;  %v4778_v29 = vadd.f32 -1.4531521, %v4746_v36  ;;  %6607 = vmatmul.mubr.f32.gmra.mrb[204].mxu0 %v5382_v37  ;;  %v4662_v12 = vadd.f32 1.0, %v4630_v42 }
 0x8a1   : > { %12137 = vst [vmem:[#allocation58_spill] sm:$0xff] %v10878_v39  ;;  %v5000_v30 = vmul.f32 %v10609_v56, %v4968_v22  ;;  %v10886_v50 = vmul.f32 0.70710677, %v10878_v39  ;;  %v10890_v59 = vadd.f32 %v10781_v60, %v10747_v58  ;;  %v10892_v35 = vpop.eup %7615  ;;  %v5078_v2 = vmul.f32 %v5046_v19, %v4598_v26 }
 0x8a2   : > { %v5255_v15 = vsub.f32 0.0, %v5191_v5  ;;  %v4841_v55 = vadd.f32 1.4214138, %v4809_v54  ;;  %v4810_v4 = vmul.f32 %v10657_v47, %v4778_v29  ;;  %v4661_v61 = vadd.f32 1.0, %v4629_v28 }
 0x8a3   : > { %12139 = vst [vmem:[#allocation64_spill] sm:$0xff] %v10886_v50  ;;  %12140 = vst [vmem:[#allocation62_spill] sm:$0xff] %v10890_v59  ;;  %v5160_v24 = vmul.f32 %v10643_v9, %v5000_v30  ;;  %v4600_v56 = vand.u32 2147483647, %v10886_v50  ;;  %v10898_v42 = vmul.f32 0.70710677, %v10890_v59  ;;  %v5077_v58 = vmul.f32 %v5045_v3, %v4597_v63 }
 0x8a4   : > { %v5287_v36 = vsel %vm5223_vm14, %v5191_v5, %v5255_v15  ;;  %v4873_v60 = vmul.f32 %v10681_v52, %v4841_v55  ;;  %v4842_v37 = vadd.f32 1.4214138, %v4810_v4  ;;  %v10903_v22 = vpop.eup %7617  ;;  %v4747_v9 = vmul.f32 1.0614054, %v10729_v7  ;;  %v12142_v63 = vld [vmem:[#allocation41_spill] sm:$0xff] }
 0x8a5   : > { %12141 = vst [vmem:[#allocation68_spill] sm:$0xff] %v10898_v42  ;;  %v5351_v26 = vadd.f32 1.0, %v5287_v36  ;;  %v5192_v19 = vsub.f32 1.0, %v5160_v24  ;;  %v5048_v54 = vsub.f32 0.0, %v4600_v56  ;;  %7623 = vrcp.f32 %v4662_v12 }
 0x8a6   : > { %v10906_v28 = vpop.eup %7619  ;;  %v4905_v29 = vadd.f32 -0.28449672, %v4873_v60  ;;  %v4874_v30 = vmul.f32 %v10657_v47, %v4842_v37  ;;  %v4599_v11 = vand.u32 2147483647, %v10898_v42  ;;  %v5139_v55 = vmul.f32 1.442695, %v5078_v2 }
 0x8a7   : > { %v10910_v5 = vpop.eup %7621  ;;  %v5383_v3 = vmul.f32 %v5351_v26, %v12142_v63  ;;  %v5256_v15 = vsub.f32 0.0, %v5192_v19  ;;  %7625 = vrcp.f32 %v4661_v61  ;;  %v5080_v36 = vmul.f32 %v5048_v54, %v4600_v56  ;;  %v12143_v2 = vld [vmem:[#allocation97_spill] sm:$0xff] }
 0x8a8   : > { %v4937_v4 = vmul.f32 %v10681_v52, %v4905_v29  ;;  %v4906_v24 = vadd.f32 -0.28449672, %v4874_v30  ;;  %v5047_v39 = vsub.f32 0.0, %v4599_v11  ;;  %v4632_v60 = vmul.f32 0.3275911, %v4600_v56  ;;  %v12144_v30 = vld [vmem:[#allocation59_spill] sm:$0xff] }
 0x8a9   : > { %6609 = vmatprep.mubr.f32.mxu0 %v5383_v3  ;;  %v5288_v12 = vsel %vm5224_vm15, %v5192_v19, %v5256_v15  ;;  %v4631_v37 = vmul.f32 0.3275911, %v4599_v11  ;;  %v4779_v50 = vadd.f32 -1.4531521, %v4747_v9  ;;  %v10916_v42 = vmul.f32 1.442695, %v5077_v58 }
 0x8aa   : > { %v5352_v59 = vadd.f32 1.0, %v5288_v12  ;;  %v4969_v0 = vadd.f32 0.2548296, %v4937_v4  ;;  %v4938_v26 = vmul.f32 %v10657_v47, %v4906_v24  ;;  %vm5225_vm0 = vcmp.ge.f32.partialorder %v12143_v2, 0.0  ;;  %v12145_v58 = vld [vmem:[#allocation95_spill] sm:$0xff] }
 0x8ab   : > { %7627 = vpow2.f32 %v5139_v55  ;;  %v5079_v61 = vmul.f32 %v5047_v39, %v4599_v11  ;;  %v4811_v54 = vmul.f32 %v10729_v7, %v4779_v50  ;;  %v4748_v29 = vmul.f32 1.0614054, %v10705_v1 }
 0x8ac   : > { %v5384_v32 = vmul.f32 %v5352_v59, %v12144_v30  ;;  %v5001_v56 = vmul.f32 %v10681_v52, %v4969_v0  ;;  %v4970_v19 = vadd.f32 0.2548296, %v4938_v26  ;;  %v10924_v9 = vmul.f32 1.442695, %v5080_v36 }
 0x8ad   : > { %vm5226_vm1 = vcmp.ge.f32.partialorder %v12145_v58, 0.0  ;;  %v4664_v63 = vadd.f32 1.0, %v4632_v60  ;;  %v4663_v3 = vadd.f32 1.0, %v4631_v37  ;;  %v4843_v15 = vadd.f32 1.4214138, %v4811_v54  ;;  %v12146_v58 = vld [vmem:[#allocation50_spill] sm:$0xff] }
 0x8ae   : > { %v4780_v4 = vadd.f32 -1.4531521, %v4748_v29  ;;  %6610 = vmatmul.mubr.f32.gmra.mrb[206].mxu0 %v5384_v32  ;;  %v5161_v39 = vmul.f32 %v10684_v8, %v5001_v56  ;;  %v5002_v50 = vmul.f32 %v10657_v47, %v4970_v19  ;;  %v4749_v11 = vmul.f32 1.0614054, %v10766_v49 }
 0x8af   : > { %v4750_v59 = vmul.f32 1.0614054, %v10759_v48  ;;  %v10931_v55 = vmul.f32 1.442695, %v5079_v61  ;;  %v4875_v52 = vmul.f32 %v10729_v7, %v4843_v15  ;;  %v4751_v24 = vmul.f32 1.0614054, %v10813_v57  ;;  %v10936_v36 = vpop.eup %7623 }
 0x8b0   : > { %v4812_v0 = vmul.f32 %v10705_v1, %v4780_v4  ;;  %v5193_v12 = vsub.f32 1.0, %v5161_v39  ;;  %v5162_v60 = vmul.f32 %v10669_v20, %v5002_v50  ;;  %v4781_v8 = vadd.f32 -1.4531521, %v4749_v11 }
 0x8b1   : > { %v4782_v37 = vadd.f32 -1.4531521, %v4750_v59  ;;  %v10939_v47 = vpop.eup %7625  ;;  %7629 = vrcp.f32 %v4664_v63  ;;  %v4907_v26 = vadd.f32 -0.28449672, %v4875_v52  ;;  %v4783_v61 = vadd.f32 -1.4531521, %v4751_v24 }
 0x8b2   : > { %v4844_v54 = vadd.f32 1.4214138, %v4812_v0  ;;  %v5257_v29 = vsub.f32 0.0, %v5193_v12  ;;  %v5194_v30 = vsub.f32 1.0, %v5162_v60  ;;  %v4813_v32 = vmul.f32 %v10766_v49, %v4781_v8 }
 0x8b3   : > { %v4814_v56 = vmul.f32 %v10759_v48, %v4782_v37  ;;  %v4939_v19 = vmul.f32 %v10729_v7, %v4907_v26  ;;  %v4815_v20 = vmul.f32 %v10813_v57, %v4783_v61  ;;  %v4752_v4 = vmul.f32 1.0614054, %v10804_v17 }
 0x8b4   : > { %v4876_v15 = vmul.f32 %v10705_v1, %v4844_v54  ;;  %v5289_v63 = vsel %vm5225_vm0, %v5193_v12, %v5257_v29  ;;  %v5258_v39 = vsub.f32 0.0, %v5194_v30  ;;  %v4845_v50 = vadd.f32 1.4214138, %v4813_v32 }
 0x8b5   : > { %v4846_v11 = vadd.f32 1.4214138, %v4814_v56  ;;  %v10949_v59 = vpop.eup %7627  ;;  %v5353_v52 = vadd.f32 1.0, %v5289_v63  ;;  %7631 = vrcp.f32 %v4663_v3  ;;  %v4971_v0 = vadd.f32 0.2548296, %v4939_v19  ;;  %v12147_v63 = vld [vmem:[#allocation42_spill] sm:$0xff] }
 0x8b6   : > { %v4908_v24 = vadd.f32 -0.28449672, %v4876_v15  ;;  %vm5227_vm2 = vcmp.ge.f32.partialorder %v10598_v27, 0.0  ;;  %v5290_v60 = vsel %vm5226_vm1, %v5194_v30, %v5258_v39  ;;  %v4877_v8 = vmul.f32 %v10766_v49, %v4845_v50 }
 0x8b7   : > { %v4878_v37 = vmul.f32 %v10759_v48, %v4846_v11  ;;  %v4847_v2 = vadd.f32 1.4214138, %v4815_v20  ;;  %v5385_v12 = vmul.f32 %v5353_v52, %v10607_v31  ;;  %v5354_v26 = vadd.f32 1.0, %v5290_v60 }
 0x8b8   : > { %v5003_v54 = vmul.f32 %v10729_v7, %v4971_v0  ;;  %v4940_v61 = vmul.f32 %v10705_v1, %v4908_v24  ;;  %v4909_v3 = vadd.f32 -0.28449672, %v4877_v8  ;;  %v4784_v56 = vadd.f32 -1.4531521, %v4752_v4 }
 0x8b9   : > { %v4910_v29 = vadd.f32 -0.28449672, %v4878_v37  ;;  %v4879_v32 = vmul.f32 %v10813_v57, %v4847_v2  ;;  %6612 = vmatprep.mubr.f32.mxu0 %v5385_v12  ;;  %v5386_v30 = vmul.f32 %v5354_v26, %v12146_v58  ;;  %v4753_v20 = vmul.f32 1.0614054, %v10853_v16  ;;  %v12148_v12 = vld [vmem:[#allocation103_spill] sm:$0xff]  ;;  %v12149_v58 = vld [vmem:[#allocation56_spill] sm:$0xff] }
 0x8ba   : > { %v5163_v19 = vmul.f32 %v10732_v43, %v5003_v54  ;;  %v4972_v15 = vadd.f32 0.2548296, %v4940_v61  ;;  %vm5228_vm3 = vcmp.ge.f32.partialorder %v12147_v63, 0.0  ;;  %v4941_v31 = vmul.f32 %v10766_v49, %v4909_v3  ;;  %v12152_v63 = vld [vmem:[#allocation99_spill] sm:$0xff] }
 0x8bb   : > { %v4942_v7 = vmul.f32 %v10759_v48, %v4910_v29  ;;  %v4911_v39 = vadd.f32 -0.28449672, %v4879_v32  ;;  %v4816_v50 = vmul.f32 %v10804_v17, %v4784_v56  ;;  %v10967_v11 = vpop.eup %7629  ;;  %6613 = vmatmul.mubr.f32.gmra.mrb[208].mxu0 %v5386_v30  ;;  %v4785_v0 = vadd.f32 -1.4531521, %v4753_v20 }
 0x8bc   : > { %v5195_v4 = vsub.f32 1.0, %v5163_v19  ;;  %v5004_v52 = vmul.f32 %v10705_v1, %v4972_v15  ;;  %v4754_v43 = vmul.f32 1.0614054, %v10848_v53  ;;  %v4973_v24 = vadd.f32 0.2548296, %v4941_v31 }
 0x8bd   : > { %v4974_v60 = vadd.f32 0.2548296, %v4942_v7  ;;  %v4943_v8 = vmul.f32 %v10813_v57, %v4911_v39  ;;  %v4848_v37 = vadd.f32 1.4214138, %v4816_v50  ;;  %vm5230_vm4 = vcmp.ge.f32.partialorder %v10639_v62, 0.0 }
 0x8be   : > { %vm5229_vm5 = vcmp.ge.f32.partialorder %v10651_v46, 0.0  ;;  %v5259_v2 = vsub.f32 0.0, %v5195_v4  ;;  %v5164_v26 = vmul.f32 %v12148_v12, %v5004_v52  ;;  %v4817_v54 = vmul.f32 %v10853_v16, %v4785_v0  ;;  %v12153_v46 = vld [vmem:[#allocation54_spill] sm:$0xff] }
 0x8bf   : > { %v4786_v61 = vadd.f32 -1.4531521, %v4754_v43  ;;  %v5005_v1 = vmul.f32 %v10766_v49, %v4973_v24  ;;  %v5006_v3 = vmul.f32 %v10759_v48, %v4974_v60  ;;  %v4975_v29 = vadd.f32 0.2548296, %v4943_v8  ;;  %v10979_v56 = vpop.eup %7631  ;;  %v12150_v43 = vld [vmem:[#allocation101_spill] sm:$0xff] }
 0x8c0   : > { %v4880_v32 = vmul.f32 %v10804_v17, %v4848_v37  ;;  %vm5231_vm6 = vcmp.ge.f32.partialorder %v12149_v58, 0.0  ;;  %v5291_v30 = vsel %vm5227_vm2, %v5195_v4, %v5259_v2  ;;  %v5196_v19 = vsub.f32 1.0, %v5164_v26 }
 0x8c1   : > { %v4849_v15 = vadd.f32 1.4214138, %v4817_v54  ;;  %v4818_v20 = vmul.f32 %v10848_v53, %v4786_v61  ;;  %v5355_v31 = vadd.f32 1.0, %v5291_v30  ;;  %v5165_v7 = vmul.f32 %v10776_v13, %v5005_v1 }
 0x8c2   : > { %v5166_v49 = vmul.f32 %v10771_v6, %v5006_v3  ;;  %v5007_v48 = vmul.f32 %v10813_v57, %v4975_v29  ;;  %v5260_v39 = vsub.f32 0.0, %v5196_v19  ;;  %v4912_v50 = vadd.f32 -0.28449672, %v4880_v32 }
 0x8c3   : > { %v4881_v52 = vmul.f32 %v10853_v16, %v4849_v15  ;;  %v4850_v0 = vadd.f32 1.4214138, %v4818_v20  ;;  %v5387_v24 = vmul.f32 %v5355_v31, %v12150_v43  ;;  %v5197_v27 = vsub.f32 1.0, %v5165_v7 }
 0x8c4   : > { %v5198_v4 = vsub.f32 1.0, %v5166_v49  ;;  %v5167_v60 = vmul.f32 %v10842_v34, %v5007_v48  ;;  %v5292_v8 = vsel %vm5228_vm3, %v5196_v19, %v5260_v39  ;;  %v4944_v13 = vmul.f32 %v10804_v17, %v4912_v50  ;;  %v12151_v34 = vld [vmem:[#allocation43_spill] sm:$0xff] }
 0x8c5   : > { %v4913_v37 = vadd.f32 -0.28449672, %v4881_v52  ;;  %v4882_v6 = vmul.f32 %v10848_v53, %v4850_v0  ;;  %6615 = vmatprep.mubr.f32.mxu0 %v5387_v24  ;;  %v5356_v57 = vadd.f32 1.0, %v5292_v8  ;;  %v5261_v2 = vsub.f32 0.0, %v5197_v27  ;;  %v12154_v52 = vld [vmem:[#allocation44_spill] sm:$0xff] }
 0x8c6   : > { %v5262_v12 = vsub.f32 0.0, %v5198_v4  ;;  %v5199_v26 = vsub.f32 1.0, %v5167_v60  ;;  %v4976_v54 = vadd.f32 0.2548296, %v4944_v13  ;;  %v4755_v3 = vmul.f32 1.0614054, %v10903_v22 }
 0x8c7   : > { %v4945_v61 = vmul.f32 %v10853_v16, %v4913_v37  ;;  %v4914_v1 = vadd.f32 -0.28449672, %v4882_v6  ;;  %vm5232_vm7 = vcmp.ge.f32.partialorder %v12151_v34, 0.0  ;;  %v5388_v29 = vmul.f32 %v5356_v57, %v12152_v63  ;;  %v12155_v60 = vld [vmem:[#allocation105_spill] sm:$0xff] }
 0x8c8   : > { %v5293_v32 = vsel %vm5229_vm5, %v5197_v27, %v5261_v2  ;;  %v5294_v30 = vsel %vm5230_vm4, %v5198_v4, %v5262_v12  ;;  %v5263_v19 = vsub.f32 0.0, %v5199_v26  ;;  %v5008_v31 = vmul.f32 %v10804_v17, %v4976_v54 }
 0x8c9   : > { %v5357_v15 = vadd.f32 1.0, %v5293_v32  ;;  %v5358_v20 = vadd.f32 1.0, %v5294_v30  ;;  %v4977_v7 = vadd.f32 0.2548296, %v4945_v61  ;;  %6616 = vmatmul.mubr.f32.gmra.mrb[210].mxu0 %v5388_v29  ;;  %v4946_v48 = vmul.f32 %v10848_v53, %v4914_v1 }
 0x8ca   : > { %v5295_v49 = vsel %vm5231_vm6, %v5199_v26, %v5263_v19  ;;  %v4787_v39 = vadd.f32 -1.4531521, %v4755_v3  ;;  %v4756_v50 = vmul.f32 1.0614054, %v10892_v35  ;;  %vm5233_vm8 = vcmp.ge.f32.partialorder %v10754_v41, 0.0 }
 0x8cb   : > { %v5389_v62 = vmul.f32 %v5357_v15, %v12153_v46  ;;  %v5390_v0 = vmul.f32 %v5358_v20, %v12154_v52  ;;  %v5359_v43 = vadd.f32 1.0, %v5295_v49  ;;  %v5168_v24 = vmul.f32 %v10836_v44, %v5008_v31 }
 0x8cc   : > { %v5009_v17 = vmul.f32 %v10853_v16, %v4977_v7  ;;  %v4978_v27 = vadd.f32 0.2548296, %v4946_v48  ;;  %v4819_v58 = vmul.f32 %v10903_v22, %v4787_v39  ;;  %v4788_v4 = vadd.f32 -1.4531521, %v4756_v50  ;;  %v12156_v7 = vld [vmem:[#allocation45_spill] sm:$0xff] }
 0x8cd   : > { %vm5234_vm9 = vcmp.ge.f32.partialorder %v12155_v60, 0.0  ;;  %6618 = vmatprep.mubr.f32.mxu0 %v5389_v62  ;;  %v5391_v8 = vmul.f32 %v5359_v43, %v10816_v18  ;;  %v5200_v13 = vsub.f32 1.0, %v5168_v24  ;;  %v4757_v37 = vmul.f32 1.0614054, %v10939_v47 }
 0x8ce   : > { %v4758_v6 = vmul.f32 1.0614054, %v10936_v36  ;;  %6619 = vmatmul.mubr.f32.gmra.mrb[212].mxu0 %v5390_v0  ;;  %v5169_v57 = vmul.f32 %v10880_v51, %v5009_v17  ;;  %v5010_v44 = vmul.f32 %v10848_v53, %v4978_v27  ;;  %v4851_v16 = vadd.f32 1.4214138, %v4819_v58 }
 0x8cf   : > { %v4820_v2 = vmul.f32 %v10892_v35, %v4788_v4  ;;  %7633 = vpow2.f32 %v10916_v42  ;;  %6621 = vmatprep.mubr.f32.mxu0 %v5391_v8  ;;  %v5264_v12 = vsub.f32 0.0, %v5200_v13  ;;  %v4789_v26 = vadd.f32 -1.4531521, %v4757_v37 }
 0x8d0   : > { %v4790_v54 = vadd.f32 -1.4531521, %v4758_v6  ;;  %v5201_v18 = vsub.f32 1.0, %v5169_v57  ;;  %v5170_v61 = vmul.f32 %v10856_v14, %v5010_v44  ;;  %v4883_v1 = vmul.f32 %v10903_v22, %v4851_v16 }
 0x8d1   : > { %v4852_v3 = vadd.f32 1.4214138, %v4820_v2  ;;  %v5296_v51 = vsel %vm5232_vm7, %v5200_v13, %v5264_v12  ;;  %v4821_v53 = vmul.f32 %v10939_v47, %v4789_v26  ;;  %v4759_v29 = vmul.f32 1.0614054, %v10979_v56 }
 0x8d2   : > { %v4822_v63 = vmul.f32 %v10936_v36, %v4790_v54  ;;  %v5360_v42 = vadd.f32 1.0, %v5296_v51  ;;  %v5265_v32 = vsub.f32 0.0, %v5201_v18  ;;  %v5202_v30 = vsub.f32 1.0, %v5170_v61 }
 0x8d3   : > { %v4915_v19 = vadd.f32 -0.28449672, %v4883_v1  ;;  %v4884_v15 = vmul.f32 %v10892_v35, %v4852_v3  ;;  %v4853_v20 = vadd.f32 1.4214138, %v4821_v53  ;;  %v4791_v31 = vadd.f32 -1.4531521, %v4759_v29 }
 0x8d4   : > { %v4854_v14 = vadd.f32 1.4214138, %v4822_v63  ;;  %v5392_v49 = vmul.f32 %v5360_v42, %v12156_v7  ;;  %v5297_v34 = vsel %vm5233_vm8, %v5201_v18, %v5265_v32  ;;  %v5266_v48 = vsub.f32 0.0, %v5202_v30 }
 0x8d5   : > { %v4947_v39 = vmul.f32 %v10903_v22, %v4915_v19  ;;  %v5361_v50 = vadd.f32 1.0, %v5297_v34  ;;  %v4916_v46 = vadd.f32 -0.28449672, %v4884_v15  ;;  %v4885_v62 = vmul.f32 %v10939_v47, %v4853_v20 }
 0x8d6   : > { %v4886_v52 = vmul.f32 %v10936_v36, %v4854_v14  ;;  %6622 = vmatmul.mubr.f32.gmra.mrb[214].mxu0 %v5392_v49  ;;  %v5298_v0 = vsel %vm5234_vm9, %v5202_v30, %v5266_v48  ;;  %v4823_v24 = vmul.f32 %v10979_v56, %v4791_v31  ;;  %v4760_v17 = vmul.f32 1.0614054, %v10967_v11 }
 0x8d7   : > { %v4979_v43 = vadd.f32 0.2548296, %v4947_v39  ;;  %v5393_v41 = vmul.f32 %v5361_v50, %v10865_v25  ;;  %v5362_v27 = vadd.f32 1.0, %v5298_v0  ;;  %v4948_v58 = vmul.f32 %v10892_v35, %v4916_v46  ;;  %v12157_v39 = vld [vmem:[#allocation60_spill] sm:$0xff] }
 0x8d8   : > { %v4917_v4 = vadd.f32 -0.28449672, %v4885_v62  ;;  %v4918_v13 = vadd.f32 -0.28449672, %v4886_v52  ;;  %v4855_v37 = vadd.f32 1.4214138, %v4823_v24  ;;  %7635 = vpow2.f32 %v10931_v55 }
 0x8d9   : > { %v5011_v8 = vmul.f32 %v10903_v22, %v4979_v43  ;;  %v4792_v6 = vadd.f32 -1.4531521, %v4760_v17  ;;  %v7634_v57 = vpop.eup %7633  ;;  %6624 = vmatprep.mubr.f32.mxu0 %v5393_v41  ;;  %v5394_v60 = vmul.f32 %v5362_v27, %v10845_v38  ;;  %v4980_v44 = vadd.f32 0.2548296, %v4948_v58  ;;  %v12158_v17 = vld [vmem:[#allocation46_spill] sm:$0xff]  ;;  %v12159_v58 = vld [vmem:[#allocation68_spill] sm:$0xff] }
 0x8da   : > { %v4949_v16 = vmul.f32 %v10939_v47, %v4917_v4  ;;  %v4950_v2 = vmul.f32 %v10936_v36, %v4918_v13  ;;  %v4887_v12 = vmul.f32 %v10979_v56, %v4855_v37  ;;  %7637 = vpow2.f32 %v10924_v9  ;;  %v12160_v13 = vld [vmem:[#allocation62_spill] sm:$0xff] }
 0x8db   : > { %v5171_v25 = vmul.f32 %v10910_v5, %v5011_v8  ;;  %v4824_v22 = vmul.f32 %v10967_v11, %v4792_v6  ;;  %6625 = vmatmul.mubr.f32.gmra.mrb[216].mxu0 %v5394_v60  ;;  %v5012_v26 = vmul.f32 %v10892_v35, %v4980_v44  ;;  %vm5235_vm10 = vcmp.ge.f32.partialorder %v10801_v40, 0.0  ;;  %v12161_v44 = vld [vmem:[#allocation64_spill] sm:$0xff] }
 0x8dc   : > { %v4981_v54 = vadd.f32 0.2548296, %v4949_v16  ;;  %v4982_v55 = vadd.f32 0.2548296, %v4950_v2  ;;  %v4919_v61 = vadd.f32 -0.28449672, %v4887_v12 }
 0x8dd   : > { %v5203_v18 = vsub.f32 1.0, %v5171_v25  ;;  %v5172_v38 = vmul.f32 %v10906_v28, %v5012_v26  ;;  %v4856_v3 = vadd.f32 1.4214138, %v4824_v22  ;;  %v5331_v42 = vmul.f32 0.5, %v10789_v23  ;;  %v12162_v25 = vld [vmem:[#allocation58_spill] sm:$0xff] }
 0x8de   : > { %v5013_v1 = vmul.f32 %v10939_v47, %v4981_v54  ;;  %v5014_v51 = vmul.f32 %v10936_v36, %v4982_v55  ;;  %v4951_v53 = vmul.f32 %v10979_v56, %v4919_v61  ;;  %vm5236_vm11 = vcmp.ge.f32.partialorder %v10797_v45, 0.0  ;;  %v11078_v26 = vld [vmem:[%s556_s25] ss:$0 sm:$0xff] }
 0x8df   : > { %v5267_v5 = vsub.f32 0.0, %v5203_v18  ;;  %v5204_v63 = vsub.f32 1.0, %v5172_v38  ;;  %v4888_v29 = vmul.f32 %v10967_v11, %v4856_v3  ;;  %v5332_v36 = vmul.f32 0.5, %v10785_v21  ;;  %v12163_v38 = vld [vmem:[#allocation20_spill] sm:$0xff]  ;;  %v12164_v3 = vld [vmem:[#allocation21_spill] sm:$0xff] }
 0x8e0   : > { %v5173_v35 = vmul.f32 %v7634_v57, %v5013_v1  ;;  %v5174_v28 = vmul.f32 %v10949_v59, %v5014_v51  ;;  %v4983_v47 = vadd.f32 0.2548296, %v4951_v53  ;;  %vm5237_vm12 = vcmp.ge.f32.partialorder %v10851_v33, 0.0 }
 0x8e1   : > { %v5299_v32 = vsel %vm5235_vm10, %v5203_v18, %v5267_v5  ;;  %v5268_v19 = vsub.f32 0.0, %v5204_v63  ;;  %v4920_v15 = vadd.f32 -0.28449672, %v4888_v29  ;;  %vm5238_vm13 = vcmp.ge.f32.partialorder %v10840_v10, 0.0  ;;  %v12165_v29 = vld [vmem:[#allocation122_spill] sm:$0xff] }
 0x8e2   : > { %v5363_v30 = vadd.f32 1.0, %v5299_v32  ;;  %v5205_v9 = vsub.f32 1.0, %v5173_v35  ;;  %v5206_v20 = vsub.f32 1.0, %v5174_v28  ;;  %v5015_v40 = vmul.f32 %v10979_v56, %v4983_v47  ;;  %v7636_v14 = vpop.eup %7635  ;;  %v12166_v32 = vld [vmem:[#allocation121_spill] sm:$0xff] }
 0x8e3   : > { %v5300_v7 = vsel %vm5236_vm11, %v5204_v63, %v5268_v19  ;;  %v4952_v23 = vmul.f32 %v10967_v11, %v4920_v15  ;;  %v5333_v45 = vmul.f32 0.5, %v12157_v39  ;;  %v5334_v33 = vmul.f32 0.5, %v12158_v17  ;;  %v12167_v15 = vld [vmem:[#allocation71_spill] sm:$0xff] }
 0x8e4   : > { %v5395_v31 = vmul.f32 %v5363_v30, %v5331_v42  ;;  %v5269_v49 = vsub.f32 0.0, %v5205_v9  ;;  %v5364_v59 = vadd.f32 1.0, %v5300_v7  ;;  %v5270_v34 = vsub.f32 0.0, %v5206_v20  ;;  %v7638_v24 = vpop.eup %7637 }
 0x8e5   : > { %v5175_v48 = vmul.f32 %v7636_v14, %v5015_v40  ;;  %v4984_v50 = vadd.f32 0.2548296, %v4952_v23  ;;  %vm5239_vm14 = vcmp.ge.f32.partialorder %v12159_v58, 0.0  ;;  %v5335_v37 = vmul.f32 0.5, %v12160_v13  ;;  %v12169_v23 = vld [vmem:[#allocation22_spill] sm:$0xff] }
 0x8e6   : > { %6627 = vmatprep.mubr.f32.mxu0 %v5395_v31  ;;  %v5301_v21 = vsel %vm5237_vm12, %v5205_v9, %v5269_v49  ;;  %v5396_v46 = vmul.f32 %v5364_v59, %v5332_v36  ;;  %v5302_v62 = vsel %vm5238_vm13, %v5206_v20, %v5270_v34  ;;  %vm5240_vm15 = vcmp.ge.f32.partialorder %v12161_v44, 0.0  ;;  %v12168_v20 = vld [vmem:[#allocation73_spill] sm:$0xff]  ;;  %v12170_v34 = vld [vmem:[#allocation23_spill] sm:$0xff] }
 0x8e7   : > { %v5365_v56 = vadd.f32 1.0, %v5301_v21  ;;  %v5207_v52 = vsub.f32 1.0, %v5175_v48  ;;  %v5366_v0 = vadd.f32 1.0, %v5302_v62  ;;  %v5016_v43 = vmul.f32 %v10967_v11, %v4984_v50  ;;  %v12172_v62 = vld [vmem:[#allocation33_spill] sm:$0xff] }
 0x8e8   : > { %6628 = vmatmul.mubr.f32.gmra.mrb[218].mxu0 %v5396_v46  ;;  %v5336_v2 = vmul.f32 0.5, %v12162_v25  ;;  %v12171_v46 = vld [vmem:[#allocation36_spill] sm:$0xff] }
 0x8e9   : > { %v5397_v41 = vmul.f32 %v5365_v56, %v5333_v45  ;;  %v5271_v27 = vsub.f32 0.0, %v5207_v52  ;;  %v5176_v10 = vmul.f32 %v7638_v24, %v5016_v43  ;;  %v5398_v4 = vmul.f32 %v5366_v0, %v5334_v33  ;;  %v12173_v33 = vld [vmem:[#allocation75_spill] sm:$0xff] }
 0x8eb   : > { %6630 = vmatprep.mubr.f32.mxu0 %v5397_v41  ;;  %v5303_v8 = vsel %vm5239_vm14, %v5207_v52, %v5271_v27  ;;  %v5208_v57 = vsub.f32 1.0, %v5176_v10  ;;  %v12174_v27 = vld [vmem:[#allocation77_spill] sm:$0xff] }
 0x8ec   : > { %v5367_v6 = vadd.f32 1.0, %v5303_v8  ;;  %6631 = vmatmul.mubr.f32.gmra.mrb[220].mxu0 %v5398_v4 }
 0x8ed   : > { %v5272_v11 = vsub.f32 0.0, %v5208_v57 }
 0x8ee   : > { %v5399_v60 = vmul.f32 %v5367_v6, %v5335_v37  ;;  %v12175_v37 = vld [vmem:[#allocation24_spill] sm:$0xff] }
 0x8ef   : > { %v5304_v16 = vsel %vm5240_vm15, %v5208_v57, %v5272_v11  ;;  %v12176_v57 = vld [vmem:[#allocation26_spill] sm:$0xff] }
 0x8f0   : > { %6633 = vmatprep.mubr.f32.mxu0 %v5399_v60  ;;  %v5368_v12 = vadd.f32 1.0, %v5304_v16 }
 0x8f2   : > { %v5400_v22 = vmul.f32 %v5368_v12, %v5336_v2  ;;  %v12177_v2 = vld [vmem:[#allocation53_spill] sm:$0xff] }
 0x8f4   : > { %6634 = vmatmul.mubr.f32.gmra.mrb[222].mxu0 %v5400_v22  ;;  %v12178_v22 = vld [vmem:[#allocation51_spill] sm:$0xff] }
 0x917   : > { %v6590_v54 = vpop.f32.mrb[192].mxu0 }
 0x918   : > { %v5496_v18 = vadd.f32 %v6590_v54, %v11078_v26  ;;  %v5490_v55 = vpop.f32.mrb[193].mxu0 }
 0x919   : > { %v5491_v61 = vadd.f32 %v11078_v26, %v5490_v55 }
 0x91a   : > { %v11083_v1 = vadd.f32 %v5496_v18, %v12163_v38 }
 0x91b   : > { %v11086_v5 = vadd.f32 %v5491_v61, %v12164_v3  ;;  %v12179_v3 = vld [vmem:[#allocation79_spill] sm:$0xff] }
 0x91c   : > { %5682 = vst [vmem:[#allocation2 + $0x8] sm:$0xff] %v11083_v1  ;;  %5718 = vst [vmem:[%s7863_s0 + $0x8] sm:$0xff] (!%p5924_p8), %v11083_v1 }
 0x91d   : > { %5681 = vst [vmem:[#allocation2] sm:$0xff] %v11086_v5  ;;  %5717 = vst [vmem:[%s7863_s0] sm:$0xff] (!%p5924_p8), %v11086_v5 }
 0x92b   : > { %v6593_v51 = vpop.f32.mrb[194].mxu0 }
 0x92c   : > { %v5506_v53 = vadd.f32 %v6593_v51, %v11078_v26  ;;  %v5500_v63 = vpop.f32.mrb[195].mxu0 }
 0x92d   : > { %v5501_v35 = vadd.f32 %v11078_v26, %v5500_v63 }
 0x92e   : > { %v11093_v42 = vadd.f32 %v5506_v53, %v12165_v29  ;;  %v12180_v53 = vld [vmem:[#allocation81_spill] sm:$0xff] }
 0x92f   : > { %v11096_v28 = vadd.f32 %v5501_v35, %v12166_v32 }
 0x930   : > { %5684 = vst [vmem:[#allocation2 + $0x18] sm:$0xff] %v11093_v42  ;;  %5720 = vst [vmem:[%s7863_s0 + $0x18] sm:$0xff] (!%p5924_p8), %v11093_v42 }
 0x931   : > { %5683 = vst [vmem:[#allocation2 + $0x10] sm:$0xff] %v11096_v28  ;;  %5719 = vst [vmem:[%s7863_s0 + $0x10] sm:$0xff] (!%p5924_p8), %v11096_v28 }
 0x93c   : > { %v6596_v47 = vpop.f32.mrb[196].mxu0 }
 0x93d   : > { %v5516_v30 = vadd.f32 %v6596_v47, %v11078_v26  ;;  %v5510_v19 = vpop.f32.mrb[197].mxu0 }
 0x93e   : > { %v5511_v9 = vadd.f32 %v11078_v26, %v5510_v19 }
 0x93f   : > { %v11103_v36 = vadd.f32 %v5516_v30, %v12167_v15  ;;  %v12181_v30 = vld [vmem:[#allocation28_spill] sm:$0xff] }
 0x940   : > { %v11106_v40 = vadd.f32 %v5511_v9, %v12168_v20  ;;  %v12182_v9 = vld [vmem:[#allocation29_spill] sm:$0xff] }
 0x941   : > { %5686 = vst [vmem:[#allocation2 + $0x28] sm:$0xff] %v11103_v36  ;;  %5722 = vst [vmem:[%s7863_s0 + $0x28] sm:$0xff] (!%p5924_p8), %v11103_v36 }
 0x942   : > { %5685 = vst [vmem:[#allocation2 + $0x20] sm:$0xff] %v11106_v40  ;;  %5721 = vst [vmem:[%s7863_s0 + $0x20] sm:$0xff] (!%p5924_p8), %v11106_v40 }
 0x948   : > { %v6599_v14 = vpop.f32.mrb[198].mxu0 }
 0x949   : > { %v5526_v31 = vadd.f32 %v6599_v14, %v11078_v26  ;;  %v5520_v7 = vpop.f32.mrb[199].mxu0 }
 0x94a   : > { %v5521_v49 = vadd.f32 %v11078_v26, %v5520_v7 }
 0x94b   : > { %v11113_v59 = vadd.f32 %v5526_v31, %v12169_v23 }
 0x94c   : > { %v11116_v48 = vadd.f32 %v5521_v49, %v12170_v34  ;;  %v12183_v49 = vld [vmem:[#allocation40_spill] sm:$0xff]  ;;  %v12184_v34 = vld [vmem:[#allocation38_spill] sm:$0xff] }
 0x94d   : > { %5688 = vst [vmem:[#allocation2 + $0x38] sm:$0xff] %v11113_v59  ;;  %5724 = vst [vmem:[%s7863_s0 + $0x38] sm:$0xff] (!%p5924_p8), %v11113_v59 }
 0x94e   : > { %5687 = vst [vmem:[#allocation2 + $0x30] sm:$0xff] %v11116_v48  ;;  %5723 = vst [vmem:[%s7863_s0 + $0x30] sm:$0xff] (!%p5924_p8), %v11116_v48 }
 0x958   : > { %v6602_v39 = vpop.f32.mrb[200].mxu0 }
 0x959   : > { %v5536_v45 = vadd.f32 %v6602_v39, %v11078_v26  ;;  %v5530_v21 = vpop.f32.mrb[201].mxu0 }
 0x95a   : > { %v5531_v50 = vadd.f32 %v11078_v26, %v5530_v21 }
 0x95b   : > { %v11123_v56 = vadd.f32 %v5536_v45, %v12171_v46 }
 0x95c   : > { %v11126_v52 = vadd.f32 %v5531_v50, %v12172_v62  ;;  %v12185_v62 = vld [vmem:[#allocation83_spill] sm:$0xff] }
 0x95d   : > { %5690 = vst [vmem:[#allocation2 + $0x48] sm:$0xff] %v11123_v56  ;;  %5726 = vst [vmem:[%s7863_s0 + $0x48] sm:$0xff] (!%p5924_p8), %v11123_v56 }
 0x95e   : > { %5689 = vst [vmem:[#allocation2 + $0x40] sm:$0xff] %v11126_v52  ;;  %5725 = vst [vmem:[%s7863_s0 + $0x40] sm:$0xff] (!%p5924_p8), %v11126_v52 }
 0x965   : > { %v6605_v0 = vpop.f32.mrb[202].mxu0 }
 0x966   : > { %v5546_v43 = vadd.f32 %v6605_v0, %v11078_v26  ;;  %v5540_v24 = vpop.f32.mrb[203].mxu0 }
 0x967   : > { %v5541_v17 = vadd.f32 %v11078_v26, %v5540_v24 }
 0x968   : > { %v11133_v41 = vadd.f32 %v5546_v43, %v12173_v33  ;;  %v12186_v43 = vld [vmem:[#allocation85_spill] sm:$0xff] }
 0x969   : > { %v11136_v58 = vadd.f32 %v5541_v17, %v12174_v27 }
 0x96a   : > { %5692 = vst [vmem:[#allocation2 + $0x58] sm:$0xff] %v11133_v41  ;;  %5728 = vst [vmem:[%s7863_s0 + $0x58] sm:$0xff] (!%p5924_p8), %v11133_v41 }
 0x96b   : > { %5691 = vst [vmem:[#allocation2 + $0x50] sm:$0xff] %v11136_v58  ;;  %5727 = vst [vmem:[%s7863_s0 + $0x50] sm:$0xff] (!%p5924_p8), %v11136_v58 }
 0x973   : > { %v6608_v10 = vpop.f32.mrb[204].mxu0 }
 0x974   : > { %v5556_v4 = vadd.f32 %v6608_v10, %v11078_v26  ;;  %v5550_v8 = vpop.f32.mrb[205].mxu0 }
 0x975   : > { %v5551_v13 = vadd.f32 %v11078_v26, %v5550_v8 }
 0x976   : > { %v11143_v6 = vadd.f32 %v5556_v4, %v12175_v37  ;;  %v12187_v4 = vld [vmem:[#allocation30_spill] sm:$0xff] }
 0x977   : > { %v11146_v60 = vadd.f32 %v5551_v13, %v12176_v57  ;;  %v12188_v13 = vld [vmem:[#allocation32_spill] sm:$0xff] }
 0x978   : > { %5694 = vst [vmem:[#allocation2 + $0x68] sm:$0xff] %v11143_v6  ;;  %5730 = vst [vmem:[%s7863_s0 + $0x68] sm:$0xff] (!%p5924_p8), %v11143_v6 }
 0x979   : > { %5693 = vst [vmem:[#allocation2 + $0x60] sm:$0xff] %v11146_v60  ;;  %5729 = vst [vmem:[%s7863_s0 + $0x60] sm:$0xff] (!%p5924_p8), %v11146_v60 }
 0x981   : > { %v6611_v11 = vpop.f32.mrb[206].mxu0 }
 0x982   : > { %v5566_v44 = vadd.f32 %v6611_v11, %v11078_v26  ;;  %v5560_v16 = vpop.f32.mrb[207].mxu0 }
 0x983   : > { %v5561_v25 = vadd.f32 %v11078_v26, %v5560_v16 }
 0x984   : > { %v11153_v12 = vadd.f32 %v5566_v44, %v12177_v2 }
 0x985   : > { %v11156_v54 = vadd.f32 %v5561_v25, %v12178_v22  ;;  %v12189_v25 = vld [vmem:[#allocation57_spill] sm:$0xff]  ;;  %v12190_v22 = vld [vmem:[#allocation55_spill] sm:$0xff] }
 0x986   : > { %5696 = vst [vmem:[#allocation2 + $0x78] sm:$0xff] %v11153_v12  ;;  %5732 = vst [vmem:[%s7863_s0 + $0x78] sm:$0xff] (!%p5924_p8), %v11153_v12 }
 0x987   : > { %5695 = vst [vmem:[#allocation2 + $0x70] sm:$0xff] %v11156_v54  ;;  %5731 = vst [vmem:[%s7863_s0 + $0x70] sm:$0xff] (!%p5924_p8), %v11156_v54 }
 0x98e   : > { %v6614_v18 = vpop.f32.mrb[208].mxu0 }
 0x98f   : > { %v5576_v55 = vadd.f32 %v6614_v18, %v11078_v26  ;;  %v5570_v61 = vpop.f32.mrb[209].mxu0 }
 0x990   : > { %v5571_v38 = vadd.f32 %v11078_v26, %v5570_v61 }
 0x991   : > { %v11163_v51 = vadd.f32 %v5576_v55, %v12179_v3 }
 0x992   : > { %v11166_v63 = vadd.f32 %v5571_v38, %v12180_v53  ;;  %v12191_v53 = vld [vmem:[#allocation87_spill] sm:$0xff] }
 0x993   : > { %5698 = vst [vmem:[#allocation2 + $0x88] sm:$0xff] %v11163_v51  ;;  %5734 = vst [vmem:[%s7863_s0 + $0x88] sm:$0xff] (!%p5924_p8), %v11163_v51 }
 0x994   : > { %5697 = vst [vmem:[#allocation2 + $0x80] sm:$0xff] %v11166_v63  ;;  %5733 = vst [vmem:[%s7863_s0 + $0x80] sm:$0xff] (!%p5924_p8), %v11166_v63 }
 0x99c   : > { %v6617_v35 = vpop.f32.mrb[210].mxu0 }
 0x99d   : > { %v5586_v29 = vadd.f32 %v6617_v35, %v11078_v26  ;;  %v5580_v32 = vpop.f32.mrb[211].mxu0 }
 0x99e   : > { %v5581_v47 = vadd.f32 %v11078_v26, %v5580_v32 }
 0x99f   : > { %v11173_v19 = vadd.f32 %v5586_v29, %v12181_v30  ;;  %v12192_v29 = vld [vmem:[#allocation89_spill] sm:$0xff] }
 0x9a0   : > { %v11176_v15 = vadd.f32 %v5581_v47, %v12182_v9 }
 0x9a1   : > { %v6620_v20 = vpop.f32.mrb[212].mxu0  ;;  %5700 = vst [vmem:[#allocation2 + $0x98] sm:$0xff] %v11173_v19  ;;  %5736 = vst [vmem:[%s7863_s0 + $0x98] sm:$0xff] (!%p5924_p8), %v11173_v19 }
 0x9a2   : > { %v5596_v14 = vadd.f32 %v6620_v20, %v11078_v26  ;;  %v5590_v31 = vpop.f32.mrb[213].mxu0  ;;  %5699 = vst [vmem:[#allocation2 + $0x90] sm:$0xff] %v11176_v15  ;;  %5735 = vst [vmem:[%s7863_s0 + $0x90] sm:$0xff] (!%p5924_p8), %v11176_v15 }
 0x9a3   : > { %v5591_v7 = vadd.f32 %v11078_v26, %v5590_v31 }
 0x9a4   : > { %v11183_v23 = vadd.f32 %v5596_v14, %v12183_v49  ;;  %v12193_v14 = vld [vmem:[#allocation34_spill] sm:$0xff] }
 0x9a5   : > { %v11186_v39 = vadd.f32 %v5591_v7, %v12184_v34  ;;  %v12194_v7 = vld [vmem:[#allocation35_spill] sm:$0xff] }
 0x9a6   : > { %5702 = vst [vmem:[#allocation2 + $0xa8] sm:$0xff] %v11183_v23  ;;  %5738 = vst [vmem:[%s7863_s0 + $0xa8] sm:$0xff] (!%p5924_p8), %v11183_v23 }
 0x9a7   : > { %5701 = vst [vmem:[#allocation2 + $0xa0] sm:$0xff] %v11186_v39  ;;  %5737 = vst [vmem:[%s7863_s0 + $0xa0] sm:$0xff] (!%p5924_p8), %v11186_v39 }
 0x9a9   : > { %v6623_v45 = vpop.f32.mrb[214].mxu0 }
 0x9aa   : > { %v5606_v21 = vadd.f32 %v6623_v45, %v11078_v26  ;;  %v5600_v50 = vpop.f32.mrb[215].mxu0 }
 0x9ab   : > { %v5601_v46 = vadd.f32 %v11078_v26, %v5600_v50 }
 0x9ac   : > { %v5672_v0 = vadd.f32 %v5606_v21, %v12185_v62 }
 0x9ad   : > { %v5671_v24 = vadd.f32 %v5601_v46, %v12186_v43 }
 0x9ae   : > { %5704 = vst [vmem:[#allocation2 + $0xb8] sm:$0xff] %v5672_v0  ;;  %v6626_v17 = vpop.f32.mrb[216].mxu0  ;;  %5740 = vst [vmem:[%s7863_s0 + $0xb8] sm:$0xff] (!%p5924_p8), %v5672_v0 }
 0x9af   : > { %5703 = vst [vmem:[#allocation2 + $0xb0] sm:$0xff] %v5671_v24  ;;  %v5616_v33 = vadd.f32 %v6626_v17, %v11078_v26  ;;  %v5610_v27 = vpop.f32.mrb[217].mxu0  ;;  %5739 = vst [vmem:[%s7863_s0 + $0xb0] sm:$0xff] (!%p5924_p8), %v5671_v24 }
 0x9b0   : > { %v5611_v10 = vadd.f32 %v11078_v26, %v5610_v27 }
 0x9b1   : > { %v5674_v8 = vadd.f32 %v5616_v33, %v12187_v4 }
 0x9b2   : > { %v5673_v37 = vadd.f32 %v5611_v10, %v12188_v13 }
 0x9b3   : > { %5706 = vst [vmem:[#allocation2 + $0xc8] sm:$0xff] %v5674_v8  ;;  %5742 = vst [vmem:[%s7863_s0 + $0xc8] sm:$0xff] (!%p5924_p8), %v5674_v8 }
 0x9b4   : > { %5705 = vst [vmem:[#allocation2 + $0xc0] sm:$0xff] %v5673_v37  ;;  %5741 = vst [vmem:[%s7863_s0 + $0xc0] sm:$0xff] (!%p5924_p8), %v5673_v37 }
 0x9bb   : > { %v6629_v57 = vpop.f32.mrb[218].mxu0 }
 0x9bc   : > { %v5626_v11 = vadd.f32 %v6629_v57, %v11078_v26  ;;  %v5620_v44 = vpop.f32.mrb[219].mxu0 }
 0x9bd   : > { %v5621_v16 = vadd.f32 %v11078_v26, %v5620_v44 }
 0x9be   : > { %v5676_v2 = vadd.f32 %v5626_v11, %v12189_v25 }
 0x9bf   : > { %v5675_v18 = vadd.f32 %v5621_v16, %v12190_v22  ;;  %v6632_v55 = vpop.f32.mrb[220].mxu0 }
 0x9c0   : > { %5708 = vst [vmem:[#allocation2 + $0xd8] sm:$0xff] %v5676_v2  ;;  %v5636_v61 = vadd.f32 %v6632_v55, %v11078_v26  ;;  %v5630_v38 = vpop.f32.mrb[221].mxu0  ;;  %5744 = vst [vmem:[%s7863_s0 + $0xd8] sm:$0xff] (!%p5924_p8), %v5676_v2 }
 0x9c1   : > { %5707 = vst [vmem:[#allocation2 + $0xd0] sm:$0xff] %v5675_v18  ;;  %v5631_v3 = vadd.f32 %v11078_v26, %v5630_v38  ;;  %5743 = vst [vmem:[%s7863_s0 + $0xd0] sm:$0xff] (!%p5924_p8), %v5675_v18 }
 0x9c2   : > { %v5678_v35 = vadd.f32 %v5636_v61, %v12191_v53 }
 0x9c3   : > { %v5677_v32 = vadd.f32 %v5631_v3, %v12192_v29 }
 0x9c4   : > { %5710 = vst [vmem:[#allocation2 + $0xe8] sm:$0xff] %v5678_v35  ;;  %5746 = vst [vmem:[%s7863_s0 + $0xe8] sm:$0xff] (!%p5924_p8), %v5678_v35 }
 0x9c5   : > { %5709 = vst [vmem:[#allocation2 + $0xe0] sm:$0xff] %v5677_v32  ;;  %5745 = vst [vmem:[%s7863_s0 + $0xe0] sm:$0xff] (!%p5924_p8), %v5677_v32 }
 0x9c7   : > { %v6635_v47 = vpop.f32.mrb[222].mxu0  ;;  %5716 = sbr.rel (%p5924_p8) target bundleno = 2510 (0x9ce), region = 76 }
 0x9c8   : > { %v5646_v30 = vadd.f32 %v6635_v47, %v11078_v26  ;;  %v5640_v9 = vpop.f32.mrb[223].mxu0 }
 0x9c9   : > { %v5641_v20 = vadd.f32 %v11078_v26, %v5640_v9 }
 0x9ca   : > { %v5680_v31 = vadd.f32 %v5646_v30, %v12193_v14 }
 0x9cb   : > { %v5679_v49 = vadd.f32 %v5641_v20, %v12194_v7 }
 0x9cc   : > { %5712 = vst [vmem:[#allocation2 + $0xf8] sm:$0xff] %v5680_v31  ;;  %5748 = vst [vmem:[%s7863_s0 + $0xf8] sm:$0xff] (!%p5924_p8), %v5680_v31 }
 0x9cd   : > { %5711 = vst [vmem:[#allocation2 + $0xf0] sm:$0xff] %v5679_v49  ;;  %5747 = vst [vmem:[%s7863_s0 + $0xf0] sm:$0xff] (!%p5924_p8), %v5679_v49 }
 0x9ce PF: > { %s12195_s21 = sld [smem:[#allocation5_spill]]  ;;  %s12197_s22 = sld [smem:[#allocation4_spill]] }
 0x9cf   : > { %s12198_s23 = sld [smem:[#allocation6_spill]]  ;;  %s12199_s24 = sld [smem:[#allocation7_spill]] }
 0x9d4   : > { %s22_s25 = sadd.s32 1, %s12195_s21   ;;  %s12196_s21 = sld [smem:[#allocation3_spill]] }
 0x9d5   : > { %p19_p9 = scmp.ge.s32.totalorder %s22_s25, 14  }
 0x9d7   :  { %21 = sbr.rel (!%p19_p9) target bundleno = 4 (0x4), region = 131 }

</bundles_post_ra>
